<compile_context>
chip_gen: v7x
topology: tpu7x:2x2x1
jax: 0.10.0
libtpu: 0.0.40
codegen_flags: <defaults>
</compile_context>

<pallas_src>
import functools

import jax
import jax.numpy as jnp
from jax.experimental import pallas as pl
from jax.experimental.pallas import tpu as pltpu  # TPU backend (VMEM-resident whole-array blocks)


def _round_up(x, m):
    return (x + m - 1) // m * m


def _cdiv(a, b):
    return (a + b - 1) // b


def _act(r, activation):
    if activation == "relu":
        return jnp.maximum(r, 0.0)
    if activation == "tanh":
        return jnp.tanh(r)
    return r


# ---------------- Pallas kernel 1: fused act((A @ B) + bias), single block ----------------

def _matmul_bias_act_kernel(a_ref, b_ref, bias_ref, o_ref, *, activation):
    # a_ref / b_ref are already bf16 (pre-cast outside the kernel); MXU accumulates f32,
    # bias + activation fused, store in o_ref.dtype (bf16 for intermediate layers).
    r = jnp.dot(a_ref[...], b_ref[...], preferred_element_type=jnp.float32) + bias_ref[...]
    o_ref[...] = _act(r, activation).astype(o_ref.dtype)


def matmul_bias_act(a, b_p, bias_p, n_real, activation, out_dtype=jnp.bfloat16):
    """act((a @ b) + bias) for small M/K/N: one kernel call, whole operands in VMEM.
    b_p (Kp, Np) bf16 and bias_p (1, Np) f32 are pre-padded/pre-cast at init."""
    M, K = a.shape
    Kp, Np = b_p.shape
    Mp = _round_up(M, 16)                               # 16: bf16 sublane packing
    a_p = jnp.pad(a.astype(jnp.bfloat16), ((0, Mp - M), (0, Kp - K)))
    out = pl.pallas_call(
        functools.partial(_matmul_bias_act_kernel, activation=activation),
        out_shape=jax.ShapeDtypeStruct((Mp, Np), out_dtype),
    )(a_p, b_p, bias_p)
    return out[:M, :n_real]


# ---------------- Pallas kernel 2: tall (988,1) ConvTranspose as block-Toeplitz matmul ----------------

def _tall_toeplitz_kernel(x_ref, bt_ref, bias_ref, o_ref, *, nblk, depth):
    """out[nb, a, l] = tanh(bias + sum_d (x[nb] @ bt[d])[a + d, l])

    x_ref   : (NB, T, C*128) bf16, T = nblk + depth - 1   (padded input slab, whole)
    bt_ref  : (depth, C*128, 128) bf16                     (block-Toeplitz weights, hoisted)
    bias_ref: (1, 128) f32
    o_ref   : (NB, nblk, 128) f32
    The per-d shift is applied to the small f32 matmul result (native sublane slice),
    so every bf16 load stays aligned.
    """
    bias = bias_ref[...]
    for nb in range(o_ref.shape[0]):
        x_nb = x_ref[nb]                                           # (T, C*128) bf16
        acc = jnp.zeros((nblk, 128), jnp.float32) + bias
        for d in range(depth):
            y = jnp.dot(x_nb, bt_ref[d], preferred_element_type=jnp.float32)  # (T, 128) f32
            acc = acc + y[d:d + nblk, :]
        o_ref[nb] = jnp.tanh(acc)


def tall_conv_transpose_h(x, bt, bias_row, kh, padding):
    """ConvTranspose2d(C -> 1, (kh, 1), stride 1, padding) + Tanh, one Pallas call."""
    depth = bt.shape[0]
    ph, pw = padding
    N, C, H, W = x.shape
    assert bt.shape[1] == C * 128
    Wout = W - 2 * pw
    assert Wout >= 1
    pad_h = kh - 1 - ph
    Hout = H + 2 * pad_h - kh + 1
    nblk = _cdiv(Hout, 128)
    T = nblk + depth - 1
    assert 128 * T >= H + pad_h

    xp = x[:, :, :, pw:W - pw] if pw > 0 else x
    xp = jnp.pad(xp.astype(jnp.bfloat16),
                 ((0, 0), (0, 0), (pad_h, 128 * T - (H + pad_h)), (0, 0)))
    NB = N * Wout
    xr = (xp.transpose(0, 3, 1, 2)                      # (N, Wout, C, 128*T)
            .reshape(NB, C, T, 128)
            .transpose(0, 2, 1, 3)                      # (NB, T, C, 128)
            .reshape(NB, T, C * 128))                   # ~64 KB bf16

    out = pl.pallas_call(
        functools.partial(_tall_toeplitz_kernel, nblk=nblk, depth=depth),
        out_shape=jax.ShapeDtypeStruct((NB, nblk, 128), jnp.float32),
    )(xr, bt, bias_row)

    out = out.reshape(NB, nblk * 128)[:, :Hout]
    return out.reshape(N, Wout, Hout).transpose(0, 2, 1)[:, None, :, :]


# ---------------- conv lowering glue (plain JAX, tiny data movement only) ----------------

def _pad_or_crop(x, axis, p):
    if p == 0:
        return x
    if p > 0:
        pads = [(0, 0)] * x.ndim
        pads[axis] = (p, p)
        return jnp.pad(x, pads)
    size = x.shape[axis]
    return jax.lax.slice_in_dim(x, -p, size + p, axis=axis)


def _im2col(x, kh, kw, sh, sw, ph, pw):
    x = _pad_or_crop(x, 2, ph)
    x = _pad_or_crop(x, 3, pw)
    N, C, Hp, Wp = x.shape
    Hout = (Hp - kh) // sh + 1
    Wout = (Wp - kw) // sw + 1
    hi = (jnp.arange(Hout) * sh)[:, None] + jnp.arange(kh)[None, :]
    wi = (jnp.arange(Wout) * sw)[:, None] + jnp.arange(kw)[None, :]
    xh = jnp.take(x, hi.reshape(-1), axis=2).reshape(N, C, Hout, kh, Wp)
    xw = jnp.take(xh, wi.reshape(-1), axis=4).reshape(N, C, Hout, kh, Wout, kw)
    patches = xw.transpose(0, 2, 4, 1, 3, 5)            # (N, Hout, Wout, C, kh, kw)
    cols = patches.reshape(N * Hout * Wout, C * kh * kw)
    return cols, Hout, Wout


def _maxpool2_s1(x):
    return jnp.maximum(jnp.maximum(x[:, :, :-1, :-1], x[:, :, :-1, 1:]),
                       jnp.maximum(x[:, :, 1:, :-1], x[:, :, 1:, 1:]))


def conv2d_p(x, wm_p, bias_p, cout, ksize, stride, padding, activation):
    kh, kw = ksize
    N = x.shape[0]
    cols, Hout, Wout = _im2col(x, kh, kw, stride[0], stride[1], padding[0], padding[1])
    out = matmul_bias_act(cols, wm_p, bias_p, cout, activation)
    return out.reshape(N, Hout, Wout, cout).transpose(0, 3, 1, 2)


def conv_transpose2d_p(x, wm_p, bias_p, cout, ksize, stride, padding, activation):
    kh, kw = ksize
    sh, sw = stride
    ph, pw = padding
    N, C, H, W = x.shape
    Hd, Wd = (H - 1) * sh + 1, (W - 1) * sw + 1
    xd = jnp.zeros((N, C, Hd, Wd), x.dtype).at[:, :, ::sh, ::sw].set(x)
    return conv2d_p(xd, wm_p, bias_p, cout, ksize, (1, 1),
                    (kh - 1 - ph, kw - 1 - pw), activation)


# ---------------- one-time weight preparation (hoisted out of the forward) ----------------

def _toeplitz_weight_matrix(wv, depth):
    """B[(c, 128*d + s), l] = wv[c, 128*d + s - l] if 0 <= idx < KH else 0 (bf16)."""
    C, KH = wv.shape
    T = depth * 128
    P = T + 1                                           # wrap lands in zero pad (128*depth >= KH+127)
    vpad = jnp.pad(wv.astype(jnp.bfloat16), ((0, 0), (0, P - KH)))
    big = jnp.tile(vpad, (1, 128))                      # big[c, i] = vpad[c, i % P]
    m1 = big[:, :128 * T].reshape(C, 128, T)            # m1[c, b, t] = wv[c, t - b] (masked)
    return m1.transpose(0, 2, 1).reshape(C * T, 128)


def _prep_matmul_weights(w_conv, b):
    cout, cin, kh, kw = w_conv.shape
    K = cin * kh * kw
    Kp, Np = _round_up(K, 128), _round_up(cout, 128)
    wm = jnp.pad(w_conv.reshape(cout, K).T.astype(jnp.bfloat16),
                 ((0, Kp - K), (0, Np - cout)))
    bias = jnp.pad(b.astype(jnp.float32).reshape(1, cout), ((0, 0), (0, Np - cout)))
    return wm, bias


def init_params(key):
    def uinit(k, shape, fan_in):
        bound = 1.0 / float(fan_in) ** 0.5
        return jax.random.uniform(k, shape, jnp.float32, -bound, bound)

    ks = jax.random.split(key, 10)
    p = {}
    p["enc_w1"] = uinit(ks[0], (16, 1, 998, 1), 1 * 998 * 1)
    p["enc_b1"] = uinit(ks[1], (16,), 1 * 998 * 1)
    p["enc_w2"] = uinit(ks[2], (8, 16, 3, 3), 16 * 3 * 3)
    p["enc_b2"] = uinit(ks[3], (8,), 16 * 3 * 3)
    p["dec_w1"] = uinit(ks[4], (8, 16, 3, 3), 16 * 3 * 3)
    p["dec_b1"] = uinit(ks[5], (16,), 16 * 3 * 3)
    p["dec_w2"] = uinit(ks[6], (16, 8, 5, 5), 8 * 5 * 5)
    p["dec_b2"] = uinit(ks[7], (8,), 8 * 5 * 5)
    p["dec_w3"] = uinit(ks[8], (8, 1, 988, 1), 1 * 988 * 1)
    p["dec_b3"] = uinit(ks[9], (1,), 1 * 988 * 1)
    return p


def prepare_params(p):
    """Run once, outside jit: weights reshaped to im2col matmul form, padded, cast to
    bf16, and the block-Toeplitz matrix for the tall ConvTranspose built (perf review
    highest-value item: no weight-side XLA work inside the forward)."""
    prep = {}
    prep["enc1_w"], prep["enc1_b"] = _prep_matmul_weights(p["enc_w1"], p["enc_b1"])
    prep["enc2_w"], prep["enc2_b"] = _prep_matmul_weights(p["enc_w2"], p["enc_b2"])
    dec1_eq = jnp.flip(p["dec_w1"], axis=(2, 3)).transpose(1, 0, 2, 3)   # ConvT -> equiv Conv
    prep["dec1_w"], prep["dec1_b"] = _prep_matmul_weights(dec1_eq, p["dec_b1"])
    dec2_eq = jnp.flip(p["dec_w2"], axis=(2, 3)).transpose(1, 0, 2, 3)
    prep["dec2_w"], prep["dec2_b"] = _prep_matmul_weights(dec2_eq, p["dec_b2"])

    # Tall ConvTranspose2d(8 -> 1, (988, 1)) -> block-Toeplitz weight (depth, C*128, 128).
    cin, cout, kh, kw = p["dec_w3"].shape
    assert cout == 1 and kw == 1
    depth = (kh + 126) // 128 + 1
    assert 128 * depth >= kh + 127, "Toeplitz wrap-around safety condition violated"
    wv = jnp.flip(p["dec_w3"][:, 0, :, 0], axis=1)      # equivalent-conv taps (C, kh)
    bmat = _toeplitz_weight_matrix(wv, depth)           # (C*depth*128, 128) bf16
    prep["dec3_bt"] = (bmat.reshape(cin, depth, 128, 128)
                           .transpose(1, 0, 2, 3)
                           .reshape(depth, cin * 128, 128))
    prep["dec3_b"] = jnp.zeros((1, 128), jnp.float32) + p["dec_b3"].astype(jnp.float32)
    return prep


# ---------------- forward passes ----------------

def autoencoder_forward(x, prep):
    # encoder: ReLU -> Conv(1,16,(998,1),p=(1,2)) -> ReLU -> Conv(16,8,3,s2,p1) -> ReLU -> MaxPool(2,s1)
    x = jnp.maximum(x, 0.0).astype(jnp.bfloat16)        # leading ReLU; bf16 activations
    x = conv2d_p(x, prep["enc1_w"], prep["enc1_b"], 16, (998, 1), (1, 1), (1, 2), "relu")
    x = conv2d_p(x, prep["enc2_w"], prep["enc2_b"], 8, (3, 3), (2, 2), (1, 1), "relu")
    x = _maxpool2_s1(x)
    # decoder: ConvT(8,16,3,s2) -> ReLU -> ConvT(16,8,5,s3,p1) -> ReLU -> ConvT(8,1,(988,1),p=(1,7)) -> Tanh
    x = conv_transpose2d_p(x, prep["dec1_w"], prep["dec1_b"], 16, (3, 3), (2, 2), (0, 0), "relu")
    x = conv_transpose2d_p(x, prep["dec2_w"], prep["dec2_b"], 8, (5, 5), (3, 3), (1, 1), "relu")
    x = tall_conv_transpose_h(x, prep["dec3_bt"], prep["dec3_b"], 988, (1, 7))
    return x


# ---------------- plain-jnp reference (same math, im2col final layer) for self-check ----------------

def _matmul_bias_act_ref(a, b, bias, activation):
    r = jnp.dot(a.astype(jnp.bfloat16), b.astype(jnp.bfloat16),
                preferred_element_type=jnp.float32)
    return _act(r + bias.astype(jnp.float32)[None, :], activation)


def _conv2d_ref(x, w, b, stride, padding, activation):
    Cout, Cin, kh, kw = w.shape
    N = x.shape[0]
    cols, Hout, Wout = _im2col(x, kh, kw, stride[0], stride[1], padding[0], padding[1])
    out = _matmul_bias_act_ref(cols, w.reshape(Cout, Cin * kh * kw).T, b, activation)
    return out.reshape(N, Hout, Wout, Cout).transpose(0, 3, 1, 2)


def _conv_transpose2d_ref(x, w, b, stride, padding, activation):
    Cin, Cout, kh, kw = w.shape
    sh, sw = stride
    ph, pw = padding
    N, C, H, W = x.shape
    Hd, Wd = (H - 1) * sh + 1, (W - 1) * sw + 1
    xd = jnp.zeros((N, C, Hd, Wd), x.dtype).at[:, :, ::sh, ::sw].set(x)
    wc = jnp.flip(w, axis=(2, 3)).transpose(1, 0, 2, 3)
    return _conv2d_ref(xd, wc, b, (1, 1), (kh - 1 - ph, kw - 1 - pw), activation)


def autoencoder_forward_ref(x, p):
    x = jnp.maximum(x, 0.0)
    x = _conv2d_ref(x, p["enc_w1"], p["enc_b1"], (1, 1), (1, 2), "relu")
    x = _conv2d_ref(x, p["enc_w2"], p["enc_b2"], (2, 2), (1, 1), "relu")
    x = _maxpool2_s1(x)
    x = _conv_transpose2d_ref(x, p["dec_w1"], p["dec_b1"], (2, 2), (0, 0), "relu")
    x = _conv_transpose2d_ref(x, p["dec_w2"], p["dec_b2"], (3, 3), (1, 1), "relu")
    x = _conv_transpose2d_ref(x, p["dec_w3"], p["dec_b3"], (1, 1), (1, 7), "tanh")
    return x


if __name__ == "__main__":
    key = jax.random.PRNGKey(0)
    kx, kp = jax.random.split(key)
    # The (998,1) encoder kernel needs padded H >= 998; keep batch/width minimal.
    x = jax.random.normal(kx, (2, 1, 998, 2), jnp.float32)
    params = init_params(kp)
    prep = prepare_params(params)            # weight prep hoisted out of the forward (once)

    fwd = jax.jit(autoencoder_forward)
    y = fwd(x, prep)
    jax.block_until_ready(y)
    assert y.shape == (2, 1, 994, 1), y.shape
    assert bool(jnp.all(jnp.isfinite(y)))

    # Self-check the block-Toeplitz reformulation + fused bf16 kernels against a plain-jnp
    # im2col reference (bf16 matmul operands, f32 intermediates).
    y_ref = jax.jit(autoencoder_forward_ref)(x, params)
    jax.block_until_ready(y_ref)
    err = float(jnp.max(jnp.abs(y - y_ref)))
    assert err < 2e-2, f"mismatch vs reference: {err}"

    print("KERNEL_OK")
</pallas_src>

<mosaic_0001>
module attributes {stable_mosaic.version = 11 : i64} {
  func.func @_matmul_bias_act_kernel(%arg0: memref<48x1024xbf16, #tpu.memory_space<vmem>>, %arg1: memref<1024x128xbf16, #tpu.memory_space<vmem>>, %arg2: memref<1x128xf32, #tpu.memory_space<vmem>>, %arg3: memref<48x128xbf16, #tpu.memory_space<vmem>>) attributes {dimension_semantics = [], scalar_prefetch = 0 : i64, scratch_operands = 0 : i64, tpu.core_type = #tpu.core_type<tc>} {
    %c0 = arith.constant 0 : index
    %c0_0 = arith.constant 0 : index
    %0 = vector.load %arg0[%c0, %c0_0] : memref<48x1024xbf16, #tpu.memory_space<vmem>>, vector<48x1024xbf16>
    %c0_1 = arith.constant 0 : index
    %c0_2 = arith.constant 0 : index
    %1 = vector.load %arg1[%c0_1, %c0_2] : memref<1024x128xbf16, #tpu.memory_space<vmem>>, vector<1024x128xbf16>
    %cst = arith.constant dense<0.000000e+00> : vector<48x128xf32>
    %2 = tpu.matmul %0, %1, %cst {dimension_numbers = #tpu.dot_dimension_numbers<[1], [0], [0], [1], [0, 0, 1, 1], [], []>} : vector<48x1024xbf16>, vector<1024x128xbf16>, vector<48x128xf32> -> vector<48x128xf32>
    %c0_3 = arith.constant 0 : index
    %c0_4 = arith.constant 0 : index
    %3 = vector.load %arg2[%c0_3, %c0_4] : memref<1x128xf32, #tpu.memory_space<vmem>>, vector<1x128xf32>
    %4 = vector.broadcast %3 : vector<1x128xf32> to vector<48x128xf32>
    %5 = arith.addf %2, %4 : vector<48x128xf32>
    %cst_5 = arith.constant 0.000000e+00 : f32
    %6 = vector.broadcast %cst_5 : f32 to vector<48x128xf32>
    %7 = arith.maximumf %5, %6 : vector<48x128xf32>
    %8 = arith.truncf %7 : vector<48x128xf32> to vector<48x128xbf16>
    %c0_6 = arith.constant 0 : index
    %c0_7 = arith.constant 0 : index
    %9 = vector.load %arg3[%c0_6, %c0_7] : memref<48x128xbf16, #tpu.memory_space<vmem>>, vector<48x128xbf16>
    tpu.vector_store %arg3[%c0_6, %c0_7], %8 {strides = array<i32>} : memref<48x128xbf16, #tpu.memory_space<vmem>>, vector<48x128xbf16>,
    return
  }
}

module attributes {stable_mosaic.version = 11 : i64} {
  func.func @_matmul_bias_act_kernel(%arg0: memref<16x256xbf16, #tpu.memory_space<vmem>>, %arg1: memref<256x128xbf16, #tpu.memory_space<vmem>>, %arg2: memref<1x128xf32, #tpu.memory_space<vmem>>, %arg3: memref<16x128xbf16, #tpu.memory_space<vmem>>) attributes {dimension_semantics = [], scalar_prefetch = 0 : i64, scratch_operands = 0 : i64, tpu.core_type = #tpu.core_type<tc>} {
    %c0 = arith.constant 0 : index
    %c0_0 = arith.constant 0 : index
    %0 = vector.load %arg0[%c0, %c0_0] : memref<16x256xbf16, #tpu.memory_space<vmem>>, vector<16x256xbf16>
    %c0_1 = arith.constant 0 : index
    %c0_2 = arith.constant 0 : index
    %1 = vector.load %arg1[%c0_1, %c0_2] : memref<256x128xbf16, #tpu.memory_space<vmem>>, vector<256x128xbf16>
    %cst = arith.constant dense<0.000000e+00> : vector<16x128xf32>
    %2 = tpu.matmul %0, %1, %cst {dimension_numbers = #tpu.dot_dimension_numbers<[1], [0], [0], [1], [0, 0, 1, 1], [], []>} : vector<16x256xbf16>, vector<256x128xbf16>, vector<16x128xf32> -> vector<16x128xf32>
    %c0_3 = arith.constant 0 : index
    %c0_4 = arith.constant 0 : index
    %3 = vector.load %arg2[%c0_3, %c0_4] : memref<1x128xf32, #tpu.memory_space<vmem>>, vector<1x128xf32>
    %4 = vector.broadcast %3 : vector<1x128xf32> to vector<16x128xf32>
    %5 = arith.addf %2, %4 : vector<16x128xf32>
    %cst_5 = arith.constant 0.000000e+00 : f32
    %6 = vector.broadcast %cst_5 : f32 to vector<16x128xf32>
    %7 = arith.maximumf %5, %6 : vector<16x128xf32>
    %8 = arith.truncf %7 : vector<16x128xf32> to vector<16x128xbf16>
    %c0_6 = arith.constant 0 : index
    %c0_7 = arith.constant 0 : index
    %9 = vector.load %arg3[%c0_6, %c0_7] : memref<16x128xbf16, #tpu.memory_space<vmem>>, vector<16x128xbf16>
    tpu.vector_store %arg3[%c0_6, %c0_7], %8 {strides = array<i32>} : memref<16x128xbf16, #tpu.memory_space<vmem>>, vector<16x128xbf16>,
    return
  }
}

module attributes {stable_mosaic.version = 11 : i64} {
  func.func @_matmul_bias_act_kernel(%arg0: memref<32x128xbf16, #tpu.memory_space<vmem>>, %arg1: memref<128x128xbf16, #tpu.memory_space<vmem>>, %arg2: memref<1x128xf32, #tpu.memory_space<vmem>>, %arg3: memref<32x128xbf16, #tpu.memory_space<vmem>>) attributes {dimension_semantics = [], scalar_prefetch = 0 : i64, scratch_operands = 0 : i64, tpu.core_type = #tpu.core_type<tc>} {
    %c0 = arith.constant 0 : index
    %c0_0 = arith.constant 0 : index
    %0 = vector.load %arg0[%c0, %c0_0] : memref<32x128xbf16, #tpu.memory_space<vmem>>, vector<32x128xbf16>
    %c0_1 = arith.constant 0 : index
    %c0_2 = arith.constant 0 : index
    %1 = vector.load %arg1[%c0_1, %c0_2] : memref<128x128xbf16, #tpu.memory_space<vmem>>, vector<128x128xbf16>
    %cst = arith.constant dense<0.000000e+00> : vector<32x128xf32>
    %2 = tpu.matmul %0, %1, %cst {dimension_numbers = #tpu.dot_dimension_numbers<[1], [0], [0], [1], [0, 0, 1, 1], [], []>} : vector<32x128xbf16>, vector<128x128xbf16>, vector<32x128xf32> -> vector<32x128xf32>
    %c0_3 = arith.constant 0 : index
    %c0_4 = arith.constant 0 : index
    %3 = vector.load %arg2[%c0_3, %c0_4] : memref<1x128xf32, #tpu.memory_space<vmem>>, vector<1x128xf32>
    %4 = vector.broadcast %3 : vector<1x128xf32> to vector<32x128xf32>
    %5 = arith.addf %2, %4 : vector<32x128xf32>
    %cst_5 = arith.constant 0.000000e+00 : f32
    %6 = vector.broadcast %cst_5 : f32 to vector<32x128xf32>
    %7 = arith.maximumf %5, %6 : vector<32x128xf32>
    %8 = arith.truncf %7 : vector<32x128xf32> to vector<32x128xbf16>
    %c0_6 = arith.constant 0 : index
    %c0_7 = arith.constant 0 : index
    %9 = vector.load %arg3[%c0_6, %c0_7] : memref<32x128xbf16, #tpu.memory_space<vmem>>, vector<32x128xbf16>
    tpu.vector_store %arg3[%c0_6, %c0_7], %8 {strides = array<i32>} : memref<32x128xbf16, #tpu.memory_space<vmem>>, vector<32x128xbf16>,
    return
  }
}

module attributes {stable_mosaic.version = 11 : i64} {
  func.func @_matmul_bias_act_kernel(%arg0: memref<272x512xbf16, #tpu.memory_space<vmem>>, %arg1: memref<512x128xbf16, #tpu.memory_space<vmem>>, %arg2: memref<1x128xf32, #tpu.memory_space<vmem>>, %arg3: memref<272x128xbf16, #tpu.memory_space<vmem>>) attributes {dimension_semantics = [], scalar_prefetch = 0 : i64, scratch_operands = 0 : i64, tpu.core_type = #tpu.core_type<tc>} {
    %c0 = arith.constant 0 : index
    %c0_0 = arith.constant 0 : index
    %0 = vector.load %arg0[%c0, %c0_0] : memref<272x512xbf16, #tpu.memory_space<vmem>>, vector<272x512xbf16>
    %c0_1 = arith.constant 0 : index
    %c0_2 = arith.constant 0 : index
    %1 = vector.load %arg1[%c0_1, %c0_2] : memref<512x128xbf16, #tpu.memory_space<vmem>>, vector<512x128xbf16>
    %cst = arith.constant dense<0.000000e+00> : vector<272x128xf32>
    %2 = tpu.matmul %0, %1, %cst {dimension_numbers = #tpu.dot_dimension_numbers<[1], [0], [0], [1], [0, 0, 1, 1], [], []>} : vector<272x512xbf16>, vector<512x128xbf16>, vector<272x128xf32> -> vector<272x128xf32>
    %c0_3 = arith.constant 0 : index
    %c0_4 = arith.constant 0 : index
    %3 = vector.load %arg2[%c0_3, %c0_4] : memref<1x128xf32, #tpu.memory_space<vmem>>, vector<1x128xf32>
    %4 = vector.broadcast %3 : vector<1x128xf32> to vector<272x128xf32>
    %5 = arith.addf %2, %4 : vector<272x128xf32>
    %cst_5 = arith.constant 0.000000e+00 : f32
    %6 = vector.broadcast %cst_5 : f32 to vector<272x128xf32>
    %7 = arith.maximumf %5, %6 : vector<272x128xf32>
    %8 = arith.truncf %7 : vector<272x128xf32> to vector<272x128xbf16>
    %c0_6 = arith.constant 0 : index
    %c0_7 = arith.constant 0 : index
    %9 = vector.load %arg3[%c0_6, %c0_7] : memref<272x128xbf16, #tpu.memory_space<vmem>>, vector<272x128xbf16>
    tpu.vector_store %arg3[%c0_6, %c0_7], %8 {strides = array<i32>} : memref<272x128xbf16, #tpu.memory_space<vmem>>, vector<272x128xbf16>,
    return
  }
}

module attributes {stable_mosaic.version = 11 : i64} {
  func.func @_tall_toeplitz_kernel(%arg0: memref<2x16x1024xbf16, #tpu.memory_space<vmem>>, %arg1: memref<9x1024x128xbf16, #tpu.memory_space<vmem>>, %arg2: memref<1x128xf32, #tpu.memory_space<vmem>>, %arg3: memref<2x8x128xf32, #tpu.memory_space<vmem>>) attributes {dimension_semantics = [], scalar_prefetch = 0 : i64, scratch_operands = 0 : i64, tpu.core_type = #tpu.core_type<tc>} {
    %c0 = arith.constant 0 : index
    %c0_0 = arith.constant 0 : index
    %0 = vector.load %arg2[%c0, %c0_0] : memref<1x128xf32, #tpu.memory_space<vmem>>, vector<1x128xf32>
    %c0_1 = arith.constant 0 : index
    %c0_2 = arith.constant 0 : index
    %c0_3 = arith.constant 0 : index
    %1 = vector.load %arg0[%c0_1, %c0_2, %c0_3] : memref<2x16x1024xbf16, #tpu.memory_space<vmem>>, vector<1x16x1024xbf16>
    %2 = vector.shape_cast %1 : vector<1x16x1024xbf16> to vector<16x1024xbf16>
    %cst = arith.constant 0.000000e+00 : f32
    %3 = vector.broadcast %cst : f32 to vector<8x128xf32>
    %4 = vector.broadcast %0 : vector<1x128xf32> to vector<8x128xf32>
    %5 = arith.addf %3, %4 : vector<8x128xf32>
    %c0_4 = arith.constant 0 : index
    %c0_5 = arith.constant 0 : index
    %c0_6 = arith.constant 0 : index
    %6 = vector.load %arg1[%c0_4, %c0_5, %c0_6] : memref<9x1024x128xbf16, #tpu.memory_space<vmem>>, vector<1x1024x128xbf16>
    %7 = vector.shape_cast %6 : vector<1x1024x128xbf16> to vector<1024x128xbf16>
    %cst_7 = arith.constant dense<0.000000e+00> : vector<16x128xf32>
    %8 = tpu.matmul %2, %7, %cst_7 {dimension_numbers = #tpu.dot_dimension_numbers<[1], [0], [0], [1], [0, 0, 1, 1], [], []>} : vector<16x1024xbf16>, vector<1024x128xbf16>, vector<16x128xf32> -> vector<16x128xf32>
    %9 = vector.extract_strided_slice %8 {offsets = [0, 0], sizes = [8, 128], strides = [1, 1]} : vector<16x128xf32> to vector<8x128xf32>
    %10 = arith.addf %5, %9 : vector<8x128xf32>
    %c1 = arith.constant 1 : index
    %c0_8 = arith.constant 0 : index
    %c0_9 = arith.constant 0 : index
    %11 = vector.load %arg1[%c1, %c0_8, %c0_9] : memref<9x1024x128xbf16, #tpu.memory_space<vmem>>, vector<1x1024x128xbf16>
    %12 = vector.shape_cast %11 : vector<1x1024x128xbf16> to vector<1024x128xbf16>
    %cst_10 = arith.constant dense<0.000000e+00> : vector<16x128xf32>
    %13 = tpu.matmul %2, %12, %cst_10 {dimension_numbers = #tpu.dot_dimension_numbers<[1], [0], [0], [1], [0, 0, 1, 1], [], []>} : vector<16x1024xbf16>, vector<1024x128xbf16>, vector<16x128xf32> -> vector<16x128xf32>
    %14 = vector.extract_strided_slice %13 {offsets = [1, 0], sizes = [8, 128], strides = [1, 1]} : vector<16x128xf32> to vector<8x128xf32>
    %15 = arith.addf %10, %14 : vector<8x128xf32>
    %c2 = arith.constant 2 : index
    %c0_11 = arith.constant 0 : index
    %c0_12 = arith.constant 0 : index
    %16 = vector.load %arg1[%c2, %c0_11, %c0_12] : memref<9x1024x128xbf16, #tpu.memory_space<vmem>>, vector<1x1024x128xbf16>
    %17 = vector.shape_cast %16 : vector<1x1024x128xbf16> to vector<1024x128xbf16>
    %cst_13 = arith.constant dense<0.000000e+00> : vector<16x128xf32>
    %18 = tpu.matmul %2, %17, %cst_13 {dimension_numbers = #tpu.dot_dimension_numbers<[1], [0], [0], [1], [0, 0, 1, 1], [], []>} : vector<16x1024xbf16>, vector<1024x128xbf16>, vector<16x128xf32> -> vector<16x128xf32>
    %19 = vector.extract_strided_slice %18 {offsets = [2, 0], sizes = [8, 128], strides = [1, 1]} : vector<16x128xf32> to vector<8x128xf32>
    %20 = arith.addf %15, %19 : vector<8x128xf32>
    %c3 = arith.constant 3 : index
    %c0_14 = arith.constant 0 : index
    %c0_15 = arith.constant 0 : index
    %21 = vector.load %arg1[%c3, %c0_14, %c0_15] : memref<9x1024x128xbf16, #tpu.memory_space<vmem>>, vector<1x1024x128xbf16>
    %22 = vector.shape_cast %21 : vector<1x1024x128xbf16> to vector<1024x128xbf16>
    %cst_16 = arith.constant dense<0.000000e+00> : vector<16x128xf32>
    %23 = tpu.matmul %2, %22, %cst_16 {dimension_numbers = #tpu.dot_dimension_numbers<[1], [0], [0], [1], [0, 0, 1, 1], [], []>} : vector<16x1024xbf16>, vector<1024x128xbf16>, vector<16x128xf32> -> vector<16x128xf32>
    %24 = vector.extract_strided_slice %23 {offsets = [3, 0], sizes = [8, 128], strides = [1, 1]} : vector<16x128xf32> to vector<8x128xf32>
    %25 = arith.addf %20, %24 : vector<8x128xf32>
    %c4 = arith.constant 4 : index
    %c0_17 = arith.constant 0 : index
    %c0_18 = arith.constant 0 : index
    %26 = vector.load %arg1[%c4, %c0_17, %c0_18] : memref<9x1024x128xbf16, #tpu.memory_space<vmem>>, vector<1x1024x128xbf16>
    %27 = vector.shape_cast %26 : vector<1x1024x128xbf16> to vector<1024x128xbf16>
    %cst_19 = arith.constant dense<0.000000e+00> : vector<16x128xf32>
    %28 = tpu.matmul %2, %27, %cst_19 {dimension_numbers = #tpu.dot_dimension_numbers<[1], [0], [0], [1], [0, 0, 1, 1], [], []>} : vector<16x1024xbf16>, vector<1024x128xbf16>, vector<16x128xf32> -> vector<16x128xf32>
    %29 = vector.extract_strided_slice %28 {offsets = [4, 0], sizes = [8, 128], strides = [1, 1]} : vector<16x128xf32> to vector<8x128xf32>
    %30 = arith.addf %25, %29 : vector<8x128xf32>
    %c5 = arith.constant 5 : index
    %c0_20 = arith.constant 0 : index
    %c0_21 = arith.constant 0 : index
    %31 = vector.load %arg1[%c5, %c0_20, %c0_21] : memref<9x1024x128xbf16, #tpu.memory_space<vmem>>, vector<1x1024x128xbf16>
    %32 = vector.shape_cast %31 : vector<1x1024x128xbf16> to vector<1024x128xbf16>
    %cst_22 = arith.constant dense<0.000000e+00> : vector<16x128xf32>
    %33 = tpu.matmul %2, %32, %cst_22 {dimension_numbers = #tpu.dot_dimension_numbers<[1], [0], [0], [1], [0, 0, 1, 1], [], []>} : vector<16x1024xbf16>, vector<1024x128xbf16>, vector<16x128xf32> -> vector<16x128xf32>
    %34 = vector.extract_strided_slice %33 {offsets = [5, 0], sizes = [8, 128], strides = [1, 1]} : vector<16x128xf32> to vector<8x128xf32>
    %35 = arith.addf %30, %34 : vector<8x128xf32>
    %c6 = arith.constant 6 : index
    %c0_23 = arith.constant 0 : index
    %c0_24 = arith.constant 0 : index
    %36 = vector.load %arg1[%c6, %c0_23, %c0_24] : memref<9x1024x128xbf16, #tpu.memory_space<vmem>>, vector<1x1024x128xbf16>
    %37 = vector.shape_cast %36 : vector<1x1024x128xbf16> to vector<1024x128xbf16>
    %cst_25 = arith.constant dense<0.000000e+00> : vector<16x128xf32>
    %38 = tpu.matmul %2, %37, %cst_25 {dimension_numbers = #tpu.dot_dimension_numbers<[1], [0], [0], [1], [0, 0, 1, 1], [], []>} : vector<16x1024xbf16>, vector<1024x128xbf16>, vector<16x128xf32> -> vector<16x128xf32>
    %39 = vector.extract_strided_slice %38 {offsets = [6, 0], sizes = [8, 128], strides = [1, 1]} : vector<16x128xf32> to vector<8x128xf32>
    %40 = arith.addf %35, %39 : vector<8x128xf32>
    %c7 = arith.constant 7 : index
    %c0_26 = arith.constant 0 : index
    %c0_27 = arith.constant 0 : index
    %41 = vector.load %arg1[%c7, %c0_26, %c0_27] : memref<9x1024x128xbf16, #tpu.memory_space<vmem>>, vector<1x1024x128xbf16>
    %42 = vector.shape_cast %41 : vector<1x1024x128xbf16> to vector<1024x128xbf16>
    %cst_28 = arith.constant dense<0.000000e+00> : vector<16x128xf32>
    %43 = tpu.matmul %2, %42, %cst_28 {dimension_numbers = #tpu.dot_dimension_numbers<[1], [0], [0], [1], [0, 0, 1, 1], [], []>} : vector<16x1024xbf16>, vector<1024x128xbf16>, vector<16x128xf32> -> vector<16x128xf32>
    %44 = vector.extract_strided_slice %43 {offsets = [7, 0], sizes = [8, 128], strides = [1, 1]} : vector<16x128xf32> to vector<8x128xf32>
    %45 = arith.addf %40, %44 : vector<8x128xf32>
    %c8 = arith.constant 8 : index
    %c0_29 = arith.constant 0 : index
    %c0_30 = arith.constant 0 : index
    %46 = vector.load %arg1[%c8, %c0_29, %c0_30] : memref<9x1024x128xbf16, #tpu.memory_space<vmem>>, vector<1x1024x128xbf16>
    %47 = vector.shape_cast %46 : vector<1x1024x128xbf16> to vector<1024x128xbf16>
    %cst_31 = arith.constant dense<0.000000e+00> : vector<16x128xf32>
    %48 = tpu.matmul %2, %47, %cst_31 {dimension_numbers = #tpu.dot_dimension_numbers<[1], [0], [0], [1], [0, 0, 1, 1], [], []>} : vector<16x1024xbf16>, vector<1024x128xbf16>, vector<16x128xf32> -> vector<16x128xf32>
    %49 = vector.extract_strided_slice %48 {offsets = [8, 0], sizes = [8, 128], strides = [1, 1]} : vector<16x128xf32> to vector<8x128xf32>
    %50 = arith.addf %45, %49 : vector<8x128xf32>
    %51 = math.tanh %50 : vector<8x128xf32>
    %c0_32 = arith.constant 0 : index
    %c0_33 = arith.constant 0 : index
    %c0_34 = arith.constant 0 : index
    %52 = vector.load %arg3[%c0_32, %c0_33, %c0_34] : memref<2x8x128xf32, #tpu.memory_space<vmem>>, vector<1x8x128xf32>
    %53 = vector.shape_cast %52 : vector<1x8x128xf32> to vector<8x128xf32>
    %54 = vector.shape_cast %51 : vector<8x128xf32> to vector<1x8x128xf32>
    tpu.vector_store %arg3[%c0_32, %c0_33, %c0_34], %54 {strides = array<i32>} : memref<2x8x128xf32, #tpu.memory_space<vmem>>, vector<1x8x128xf32>,
    %c1_35 = arith.constant 1 : index
    %c0_36 = arith.constant 0 : index
    %c0_37 = arith.constant 0 : index
    %55 = vector.load %arg0[%c1_35, %c0_36, %c0_37] : memref<2x16x1024xbf16, #tpu.memory_space<vmem>>, vector<1x16x1024xbf16>
    %56 = vector.shape_cast %55 : vector<1x16x1024xbf16> to vector<16x1024xbf16>
    %cst_38 = arith.constant 0.000000e+00 : f32
    %57 = vector.broadcast %cst_38 : f32 to vector<8x128xf32>
    %58 = vector.broadcast %0 : vector<1x128xf32> to vector<8x128xf32>
    %59 = arith.addf %57, %58 : vector<8x128xf32>
    %c0_39 = arith.constant 0 : index
    %c0_40 = arith.constant 0 : index
    %c0_41 = arith.constant 0 : index
    %60 = vector.load %arg1[%c0_39, %c0_40, %c0_41] : memref<9x1024x128xbf16, #tpu.memory_space<vmem>>, vector<1x1024x128xbf16>
    %61 = vector.shape_cast %60 : vector<1x1024x128xbf16> to vector<1024x128xbf16>
    %cst_42 = arith.constant dense<0.000000e+00> : vector<16x128xf32>
    %62 = tpu.matmul %56, %61, %cst_42 {dimension_numbers = #tpu.dot_dimension_numbers<[1], [0], [0], [1], [0, 0, 1, 1], [], []>} : vector<16x1024xbf16>, vector<1024x128xbf16>, vector<16x128xf32> -> vector<16x128xf32>
    %63 = vector.extract_strided_slice %62 {offsets = [0, 0], sizes = [8, 128], strides = [1, 1]} : vector<16x128xf32> to vector<8x128xf32>
    %64 = arith.addf %59, %63 : vector<8x128xf32>
    %c1_43 = arith.constant 1 : index
    %c0_44 = arith.constant 0 : index
    %c0_45 = arith.constant 0 : index
    %65 = vector.load %arg1[%c1_43, %c0_44, %c0_45] : memref<9x1024x128xbf16, #tpu.memory_space<vmem>>, vector<1x1024x128xbf16>
    %66 = vector.shape_cast %65 : vector<1x1024x128xbf16> to vector<1024x128xbf16>
    %cst_46 = arith.constant dense<0.000000e+00> : vector<16x128xf32>
    %67 = tpu.matmul %56, %66, %cst_46 {dimension_numbers = #tpu.dot_dimension_numbers<[1], [0], [0], [1], [0, 0, 1, 1], [], []>} : vector<16x1024xbf16>, vector<1024x128xbf16>, vector<16x128xf32> -> vector<16x128xf32>
    %68 = vector.extract_strided_slice %67 {offsets = [1, 0], sizes = [8, 128], strides = [1, 1]} : vector<16x128xf32> to vector<8x128xf32>
    %69 = arith.addf %64, %68 : vector<8x128xf32>
    %c2_47 = arith.constant 2 : index
    %c0_48 = arith.constant 0 : index
    %c0_49 = arith.constant 0 : index
    %70 = vector.load %arg1[%c2_47, %c0_48, %c0_49] : memref<9x1024x128xbf16, #tpu.memory_space<vmem>>, vector<1x1024x128xbf16>
    %71 = vector.shape_cast %70 : vector<1x1024x128xbf16> to vector<1024x128xbf16>
    %cst_50 = arith.constant dense<0.000000e+00> : vector<16x128xf32>
    %72 = tpu.matmul %56, %71, %cst_50 {dimension_numbers = #tpu.dot_dimension_numbers<[1], [0], [0], [1], [0, 0, 1, 1], [], []>} : vector<16x1024xbf16>, vector<1024x128xbf16>, vector<16x128xf32> -> vector<16x128xf32>
    %73 = vector.extract_strided_slice %72 {offsets = [2, 0], sizes = [8, 128], strides = [1, 1]} : vector<16x128xf32> to vector<8x128xf32>
    %74 = arith.addf %69, %73 : vector<8x128xf32>
    %c3_51 = arith.constant 3 : index
    %c0_52 = arith.constant 0 : index
    %c0_53 = arith.constant 0 : index
    %75 = vector.load %arg1[%c3_51, %c0_52, %c0_53] : memref<9x1024x128xbf16, #tpu.memory_space<vmem>>, vector<1x1024x128xbf16>
    %76 = vector.shape_cast %75 : vector<1x1024x128xbf16> to vector<1024x128xbf16>
    %cst_54 = arith.constant dense<0.000000e+00> : vector<16x128xf32>
    %77 = tpu.matmul %56, %76, %cst_54 {dimension_numbers = #tpu.dot_dimension_numbers<[1], [0], [0], [1], [0, 0, 1, 1], [], []>} : vector<16x1024xbf16>, vector<1024x128xbf16>, vector<16x128xf32> -> vector<16x128xf32>
    %78 = vector.extract_strided_slice %77 {offsets = [3, 0], sizes = [8, 128], strides = [1, 1]} : vector<16x128xf32> to vector<8x128xf32>
    %79 = arith.addf %74, %78 : vector<8x128xf32>
    %c4_55 = arith.constant 4 : index
    %c0_56 = arith.constant 0 : index
    %c0_57 = arith.constant 0 : index
    %80 = vector.load %arg1[%c4_55, %c0_56, %c0_57] : memref<9x1024x128xbf16, #tpu.memory_space<vmem>>, vector<1x1024x128xbf16>
    %81 = vector.shape_cast %80 : vector<1x1024x128xbf16> to vector<1024x128xbf16>
    %cst_58 = arith.constant dense<0.000000e+00> : vector<16x128xf32>
    %82 = tpu.matmul %56, %81, %cst_58 {dimension_numbers = #tpu.dot_dimension_numbers<[1], [0], [0], [1], [0, 0, 1, 1], [], []>} : vector<16x1024xbf16>, vector<1024x128xbf16>, vector<16x128xf32> -> vector<16x128xf32>
    %83 = vector.extract_strided_slice %82 {offsets = [4, 0], sizes = [8, 128], strides = [1, 1]} : vector<16x128xf32> to vector<8x128xf32>
    %84 = arith.addf %79, %83 : vector<8x128xf32>
    %c5_59 = arith.constant 5 : index
    %c0_60 = arith.constant 0 : index
    %c0_61 = arith.constant 0 : index
    %85 = vector.load %arg1[%c5_59, %c0_60, %c0_61] : memref<9x1024x128xbf16, #tpu.memory_space<vmem>>, vector<1x1024x128xbf16>
    %86 = vector.shape_cast %85 : vector<1x1024x128xbf16> to vector<1024x128xbf16>
    %cst_62 = arith.constant dense<0.000000e+00> : vector<16x128xf32>
    %87 = tpu.matmul %56, %86, %cst_62 {dimension_numbers = #tpu.dot_dimension_numbers<[1], [0], [0], [1], [0, 0, 1, 1], [], []>} : vector<16x1024xbf16>, vector<1024x128xbf16>, vector<16x128xf32> -> vector<16x128xf32>
    %88 = vector.extract_strided_slice %87 {offsets = [5, 0], sizes = [8, 128], strides = [1, 1]} : vector<16x128xf32> to vector<8x128xf32>
    %89 = arith.addf %84, %88 : vector<8x128xf32>
    %c6_63 = arith.constant 6 : index
    %c0_64 = arith.constant 0 : index
    %c0_65 = arith.constant 0 : index
    %90 = vector.load %arg1[%c6_63, %c0_64, %c0_65] : memref<9x1024x128xbf16, #tpu.memory_space<vmem>>, vector<1x1024x128xbf16>
    %91 = vector.shape_cast %90 : vector<1x1024x128xbf16> to vector<1024x128xbf16>
    %cst_66 = arith.constant dense<0.000000e+00> : vector<16x128xf32>
    %92 = tpu.matmul %56, %91, %cst_66 {dimension_numbers = #tpu.dot_dimension_numbers<[1], [0], [0], [1], [0, 0, 1, 1], [], []>} : vector<16x1024xbf16>, vector<1024x128xbf16>, vector<16x128xf32> -> vector<16x128xf32>
    %93 = vector.extract_strided_slice %92 {offsets = [6, 0], sizes = [8, 128], strides = [1, 1]} : vector<16x128xf32> to vector<8x128xf32>
    %94 = arith.addf %89, %93 : vector<8x128xf32>
    %c7_67 = arith.constant 7 : index
    %c0_68 = arith.constant 0 : index
    %c0_69 = arith.constant 0 : index
    %95 = vector.load %arg1[%c7_67, %c0_68, %c0_69] : memref<9x1024x128xbf16, #tpu.memory_space<vmem>>, vector<1x1024x128xbf16>
    %96 = vector.shape_cast %95 : vector<1x1024x128xbf16> to vector<1024x128xbf16>
    %cst_70 = arith.constant dense<0.000000e+00> : vector<16x128xf32>
    %97 = tpu.matmul %56, %96, %cst_70 {dimension_numbers = #tpu.dot_dimension_numbers<[1], [0], [0], [1], [0, 0, 1, 1], [], []>} : vector<16x1024xbf16>, vector<1024x128xbf16>, vector<16x128xf32> -> vector<16x128xf32>
    %98 = vector.extract_strided_slice %97 {offsets = [7, 0], sizes = [8, 128], strides = [1, 1]} : vector<16x128xf32> to vector<8x128xf32>
    %99 = arith.addf %94, %98 : vector<8x128xf32>
    %c8_71 = arith.constant 8 : index
    %c0_72 = arith.constant 0 : index
    %c0_73 = arith.constant 0 : index
    %100 = vector.load %arg1[%c8_71, %c0_72, %c0_73] : memref<9x1024x128xbf16, #tpu.memory_space<vmem>>, vector<1x1024x128xbf16>
    %101 = vector.shape_cast %100 : vector<1x1024x128xbf16> to vector<1024x128xbf16>
    %cst_74 = arith.constant dense<0.000000e+00> : vector<16x128xf32>
    %102 = tpu.matmul %56, %101, %cst_74 {dimension_numbers = #tpu.dot_dimension_numbers<[1], [0], [0], [1], [0, 0, 1, 1], [], []>} : vector<16x1024xbf16>, vector<1024x128xbf16>, vector<16x128xf32> -> vector<16x128xf32>
    %103 = vector.extract_strided_slice %102 {offsets = [8, 0], sizes = [8, 128], strides = [1, 1]} : vector<16x128xf32> to vector<8x128xf32>
    %104 = arith.addf %99, %103 : vector<8x128xf32>
    %105 = math.tanh %104 : vector<8x128xf32>
    %c1_75 = arith.constant 1 : index
    %c0_76 = arith.constant 0 : index
    %c0_77 = arith.constant 0 : index
    %106 = vector.load %arg3[%c1_75, %c0_76, %c0_77] : memref<2x8x128xf32, #tpu.memory_space<vmem>>, vector<1x8x128xf32>
    %107 = vector.shape_cast %106 : vector<1x8x128xf32> to vector<8x128xf32>
    %108 = vector.shape_cast %105 : vector<8x128xf32> to vector<1x8x128xf32>
    tpu.vector_store %arg3[%c1_75, %c0_76, %c0_77], %108 {strides = array<i32>} : memref<2x8x128xf32, #tpu.memory_space<vmem>>, vector<1x8x128xf32>,
    return
  }
}

</mosaic_0001>

<bundles_post_ra>
// kernel: autoencoder_forward.5
= control target key start
LH: loop header
LB: loop body
LE: loop exit
PB: predicated region body
PF: predicated region fallthrough
CT: control target
= control target key end

     0   :  { %s1560_s1 = inlined_call_operand.vmem [shape: bf16[1024,128], index: 1, kind: input, shape index: {}]   ;;  %s1561_s0 = inlined_call_operand.vmem [shape: bf16[48,1024], index: 0, kind: input, shape index: {}]   ;;  %s1562_s2 = inlined_call_operand.vmem [shape: f32[1,128], index: 2, kind: input, shape index: {}]   ;;  %s1563_s3 = inlined_call_operand.vmem [shape: bf16[48,128], index: 3, kind: output, shape index: {}]  }
   0x1   :  { %v1200_v0 = vld [vmem:[%s1560_s1 + $0x40] sm:$0xff]   ;;  %v1204_v4 = vld [vmem:[%s1560_s1 + $0x48] sm:$0xff]   ;;  %v1208_v8 = vld [vmem:[%s1560_s1 + $0x50] sm:$0xff]  }
   0x2   :  { %v1201_v1 = vld [vmem:[%s1560_s1 + $0xc0] sm:$0xff]   ;;  %1064 = vmatprep.subr.bf16.mxu0 %v1200_v0  ;;  %v1205_v5 = vld [vmem:[%s1560_s1 + $0xc8] sm:$0xff]   ;;  %v1209_v9 = vld [vmem:[%s1560_s1 + $0xd0] sm:$0xff]  }
   0x3   :  { %v1202_v2 = vld [vmem:[%s1560_s1] sm:$0xff]   ;;  %1098 = vmatprep.subr.bf16.mxu1 %v1201_v1  ;;  %v1206_v6 = vld [vmem:[%s1560_s1 + $0x8] sm:$0xff]   ;;  %v1210_v10 = vld [vmem:[%s1560_s1 + $0x10] sm:$0xff]  }
   0x4   :  { %v1203_v3 = vld [vmem:[%s1560_s1 + $0x80] sm:$0xff]   ;;  %1065 = vmatpush3.bf16.msra.mxu0 %v1202_v2  ;;  %v1207_v7 = vld [vmem:[%s1560_s1 + $0x88] sm:$0xff]   ;;  %v1211_v11 = vld [vmem:[%s1560_s1 + $0x90] sm:$0xff]  }
   0x5   :  { %1099 = vmatpush3.bf16.msra.mxu1 %v1203_v3  ;;  %1066 = vmatprep.subr.bf16.mxu0 %v1204_v4  ;;  %v1212_v12 = vld [vmem:[%s1560_s1 + $0x58] sm:$0xff]   ;;  %v1216_v16 = vld [vmem:[%s1560_s1 + $0x60] sm:$0xff]   ;;  %v1220_v20 = vld [vmem:[%s1560_s1 + $0x68] sm:$0xff]  }
   0x6   :  { %1100 = vmatprep.subr.bf16.mxu1 %v1205_v5  ;;  %v1213_v13 = vld [vmem:[%s1560_s1 + $0xd8] sm:$0xff]   ;;  %v1217_v17 = vld [vmem:[%s1560_s1 + $0xe0] sm:$0xff]   ;;  %v1221_v21 = vld [vmem:[%s1560_s1 + $0xe8] sm:$0xff]  }
   0x7   :  { %v1214_v14 = vld [vmem:[%s1560_s1 + $0x18] sm:$0xff]   ;;  %v1218_v18 = vld [vmem:[%s1560_s1 + $0x20] sm:$0xff]   ;;  %v1222_v22 = vld [vmem:[%s1560_s1 + $0x28] sm:$0xff]  }
   0x8   :  { %1067 = vmatpush3.bf16.msra.mxu0 %v1206_v6  ;;  %v1215_v15 = vld [vmem:[%s1560_s1 + $0x98] sm:$0xff]   ;;  %v1219_v19 = vld [vmem:[%s1560_s1 + $0xa0] sm:$0xff]   ;;  %v1223_v23 = vld [vmem:[%s1560_s1 + $0xa8] sm:$0xff]  }
   0x9   :  { %1101 = vmatpush3.bf16.msra.mxu1 %v1207_v7  ;;  %1068 = vmatprep.subr.bf16.mxu0 %v1208_v8  ;;  %v1224_v24 = vld [vmem:[%s1560_s1 + $0x70] sm:$0xff]   ;;  %v1228_v28 = vld [vmem:[%s1560_s1 + $0x78] sm:$0xff]   ;;  %v15_v32 = vld [vmem:[%s1561_s0] sm:$0xff] }
   0xa   :  { %1102 = vmatprep.subr.bf16.mxu1 %v1209_v9  ;;  %v1225_v25 = vld [vmem:[%s1560_s1 + $0xf0] sm:$0xff]   ;;  %v1229_v29 = vld [vmem:[%s1560_s1 + $0xf8] sm:$0xff]   ;;  %v19_v33 = vld [vmem:[%s1561_s0 + $0x20] sm:$0xff] }
   0xb   :  { %v1226_v26 = vld [vmem:[%s1560_s1 + $0x30] sm:$0xff]   ;;  %v1230_v30 = vld [vmem:[%s1560_s1 + $0x38] sm:$0xff]   ;;  %v16_v34 = vld [vmem:[%s1561_s0 + $0x8] sm:$0xff]  ;;  %v947_v35 = vcombine.low %v15_v32, %v19_v33  ;;  %v948_v36 = vcombine.high %v15_v32, %v19_v33 }
   0xc   :  { %1069 = vmatpush3.bf16.msra.mxu0 %v1210_v10  ;;  %v1227_v27 = vld [vmem:[%s1560_s1 + $0xb0] sm:$0xff]   ;;  %v1231_v31 = vld [vmem:[%s1560_s1 + $0xb8] sm:$0xff]   ;;  %v20_v37 = vld [vmem:[%s1561_s0 + $0x28] sm:$0xff] }
   0xd   :  { %1103 = vmatpush3.bf16.msra.mxu1 %v1211_v11  ;;  %1070 = vmatprep.subr.bf16.mxu0 %v1212_v12  ;;  %v949_v38 = vcombine.low %v16_v34, %v20_v37  ;;  %v950_v39 = vcombine.high %v16_v34, %v20_v37  ;;  %v1232_v40 = vld [vmem:[%s1560_s1 + $0x140] sm:$0xff]   ;;  %v1236_v44 = vld [vmem:[%s1560_s1 + $0x148] sm:$0xff]   ;;  %v1240_v48 = vld [vmem:[%s1560_s1 + $0x150] sm:$0xff]  }
   0xe   :  { %1104 = vmatprep.subr.bf16.mxu1 %v1213_v13  ;;  %710 = vmatprep.mubr.bf16.mxu0 %v948_v36  ;;  %v1233_v41 = vld [vmem:[%s1560_s1 + $0x1c0] sm:$0xff]   ;;  %v1237_v45 = vld [vmem:[%s1560_s1 + $0x1c8] sm:$0xff]   ;;  %v1241_v49 = vld [vmem:[%s1560_s1 + $0x1d0] sm:$0xff]  }
   0xf   :  { %767 = vmatprep.mubr.bf16.mxu1 %v950_v39  ;;  %v1234_v42 = vld [vmem:[%s1560_s1 + $0x100] sm:$0xff]   ;;  %v1238_v46 = vld [vmem:[%s1560_s1 + $0x108] sm:$0xff]   ;;  %v1242_v50 = vld [vmem:[%s1560_s1 + $0x110] sm:$0xff]  }
  0x10   :  { %1071 = vmatpush3.bf16.msra.mxu0 %v1214_v14  ;;  %v1235_v43 = vld [vmem:[%s1560_s1 + $0x180] sm:$0xff]   ;;  %v1239_v47 = vld [vmem:[%s1560_s1 + $0x188] sm:$0xff]   ;;  %v1243_v51 = vld [vmem:[%s1560_s1 + $0x190] sm:$0xff]  }
  0x11   :  { %1105 = vmatpush3.bf16.msra.mxu1 %v1215_v15  ;;  %1072 = vmatprep.subr.bf16.mxu0 %v1216_v16  ;;  %v23_v52 = vld [vmem:[%s1561_s0 + $0x40] sm:$0xff]  ;;  %v1244_v55 = vld [vmem:[%s1560_s1 + $0x158] sm:$0xff]   ;;  %v24_v60 = vld [vmem:[%s1561_s0 + $0x48] sm:$0xff] }
  0x12   :  { %1106 = vmatprep.subr.bf16.mxu1 %v1217_v17  ;;  %v27_v53 = vld [vmem:[%s1561_s0 + $0x60] sm:$0xff]  ;;  %v1245_v57 = vld [vmem:[%s1560_s1 + $0x1d8] sm:$0xff]   ;;  %v28_v61 = vld [vmem:[%s1561_s0 + $0x68] sm:$0xff] }
  0x13   :  { %v956_v54 = vcombine.high %v23_v52, %v27_v53  ;;  %v955_v56 = vcombine.low %v23_v52, %v27_v53  ;;  %v1246_v58 = vld [vmem:[%s1560_s1 + $0x118] sm:$0xff]   ;;  %v958_v62 = vcombine.high %v24_v60, %v28_v61  ;;  %v957_v63 = vcombine.low %v24_v60, %v28_v61  ;;  %v1248_v0 = vld [vmem:[%s1560_s1 + $0x160] sm:$0xff]   ;;  %v1252_v7 = vld [vmem:[%s1560_s1 + $0x168] sm:$0xff]  }
  0x14   :  { %1073 = vmatpush3.bf16.msra.mxu0 %v1218_v18  ;;  %v1247_v59 = vld [vmem:[%s1560_s1 + $0x198] sm:$0xff]   ;;  %v1249_v1 = vld [vmem:[%s1560_s1 + $0x1e0] sm:$0xff]   ;;  %v1253_v9 = vld [vmem:[%s1560_s1 + $0x1e8] sm:$0xff]  }
  0x15   :  { %1107 = vmatpush3.bf16.msra.mxu1 %v1219_v19  ;;  %1074 = vmatprep.subr.bf16.mxu0 %v1220_v20  ;;  %v1250_v2 = vld [vmem:[%s1560_s1 + $0x120] sm:$0xff]   ;;  %v1254_v10 = vld [vmem:[%s1560_s1 + $0x128] sm:$0xff]   ;;  %v1256_v16 = vld [vmem:[%s1560_s1 + $0x170] sm:$0xff]  }
  0x16   :  { %1108 = vmatprep.subr.bf16.mxu1 %v1221_v21  ;;  %v1251_v3 = vld [vmem:[%s1560_s1 + $0x1a0] sm:$0xff]   ;;  %v1255_v11 = vld [vmem:[%s1560_s1 + $0x1a8] sm:$0xff]   ;;  %v1257_v17 = vld [vmem:[%s1560_s1 + $0x1f0] sm:$0xff]  }
  0x17   :  { %v31_v4 = vld [vmem:[%s1561_s0 + $0x80] sm:$0xff]  ;;  %v32_v12 = vld [vmem:[%s1561_s0 + $0x88] sm:$0xff]  ;;  %v1258_v18 = vld [vmem:[%s1560_s1 + $0x130] sm:$0xff]  }
  0x18   :  { %1075 = vmatpush3.bf16.msra.mxu0 %v1222_v22  ;;  %v35_v5 = vld [vmem:[%s1561_s0 + $0xa0] sm:$0xff]  ;;  %v36_v13 = vld [vmem:[%s1561_s0 + $0xa8] sm:$0xff]  ;;  %v1259_v19 = vld [vmem:[%s1560_s1 + $0x1b0] sm:$0xff]  }
  0x19   :  { %1109 = vmatpush3.bf16.msra.mxu1 %v1223_v23  ;;  %1076 = vmatprep.subr.bf16.mxu0 %v1224_v24  ;;  %v964_v6 = vcombine.high %v31_v4, %v35_v5  ;;  %v963_v8 = vcombine.low %v31_v4, %v35_v5  ;;  %v966_v14 = vcombine.high %v32_v12, %v36_v13  ;;  %v1260_v20 = vld [vmem:[%s1560_s1 + $0x178] sm:$0xff]   ;;  %v17_v24 = vld [vmem:[%s1561_s0 + $0x10] sm:$0xff] }
  0x1a   :  { %1110 = vmatprep.subr.bf16.mxu1 %v1225_v25  ;;  %v965_v15 = vcombine.low %v32_v12, %v36_v13  ;;  %v1261_v21 = vld [vmem:[%s1560_s1 + $0x1f8] sm:$0xff]   ;;  %v21_v25 = vld [vmem:[%s1561_s0 + $0x30] sm:$0xff] }
  0x1b   :  { %v1262_v22 = vld [vmem:[%s1560_s1 + $0x138] sm:$0xff]   ;;  %v37_v39 = vld [vmem:[%s1561_s0 + $0xb0] sm:$0xff] }
  0x1c   :  { %1077 = vmatpush3.bf16.msra.mxu0 %v1226_v26  ;;  %v1263_v23 = vld [vmem:[%s1560_s1 + $0x1b8] sm:$0xff]  }
  0x1d   :  { %1111 = vmatpush3.bf16.msra.mxu1 %v1227_v27  ;;  %1078 = vmatprep.subr.bf16.mxu0 %v1228_v28  ;;  %v18_v26 = vld [vmem:[%s1561_s0 + $0x18] sm:$0xff]  ;;  %v951_v27 = vcombine.low %v17_v24, %v21_v25  ;;  %v952_v28 = vcombine.high %v17_v24, %v21_v25 }
  0x1e   :  { %1112 = vmatprep.subr.bf16.mxu1 %v1229_v29  ;;  %v22_v29 = vld [vmem:[%s1561_s0 + $0x38] sm:$0xff] }
  0x1f   :  { %v953_v32 = vcombine.low %v18_v26, %v22_v29  ;;  %v954_v33 = vcombine.high %v18_v26, %v22_v29  ;;  %v30_v36 = vld [vmem:[%s1561_s0 + $0x78] sm:$0xff] }
  0x20   :  { %1079 = vmatpush3.bf16.msra.mxu0 %v1230_v30  ;;  %v25_v30 = vld [vmem:[%s1561_s0 + $0x50] sm:$0xff] }
  0x21   :  { %1113 = vmatpush3.bf16.msra.mxu1 %v1231_v31  ;;  %1132 = vmatprep.subr.bf16.mxu0 %v1232_v40  ;;  %v29_v31 = vld [vmem:[%s1561_s0 + $0x70] sm:$0xff]  ;;  %v34_v40 = vld [vmem:[%s1561_s0 + $0x98] sm:$0xff] }
  0x22   :  { %1166 = vmatprep.subr.bf16.mxu1 %v1233_v41  ;;  %v960_v34 = vcombine.high %v25_v30, %v29_v31  ;;  %v38_v41 = vld [vmem:[%s1561_s0 + $0xb8] sm:$0xff] }
  0x23   :  { %711 = vmatmul.mubr.bf16.vlgmr.msra.gmra.mrb[0].mxu0 %v947_v35  ;;  %v26_v35 = vld [vmem:[%s1561_s0 + $0x58] sm:$0xff] }
  0x24   :  { %768 = vmatmul.mubr.bf16.vlgmr.msra.gmra.mrb[0].mxu1 %v949_v38  ;;  %1133 = vmatpush3.bf16.msra.mxu0 %v1234_v42  ;;  %v962_v37 = vcombine.high %v26_v35, %v30_v36  ;;  %v33_v38 = vld [vmem:[%s1561_s0 + $0x90] sm:$0xff]  ;;  %v959_v42 = vcombine.low %v25_v30, %v29_v31 }
  0x25   :  { %1167 = vmatpush3.bf16.msra.mxu1 %v1235_v43  ;;  %1134 = vmatprep.subr.bf16.mxu0 %v1236_v44  ;;  %v961_v43 = vcombine.low %v26_v35, %v30_v36  ;;  %v968_v44 = vcombine.high %v33_v38, %v37_v39 }
  0x26   :  { %1168 = vmatprep.subr.bf16.mxu1 %v1237_v45  ;;  %718 = vmatprep.mubr.bf16.mxu0 %v956_v54  ;;  %v970_v45 = vcombine.high %v34_v40, %v38_v41 }
  0x27   :  { %775 = vmatprep.mubr.bf16.mxu1 %v958_v62 }
  0x28   :  { %1135 = vmatpush3.bf16.msra.mxu0 %v1238_v46  ;;  %v967_v46 = vcombine.low %v33_v38, %v37_v39 }
  0x29   :  { %1169 = vmatpush3.bf16.msra.mxu1 %v1239_v47  ;;  %1136 = vmatprep.subr.bf16.mxu0 %v1240_v48  ;;  %v969_v47 = vcombine.low %v34_v40, %v38_v41 }
  0x2a   :  { %1170 = vmatprep.subr.bf16.mxu1 %v1241_v49 }
  0x2b   :  { %719 = vmatmul.mubr.bf16.gmra.mrb[4].mxu0 %v955_v56 }
  0x2c   :  { %1137 = vmatpush3.bf16.msra.mxu0 %v1242_v50  ;;  %776 = vmatmul.mubr.bf16.gmra.mrb[4].mxu1 %v957_v63  ;;  %v946_v50 = vld [vmem:[%s1562_s2] ss:$0 sm:$0xff] }
  0x2d   :  { %1171 = vmatpush3.bf16.msra.mxu1 %v1243_v51  ;;  %1138 = vmatprep.subr.bf16.mxu0 %v1244_v55 }
  0x2e   :  { %1172 = vmatprep.subr.bf16.mxu1 %v1245_v57  ;;  %726 = vmatprep.mubr.bf16.mxu0 %v964_v6 }
  0x2f   :  { %783 = vmatprep.mubr.bf16.mxu1 %v966_v14 }
  0x30   :  { %1139 = vmatpush3.bf16.msra.mxu0 %v1246_v58 }
  0x31   :  { %1173 = vmatpush3.bf16.msra.mxu1 %v1247_v59  ;;  %1140 = vmatprep.subr.bf16.mxu0 %v1248_v0 }
  0x32   :  { %1174 = vmatprep.subr.bf16.mxu1 %v1249_v1 }
  0x33   :  { %727 = vmatmul.mubr.bf16.gmra.mrb[8].mxu0 %v963_v8 }
  0x34   :  { %1141 = vmatpush3.bf16.msra.mxu0 %v1250_v2  ;;  %784 = vmatmul.mubr.bf16.gmra.mrb[8].mxu1 %v965_v15 }
  0x35   :  { %1175 = vmatpush3.bf16.msra.mxu1 %v1251_v3  ;;  %1142 = vmatprep.subr.bf16.mxu0 %v1252_v7 }
  0x36   :  { %1176 = vmatprep.subr.bf16.mxu1 %v1253_v9  ;;  %824 = vmatprep.mubr.bf16.mxu0 %v952_v28 }
  0x37   :  { %881 = vmatprep.mubr.bf16.mxu1 %v954_v33 }
  0x38   :  { %1143 = vmatpush3.bf16.msra.mxu0 %v1254_v10 }
  0x39   :  { %1177 = vmatpush3.bf16.msra.mxu1 %v1255_v11  ;;  %1144 = vmatprep.subr.bf16.mxu0 %v1256_v16 }
  0x3a   :  { %1178 = vmatprep.subr.bf16.mxu1 %v1257_v17 }
  0x3c   :  { %1145 = vmatpush3.bf16.msra.mxu0 %v1258_v18 }
  0x3d   :  { %1179 = vmatpush3.bf16.msra.mxu1 %v1259_v19  ;;  %1146 = vmatprep.subr.bf16.mxu0 %v1260_v20 }
  0x3e   :  { %1180 = vmatprep.subr.bf16.mxu1 %v1261_v21 }
  0x40   :  { %1147 = vmatpush3.bf16.msra.mxu0 %v1262_v22 }
  0x41   :  { %1181 = vmatpush3.bf16.msra.mxu1 %v1263_v23 }
  0x43   :  { %825 = vmatmul.mubr.bf16.vlgmr.msra.gmra.mrb[12].mxu0 %v951_v27 }
  0x44   :  { %882 = vmatmul.mubr.bf16.vlgmr.msra.gmra.mrb[12].mxu1 %v953_v32  ;;  %832 = vmatprep.mubr.bf16.mxu0 %v960_v34 }
  0x45   :  { %889 = vmatprep.mubr.bf16.mxu1 %v962_v37 }
  0x4b   :  { %833 = vmatmul.mubr.bf16.gmra.mrb[16].mxu0 %v959_v42 }
  0x4c   :  { %890 = vmatmul.mubr.bf16.gmra.mrb[16].mxu1 %v961_v43  ;;  %840 = vmatprep.mubr.bf16.mxu0 %v968_v44 }
  0x4d   :  { %897 = vmatprep.mubr.bf16.mxu1 %v970_v45 }
  0x53   :  { %841 = vmatmul.mubr.bf16.gmra.mrb[20].mxu0 %v967_v46 }
  0x54   :  { %898 = vmatmul.mubr.bf16.gmra.mrb[20].mxu1 %v969_v47 }
  0xf6   :  { %v1080_v48 = vpop.f32.mrb[0].mxu0 }
  0xf7   :  { %v1114_v49 = vpop.f32.mrb[0].mxu1  ;;  %v1081_v51 = vpop.f32.mrb[1].mxu0 }
  0xf8   :  { %v1082_v52 = vadd.f32 %v1081_v51, %v1080_v48  ;;  %v1115_v53 = vpop.f32.mrb[1].mxu1  ;;  %v1083_v54 = vpop.f32.mrb[2].mxu0 }
  0xf9   :  { %v1116_v55 = vadd.f32 %v1115_v53, %v1114_v49  ;;  %v1117_v56 = vpop.f32.mrb[2].mxu1  ;;  %v1084_v57 = vpop.f32.mrb[3].mxu0 }
  0xfa   :  { %v713_v58 = vadd.f32 %v1082_v52, %v946_v50  ;;  %v1085_v59 = vadd.f32 %v1084_v57, %v1083_v54  ;;  %v1118_v60 = vpop.f32.mrb[3].mxu1 }
  0xfb   :  { %v1119_v61 = vadd.f32 %v1118_v60, %v1117_v56 }
  0xfc   :  { %v770_v62 = vadd.f32 %v1116_v55, %v713_v58  ;;  %v716_v63 = vadd.f32 %v1085_v59, %v946_v50 }
  0xfe   :  { %v773_v0 = vadd.f32 %v1119_v61, %v716_v63  ;;  %v1086_v1 = vpop.f32.mrb[4].mxu0 }
  0xff   :  { %v1087_v2 = vpop.f32.mrb[5].mxu0  ;;  %v1120_v8 = vpop.f32.mrb[4].mxu1 }
 0x100   :  { %v1088_v3 = vadd.f32 %v1087_v2, %v1086_v1  ;;  %v1089_v4 = vpop.f32.mrb[6].mxu0  ;;  %v1121_v9 = vpop.f32.mrb[5].mxu1 }
 0x101   :  { %v1090_v5 = vpop.f32.mrb[7].mxu0  ;;  %v1122_v11 = vadd.f32 %v1121_v9, %v1120_v8  ;;  %v1123_v12 = vpop.f32.mrb[6].mxu1 }
 0x102   :  { %v1091_v6 = vadd.f32 %v1090_v5, %v1089_v4  ;;  %v721_v7 = vadd.f32 %v1088_v3, %v946_v50  ;;  %v1124_v13 = vpop.f32.mrb[7].mxu1 }
 0x103   :  { %v1125_v15 = vadd.f32 %v1124_v13, %v1123_v12 }
 0x104   :  { %v724_v10 = vadd.f32 %v1091_v6, %v946_v50  ;;  %v778_v14 = vadd.f32 %v1122_v11, %v721_v7 }
 0x106   :  { %v1092_v16 = vpop.f32.mrb[8].mxu0  ;;  %v781_v17 = vadd.f32 %v1125_v15, %v724_v10 }
 0x107   :  { %v1093_v18 = vpop.f32.mrb[9].mxu0  ;;  %v1126_v23 = vpop.f32.mrb[8].mxu1 }
 0x108   :  { %v1094_v19 = vadd.f32 %v1093_v18, %v1092_v16  ;;  %v1095_v20 = vpop.f32.mrb[10].mxu0  ;;  %v1127_v25 = vpop.f32.mrb[9].mxu1 }
 0x109   :  { %v1096_v21 = vpop.f32.mrb[11].mxu0  ;;  %v1128_v27 = vadd.f32 %v1127_v25, %v1126_v23  ;;  %v1129_v28 = vpop.f32.mrb[10].mxu1 }
 0x10a   :  { %v729_v22 = vadd.f32 %v1094_v19, %v946_v50  ;;  %v1097_v24 = vadd.f32 %v1096_v21, %v1095_v20  ;;  %v1130_v29 = vpop.f32.mrb[11].mxu1 }
 0x10b   :  { %v1131_v31 = vadd.f32 %v1130_v29, %v1129_v28 }
 0x10c   :  { %v732_v26 = vadd.f32 %v1097_v24, %v946_v50  ;;  %v786_v30 = vadd.f32 %v1128_v27, %v729_v22 }
 0x10e   :  { %v789_v32 = vadd.f32 %v1131_v31, %v732_v26 }
 0x116   :  { %v1148_v33 = vpop.f32.mrb[12].mxu0 }
 0x117   :  { %v1182_v34 = vpop.f32.mrb[12].mxu1  ;;  %v1149_v35 = vpop.f32.mrb[13].mxu0 }
 0x118   :  { %v1150_v36 = vadd.f32 %v1149_v35, %v1148_v33  ;;  %v1183_v37 = vpop.f32.mrb[13].mxu1  ;;  %v1151_v38 = vpop.f32.mrb[14].mxu0 }
 0x119   :  { %v1184_v39 = vadd.f32 %v1183_v37, %v1182_v34  ;;  %v1185_v40 = vpop.f32.mrb[14].mxu1  ;;  %v1152_v41 = vpop.f32.mrb[15].mxu0 }
 0x11a   :  { %v827_v42 = vadd.f32 %v1150_v36, %v770_v62  ;;  %v1153_v43 = vadd.f32 %v1152_v41, %v1151_v38  ;;  %v1186_v44 = vpop.f32.mrb[15].mxu1 }
 0x11b   :  { %v1187_v45 = vadd.f32 %v1186_v44, %v1185_v40 }
 0x11c   :  { %v884_v46 = vadd.f32 %v1184_v39, %v827_v42  ;;  %v830_v47 = vadd.f32 %v1153_v43, %v773_v0 }
 0x11e   :  { %v887_v48 = vadd.f32 %v1187_v45, %v830_v47  ;;  %v1154_v49 = vpop.f32.mrb[16].mxu0  ;;  %v906_v52 = vmax.f32 %v884_v46, 0.0 }
 0x11f   :  { %v1188_v50 = vpop.f32.mrb[16].mxu1  ;;  %v1155_v51 = vpop.f32.mrb[17].mxu0 }
 0x120   :  { %v907_v53 = vmax.f32 %v887_v48, 0.0  ;;  %v1156_v54 = vadd.f32 %v1155_v51, %v1154_v49  ;;  %v1189_v55 = vpop.f32.mrb[17].mxu1  ;;  %v1157_v56 = vpop.f32.mrb[18].mxu0 }
 0x121   :  { %v1190_v57 = vadd.f32 %v1189_v55, %v1188_v50  ;;  %v1191_v58 = vpop.f32.mrb[18].mxu1  ;;  %v1158_v59 = vpop.f32.mrb[19].mxu0 }
 0x122   :  { %v1050_v60 = vpack.c.bf16 %v907_v53, %v906_v52  ;;  %v835_v61 = vadd.f32 %v1156_v54, %v778_v14  ;;  %v1159_v62 = vadd.f32 %v1158_v59, %v1157_v56  ;;  %v1192_v63 = vpop.f32.mrb[19].mxu1 }
 0x123   :  { %v1193_v1 = vadd.f32 %v1192_v63, %v1191_v58 }
 0x124   :  { %1051 = vst [vmem:[%s1563_s3] sm:$0xff] %v1050_v60   ;;  %v892_v0 = vadd.f32 %v1190_v57, %v835_v61  ;;  %v838_v2 = vadd.f32 %v1159_v62, %v781_v17 }
 0x126   :  { %v895_v3 = vadd.f32 %v1193_v1, %v838_v2  ;;  %v1160_v4 = vpop.f32.mrb[20].mxu0  ;;  %v908_v7 = vmax.f32 %v892_v0, 0.0 }
 0x127   :  { %v1194_v5 = vpop.f32.mrb[20].mxu1  ;;  %v1161_v6 = vpop.f32.mrb[21].mxu0 }
 0x128   :  { %v909_v8 = vmax.f32 %v895_v3, 0.0  ;;  %v1162_v9 = vadd.f32 %v1161_v6, %v1160_v4  ;;  %v1195_v10 = vpop.f32.mrb[21].mxu1  ;;  %v1163_v11 = vpop.f32.mrb[22].mxu0 }
 0x129   :  { %v1196_v12 = vadd.f32 %v1195_v10, %v1194_v5  ;;  %v1197_v13 = vpop.f32.mrb[22].mxu1  ;;  %v1164_v14 = vpop.f32.mrb[23].mxu0 }
 0x12a   :  { %v1055_v15 = vpack.c.bf16 %v909_v8, %v908_v7  ;;  %v843_v16 = vadd.f32 %v1162_v9, %v786_v30  ;;  %v1165_v18 = vadd.f32 %v1164_v14, %v1163_v11  ;;  %v1198_v19 = vpop.f32.mrb[23].mxu1 }
 0x12b   :  { %v1199_v20 = vadd.f32 %v1198_v19, %v1197_v13 }
 0x12c   :  { %1062 = vst [vmem:[%s1563_s3 + $0x8] sm:$0xff] %v1055_v15   ;;  %v900_v17 = vadd.f32 %v1196_v12, %v843_v16  ;;  %v846_v21 = vadd.f32 %v1165_v18, %v789_v32 }
 0x12e   :  { %v903_v22 = vadd.f32 %v1199_v20, %v846_v21  ;;  %v910_v23 = vmax.f32 %v900_v17, 0.0 }
 0x130   :  { %v911_v24 = vmax.f32 %v903_v22, 0.0 }
 0x132   :  { %v1060_v25 = vpack.c.bf16 %v911_v24, %v910_v23 }
 0x134   :  { %1063 = vst [vmem:[%s1563_s3 + $0x10] sm:$0xff] %v1060_v25  }

// kernel: autoencoder_forward.6
= control target key start
LH: loop header
LB: loop body
LE: loop exit
PB: predicated region body
PF: predicated region fallthrough
CT: control target
= control target key end

     0   :  { %s368_s1 = inlined_call_operand.vmem [shape: bf16[256,128], index: 1, kind: input, shape index: {}]   ;;  %s369_s0 = inlined_call_operand.vmem [shape: bf16[16,256], index: 0, kind: input, shape index: {}]   ;;  %s370_s2 = inlined_call_operand.vmem [shape: f32[1,128], index: 2, kind: input, shape index: {}]   ;;  %s371_s3 = inlined_call_operand.vmem [shape: bf16[16,128], index: 3, kind: output, shape index: {}]  }
   0x1   :  { %v269_v0 = vld [vmem:[%s368_s1 + $0x40] sm:$0xff]   ;;  %v271_v2 = vld [vmem:[%s368_s1 + $0x48] sm:$0xff]   ;;  %v273_v4 = vld [vmem:[%s368_s1 + $0x50] sm:$0xff]  }
   0x2   :  { %v270_v1 = vld [vmem:[%s368_s1] sm:$0xff]   ;;  %247 = vmatprep.subr.bf16.mxu0 %v269_v0  ;;  %v272_v3 = vld [vmem:[%s368_s1 + $0x8] sm:$0xff]   ;;  %v274_v5 = vld [vmem:[%s368_s1 + $0x10] sm:$0xff]  }
   0x3   :  { %248 = vmatpush3.bf16.msra.mxu0 %v270_v1  ;;  %v275_v6 = vld [vmem:[%s368_s1 + $0x58] sm:$0xff]   ;;  %v277_v8 = vld [vmem:[%s368_s1 + $0x60] sm:$0xff]   ;;  %v279_v10 = vld [vmem:[%s368_s1 + $0x68] sm:$0xff]  }
   0x4   :  { %249 = vmatprep.subr.bf16.mxu0 %v271_v2  ;;  %v276_v7 = vld [vmem:[%s368_s1 + $0x18] sm:$0xff]   ;;  %v278_v9 = vld [vmem:[%s368_s1 + $0x20] sm:$0xff]   ;;  %v280_v12 = vld [vmem:[%s368_s1 + $0x28] sm:$0xff]  }
   0x5   :  { %v287_v11 = vld [vmem:[%s369_s0 + $0x4] ss:$8 sps:$4 sm:$0xff]   ;;  %v281_v13 = vld [vmem:[%s368_s1 + $0x70] sm:$0xff]   ;;  %v283_v15 = vld [vmem:[%s368_s1 + $0x78] sm:$0xff]  }
   0x6   :  { %194 = vmatprep.mubr.bf16.mxu0 %v287_v11  ;;  %v282_v14 = vld [vmem:[%s368_s1 + $0x30] sm:$0xff]   ;;  %v284_v16 = vld [vmem:[%s368_s1 + $0x38] sm:$0xff]   ;;  %v285_v17 = vld [vmem:[%s369_s0] ss:$8 sps:$4 sm:$0xff]  }
   0x7   :  { %250 = vmatpush3.bf16.msra.mxu0 %v272_v3  ;;  %v219_v19 = vld [vmem:[%s370_s2] ss:$0 sm:$0xff] }
   0x8   :  { %251 = vmatprep.subr.bf16.mxu0 %v273_v4 }
   0xb   :  { %252 = vmatpush3.bf16.msra.mxu0 %v274_v5 }
   0xc   :  { %253 = vmatprep.subr.bf16.mxu0 %v275_v6 }
   0xf   :  { %254 = vmatpush3.bf16.msra.mxu0 %v276_v7 }
  0x10   :  { %255 = vmatprep.subr.bf16.mxu0 %v277_v8 }
  0x13   :  { %256 = vmatpush3.bf16.msra.mxu0 %v278_v9 }
  0x14   :  { %257 = vmatprep.subr.bf16.mxu0 %v279_v10 }
  0x17   :  { %258 = vmatpush3.bf16.msra.mxu0 %v280_v12 }
  0x18   :  { %259 = vmatprep.subr.bf16.mxu0 %v281_v13 }
  0x1b   :  { %260 = vmatpush3.bf16.msra.mxu0 %v282_v14 }
  0x1c   :  { %261 = vmatprep.subr.bf16.mxu0 %v283_v15 }
  0x1f   :  { %262 = vmatpush3.bf16.msra.mxu0 %v284_v16 }
  0x22   :  { %195 = vmatmul.mubr.bf16.vlgmr.msra.gmra.mrb[0].mxu0 %v285_v17 }
  0xf5   :  { %v263_v18 = vpop.f32.mrb[0].mxu0 }
  0xf6   :  { %v264_v20 = vpop.f32.mrb[1].mxu0 }
  0xf7   :  { %v265_v21 = vadd.f32 %v264_v20, %v263_v18  ;;  %v266_v22 = vpop.f32.mrb[2].mxu0 }
  0xf8   :  { %v267_v23 = vpop.f32.mrb[3].mxu0 }
  0xf9   :  { %v197_v24 = vadd.f32 %v265_v21, %v219_v19  ;;  %v268_v25 = vadd.f32 %v267_v23, %v266_v22 }
  0xfb   :  { %v200_v26 = vadd.f32 %v268_v25, %v219_v19  ;;  %v203_v27 = vmax.f32 %v197_v24, 0.0 }
  0xfd   :  { %v204_v28 = vmax.f32 %v200_v26, 0.0 }
  0xff   :  { %v245_v29 = vpack.c.bf16 %v204_v28, %v203_v27 }
 0x101   :  { %246 = vst [vmem:[%s371_s3] sm:$0xff] %v245_v29  }

// kernel: autoencoder_forward.7
= control target key start
LH: loop header
LB: loop body
LE: loop exit
PB: predicated region body
PF: predicated region fallthrough
CT: control target
= control target key end

     0   :  { %s308_s1 = inlined_call_operand.vmem [shape: bf16[128,128], index: 1, kind: input, shape index: {}]   ;;  %s309_s0 = inlined_call_operand.vmem [shape: bf16[32,128], index: 0, kind: input, shape index: {}]   ;;  %s310_s2 = inlined_call_operand.vmem [shape: f32[1,128], index: 2, kind: input, shape index: {}]   ;;  %s311_s3 = inlined_call_operand.vmem [shape: bf16[32,128], index: 3, kind: output, shape index: {}]  }
   0x1   :  { %v239_v0 = vld [vmem:[%s308_s1] sm:$0xff]   ;;  %v240_v1 = vld [vmem:[%s308_s1 + $0x8] sm:$0xff]   ;;  %v241_v2 = vld [vmem:[%s308_s1 + $0x10] sm:$0xff]  }
   0x2   :  { %219 = vmatprep.subr.bf16.mxu0 %v239_v0  ;;  %v242_v3 = vld [vmem:[%s308_s1 + $0x18] sm:$0xff]   ;;  %v247_v4 = vld [vmem:[%s309_s0] sm:$0xff]   ;;  %v244_v6 = vld [vmem:[%s308_s1 + $0x28] sm:$0xff]  }
   0x3   :  { %220 = vmatpush3.bf16.msra.mxu0 %v239_v0  ;;  %235 = vmatprep.mubr.bf16.mxu0 %v247_v4  ;;  %v243_v5 = vld [vmem:[%s308_s1 + $0x20] sm:$0xff]   ;;  %v245_v7 = vld [vmem:[%s308_s1 + $0x30] sm:$0xff]   ;;  %v246_v8 = vld [vmem:[%s308_s1 + $0x38] sm:$0xff]  }
   0x4   :  { %221 = vmatprep.subr.bf16.mxu0 %v240_v1  ;;  %v248_v9 = vld [vmem:[%s309_s0 + $0x8] sm:$0xff]   ;;  %v179_v10 = vld [vmem:[%s310_s2] ss:$0 sm:$0xff] }
   0x7   :  { %222 = vmatpush3.bf16.msra.mxu0 %v240_v1 }
   0x8   :  { %223 = vmatprep.subr.bf16.mxu0 %v241_v2 }
   0xb   :  { %224 = vmatpush3.bf16.msra.mxu0 %v241_v2 }
   0xc   :  { %225 = vmatprep.subr.bf16.mxu0 %v242_v3 }
   0xf   :  { %226 = vmatpush3.bf16.msra.mxu0 %v242_v3 }
  0x10   :  { %227 = vmatprep.subr.bf16.mxu0 %v243_v5 }
  0x13   :  { %228 = vmatpush3.bf16.msra.mxu0 %v243_v5 }
  0x14   :  { %229 = vmatprep.subr.bf16.mxu0 %v244_v6 }
  0x17   :  { %230 = vmatpush3.bf16.msra.mxu0 %v244_v6 }
  0x18   :  { %231 = vmatprep.subr.bf16.mxu0 %v245_v7 }
  0x1b   :  { %232 = vmatpush3.bf16.msra.mxu0 %v245_v7 }
  0x1c   :  { %233 = vmatprep.subr.bf16.mxu0 %v246_v8 }
  0x1f   :  { %234 = vmatpush3.bf16.msra.mxu0 %v246_v8 }
  0x22   :  { %236 = vmatmul.mubr.bf16.vlgmr.msra.gmra.mrb[0].mxu0 %v248_v9 }
  0xf5   :  { %v237_v11 = vpop.f32.mrb[0].mxu0 }
  0xf6   :  { %v145_v12 = vadd.f32 %v237_v11, %v179_v10  ;;  %v136_v13 = vpop.f32.mrb[1].mxu0 }
  0xf7   :  { %v137_v14 = vadd.f32 %v179_v10, %v136_v13  ;;  %v238_v15 = vpop.f32.mrb[2].mxu0 }
  0xf8   :  { %v148_v16 = vadd.f32 %v238_v15, %v179_v10  ;;  %v139_v17 = vpop.f32.mrb[3].mxu0  ;;  %v153_v19 = vmax.f32 %v145_v12, 0.0 }
  0xf9   :  { %v140_v18 = vadd.f32 %v179_v10, %v139_v17  ;;  %v151_v21 = vmax.f32 %v137_v14, 0.0 }
  0xfa   :  { %v154_v20 = vmax.f32 %v148_v16, 0.0 }
  0xfb   :  { %v152_v22 = vmax.f32 %v140_v18, 0.0 }
  0xfc   :  { %v206_v23 = vpack.c.bf16 %v154_v20, %v153_v19 }
  0xfd   :  { %v201_v24 = vpack.c.bf16 %v152_v22, %v151_v21 }
  0xfe   :  { %208 = vst [vmem:[%s311_s3 + $0x8] sm:$0xff] %v206_v23  }
  0xff   :  { %202 = vst [vmem:[%s311_s3] sm:$0xff] %v201_v24  }

// kernel: autoencoder_forward.8
= control target key start
LH: loop header
LB: loop body
LE: loop exit
PB: predicated region body
PF: predicated region fallthrough
CT: control target
= control target key end

     0   :  { %v1705_v0 = vmov 0   ;;  %s2148_s1 = inlined_call_operand.vmem [shape: bf16[512,128], index: 1, kind: input, shape index: {}]   ;;  %s2149_s0 = inlined_call_operand.vmem [shape: bf16[272,512], index: 0, kind: input, shape index: {}]   ;;  %s2150_s2 = inlined_call_operand.vmem [shape: f32[1,128], index: 2, kind: input, shape index: {}]   ;;  %s2151_s3 = inlined_call_operand.vmem [shape: bf16[272,128], index: 3, kind: output, shape index: {}]  }
   0x1   :  { %686 = vmatprep.subr.bf16.mxu1 %v1705_v0  ;;  %855 = vmatprep.subr.bf16.mxu0 %v1705_v0  ;;  %v1571_v1 = vld [vmem:[%s2148_s1] sm:$0xff]   ;;  %v1573_v3 = vld [vmem:[%s2148_s1 + $0x8] sm:$0xff]   ;;  %v1575_v5 = vld [vmem:[%s2148_s1 + $0x10] sm:$0xff]  }
   0x2   :  { %v1572_v2 = vld [vmem:[%s2148_s1 + $0x80] sm:$0xff]   ;;  %687 = vmatpush1.bf16.msra.mxu1 %v1571_v1  ;;  %v1574_v4 = vld [vmem:[%s2148_s1 + $0x88] sm:$0xff]   ;;  %v1576_v6 = vld [vmem:[%s2148_s1 + $0x90] sm:$0xff]  }
   0x3   :  { %856 = vmatpush1.bf16.msra.mxu0 %v1572_v2  ;;  %688 = vmatprep.subr.bf16.mxu1 %v1705_v0  ;;  %v1577_v7 = vld [vmem:[%s2148_s1 + $0x18] sm:$0xff]   ;;  %v1579_v9 = vld [vmem:[%s2148_s1 + $0x20] sm:$0xff]   ;;  %v1581_v11 = vld [vmem:[%s2148_s1 + $0x28] sm:$0xff]  }
   0x4   :  { %857 = vmatprep.subr.bf16.mxu0 %v1705_v0  ;;  %v1578_v8 = vld [vmem:[%s2148_s1 + $0x98] sm:$0xff]   ;;  %v1580_v10 = vld [vmem:[%s2148_s1 + $0xa0] sm:$0xff]   ;;  %v1582_v12 = vld [vmem:[%s2148_s1 + $0xa8] sm:$0xff]  }
   0x5   :  { %v1583_v13 = vld [vmem:[%s2148_s1 + $0x30] sm:$0xff]   ;;  %v1585_v15 = vld [vmem:[%s2148_s1 + $0x38] sm:$0xff]   ;;  %v1587_v17 = vld [vmem:[%s2148_s1 + $0x40] sm:$0xff]  }
   0x6   :  { %689 = vmatpush1.bf16.msra.mxu1 %v1573_v3  ;;  %v1584_v14 = vld [vmem:[%s2148_s1 + $0xb0] sm:$0xff]   ;;  %v1586_v16 = vld [vmem:[%s2148_s1 + $0xb8] sm:$0xff]   ;;  %v1588_v18 = vld [vmem:[%s2148_s1 + $0xc0] sm:$0xff]  }
   0x7   :  { %858 = vmatpush1.bf16.msra.mxu0 %v1574_v4  ;;  %690 = vmatprep.subr.bf16.mxu1 %v1705_v0  ;;  %v1605_v19 = vld [vmem:[%s2149_s0 + $0x4] ss:$16 sps:$4 sm:$0xff]   ;;  %v1589_v20 = vld [vmem:[%s2148_s1 + $0x48] sm:$0xff]   ;;  %v1593_v25 = vld [vmem:[%s2148_s1 + $0x58] sm:$0xff]  }
   0x8   :  { %859 = vmatprep.subr.bf16.mxu0 %v1705_v0  ;;  %v1608_v21 = vld [vmem:[%s2149_s0 + $0xc] ss:$16 sps:$4 sm:$0xff]   ;;  %718 = vmatprep.mubr.bf16.mxu1 %v1605_v19  ;;  %v1591_v23 = vld [vmem:[%s2148_s1 + $0x50] sm:$0xff]   ;;  %v1595_v27 = vld [vmem:[%s2148_s1 + $0x60] sm:$0xff]  }
   0x9   :  { %v1590_v22 = vld [vmem:[%s2148_s1 + $0xc8] sm:$0xff]   ;;  %887 = vmatprep.mubr.bf16.mxu0 %v1608_v21  ;;  %v1592_v24 = vld [vmem:[%s2148_s1 + $0xd0] sm:$0xff]   ;;  %v1594_v26 = vld [vmem:[%s2148_s1 + $0xd8] sm:$0xff]  }
   0xa   :  { %691 = vmatpush1.bf16.msra.mxu1 %v1575_v5  ;;  %v1596_v28 = vld [vmem:[%s2148_s1 + $0xe0] sm:$0xff]   ;;  %v1597_v29 = vld [vmem:[%s2148_s1 + $0x68] sm:$0xff]   ;;  %v1599_v31 = vld [vmem:[%s2148_s1 + $0x70] sm:$0xff]  }
   0xb   :  { %860 = vmatpush1.bf16.msra.mxu0 %v1576_v6  ;;  %692 = vmatprep.subr.bf16.mxu1 %v1705_v0  ;;  %v1598_v30 = vld [vmem:[%s2148_s1 + $0xe8] sm:$0xff]   ;;  %v1600_v32 = vld [vmem:[%s2148_s1 + $0xf0] sm:$0xff]   ;;  %v1601_v33 = vld [vmem:[%s2148_s1 + $0x78] sm:$0xff]  }
   0xc   :  { %861 = vmatprep.subr.bf16.mxu0 %v1705_v0  ;;  %v1602_v34 = vld [vmem:[%s2148_s1 + $0xf8] sm:$0xff]   ;;  %v1603_v35 = vld [vmem:[%s2149_s0] ss:$16 sps:$4 sm:$0xff]   ;;  %v1609_v37 = vld [vmem:[%s2149_s0 + $0x24] ss:$16 sps:$4 sm:$0xff]  }
   0xd   :  { %v1606_v36 = vld [vmem:[%s2149_s0 + $0x8] ss:$16 sps:$4 sm:$0xff]   ;;  %v1611_v38 = vld [vmem:[%s2149_s0 + $0x2c] ss:$16 sps:$4 sm:$0xff]   ;;  %v1613_v39 = vld [vmem:[%s2149_s0 + $0x20] ss:$16 sps:$4 sm:$0xff]  }
   0xe   :  { %693 = vmatpush1.bf16.msra.mxu1 %v1577_v7  ;;  %v1614_v40 = vld [vmem:[%s2149_s0 + $0x28] ss:$16 sps:$4 sm:$0xff]   ;;  %v1615_v41 = vld [vmem:[%s2149_s0 + $0x44] ss:$16 sps:$4 sm:$0xff]   ;;  %v1617_v42 = vld [vmem:[%s2149_s0 + $0x4c] ss:$16 sps:$4 sm:$0xff]  }
   0xf   :  { %862 = vmatpush1.bf16.msra.mxu0 %v1578_v8  ;;  %694 = vmatprep.subr.bf16.mxu1 %v1705_v0  ;;  %v1619_v43 = vld [vmem:[%s2149_s0 + $0x40] ss:$16 sps:$4 sm:$0xff]   ;;  %v1620_v44 = vld [vmem:[%s2149_s0 + $0x48] ss:$16 sps:$4 sm:$0xff]   ;;  %v1621_v45 = vld [vmem:[%s2149_s0 + $0x64] ss:$16 sps:$4 sm:$0xff]  }
  0x10   :  { %863 = vmatprep.subr.bf16.mxu0 %v1705_v0  ;;  %v1623_v46 = vld [vmem:[%s2149_s0 + $0x6c] ss:$16 sps:$4 sm:$0xff]   ;;  %v1625_v47 = vld [vmem:[%s2149_s0 + $0x60] ss:$16 sps:$4 sm:$0xff]   ;;  %v1626_v48 = vld [vmem:[%s2149_s0 + $0x68] ss:$16 sps:$4 sm:$0xff]  }
  0x11   :  { %v1627_v49 = vld [vmem:[%s2149_s0 + $0x84] ss:$16 sps:$4 sm:$0xff]   ;;  %v1629_v50 = vld [vmem:[%s2149_s0 + $0x8c] ss:$16 sps:$4 sm:$0xff]   ;;  %v1631_v51 = vld [vmem:[%s2149_s0 + $0x80] ss:$16 sps:$4 sm:$0xff]  }
  0x12   :  { %695 = vmatpush1.bf16.msra.mxu1 %v1579_v9  ;;  %v1632_v52 = vld [vmem:[%s2149_s0 + $0x88] ss:$16 sps:$4 sm:$0xff]   ;;  %v1633_v53 = vld [vmem:[%s2149_s0 + $0xa4] ss:$16 sps:$4 sm:$0xff]   ;;  %v1635_v54 = vld [vmem:[%s2149_s0 + $0xac] ss:$16 sps:$4 sm:$0xff]  }
  0x13   :  { %864 = vmatpush1.bf16.msra.mxu0 %v1580_v10  ;;  %696 = vmatprep.subr.bf16.mxu1 %v1705_v0  ;;  %v1637_v55 = vld [vmem:[%s2149_s0 + $0xa0] ss:$16 sps:$4 sm:$0xff]   ;;  %v1638_v56 = vld [vmem:[%s2149_s0 + $0xa8] ss:$16 sps:$4 sm:$0xff]   ;;  %v1639_v57 = vld [vmem:[%s2149_s0 + $0xc4] ss:$16 sps:$4 sm:$0xff]  }
  0x14   :  { %865 = vmatprep.subr.bf16.mxu0 %v1705_v0  ;;  %v1641_v58 = vld [vmem:[%s2149_s0 + $0xcc] ss:$16 sps:$4 sm:$0xff]   ;;  %v1643_v59 = vld [vmem:[%s2149_s0 + $0xc0] ss:$16 sps:$4 sm:$0xff]   ;;  %v1644_v60 = vld [vmem:[%s2149_s0 + $0xc8] ss:$16 sps:$4 sm:$0xff]  }
  0x15   :  { %v1645_v61 = vld [vmem:[%s2149_s0 + $0xe4] ss:$16 sps:$4 sm:$0xff]   ;;  %v1647_v62 = vld [vmem:[%s2149_s0 + $0xec] ss:$16 sps:$4 sm:$0xff]   ;;  %v1649_v63 = vld [vmem:[%s2149_s0 + $0xe0] ss:$16 sps:$4 sm:$0xff]  }
  0x16   :  { %697 = vmatpush1.bf16.msra.mxu1 %v1581_v11  ;;  %v1651_v1 = vld [vmem:[%s2149_s0 + $0x104] ss:$16 sps:$4 sm:$0xff]   ;;  %v1653_v2 = vld [vmem:[%s2149_s0 + $0x10c] ss:$16 sps:$4 sm:$0xff]   ;;  %v1655_v3 = vld [vmem:[%s2149_s0 + $0x100] ss:$16 sps:$4 sm:$0xff]  }
  0x17   :  { %866 = vmatpush1.bf16.msra.mxu0 %v1582_v12  ;;  %698 = vmatprep.subr.bf16.mxu1 %v1705_v0  ;;  %v1656_v4 = vld [vmem:[%s2149_s0 + $0x108] ss:$16 sps:$4 sm:$0xff]   ;;  %v1657_v5 = vld [vmem:[%s2149_s0 + $0x124] ss:$16 sps:$4 sm:$0xff]   ;;  %v1659_v6 = vld [vmem:[%s2149_s0 + $0x12c] ss:$16 sps:$4 sm:$0xff]  }
  0x18   :  { %867 = vmatprep.subr.bf16.mxu0 %v1705_v0  ;;  %v1661_v7 = vld [vmem:[%s2149_s0 + $0x120] ss:$16 sps:$4 sm:$0xff]   ;;  %v1662_v8 = vld [vmem:[%s2149_s0 + $0x128] ss:$16 sps:$4 sm:$0xff]   ;;  %v1663_v9 = vld [vmem:[%s2149_s0 + $0x144] ss:$16 sps:$4 sm:$0xff]  }
  0x19   :  { %v1665_v10 = vld [vmem:[%s2149_s0 + $0x14c] ss:$16 sps:$4 sm:$0xff]   ;;  %v1667_v11 = vld [vmem:[%s2149_s0 + $0x140] ss:$16 sps:$4 sm:$0xff]   ;;  %v1668_v12 = vld [vmem:[%s2149_s0 + $0x148] ss:$16 sps:$4 sm:$0xff]  }
  0x1a   :  { %699 = vmatpush1.bf16.msra.mxu1 %v1583_v13  ;;  %v1669_v13 = vld [vmem:[%s2149_s0 + $0x164] ss:$16 sps:$4 sm:$0xff]   ;;  %v1679_v19 = vld [vmem:[%s2149_s0 + $0x180] ss:$16 sps:$4 sm:$0xff]  }
  0x1b   :  { %868 = vmatpush1.bf16.msra.mxu0 %v1584_v14  ;;  %700 = vmatprep.subr.bf16.mxu1 %v1705_v0  ;;  %v1671_v14 = vld [vmem:[%s2149_s0 + $0x16c] ss:$16 sps:$4 sm:$0xff]   ;;  %v1681_v21 = vld [vmem:[%s2149_s0 + $0x1a4] ss:$16 sps:$4 sm:$0xff]  }
  0x1c   :  { %869 = vmatprep.subr.bf16.mxu0 %v1705_v0 }
  0x1e   :  { %701 = vmatpush1.bf16.msra.mxu1 %v1585_v15  ;;  %v1673_v15 = vld [vmem:[%s2149_s0 + $0x160] ss:$16 sps:$4 sm:$0xff]  }
  0x1f   :  { %870 = vmatpush1.bf16.msra.mxu0 %v1586_v16  ;;  %702 = vmatprep.subr.bf16.mxu1 %v1705_v0  ;;  %v1674_v16 = vld [vmem:[%s2149_s0 + $0x168] ss:$16 sps:$4 sm:$0xff]  }
  0x20   :  { %871 = vmatprep.subr.bf16.mxu0 %v1705_v0 }
  0x22   :  { %703 = vmatpush1.bf16.msra.mxu1 %v1587_v17  ;;  %v1675_v17 = vld [vmem:[%s2149_s0 + $0x184] ss:$16 sps:$4 sm:$0xff]  }
  0x23   :  { %872 = vmatpush1.bf16.msra.mxu0 %v1588_v18  ;;  %704 = vmatprep.subr.bf16.mxu1 %v1705_v0  ;;  %v1677_v18 = vld [vmem:[%s2149_s0 + $0x18c] ss:$16 sps:$4 sm:$0xff]  }
  0x24   :  { %873 = vmatprep.subr.bf16.mxu0 %v1705_v0 }
  0x26   :  { %705 = vmatpush1.bf16.msra.mxu1 %v1589_v20  ;;  %v1680_v20 = vld [vmem:[%s2149_s0 + $0x188] ss:$16 sps:$4 sm:$0xff]  }
  0x27   :  { %874 = vmatpush1.bf16.msra.mxu0 %v1590_v22  ;;  %706 = vmatprep.subr.bf16.mxu1 %v1705_v0  ;;  %v1683_v22 = vld [vmem:[%s2149_s0 + $0x1ac] ss:$16 sps:$4 sm:$0xff]  }
  0x28   :  { %875 = vmatprep.subr.bf16.mxu0 %v1705_v0 }
  0x2a   :  { %707 = vmatpush1.bf16.msra.mxu1 %v1591_v23  ;;  %v1685_v23 = vld [vmem:[%s2149_s0 + $0x1a0] ss:$16 sps:$4 sm:$0xff]  }
  0x2b   :  { %876 = vmatpush1.bf16.msra.mxu0 %v1592_v24  ;;  %708 = vmatprep.subr.bf16.mxu1 %v1705_v0  ;;  %v1686_v24 = vld [vmem:[%s2149_s0 + $0x1a8] ss:$16 sps:$4 sm:$0xff]  }
  0x2c   :  { %877 = vmatprep.subr.bf16.mxu0 %v1705_v0 }
  0x2e   :  { %709 = vmatpush1.bf16.msra.mxu1 %v1593_v25  ;;  %v1687_v25 = vld [vmem:[%s2149_s0 + $0x1c4] ss:$16 sps:$4 sm:$0xff]  }
  0x2f   :  { %878 = vmatpush1.bf16.msra.mxu0 %v1594_v26  ;;  %710 = vmatprep.subr.bf16.mxu1 %v1705_v0  ;;  %v1689_v26 = vld [vmem:[%s2149_s0 + $0x1cc] ss:$16 sps:$4 sm:$0xff]  }
  0x30   :  { %879 = vmatprep.subr.bf16.mxu0 %v1705_v0 }
  0x32   :  { %711 = vmatpush1.bf16.msra.mxu1 %v1595_v27  ;;  %v1691_v27 = vld [vmem:[%s2149_s0 + $0x1c0] ss:$16 sps:$4 sm:$0xff]  }
  0x33   :  { %880 = vmatpush1.bf16.msra.mxu0 %v1596_v28  ;;  %712 = vmatprep.subr.bf16.mxu1 %v1705_v0  ;;  %v1692_v28 = vld [vmem:[%s2149_s0 + $0x1c8] ss:$16 sps:$4 sm:$0xff]  }
  0x34   :  { %881 = vmatprep.subr.bf16.mxu0 %v1705_v0 }
  0x36   :  { %713 = vmatpush1.bf16.msra.mxu1 %v1597_v29  ;;  %v1693_v29 = vld [vmem:[%s2149_s0 + $0x1e4] ss:$16 sps:$4 sm:$0xff]  }
  0x37   :  { %882 = vmatpush1.bf16.msra.mxu0 %v1598_v30  ;;  %714 = vmatprep.subr.bf16.mxu1 %v1705_v0  ;;  %v1695_v30 = vld [vmem:[%s2149_s0 + $0x1ec] ss:$16 sps:$4 sm:$0xff]  }
  0x38   :  { %883 = vmatprep.subr.bf16.mxu0 %v1705_v0 }
  0x3a   :  { %715 = vmatpush1.bf16.msra.mxu1 %v1599_v31  ;;  %v1697_v31 = vld [vmem:[%s2149_s0 + $0x1e0] ss:$16 sps:$4 sm:$0xff]  }
  0x3b   :  { %884 = vmatpush1.bf16.msra.mxu0 %v1600_v32  ;;  %716 = vmatprep.subr.bf16.mxu1 %v1705_v0  ;;  %v1698_v32 = vld [vmem:[%s2149_s0 + $0x1e8] ss:$16 sps:$4 sm:$0xff]  }
  0x3c   :  { %885 = vmatprep.subr.bf16.mxu0 %v1705_v0  ;;  %v1650_v0 = vld [vmem:[%s2149_s0 + $0xe8] ss:$16 sps:$4 sm:$0xff]  }
  0x3e   :  { %717 = vmatpush1.bf16.msra.mxu1 %v1601_v33  ;;  %v1699_v33 = vld [vmem:[%s2149_s0 + $0x204] ss:$16 sps:$4 sm:$0xff]  }
  0x3f   :  { %886 = vmatpush1.bf16.msra.mxu0 %v1602_v34  ;;  %v1701_v34 = vld [vmem:[%s2149_s0 + $0x20c] ss:$16 sps:$4 sm:$0xff]  }
  0x41   :  { %719 = vmatmul.mubr.bf16.vlgmr.msra.gmra.mrb[0].mxu1 %v1603_v35  ;;  %v1703_v35 = vld [vmem:[%s2149_s0 + $0x200] ss:$16 sps:$4 sm:$0xff]  }
  0x42   :  { %888 = vmatmul.mubr.bf16.vlgmr.msra.gmra.mrb[0].mxu0 %v1606_v36  ;;  %726 = vmatprep.mubr.bf16.mxu1 %v1609_v37  ;;  %v1704_v36 = vld [vmem:[%s2149_s0 + $0x208] ss:$16 sps:$4 sm:$0xff]   ;;  %v2061_v37 = vld [vmem:[%s2150_s2] ss:$0 sm:$0xff] }
  0x43   :  { %895 = vmatprep.mubr.bf16.mxu0 %v1611_v38 }
  0x49   :  { %727 = vmatmul.mubr.bf16.gmra.mrb[4].mxu1 %v1613_v39 }
  0x4a   :  { %896 = vmatmul.mubr.bf16.gmra.mrb[4].mxu0 %v1614_v40  ;;  %734 = vmatprep.mubr.bf16.mxu1 %v1615_v41 }
  0x4b   :  { %903 = vmatprep.mubr.bf16.mxu0 %v1617_v42 }
  0x51   :  { %735 = vmatmul.mubr.bf16.gmra.mrb[8].mxu1 %v1619_v43 }
  0x52   :  { %904 = vmatmul.mubr.bf16.gmra.mrb[8].mxu0 %v1620_v44  ;;  %742 = vmatprep.mubr.bf16.mxu1 %v1621_v45 }
  0x53   :  { %911 = vmatprep.mubr.bf16.mxu0 %v1623_v46 }
  0x59   :  { %743 = vmatmul.mubr.bf16.gmra.mrb[12].mxu1 %v1625_v47 }
  0x5a   :  { %912 = vmatmul.mubr.bf16.gmra.mrb[12].mxu0 %v1626_v48  ;;  %750 = vmatprep.mubr.bf16.mxu1 %v1627_v49 }
  0x5b   :  { %919 = vmatprep.mubr.bf16.mxu0 %v1629_v50 }
  0x61   :  { %751 = vmatmul.mubr.bf16.gmra.mrb[16].mxu1 %v1631_v51 }
  0x62   :  { %920 = vmatmul.mubr.bf16.gmra.mrb[16].mxu0 %v1632_v52  ;;  %758 = vmatprep.mubr.bf16.mxu1 %v1633_v53 }
  0x63   :  { %927 = vmatprep.mubr.bf16.mxu0 %v1635_v54 }
  0x69   :  { %759 = vmatmul.mubr.bf16.gmra.mrb[20].mxu1 %v1637_v55 }
  0x6a   :  { %928 = vmatmul.mubr.bf16.gmra.mrb[20].mxu0 %v1638_v56  ;;  %766 = vmatprep.mubr.bf16.mxu1 %v1639_v57 }
  0x6b   :  { %935 = vmatprep.mubr.bf16.mxu0 %v1641_v58 }
  0x71   :  { %767 = vmatmul.mubr.bf16.gmra.mrb[24].mxu1 %v1643_v59 }
  0x72   :  { %936 = vmatmul.mubr.bf16.gmra.mrb[24].mxu0 %v1644_v60  ;;  %774 = vmatprep.mubr.bf16.mxu1 %v1645_v61 }
  0x73   :  { %943 = vmatprep.mubr.bf16.mxu0 %v1647_v62 }
  0x79   :  { %775 = vmatmul.mubr.bf16.gmra.mrb[28].mxu1 %v1649_v63 }
  0x7a   :  { %944 = vmatmul.mubr.bf16.gmra.mrb[28].mxu0 %v1650_v0  ;;  %782 = vmatprep.mubr.bf16.mxu1 %v1651_v1 }
  0x7b   :  { %951 = vmatprep.mubr.bf16.mxu0 %v1653_v2 }
  0x81   :  { %783 = vmatmul.mubr.bf16.gmra.mrb[32].mxu1 %v1655_v3 }
  0x82   :  { %952 = vmatmul.mubr.bf16.gmra.mrb[32].mxu0 %v1656_v4  ;;  %790 = vmatprep.mubr.bf16.mxu1 %v1657_v5 }
  0x83   :  { %959 = vmatprep.mubr.bf16.mxu0 %v1659_v6 }
  0x89   :  { %791 = vmatmul.mubr.bf16.gmra.mrb[36].mxu1 %v1661_v7 }
  0x8a   :  { %960 = vmatmul.mubr.bf16.gmra.mrb[36].mxu0 %v1662_v8  ;;  %798 = vmatprep.mubr.bf16.mxu1 %v1663_v9 }
  0x8b   :  { %967 = vmatprep.mubr.bf16.mxu0 %v1665_v10 }
  0x91   :  { %799 = vmatmul.mubr.bf16.gmra.mrb[40].mxu1 %v1667_v11 }
  0x92   :  { %968 = vmatmul.mubr.bf16.gmra.mrb[40].mxu0 %v1668_v12  ;;  %806 = vmatprep.mubr.bf16.mxu1 %v1669_v13 }
  0x93   :  { %975 = vmatprep.mubr.bf16.mxu0 %v1671_v14 }
  0x99   :  { %807 = vmatmul.mubr.bf16.gmra.mrb[44].mxu1 %v1673_v15 }
  0x9a   :  { %976 = vmatmul.mubr.bf16.gmra.mrb[44].mxu0 %v1674_v16  ;;  %814 = vmatprep.mubr.bf16.mxu1 %v1675_v17 }
  0x9b   :  { %983 = vmatprep.mubr.bf16.mxu0 %v1677_v18 }
  0xa1   :  { %815 = vmatmul.mubr.bf16.gmra.mrb[48].mxu1 %v1679_v19 }
  0xa2   :  { %984 = vmatmul.mubr.bf16.gmra.mrb[48].mxu0 %v1680_v20  ;;  %822 = vmatprep.mubr.bf16.mxu1 %v1681_v21 }
  0xa3   :  { %991 = vmatprep.mubr.bf16.mxu0 %v1683_v22 }
  0xa9   :  { %823 = vmatmul.mubr.bf16.gmra.mrb[52].mxu1 %v1685_v23 }
  0xaa   :  { %992 = vmatmul.mubr.bf16.gmra.mrb[52].mxu0 %v1686_v24  ;;  %830 = vmatprep.mubr.bf16.mxu1 %v1687_v25 }
  0xab   :  { %999 = vmatprep.mubr.bf16.mxu0 %v1689_v26 }
  0xb1   :  { %831 = vmatmul.mubr.bf16.gmra.mrb[56].mxu1 %v1691_v27 }
  0xb2   :  { %1000 = vmatmul.mubr.bf16.gmra.mrb[56].mxu0 %v1692_v28  ;;  %838 = vmatprep.mubr.bf16.mxu1 %v1693_v29 }
  0xb3   :  { %1007 = vmatprep.mubr.bf16.mxu0 %v1695_v30 }
  0xb9   :  { %839 = vmatmul.mubr.bf16.gmra.mrb[60].mxu1 %v1697_v31 }
  0xba   :  { %1008 = vmatmul.mubr.bf16.gmra.mrb[60].mxu0 %v1698_v32  ;;  %846 = vmatprep.mubr.bf16.mxu1 %v1699_v33 }
  0xbb   :  { %1015 = vmatprep.mubr.bf16.mxu0 %v1701_v34 }
  0xc1   :  { %847 = vmatmul.mubr.bf16.gmra.mrb[64].mxu1 %v1703_v35 }
  0xc2   :  { %1016 = vmatmul.mubr.bf16.gmra.mrb[64].mxu0 %v1704_v36 }
 0x114   :  { %v720_v38 = vpop.f32.mrb[0].mxu1 }
 0x115   :  { %v721_v39 = vadd.f32 %v2061_v37, %v720_v38  ;;  %v889_v40 = vpop.f32.mrb[0].mxu0  ;;  %v722_v41 = vpop.f32.mrb[1].mxu1 }
 0x116   :  { %v891_v42 = vpop.f32.mrb[1].mxu0  ;;  %v723_v43 = vpop.f32.mrb[2].mxu1 }
 0x117   :  { %v890_v44 = vadd.f32 %v889_v40, %v721_v39  ;;  %v724_v45 = vadd.f32 %v2061_v37, %v723_v43  ;;  %v892_v46 = vpop.f32.mrb[2].mxu0  ;;  %v725_v47 = vpop.f32.mrb[3].mxu1 }
 0x118   :  { %v894_v48 = vpop.f32.mrb[3].mxu0 }
 0x119   :  { %v893_v49 = vadd.f32 %v892_v46, %v724_v45  ;;  %v1024_v50 = vmax.f32 %v890_v44, 0.0 }
 0x11b   :  { %v1025_v51 = vmax.f32 %v893_v49, 0.0 }
 0x11c   :  { %v728_v52 = vpop.f32.mrb[4].mxu1 }
 0x11d   :  { %v1404_v53 = vpack.c.bf16 %v1025_v51, %v1024_v50  ;;  %v729_v54 = vadd.f32 %v2061_v37, %v728_v52  ;;  %v897_v55 = vpop.f32.mrb[4].mxu0  ;;  %v730_v56 = vpop.f32.mrb[5].mxu1 }
 0x11e   :  { %v899_v57 = vpop.f32.mrb[5].mxu0  ;;  %v731_v58 = vpop.f32.mrb[6].mxu1 }
 0x11f   :  { %1405 = vst [vmem:[%s2151_s3] sm:$0xff] %v1404_v53   ;;  %v898_v59 = vadd.f32 %v897_v55, %v729_v54  ;;  %v732_v60 = vadd.f32 %v2061_v37, %v731_v58  ;;  %v900_v61 = vpop.f32.mrb[6].mxu0  ;;  %v733_v62 = vpop.f32.mrb[7].mxu1 }
 0x120   :  { %v902_v63 = vpop.f32.mrb[7].mxu0 }
 0x121   :  { %v901_v0 = vadd.f32 %v900_v61, %v732_v60  ;;  %v1026_v1 = vmax.f32 %v898_v59, 0.0 }
 0x123   :  { %v1027_v2 = vmax.f32 %v901_v0, 0.0 }
 0x124   :  { %v736_v3 = vpop.f32.mrb[8].mxu1 }
 0x125   :  { %v1409_v4 = vpack.c.bf16 %v1027_v2, %v1026_v1  ;;  %v737_v5 = vadd.f32 %v2061_v37, %v736_v3  ;;  %v905_v6 = vpop.f32.mrb[8].mxu0  ;;  %v738_v7 = vpop.f32.mrb[9].mxu1 }
 0x126   :  { %v907_v8 = vpop.f32.mrb[9].mxu0  ;;  %v739_v9 = vpop.f32.mrb[10].mxu1 }
 0x127   :  { %1486 = vst [vmem:[%s2151_s3 + $0x8] sm:$0xff] %v1409_v4   ;;  %v906_v10 = vadd.f32 %v905_v6, %v737_v5  ;;  %v740_v11 = vadd.f32 %v2061_v37, %v739_v9  ;;  %v908_v12 = vpop.f32.mrb[10].mxu0  ;;  %v741_v13 = vpop.f32.mrb[11].mxu1 }
 0x128   :  { %v910_v14 = vpop.f32.mrb[11].mxu0 }
 0x129   :  { %v909_v15 = vadd.f32 %v908_v12, %v740_v11  ;;  %v1028_v16 = vmax.f32 %v906_v10, 0.0 }
 0x12b   :  { %v1029_v17 = vmax.f32 %v909_v15, 0.0 }
 0x12c   :  { %v744_v18 = vpop.f32.mrb[12].mxu1 }
 0x12d   :  { %v1414_v19 = vpack.c.bf16 %v1029_v17, %v1028_v16  ;;  %v745_v20 = vadd.f32 %v2061_v37, %v744_v18  ;;  %v913_v21 = vpop.f32.mrb[12].mxu0  ;;  %v746_v22 = vpop.f32.mrb[13].mxu1 }
 0x12e   :  { %v915_v23 = vpop.f32.mrb[13].mxu0  ;;  %v747_v24 = vpop.f32.mrb[14].mxu1 }
 0x12f   :  { %1487 = vst [vmem:[%s2151_s3 + $0x10] sm:$0xff] %v1414_v19   ;;  %v914_v25 = vadd.f32 %v913_v21, %v745_v20  ;;  %v748_v26 = vadd.f32 %v2061_v37, %v747_v24  ;;  %v916_v27 = vpop.f32.mrb[14].mxu0  ;;  %v749_v28 = vpop.f32.mrb[15].mxu1 }
 0x130   :  { %v918_v29 = vpop.f32.mrb[15].mxu0 }
 0x131   :  { %v917_v30 = vadd.f32 %v916_v27, %v748_v26  ;;  %v1030_v31 = vmax.f32 %v914_v25, 0.0 }
 0x133   :  { %v1031_v32 = vmax.f32 %v917_v30, 0.0 }
 0x134   :  { %v752_v33 = vpop.f32.mrb[16].mxu1 }
 0x135   :  { %v1419_v34 = vpack.c.bf16 %v1031_v32, %v1030_v31  ;;  %v753_v35 = vadd.f32 %v2061_v37, %v752_v33  ;;  %v921_v36 = vpop.f32.mrb[16].mxu0  ;;  %v754_v38 = vpop.f32.mrb[17].mxu1 }
 0x136   :  { %v923_v39 = vpop.f32.mrb[17].mxu0  ;;  %v755_v40 = vpop.f32.mrb[18].mxu1 }
 0x137   :  { %1488 = vst [vmem:[%s2151_s3 + $0x18] sm:$0xff] %v1419_v34   ;;  %v922_v41 = vadd.f32 %v921_v36, %v753_v35  ;;  %v756_v42 = vadd.f32 %v2061_v37, %v755_v40  ;;  %v924_v43 = vpop.f32.mrb[18].mxu0  ;;  %v757_v44 = vpop.f32.mrb[19].mxu1 }
 0x138   :  { %v926_v45 = vpop.f32.mrb[19].mxu0 }
 0x139   :  { %v925_v46 = vadd.f32 %v924_v43, %v756_v42  ;;  %v1032_v47 = vmax.f32 %v922_v41, 0.0 }
 0x13b   :  { %v1033_v48 = vmax.f32 %v925_v46, 0.0 }
 0x13c   :  { %v760_v49 = vpop.f32.mrb[20].mxu1 }
 0x13d   :  { %v1424_v50 = vpack.c.bf16 %v1033_v48, %v1032_v47  ;;  %v761_v51 = vadd.f32 %v2061_v37, %v760_v49  ;;  %v929_v52 = vpop.f32.mrb[20].mxu0  ;;  %v762_v53 = vpop.f32.mrb[21].mxu1 }
 0x13e   :  { %v931_v54 = vpop.f32.mrb[21].mxu0  ;;  %v763_v55 = vpop.f32.mrb[22].mxu1 }
 0x13f   :  { %1489 = vst [vmem:[%s2151_s3 + $0x20] sm:$0xff] %v1424_v50   ;;  %v930_v56 = vadd.f32 %v929_v52, %v761_v51  ;;  %v764_v57 = vadd.f32 %v2061_v37, %v763_v55  ;;  %v932_v58 = vpop.f32.mrb[22].mxu0  ;;  %v765_v59 = vpop.f32.mrb[23].mxu1 }
 0x140   :  { %v934_v60 = vpop.f32.mrb[23].mxu0 }
 0x141   :  { %v933_v61 = vadd.f32 %v932_v58, %v764_v57  ;;  %v1034_v62 = vmax.f32 %v930_v56, 0.0 }
 0x143   :  { %v1035_v63 = vmax.f32 %v933_v61, 0.0 }
 0x144   :  { %v768_v0 = vpop.f32.mrb[24].mxu1 }
 0x145   :  { %v1429_v1 = vpack.c.bf16 %v1035_v63, %v1034_v62  ;;  %v769_v2 = vadd.f32 %v2061_v37, %v768_v0  ;;  %v937_v3 = vpop.f32.mrb[24].mxu0  ;;  %v770_v4 = vpop.f32.mrb[25].mxu1 }
 0x146   :  { %v939_v5 = vpop.f32.mrb[25].mxu0  ;;  %v771_v6 = vpop.f32.mrb[26].mxu1 }
 0x147   :  { %1490 = vst [vmem:[%s2151_s3 + $0x28] sm:$0xff] %v1429_v1   ;;  %v938_v7 = vadd.f32 %v937_v3, %v769_v2  ;;  %v772_v8 = vadd.f32 %v2061_v37, %v771_v6  ;;  %v940_v9 = vpop.f32.mrb[26].mxu0  ;;  %v773_v10 = vpop.f32.mrb[27].mxu1 }
 0x148   :  { %v942_v11 = vpop.f32.mrb[27].mxu0 }
 0x149   :  { %v941_v12 = vadd.f32 %v940_v9, %v772_v8  ;;  %v1036_v13 = vmax.f32 %v938_v7, 0.0 }
 0x14b   :  { %v1037_v14 = vmax.f32 %v941_v12, 0.0 }
 0x14c   :  { %v776_v15 = vpop.f32.mrb[28].mxu1 }
 0x14d   :  { %v1434_v16 = vpack.c.bf16 %v1037_v14, %v1036_v13  ;;  %v777_v17 = vadd.f32 %v2061_v37, %v776_v15  ;;  %v945_v18 = vpop.f32.mrb[28].mxu0  ;;  %v778_v19 = vpop.f32.mrb[29].mxu1 }
 0x14e   :  { %v947_v20 = vpop.f32.mrb[29].mxu0  ;;  %v779_v21 = vpop.f32.mrb[30].mxu1 }
 0x14f   :  { %1491 = vst [vmem:[%s2151_s3 + $0x30] sm:$0xff] %v1434_v16   ;;  %v946_v22 = vadd.f32 %v945_v18, %v777_v17  ;;  %v780_v23 = vadd.f32 %v2061_v37, %v779_v21  ;;  %v948_v24 = vpop.f32.mrb[30].mxu0  ;;  %v781_v25 = vpop.f32.mrb[31].mxu1 }
 0x150   :  { %v950_v26 = vpop.f32.mrb[31].mxu0 }
 0x151   :  { %v949_v27 = vadd.f32 %v948_v24, %v780_v23  ;;  %v1038_v28 = vmax.f32 %v946_v22, 0.0 }
 0x153   :  { %v1039_v29 = vmax.f32 %v949_v27, 0.0 }
 0x154   :  { %v784_v30 = vpop.f32.mrb[32].mxu1 }
 0x155   :  { %v1439_v31 = vpack.c.bf16 %v1039_v29, %v1038_v28  ;;  %v785_v32 = vadd.f32 %v2061_v37, %v784_v30  ;;  %v953_v33 = vpop.f32.mrb[32].mxu0  ;;  %v786_v34 = vpop.f32.mrb[33].mxu1 }
 0x156   :  { %v955_v35 = vpop.f32.mrb[33].mxu0  ;;  %v787_v36 = vpop.f32.mrb[34].mxu1 }
 0x157   :  { %1492 = vst [vmem:[%s2151_s3 + $0x38] sm:$0xff] %v1439_v31   ;;  %v954_v38 = vadd.f32 %v953_v33, %v785_v32  ;;  %v788_v39 = vadd.f32 %v2061_v37, %v787_v36  ;;  %v956_v40 = vpop.f32.mrb[34].mxu0  ;;  %v789_v41 = vpop.f32.mrb[35].mxu1 }
 0x158   :  { %v958_v42 = vpop.f32.mrb[35].mxu0 }
 0x159   :  { %v957_v43 = vadd.f32 %v956_v40, %v788_v39  ;;  %v1040_v44 = vmax.f32 %v954_v38, 0.0 }
 0x15b   :  { %v1041_v45 = vmax.f32 %v957_v43, 0.0 }
 0x15c   :  { %v792_v46 = vpop.f32.mrb[36].mxu1 }
 0x15d   :  { %v1444_v47 = vpack.c.bf16 %v1041_v45, %v1040_v44  ;;  %v793_v48 = vadd.f32 %v2061_v37, %v792_v46  ;;  %v961_v49 = vpop.f32.mrb[36].mxu0  ;;  %v794_v50 = vpop.f32.mrb[37].mxu1 }
 0x15e   :  { %v963_v51 = vpop.f32.mrb[37].mxu0  ;;  %v795_v52 = vpop.f32.mrb[38].mxu1 }
 0x15f   :  { %1493 = vst [vmem:[%s2151_s3 + $0x40] sm:$0xff] %v1444_v47   ;;  %v962_v53 = vadd.f32 %v961_v49, %v793_v48  ;;  %v796_v54 = vadd.f32 %v2061_v37, %v795_v52  ;;  %v964_v55 = vpop.f32.mrb[38].mxu0  ;;  %v797_v56 = vpop.f32.mrb[39].mxu1 }
 0x160   :  { %v966_v57 = vpop.f32.mrb[39].mxu0 }
 0x161   :  { %v965_v58 = vadd.f32 %v964_v55, %v796_v54  ;;  %v1042_v59 = vmax.f32 %v962_v53, 0.0 }
 0x163   :  { %v1043_v60 = vmax.f32 %v965_v58, 0.0 }
 0x164   :  { %v800_v61 = vpop.f32.mrb[40].mxu1 }
 0x165   :  { %v1449_v62 = vpack.c.bf16 %v1043_v60, %v1042_v59  ;;  %v801_v63 = vadd.f32 %v2061_v37, %v800_v61  ;;  %v969_v0 = vpop.f32.mrb[40].mxu0  ;;  %v802_v1 = vpop.f32.mrb[41].mxu1 }
 0x166   :  { %v971_v2 = vpop.f32.mrb[41].mxu0  ;;  %v803_v3 = vpop.f32.mrb[42].mxu1 }
 0x167   :  { %1494 = vst [vmem:[%s2151_s3 + $0x48] sm:$0xff] %v1449_v62   ;;  %v970_v4 = vadd.f32 %v969_v0, %v801_v63  ;;  %v804_v5 = vadd.f32 %v2061_v37, %v803_v3  ;;  %v972_v6 = vpop.f32.mrb[42].mxu0  ;;  %v805_v7 = vpop.f32.mrb[43].mxu1 }
 0x168   :  { %v974_v8 = vpop.f32.mrb[43].mxu0 }
 0x169   :  { %v973_v9 = vadd.f32 %v972_v6, %v804_v5  ;;  %v1044_v10 = vmax.f32 %v970_v4, 0.0 }
 0x16b   :  { %v1045_v11 = vmax.f32 %v973_v9, 0.0 }
 0x16c   :  { %v808_v12 = vpop.f32.mrb[44].mxu1 }
 0x16d   :  { %v1454_v13 = vpack.c.bf16 %v1045_v11, %v1044_v10  ;;  %v809_v14 = vadd.f32 %v2061_v37, %v808_v12  ;;  %v977_v15 = vpop.f32.mrb[44].mxu0  ;;  %v810_v16 = vpop.f32.mrb[45].mxu1 }
 0x16e   :  { %v979_v17 = vpop.f32.mrb[45].mxu0  ;;  %v811_v18 = vpop.f32.mrb[46].mxu1 }
 0x16f   :  { %1495 = vst [vmem:[%s2151_s3 + $0x50] sm:$0xff] %v1454_v13   ;;  %v978_v19 = vadd.f32 %v977_v15, %v809_v14  ;;  %v812_v20 = vadd.f32 %v2061_v37, %v811_v18  ;;  %v980_v21 = vpop.f32.mrb[46].mxu0  ;;  %v813_v22 = vpop.f32.mrb[47].mxu1 }
 0x170   :  { %v982_v23 = vpop.f32.mrb[47].mxu0 }
 0x171   :  { %v981_v24 = vadd.f32 %v980_v21, %v812_v20  ;;  %v1046_v25 = vmax.f32 %v978_v19, 0.0 }
 0x173   :  { %v1047_v26 = vmax.f32 %v981_v24, 0.0 }
 0x174   :  { %v816_v27 = vpop.f32.mrb[48].mxu1 }
 0x175   :  { %v1459_v28 = vpack.c.bf16 %v1047_v26, %v1046_v25  ;;  %v817_v29 = vadd.f32 %v2061_v37, %v816_v27  ;;  %v985_v30 = vpop.f32.mrb[48].mxu0  ;;  %v818_v31 = vpop.f32.mrb[49].mxu1 }
 0x176   :  { %v987_v32 = vpop.f32.mrb[49].mxu0  ;;  %v819_v33 = vpop.f32.mrb[50].mxu1 }
 0x177   :  { %1496 = vst [vmem:[%s2151_s3 + $0x58] sm:$0xff] %v1459_v28   ;;  %v986_v34 = vadd.f32 %v985_v30, %v817_v29  ;;  %v820_v35 = vadd.f32 %v2061_v37, %v819_v33  ;;  %v988_v36 = vpop.f32.mrb[50].mxu0  ;;  %v821_v38 = vpop.f32.mrb[51].mxu1 }
 0x178   :  { %v990_v39 = vpop.f32.mrb[51].mxu0 }
 0x179   :  { %v989_v40 = vadd.f32 %v988_v36, %v820_v35  ;;  %v1048_v41 = vmax.f32 %v986_v34, 0.0 }
 0x17b   :  { %v1049_v42 = vmax.f32 %v989_v40, 0.0 }
 0x17c   :  { %v824_v43 = vpop.f32.mrb[52].mxu1 }
 0x17d   :  { %v1464_v44 = vpack.c.bf16 %v1049_v42, %v1048_v41  ;;  %v825_v45 = vadd.f32 %v2061_v37, %v824_v43  ;;  %v993_v46 = vpop.f32.mrb[52].mxu0  ;;  %v826_v47 = vpop.f32.mrb[53].mxu1 }
 0x17e   :  { %v995_v48 = vpop.f32.mrb[53].mxu0  ;;  %v827_v49 = vpop.f32.mrb[54].mxu1 }
 0x17f   :  { %1497 = vst [vmem:[%s2151_s3 + $0x60] sm:$0xff] %v1464_v44   ;;  %v994_v50 = vadd.f32 %v993_v46, %v825_v45  ;;  %v828_v51 = vadd.f32 %v2061_v37, %v827_v49  ;;  %v996_v52 = vpop.f32.mrb[54].mxu0  ;;  %v829_v53 = vpop.f32.mrb[55].mxu1 }
 0x180   :  { %v998_v54 = vpop.f32.mrb[55].mxu0 }
 0x181   :  { %v997_v55 = vadd.f32 %v996_v52, %v828_v51  ;;  %v1050_v56 = vmax.f32 %v994_v50, 0.0 }
 0x183   :  { %v1051_v57 = vmax.f32 %v997_v55, 0.0 }
 0x184   :  { %v832_v58 = vpop.f32.mrb[56].mxu1 }
 0x185   :  { %v1469_v59 = vpack.c.bf16 %v1051_v57, %v1050_v56  ;;  %v833_v60 = vadd.f32 %v2061_v37, %v832_v58  ;;  %v1001_v61 = vpop.f32.mrb[56].mxu0  ;;  %v834_v62 = vpop.f32.mrb[57].mxu1 }
 0x186   :  { %v1003_v63 = vpop.f32.mrb[57].mxu0  ;;  %v835_v0 = vpop.f32.mrb[58].mxu1 }
 0x187   :  { %1498 = vst [vmem:[%s2151_s3 + $0x68] sm:$0xff] %v1469_v59   ;;  %v1002_v1 = vadd.f32 %v1001_v61, %v833_v60  ;;  %v836_v2 = vadd.f32 %v2061_v37, %v835_v0  ;;  %v1004_v3 = vpop.f32.mrb[58].mxu0  ;;  %v837_v4 = vpop.f32.mrb[59].mxu1 }
 0x188   :  { %v1006_v5 = vpop.f32.mrb[59].mxu0 }
 0x189   :  { %v1005_v6 = vadd.f32 %v1004_v3, %v836_v2  ;;  %v1052_v7 = vmax.f32 %v1002_v1, 0.0 }
 0x18b   :  { %v1053_v8 = vmax.f32 %v1005_v6, 0.0 }
 0x18c   :  { %v840_v9 = vpop.f32.mrb[60].mxu1 }
 0x18d   :  { %v1474_v10 = vpack.c.bf16 %v1053_v8, %v1052_v7  ;;  %v841_v11 = vadd.f32 %v2061_v37, %v840_v9  ;;  %v1009_v12 = vpop.f32.mrb[60].mxu0  ;;  %v842_v13 = vpop.f32.mrb[61].mxu1 }
 0x18e   :  { %v1011_v14 = vpop.f32.mrb[61].mxu0  ;;  %v843_v15 = vpop.f32.mrb[62].mxu1 }
 0x18f   :  { %1499 = vst [vmem:[%s2151_s3 + $0x70] sm:$0xff] %v1474_v10   ;;  %v1010_v16 = vadd.f32 %v1009_v12, %v841_v11  ;;  %v844_v17 = vadd.f32 %v2061_v37, %v843_v15  ;;  %v1012_v18 = vpop.f32.mrb[62].mxu0  ;;  %v845_v19 = vpop.f32.mrb[63].mxu1 }
 0x190   :  { %v1014_v20 = vpop.f32.mrb[63].mxu0 }
 0x191   :  { %v1013_v21 = vadd.f32 %v1012_v18, %v844_v17  ;;  %v1054_v22 = vmax.f32 %v1010_v16, 0.0 }
 0x193   :  { %v1055_v23 = vmax.f32 %v1013_v21, 0.0 }
 0x194   :  { %v848_v24 = vpop.f32.mrb[64].mxu1 }
 0x195   :  { %v1479_v25 = vpack.c.bf16 %v1055_v23, %v1054_v22  ;;  %v849_v26 = vadd.f32 %v2061_v37, %v848_v24  ;;  %v1017_v27 = vpop.f32.mrb[64].mxu0  ;;  %v850_v28 = vpop.f32.mrb[65].mxu1 }
 0x196   :  { %v1019_v29 = vpop.f32.mrb[65].mxu0  ;;  %v851_v30 = vpop.f32.mrb[66].mxu1 }
 0x197   :  { %1500 = vst [vmem:[%s2151_s3 + $0x78] sm:$0xff] %v1479_v25   ;;  %v1018_v31 = vadd.f32 %v1017_v27, %v849_v26  ;;  %v852_v32 = vadd.f32 %v2061_v37, %v851_v30  ;;  %v1020_v33 = vpop.f32.mrb[66].mxu0  ;;  %v853_v34 = vpop.f32.mrb[67].mxu1 }
 0x198   :  { %v1022_v35 = vpop.f32.mrb[67].mxu0 }
 0x199   :  { %v1021_v36 = vadd.f32 %v1020_v33, %v852_v32  ;;  %v1056_v38 = vmax.f32 %v1018_v31, 0.0 }
 0x19b   :  { %v1057_v39 = vmax.f32 %v1021_v36, 0.0 }
 0x19d   :  { %v1484_v40 = vpack.c.bf16 %v1057_v39, %v1056_v38 }
 0x19f   :  { %1501 = vst [vmem:[%s2151_s3 + $0x80] sm:$0xff] %v1484_v40  }

// kernel: autoencoder_forward.9
= control target key start
LH: loop header
LB: loop body
LE: loop exit
PB: predicated region body
PF: predicated region fallthrough
CT: control target
= control target key end

     0   :  { %vm1423_vm0 = vcmask 1046528   ;;  %vm2108_vm1 = vcmask 1045504   ;;  %vm2793_vm2 = vcmask 1044480   ;;  %vm3478_vm3 = vcmask 1043456   ;;  %s22205_s1 = inlined_call_operand.vmem [shape: bf16[9,1024,128], index: 1, kind: input, shape index: {}]   ;;  %s22206_s0 = inlined_call_operand.vmem [shape: bf16[2,16,1024], index: 0, kind: input, shape index: {}]   ;;  %s22207_s2 = inlined_call_operand.vmem [shape: f32[1,128], index: 2, kind: input, shape index: {}]   ;;  %s22208_s3 = inlined_call_operand.vmem [shape: f32[2,8,128], index: 3, kind: output, shape index: {}]  }
   0x1   :  { %v17208_v0 = vld [vmem:[%s22205_s1 + $0x40] sm:$0xff]   ;;  %v17212_v4 = vld [vmem:[%s22205_s1 + $0x48] sm:$0xff]   ;;  %v17216_v8 = vld [vmem:[%s22205_s1 + $0x50] sm:$0xff]   ;;  %vm4163_vm4 = vcmask 1042432   ;;  %vm4848_vm5 = vcmask 1041408   ;;  %vm5533_vm6 = vcmask 1040384  }
   0x2   :  { %v17209_v1 = vld [vmem:[%s22205_s1 + $0xc0] sm:$0xff]   ;;  %15624 = vmatprep.subr.bf16.mxu0 %v17208_v0  ;;  %v17213_v5 = vld [vmem:[%s22205_s1 + $0xc8] sm:$0xff]   ;;  %v17217_v9 = vld [vmem:[%s22205_s1 + $0xd0] sm:$0xff]  }
   0x3   :  { %v17210_v2 = vld [vmem:[%s22205_s1] sm:$0xff]   ;;  %15646 = vmatprep.subr.bf16.mxu1 %v17209_v1  ;;  %v17214_v6 = vld [vmem:[%s22205_s1 + $0x8] sm:$0xff]   ;;  %v17218_v10 = vld [vmem:[%s22205_s1 + $0x10] sm:$0xff]  }
   0x4   :  { %v17211_v3 = vld [vmem:[%s22205_s1 + $0x80] sm:$0xff]   ;;  %15625 = vmatpush3.bf16.msra.mxu0 %v17210_v2  ;;  %v17215_v7 = vld [vmem:[%s22205_s1 + $0x88] sm:$0xff]   ;;  %v17219_v11 = vld [vmem:[%s22205_s1 + $0x90] sm:$0xff]  }
   0x5   :  { %15647 = vmatpush3.bf16.msra.mxu1 %v17211_v3  ;;  %15626 = vmatprep.subr.bf16.mxu0 %v17212_v4  ;;  %v17220_v12 = vld [vmem:[%s22205_s1 + $0x58] sm:$0xff]   ;;  %v17224_v16 = vld [vmem:[%s22205_s1 + $0x60] sm:$0xff]   ;;  %v17228_v20 = vld [vmem:[%s22205_s1 + $0x68] sm:$0xff]  }
   0x6   :  { %15648 = vmatprep.subr.bf16.mxu1 %v17213_v5  ;;  %v17221_v13 = vld [vmem:[%s22205_s1 + $0xd8] sm:$0xff]   ;;  %v17225_v17 = vld [vmem:[%s22205_s1 + $0xe0] sm:$0xff]   ;;  %v17229_v21 = vld [vmem:[%s22205_s1 + $0xe8] sm:$0xff]  }
   0x7   :  { %v17222_v14 = vld [vmem:[%s22205_s1 + $0x18] sm:$0xff]   ;;  %v17226_v18 = vld [vmem:[%s22205_s1 + $0x20] sm:$0xff]   ;;  %v17230_v22 = vld [vmem:[%s22205_s1 + $0x28] sm:$0xff]  }
   0x8   :  { %15627 = vmatpush3.bf16.msra.mxu0 %v17214_v6  ;;  %v17223_v15 = vld [vmem:[%s22205_s1 + $0x98] sm:$0xff]   ;;  %v17227_v19 = vld [vmem:[%s22205_s1 + $0xa0] sm:$0xff]   ;;  %v17231_v23 = vld [vmem:[%s22205_s1 + $0xa8] sm:$0xff]  }
   0x9   :  { %15649 = vmatpush3.bf16.msra.mxu1 %v17215_v7  ;;  %15628 = vmatprep.subr.bf16.mxu0 %v17216_v8  ;;  %v17232_v24 = vld [vmem:[%s22205_s1 + $0x70] sm:$0xff]   ;;  %v17236_v28 = vld [vmem:[%s22205_s1 + $0x78] sm:$0xff]   ;;  %v16_v32 = vld [vmem:[%s22206_s0] sm:$0xff] }
   0xa   :  { %15650 = vmatprep.subr.bf16.mxu1 %v17217_v9  ;;  %v17233_v25 = vld [vmem:[%s22205_s1 + $0xf0] sm:$0xff]   ;;  %v17237_v29 = vld [vmem:[%s22205_s1 + $0xf8] sm:$0xff]   ;;  %v20_v33 = vld [vmem:[%s22206_s0 + $0x20] sm:$0xff] }
   0xb   :  { %v17234_v26 = vld [vmem:[%s22205_s1 + $0x30] sm:$0xff]   ;;  %v17238_v30 = vld [vmem:[%s22205_s1 + $0x38] sm:$0xff]   ;;  %v17_v34 = vld [vmem:[%s22206_s0 + $0x8] sm:$0xff]  ;;  %v18490_v35 = vcombine.high %v16_v32, %v20_v33  ;;  %v18495_v37 = vcombine.low %v16_v32, %v20_v33 }
   0xc   :  { %15629 = vmatpush3.bf16.msra.mxu0 %v17218_v10  ;;  %v17235_v27 = vld [vmem:[%s22205_s1 + $0xb0] sm:$0xff]   ;;  %v17239_v31 = vld [vmem:[%s22205_s1 + $0xb8] sm:$0xff]   ;;  %v21_v36 = vld [vmem:[%s22206_s0 + $0x28] sm:$0xff] }
   0xd   :  { %15651 = vmatpush3.bf16.msra.mxu1 %v17219_v11  ;;  %15630 = vmatprep.subr.bf16.mxu0 %v17220_v12  ;;  %v18497_v38 = vcombine.high %v17_v34, %v21_v36  ;;  %v18499_v39 = vcombine.low %v17_v34, %v21_v36  ;;  %v17240_v40 = vld [vmem:[%s22205_s1 + $0x140] sm:$0xff]   ;;  %v17244_v44 = vld [vmem:[%s22205_s1 + $0x148] sm:$0xff]   ;;  %v17248_v48 = vld [vmem:[%s22205_s1 + $0x150] sm:$0xff]  }
   0xe   :  { %15652 = vmatprep.subr.bf16.mxu1 %v17221_v13  ;;  %615 = vmatprep.mubr.bf16.mxu0 %v18490_v35  ;;  %v17241_v41 = vld [vmem:[%s22205_s1 + $0x1c0] sm:$0xff]   ;;  %v17245_v45 = vld [vmem:[%s22205_s1 + $0x1c8] sm:$0xff]   ;;  %v17249_v49 = vld [vmem:[%s22205_s1 + $0x1d0] sm:$0xff]  }
   0xf   :  { %655 = vmatprep.mubr.bf16.mxu1 %v18497_v38  ;;  %v17242_v42 = vld [vmem:[%s22205_s1 + $0x100] sm:$0xff]   ;;  %v17246_v46 = vld [vmem:[%s22205_s1 + $0x108] sm:$0xff]   ;;  %v17250_v50 = vld [vmem:[%s22205_s1 + $0x110] sm:$0xff]  }
  0x10   :  { %15631 = vmatpush3.bf16.msra.mxu0 %v17222_v14  ;;  %v17243_v43 = vld [vmem:[%s22205_s1 + $0x180] sm:$0xff]   ;;  %v17247_v47 = vld [vmem:[%s22205_s1 + $0x188] sm:$0xff]   ;;  %v17251_v51 = vld [vmem:[%s22205_s1 + $0x190] sm:$0xff]  }
  0x11   :  { %15653 = vmatpush3.bf16.msra.mxu1 %v17223_v15  ;;  %15632 = vmatprep.subr.bf16.mxu0 %v17224_v16  ;;  %v17252_v52 = vld [vmem:[%s22205_s1 + $0x158] sm:$0xff]   ;;  %v17256_v56 = vld [vmem:[%s22205_s1 + $0x160] sm:$0xff]   ;;  %v17260_v60 = vld [vmem:[%s22205_s1 + $0x168] sm:$0xff]  }
  0x12   :  { %15654 = vmatprep.subr.bf16.mxu1 %v17225_v17  ;;  %v17253_v53 = vld [vmem:[%s22205_s1 + $0x1d8] sm:$0xff]   ;;  %v17257_v57 = vld [vmem:[%s22205_s1 + $0x1e0] sm:$0xff]   ;;  %v17261_v61 = vld [vmem:[%s22205_s1 + $0x1e8] sm:$0xff]  }
  0x13   :  { %v17254_v54 = vld [vmem:[%s22205_s1 + $0x118] sm:$0xff]   ;;  %v17258_v58 = vld [vmem:[%s22205_s1 + $0x120] sm:$0xff]   ;;  %v17262_v62 = vld [vmem:[%s22205_s1 + $0x128] sm:$0xff]  }
  0x14   :  { %15633 = vmatpush3.bf16.msra.mxu0 %v17226_v18  ;;  %v17255_v55 = vld [vmem:[%s22205_s1 + $0x198] sm:$0xff]   ;;  %v17259_v59 = vld [vmem:[%s22205_s1 + $0x1a0] sm:$0xff]   ;;  %v17263_v63 = vld [vmem:[%s22205_s1 + $0x1a8] sm:$0xff]  }
  0x15   :  { %15655 = vmatpush3.bf16.msra.mxu1 %v17227_v19  ;;  %15634 = vmatprep.subr.bf16.mxu0 %v17228_v20  ;;  %v17264_v0 = vld [vmem:[%s22205_s1 + $0x170] sm:$0xff]   ;;  %v17268_v4 = vld [vmem:[%s22205_s1 + $0x178] sm:$0xff]   ;;  %v17272_v16 = vld [vmem:[%s22205_s1 + $0x240] sm:$0xff]  }
  0x16   :  { %15656 = vmatprep.subr.bf16.mxu1 %v17229_v21  ;;  %v17265_v1 = vld [vmem:[%s22205_s1 + $0x1f0] sm:$0xff]   ;;  %v17269_v5 = vld [vmem:[%s22205_s1 + $0x1f8] sm:$0xff]   ;;  %v17273_v17 = vld [vmem:[%s22205_s1 + $0x2c0] sm:$0xff]  }
  0x17   :  { %v17266_v2 = vld [vmem:[%s22205_s1 + $0x130] sm:$0xff]   ;;  %v17270_v6 = vld [vmem:[%s22205_s1 + $0x138] sm:$0xff]   ;;  %v17274_v18 = vld [vmem:[%s22205_s1 + $0x200] sm:$0xff]  }
  0x18   :  { %15635 = vmatpush3.bf16.msra.mxu0 %v17230_v22  ;;  %v17267_v3 = vld [vmem:[%s22205_s1 + $0x1b0] sm:$0xff]   ;;  %v17271_v7 = vld [vmem:[%s22205_s1 + $0x1b8] sm:$0xff]   ;;  %v17275_v19 = vld [vmem:[%s22205_s1 + $0x280] sm:$0xff]  }
  0x19   :  { %15657 = vmatpush3.bf16.msra.mxu1 %v17231_v23  ;;  %15636 = vmatprep.subr.bf16.mxu0 %v17232_v24  ;;  %v18_v8 = vld [vmem:[%s22206_s0 + $0x10] sm:$0xff]  ;;  %v19_v11 = vld [vmem:[%s22206_s0 + $0x18] sm:$0xff]  ;;  %v17276_v20 = vld [vmem:[%s22205_s1 + $0x248] sm:$0xff]  }
  0x1a   :  { %15658 = vmatprep.subr.bf16.mxu1 %v17233_v25  ;;  %v22_v9 = vld [vmem:[%s22206_s0 + $0x30] sm:$0xff]  ;;  %v23_v12 = vld [vmem:[%s22206_s0 + $0x38] sm:$0xff]  ;;  %v17277_v21 = vld [vmem:[%s22205_s1 + $0x2c8] sm:$0xff]  }
  0x1b   :  { %v18607_v10 = vcombine.high %v18_v8, %v22_v9  ;;  %v18615_v13 = vcombine.low %v18_v8, %v22_v9  ;;  %v18617_v14 = vcombine.high %v19_v11, %v23_v12  ;;  %v18619_v15 = vcombine.low %v19_v11, %v23_v12  ;;  %v17278_v22 = vld [vmem:[%s22205_s1 + $0x208] sm:$0xff]   ;;  %v17280_v24 = vld [vmem:[%s22205_s1 + $0x250] sm:$0xff]   ;;  %v17288_v32 = vld [vmem:[%s22205_s1 + $0x260] sm:$0xff]  }
  0x1c   :  { %15637 = vmatpush3.bf16.msra.mxu0 %v17234_v26  ;;  %v17279_v23 = vld [vmem:[%s22205_s1 + $0x288] sm:$0xff]   ;;  %v17281_v25 = vld [vmem:[%s22205_s1 + $0x2d0] sm:$0xff]   ;;  %v17289_v33 = vld [vmem:[%s22205_s1 + $0x2e0] sm:$0xff]  }
  0x1d   :  { %15659 = vmatpush3.bf16.msra.mxu1 %v17235_v27  ;;  %15638 = vmatprep.subr.bf16.mxu0 %v17236_v28  ;;  %v17282_v26 = vld [vmem:[%s22205_s1 + $0x210] sm:$0xff]   ;;  %v17284_v28 = vld [vmem:[%s22205_s1 + $0x258] sm:$0xff]   ;;  %v17290_v34 = vld [vmem:[%s22205_s1 + $0x220] sm:$0xff]  }
  0x1e   :  { %15660 = vmatprep.subr.bf16.mxu1 %v17237_v29  ;;  %v17283_v27 = vld [vmem:[%s22205_s1 + $0x290] sm:$0xff]   ;;  %v17285_v29 = vld [vmem:[%s22205_s1 + $0x2d8] sm:$0xff]   ;;  %v17291_v36 = vld [vmem:[%s22205_s1 + $0x2a0] sm:$0xff]  }
  0x1f   :  { %v17324_v8 = vld [vmem:[%s22205_s1 + $0x368] sm:$0xff]  }
  0x20   :  { %15639 = vmatpush3.bf16.msra.mxu0 %v17238_v30  ;;  %v17286_v30 = vld [vmem:[%s22205_s1 + $0x218] sm:$0xff]   ;;  %v17325_v9 = vld [vmem:[%s22205_s1 + $0x3e8] sm:$0xff]  }
  0x21   :  { %15661 = vmatpush3.bf16.msra.mxu1 %v17239_v31  ;;  %15668 = vmatprep.subr.bf16.mxu0 %v17240_v40  ;;  %v17287_v31 = vld [vmem:[%s22205_s1 + $0x298] sm:$0xff]   ;;  %v17292_v40 = vld [vmem:[%s22205_s1 + $0x268] sm:$0xff]  }
  0x22   :  { %15690 = vmatprep.subr.bf16.mxu1 %v17241_v41  ;;  %v17293_v41 = vld [vmem:[%s22205_s1 + $0x2e8] sm:$0xff]  }
  0x23   :  { %616 = vmatmul.mubr.bf16.vlgmr.msra.gmra.mrb[0].mxu0 %v18495_v37  ;;  %v17326_v11 = vld [vmem:[%s22205_s1 + $0x328] sm:$0xff]  }
  0x24   :  { %656 = vmatmul.mubr.bf16.vlgmr.msra.gmra.mrb[0].mxu1 %v18499_v39  ;;  %15669 = vmatpush3.bf16.msra.mxu0 %v17242_v42  ;;  %v17294_v42 = vld [vmem:[%s22205_s1 + $0x228] sm:$0xff]  }
  0x25   :  { %15691 = vmatpush3.bf16.msra.mxu1 %v17243_v43  ;;  %15670 = vmatprep.subr.bf16.mxu0 %v17244_v44  ;;  %v17295_v43 = vld [vmem:[%s22205_s1 + $0x2a8] sm:$0xff]   ;;  %v17296_v44 = vld [vmem:[%s22205_s1 + $0x270] sm:$0xff]  }
  0x26   :  { %15692 = vmatprep.subr.bf16.mxu1 %v17245_v45  ;;  %695 = vmatprep.mubr.bf16.mxu0 %v18607_v10  ;;  %v17297_v45 = vld [vmem:[%s22205_s1 + $0x2f0] sm:$0xff]   ;;  %v17327_v12 = vld [vmem:[%s22205_s1 + $0x3a8] sm:$0xff]  }
  0x27   :  { %735 = vmatprep.mubr.bf16.mxu1 %v18617_v14 }
  0x28   :  { %15671 = vmatpush3.bf16.msra.mxu0 %v17246_v46  ;;  %v17298_v46 = vld [vmem:[%s22205_s1 + $0x230] sm:$0xff]  }
  0x29   :  { %15693 = vmatpush3.bf16.msra.mxu1 %v17247_v47  ;;  %15672 = vmatprep.subr.bf16.mxu0 %v17248_v48  ;;  %v17299_v47 = vld [vmem:[%s22205_s1 + $0x2b0] sm:$0xff]   ;;  %v17300_v48 = vld [vmem:[%s22205_s1 + $0x278] sm:$0xff]  }
  0x2a   :  { %15694 = vmatprep.subr.bf16.mxu1 %v17249_v49  ;;  %v17301_v49 = vld [vmem:[%s22205_s1 + $0x2f8] sm:$0xff]  }
  0x2c   :  { %15673 = vmatpush3.bf16.msra.mxu0 %v17250_v50  ;;  %v17302_v50 = vld [vmem:[%s22205_s1 + $0x238] sm:$0xff]  }
  0x2d   :  { %15695 = vmatpush3.bf16.msra.mxu1 %v17251_v51  ;;  %15674 = vmatprep.subr.bf16.mxu0 %v17252_v52  ;;  %v17303_v51 = vld [vmem:[%s22205_s1 + $0x2b8] sm:$0xff]   ;;  %v17304_v52 = vld [vmem:[%s22205_s1 + $0x340] sm:$0xff]  }
  0x2e   :  { %15696 = vmatprep.subr.bf16.mxu1 %v17253_v53  ;;  %v17305_v53 = vld [vmem:[%s22205_s1 + $0x3c0] sm:$0xff]  }
  0x30   :  { %15675 = vmatpush3.bf16.msra.mxu0 %v17254_v54  ;;  %v17306_v54 = vld [vmem:[%s22205_s1 + $0x300] sm:$0xff]  }
  0x31   :  { %15697 = vmatpush3.bf16.msra.mxu1 %v17255_v55  ;;  %15676 = vmatprep.subr.bf16.mxu0 %v17256_v56  ;;  %v17307_v55 = vld [vmem:[%s22205_s1 + $0x380] sm:$0xff]   ;;  %v17308_v56 = vld [vmem:[%s22205_s1 + $0x348] sm:$0xff]  }
  0x32   :  { %15698 = vmatprep.subr.bf16.mxu1 %v17257_v57  ;;  %v17309_v57 = vld [vmem:[%s22205_s1 + $0x3c8] sm:$0xff]  }
  0x34   :  { %15677 = vmatpush3.bf16.msra.mxu0 %v17258_v58  ;;  %v17310_v58 = vld [vmem:[%s22205_s1 + $0x308] sm:$0xff]  }
  0x35   :  { %15699 = vmatpush3.bf16.msra.mxu1 %v17259_v59  ;;  %15678 = vmatprep.subr.bf16.mxu0 %v17260_v60  ;;  %v17311_v59 = vld [vmem:[%s22205_s1 + $0x388] sm:$0xff]   ;;  %v17312_v60 = vld [vmem:[%s22205_s1 + $0x350] sm:$0xff]  }
  0x36   :  { %15700 = vmatprep.subr.bf16.mxu1 %v17261_v61  ;;  %v17313_v61 = vld [vmem:[%s22205_s1 + $0x3d0] sm:$0xff]  }
  0x38   :  { %15679 = vmatpush3.bf16.msra.mxu0 %v17262_v62  ;;  %v17314_v62 = vld [vmem:[%s22205_s1 + $0x310] sm:$0xff]  }
  0x39   :  { %15701 = vmatpush3.bf16.msra.mxu1 %v17263_v63  ;;  %15680 = vmatprep.subr.bf16.mxu0 %v17264_v0  ;;  %v17315_v63 = vld [vmem:[%s22205_s1 + $0x390] sm:$0xff]   ;;  %v17316_v0 = vld [vmem:[%s22205_s1 + $0x358] sm:$0xff]  }
  0x3a   :  { %15702 = vmatprep.subr.bf16.mxu1 %v17265_v1  ;;  %v17317_v1 = vld [vmem:[%s22205_s1 + $0x3d8] sm:$0xff]  }
  0x3c   :  { %15681 = vmatpush3.bf16.msra.mxu0 %v17266_v2  ;;  %v17318_v2 = vld [vmem:[%s22205_s1 + $0x318] sm:$0xff]  }
  0x3d   :  { %15703 = vmatpush3.bf16.msra.mxu1 %v17267_v3  ;;  %15682 = vmatprep.subr.bf16.mxu0 %v17268_v4  ;;  %v17319_v3 = vld [vmem:[%s22205_s1 + $0x398] sm:$0xff]   ;;  %v17320_v4 = vld [vmem:[%s22205_s1 + $0x360] sm:$0xff]  }
  0x3e   :  { %15704 = vmatprep.subr.bf16.mxu1 %v17269_v5  ;;  %v17321_v5 = vld [vmem:[%s22205_s1 + $0x3e0] sm:$0xff]  }
  0x40   :  { %15683 = vmatpush3.bf16.msra.mxu0 %v17270_v6  ;;  %v17322_v6 = vld [vmem:[%s22205_s1 + $0x320] sm:$0xff]  }
  0x41   :  { %15705 = vmatpush3.bf16.msra.mxu1 %v17271_v7  ;;  %15712 = vmatprep.subr.bf16.mxu0 %v17272_v16  ;;  %v17323_v7 = vld [vmem:[%s22205_s1 + $0x3a0] sm:$0xff]   ;;  %v17328_v16 = vld [vmem:[%s22205_s1 + $0x370] sm:$0xff]  }
  0x42   :  { %15734 = vmatprep.subr.bf16.mxu1 %v17273_v17  ;;  %v17329_v17 = vld [vmem:[%s22205_s1 + $0x3f0] sm:$0xff]  }
  0x43   :  { %696 = vmatmul.mubr.bf16.vlgmr.msra.gmra.mrb[4].mxu0 %v18615_v13 }
  0x44   :  { %736 = vmatmul.mubr.bf16.vlgmr.msra.gmra.mrb[4].mxu1 %v18619_v15  ;;  %15713 = vmatpush3.bf16.msra.mxu0 %v17274_v18  ;;  %v17330_v18 = vld [vmem:[%s22205_s1 + $0x330] sm:$0xff]  }
  0x45   :  { %15735 = vmatpush3.bf16.msra.mxu1 %v17275_v19  ;;  %1289 = vmatprep.mubr.bf16.mxu0 %v18490_v35  ;;  %v17331_v19 = vld [vmem:[%s22205_s1 + $0x3b0] sm:$0xff]  }
  0x46   :  { %15714 = vmatprep.subr.bf16.mxu0 %v17276_v20  ;;  %1330 = vmatprep.mubr.bf16.mxu1 %v18497_v38  ;;  %v17332_v20 = vld [vmem:[%s22205_s1 + $0x378] sm:$0xff]  }
  0x47   :  { %15736 = vmatprep.subr.bf16.mxu1 %v17277_v21  ;;  %v17333_v21 = vld [vmem:[%s22205_s1 + $0x3f8] sm:$0xff]  }
  0x48   :  { %15715 = vmatpush3.bf16.msra.mxu0 %v17278_v22  ;;  %v17334_v22 = vld [vmem:[%s22205_s1 + $0x338] sm:$0xff]  }
  0x49   :  { %15737 = vmatpush3.bf16.msra.mxu1 %v17279_v23  ;;  %15716 = vmatprep.subr.bf16.mxu0 %v17280_v24  ;;  %v17335_v23 = vld [vmem:[%s22205_s1 + $0x3b8] sm:$0xff]   ;;  %v17336_v24 = vld [vmem:[%s22205_s1 + $0x440] sm:$0xff]  }
  0x4a   :  { %15738 = vmatprep.subr.bf16.mxu1 %v17281_v25  ;;  %v17337_v25 = vld [vmem:[%s22205_s1 + $0x4c0] sm:$0xff]  }
  0x4c   :  { %15717 = vmatpush3.bf16.msra.mxu0 %v17282_v26  ;;  %v17338_v26 = vld [vmem:[%s22205_s1 + $0x400] sm:$0xff]  }
  0x4d   :  { %15739 = vmatpush3.bf16.msra.mxu1 %v17283_v27  ;;  %15718 = vmatprep.subr.bf16.mxu0 %v17284_v28  ;;  %v17339_v27 = vld [vmem:[%s22205_s1 + $0x480] sm:$0xff]   ;;  %v17340_v28 = vld [vmem:[%s22205_s1 + $0x448] sm:$0xff]  }
  0x4e   :  { %15740 = vmatprep.subr.bf16.mxu1 %v17285_v29  ;;  %v17341_v29 = vld [vmem:[%s22205_s1 + $0x4c8] sm:$0xff]  }
  0x50   :  { %15719 = vmatpush3.bf16.msra.mxu0 %v17286_v30  ;;  %v17342_v30 = vld [vmem:[%s22205_s1 + $0x408] sm:$0xff]  }
  0x51   :  { %15741 = vmatpush3.bf16.msra.mxu1 %v17287_v31  ;;  %15720 = vmatprep.subr.bf16.mxu0 %v17288_v32  ;;  %v17343_v31 = vld [vmem:[%s22205_s1 + $0x488] sm:$0xff]   ;;  %v17344_v32 = vld [vmem:[%s22205_s1 + $0x450] sm:$0xff]  }
  0x52   :  { %15742 = vmatprep.subr.bf16.mxu1 %v17289_v33  ;;  %v17345_v33 = vld [vmem:[%s22205_s1 + $0x4d0] sm:$0xff]  }
  0x54   :  { %15721 = vmatpush3.bf16.msra.mxu0 %v17290_v34  ;;  %v17346_v34 = vld [vmem:[%s22205_s1 + $0x410] sm:$0xff]  }
  0x55   :  { %15743 = vmatpush3.bf16.msra.mxu1 %v17291_v36  ;;  %15722 = vmatprep.subr.bf16.mxu0 %v17292_v40  ;;  %v17347_v36 = vld [vmem:[%s22205_s1 + $0x490] sm:$0xff]   ;;  %v17348_v40 = vld [vmem:[%s22205_s1 + $0x458] sm:$0xff]  }
  0x56   :  { %15744 = vmatprep.subr.bf16.mxu1 %v17293_v41  ;;  %v17349_v41 = vld [vmem:[%s22205_s1 + $0x4d8] sm:$0xff]  }
  0x58   :  { %15723 = vmatpush3.bf16.msra.mxu0 %v17294_v42  ;;  %v17350_v42 = vld [vmem:[%s22205_s1 + $0x418] sm:$0xff]  }
  0x59   :  { %15745 = vmatpush3.bf16.msra.mxu1 %v17295_v43  ;;  %15724 = vmatprep.subr.bf16.mxu0 %v17296_v44  ;;  %v17351_v43 = vld [vmem:[%s22205_s1 + $0x498] sm:$0xff]   ;;  %v17352_v44 = vld [vmem:[%s22205_s1 + $0x460] sm:$0xff]  }
  0x5a   :  { %15746 = vmatprep.subr.bf16.mxu1 %v17297_v45  ;;  %v17353_v45 = vld [vmem:[%s22205_s1 + $0x4e0] sm:$0xff]  }
  0x5c   :  { %15725 = vmatpush3.bf16.msra.mxu0 %v17298_v46  ;;  %v17354_v46 = vld [vmem:[%s22205_s1 + $0x420] sm:$0xff]  }
  0x5d   :  { %15747 = vmatpush3.bf16.msra.mxu1 %v17299_v47  ;;  %15726 = vmatprep.subr.bf16.mxu0 %v17300_v48  ;;  %v17355_v47 = vld [vmem:[%s22205_s1 + $0x4a0] sm:$0xff]   ;;  %v17356_v48 = vld [vmem:[%s22205_s1 + $0x468] sm:$0xff]  }
  0x5e   :  { %15748 = vmatprep.subr.bf16.mxu1 %v17301_v49  ;;  %v17357_v49 = vld [vmem:[%s22205_s1 + $0x4e8] sm:$0xff]  }
  0x60   :  { %15727 = vmatpush3.bf16.msra.mxu0 %v17302_v50  ;;  %v17358_v50 = vld [vmem:[%s22205_s1 + $0x428] sm:$0xff]  }
  0x61   :  { %15749 = vmatpush3.bf16.msra.mxu1 %v17303_v51  ;;  %15756 = vmatprep.subr.bf16.mxu0 %v17304_v52  ;;  %v17359_v51 = vld [vmem:[%s22205_s1 + $0x4a8] sm:$0xff]   ;;  %v17360_v52 = vld [vmem:[%s22205_s1 + $0x470] sm:$0xff]  }
  0x62   :  { %15778 = vmatprep.subr.bf16.mxu1 %v17305_v53  ;;  %v17361_v53 = vld [vmem:[%s22205_s1 + $0x4f0] sm:$0xff]  }
  0x63   :  { %1290 = vmatmul.mubr.bf16.vlgmr.msra.gmra.mrb[8].mxu0 %v18495_v37 }
  0x64   :  { %1331 = vmatmul.mubr.bf16.vlgmr.msra.gmra.mrb[8].mxu1 %v18499_v39  ;;  %15757 = vmatpush3.bf16.msra.mxu0 %v17306_v54  ;;  %v17362_v54 = vld [vmem:[%s22205_s1 + $0x430] sm:$0xff]  }
  0x65   :  { %15779 = vmatpush3.bf16.msra.mxu1 %v17307_v55  ;;  %1371 = vmatprep.mubr.bf16.mxu0 %v18607_v10  ;;  %v17363_v55 = vld [vmem:[%s22205_s1 + $0x4b0] sm:$0xff]  }
  0x66   :  { %15758 = vmatprep.subr.bf16.mxu0 %v17308_v56  ;;  %1412 = vmatprep.mubr.bf16.mxu1 %v18617_v14  ;;  %v17364_v56 = vld [vmem:[%s22205_s1 + $0x478] sm:$0xff]  }
  0x67   :  { %15780 = vmatprep.subr.bf16.mxu1 %v17309_v57  ;;  %v17365_v57 = vld [vmem:[%s22205_s1 + $0x4f8] sm:$0xff]  }
  0x68   :  { %15759 = vmatpush3.bf16.msra.mxu0 %v17310_v58  ;;  %v17366_v58 = vld [vmem:[%s22205_s1 + $0x438] sm:$0xff]  }
  0x69   :  { %15781 = vmatpush3.bf16.msra.mxu1 %v17311_v59  ;;  %15760 = vmatprep.subr.bf16.mxu0 %v17312_v60  ;;  %v17367_v59 = vld [vmem:[%s22205_s1 + $0x4b8] sm:$0xff]   ;;  %v17368_v60 = vld [vmem:[%s22205_s1 + $0x540] sm:$0xff]  }
  0x6a   :  { %15782 = vmatprep.subr.bf16.mxu1 %v17313_v61  ;;  %v17369_v61 = vld [vmem:[%s22205_s1 + $0x5c0] sm:$0xff]  }
  0x6c   :  { %15761 = vmatpush3.bf16.msra.mxu0 %v17314_v62  ;;  %v17370_v62 = vld [vmem:[%s22205_s1 + $0x500] sm:$0xff]  }
  0x6d   :  { %15783 = vmatpush3.bf16.msra.mxu1 %v17315_v63  ;;  %15762 = vmatprep.subr.bf16.mxu0 %v17316_v0  ;;  %v17371_v63 = vld [vmem:[%s22205_s1 + $0x580] sm:$0xff]   ;;  %v17372_v0 = vld [vmem:[%s22205_s1 + $0x548] sm:$0xff]  }
  0x6e   :  { %15784 = vmatprep.subr.bf16.mxu1 %v17317_v1  ;;  %v17373_v1 = vld [vmem:[%s22205_s1 + $0x5c8] sm:$0xff]  }
  0x70   :  { %15763 = vmatpush3.bf16.msra.mxu0 %v17318_v2  ;;  %v17374_v2 = vld [vmem:[%s22205_s1 + $0x508] sm:$0xff]  }
  0x71   :  { %15785 = vmatpush3.bf16.msra.mxu1 %v17319_v3  ;;  %15764 = vmatprep.subr.bf16.mxu0 %v17320_v4  ;;  %v17375_v3 = vld [vmem:[%s22205_s1 + $0x588] sm:$0xff]   ;;  %v17376_v4 = vld [vmem:[%s22205_s1 + $0x550] sm:$0xff]  }
  0x72   :  { %15786 = vmatprep.subr.bf16.mxu1 %v17321_v5  ;;  %v17377_v5 = vld [vmem:[%s22205_s1 + $0x5d0] sm:$0xff]  }
  0x74   :  { %15765 = vmatpush3.bf16.msra.mxu0 %v17322_v6  ;;  %v17378_v6 = vld [vmem:[%s22205_s1 + $0x510] sm:$0xff]  }
  0x75   :  { %15787 = vmatpush3.bf16.msra.mxu1 %v17323_v7  ;;  %15766 = vmatprep.subr.bf16.mxu0 %v17324_v8  ;;  %v17379_v7 = vld [vmem:[%s22205_s1 + $0x590] sm:$0xff]   ;;  %v17380_v8 = vld [vmem:[%s22205_s1 + $0x558] sm:$0xff]  }
  0x76   :  { %15788 = vmatprep.subr.bf16.mxu1 %v17325_v9  ;;  %v17381_v9 = vld [vmem:[%s22205_s1 + $0x5d8] sm:$0xff]  }
  0x78   :  { %15767 = vmatpush3.bf16.msra.mxu0 %v17326_v11  ;;  %v17382_v11 = vld [vmem:[%s22205_s1 + $0x518] sm:$0xff]  }
  0x79   :  { %15789 = vmatpush3.bf16.msra.mxu1 %v17327_v12  ;;  %15768 = vmatprep.subr.bf16.mxu0 %v17328_v16  ;;  %v17383_v12 = vld [vmem:[%s22205_s1 + $0x598] sm:$0xff]   ;;  %v17384_v16 = vld [vmem:[%s22205_s1 + $0x560] sm:$0xff]  }
  0x7a   :  { %15790 = vmatprep.subr.bf16.mxu1 %v17329_v17  ;;  %v17385_v17 = vld [vmem:[%s22205_s1 + $0x5e0] sm:$0xff]  }
  0x7c   :  { %15769 = vmatpush3.bf16.msra.mxu0 %v17330_v18  ;;  %v17386_v18 = vld [vmem:[%s22205_s1 + $0x520] sm:$0xff]  }
  0x7d   :  { %15791 = vmatpush3.bf16.msra.mxu1 %v17331_v19  ;;  %15770 = vmatprep.subr.bf16.mxu0 %v17332_v20  ;;  %v17387_v19 = vld [vmem:[%s22205_s1 + $0x5a0] sm:$0xff]   ;;  %v17388_v20 = vld [vmem:[%s22205_s1 + $0x568] sm:$0xff]  }
  0x7e   :  { %15792 = vmatprep.subr.bf16.mxu1 %v17333_v21  ;;  %v17389_v21 = vld [vmem:[%s22205_s1 + $0x5e8] sm:$0xff]  }
  0x80   :  { %15771 = vmatpush3.bf16.msra.mxu0 %v17334_v22  ;;  %v17390_v22 = vld [vmem:[%s22205_s1 + $0x528] sm:$0xff]  }
  0x81   :  { %15793 = vmatpush3.bf16.msra.mxu1 %v17335_v23  ;;  %15800 = vmatprep.subr.bf16.mxu0 %v17336_v24  ;;  %v17391_v23 = vld [vmem:[%s22205_s1 + $0x5a8] sm:$0xff]   ;;  %v17392_v24 = vld [vmem:[%s22205_s1 + $0x570] sm:$0xff]  }
  0x82   :  { %15822 = vmatprep.subr.bf16.mxu1 %v17337_v25  ;;  %v17393_v25 = vld [vmem:[%s22205_s1 + $0x5f0] sm:$0xff]  }
  0x83   :  { %1372 = vmatmul.mubr.bf16.vlgmr.msra.gmra.mrb[12].mxu0 %v18615_v13 }
  0x84   :  { %1413 = vmatmul.mubr.bf16.vlgmr.msra.gmra.mrb[12].mxu1 %v18619_v15  ;;  %15801 = vmatpush3.bf16.msra.mxu0 %v17338_v26  ;;  %v17394_v26 = vld [vmem:[%s22205_s1 + $0x530] sm:$0xff]  }
  0x85   :  { %15823 = vmatpush3.bf16.msra.mxu1 %v17339_v27  ;;  %1974 = vmatprep.mubr.bf16.mxu0 %v18490_v35  ;;  %v17395_v27 = vld [vmem:[%s22205_s1 + $0x5b0] sm:$0xff]  }
  0x86   :  { %15802 = vmatprep.subr.bf16.mxu0 %v17340_v28  ;;  %2015 = vmatprep.mubr.bf16.mxu1 %v18497_v38  ;;  %v17396_v28 = vld [vmem:[%s22205_s1 + $0x578] sm:$0xff]  }
  0x87   :  { %15824 = vmatprep.subr.bf16.mxu1 %v17341_v29  ;;  %v17397_v29 = vld [vmem:[%s22205_s1 + $0x5f8] sm:$0xff]  }
  0x88   :  { %15803 = vmatpush3.bf16.msra.mxu0 %v17342_v30  ;;  %v17398_v30 = vld [vmem:[%s22205_s1 + $0x538] sm:$0xff]  }
  0x89   :  { %15825 = vmatpush3.bf16.msra.mxu1 %v17343_v31  ;;  %15804 = vmatprep.subr.bf16.mxu0 %v17344_v32  ;;  %v17399_v31 = vld [vmem:[%s22205_s1 + $0x5b8] sm:$0xff]   ;;  %v17400_v32 = vld [vmem:[%s22205_s1 + $0x640] sm:$0xff]  }
  0x8a   :  { %15826 = vmatprep.subr.bf16.mxu1 %v17345_v33  ;;  %v17401_v33 = vld [vmem:[%s22205_s1 + $0x6c0] sm:$0xff]  }
  0x8c   :  { %15805 = vmatpush3.bf16.msra.mxu0 %v17346_v34  ;;  %v17402_v34 = vld [vmem:[%s22205_s1 + $0x600] sm:$0xff]  }
  0x8d   :  { %15827 = vmatpush3.bf16.msra.mxu1 %v17347_v36  ;;  %15806 = vmatprep.subr.bf16.mxu0 %v17348_v40  ;;  %v17403_v36 = vld [vmem:[%s22205_s1 + $0x680] sm:$0xff]   ;;  %v17404_v40 = vld [vmem:[%s22205_s1 + $0x648] sm:$0xff]  }
  0x8e   :  { %15828 = vmatprep.subr.bf16.mxu1 %v17349_v41  ;;  %v17405_v41 = vld [vmem:[%s22205_s1 + $0x6c8] sm:$0xff]  }
  0x90   :  { %15807 = vmatpush3.bf16.msra.mxu0 %v17350_v42  ;;  %v17406_v42 = vld [vmem:[%s22205_s1 + $0x608] sm:$0xff]  }
  0x91   :  { %15829 = vmatpush3.bf16.msra.mxu1 %v17351_v43  ;;  %15808 = vmatprep.subr.bf16.mxu0 %v17352_v44  ;;  %v17407_v43 = vld [vmem:[%s22205_s1 + $0x688] sm:$0xff]   ;;  %v17408_v44 = vld [vmem:[%s22205_s1 + $0x650] sm:$0xff]  }
  0x92   :  { %15830 = vmatprep.subr.bf16.mxu1 %v17353_v45  ;;  %v17409_v45 = vld [vmem:[%s22205_s1 + $0x6d0] sm:$0xff]  }
  0x94   :  { %15809 = vmatpush3.bf16.msra.mxu0 %v17354_v46  ;;  %v17410_v46 = vld [vmem:[%s22205_s1 + $0x610] sm:$0xff]  }
  0x95   :  { %15831 = vmatpush3.bf16.msra.mxu1 %v17355_v47  ;;  %15810 = vmatprep.subr.bf16.mxu0 %v17356_v48  ;;  %v17411_v47 = vld [vmem:[%s22205_s1 + $0x690] sm:$0xff]   ;;  %v17412_v48 = vld [vmem:[%s22205_s1 + $0x658] sm:$0xff]  }
  0x96   :  { %15832 = vmatprep.subr.bf16.mxu1 %v17357_v49  ;;  %v17413_v49 = vld [vmem:[%s22205_s1 + $0x6d8] sm:$0xff]  }
  0x98   :  { %15811 = vmatpush3.bf16.msra.mxu0 %v17358_v50  ;;  %v17414_v50 = vld [vmem:[%s22205_s1 + $0x618] sm:$0xff]  }
  0x99   :  { %15833 = vmatpush3.bf16.msra.mxu1 %v17359_v51  ;;  %15812 = vmatprep.subr.bf16.mxu0 %v17360_v52  ;;  %v17415_v51 = vld [vmem:[%s22205_s1 + $0x698] sm:$0xff]   ;;  %v17416_v52 = vld [vmem:[%s22205_s1 + $0x660] sm:$0xff]  }
  0x9a   :  { %15834 = vmatprep.subr.bf16.mxu1 %v17361_v53  ;;  %v17417_v53 = vld [vmem:[%s22205_s1 + $0x6e0] sm:$0xff]  }
  0x9c   :  { %15813 = vmatpush3.bf16.msra.mxu0 %v17362_v54  ;;  %v17418_v54 = vld [vmem:[%s22205_s1 + $0x620] sm:$0xff]  }
  0x9d   :  { %15835 = vmatpush3.bf16.msra.mxu1 %v17363_v55  ;;  %15814 = vmatprep.subr.bf16.mxu0 %v17364_v56  ;;  %v17419_v55 = vld [vmem:[%s22205_s1 + $0x6a0] sm:$0xff]   ;;  %v17420_v56 = vld [vmem:[%s22205_s1 + $0x668] sm:$0xff]  }
  0x9e   :  { %15836 = vmatprep.subr.bf16.mxu1 %v17365_v57  ;;  %v17421_v57 = vld [vmem:[%s22205_s1 + $0x6e8] sm:$0xff]  }
  0xa0   :  { %15815 = vmatpush3.bf16.msra.mxu0 %v17366_v58  ;;  %v17422_v58 = vld [vmem:[%s22205_s1 + $0x628] sm:$0xff]  }
  0xa1   :  { %15837 = vmatpush3.bf16.msra.mxu1 %v17367_v59  ;;  %15844 = vmatprep.subr.bf16.mxu0 %v17368_v60  ;;  %v17423_v59 = vld [vmem:[%s22205_s1 + $0x6a8] sm:$0xff]   ;;  %v17424_v60 = vld [vmem:[%s22205_s1 + $0x670] sm:$0xff]  }
  0xa2   :  { %15866 = vmatprep.subr.bf16.mxu1 %v17369_v61  ;;  %v17425_v61 = vld [vmem:[%s22205_s1 + $0x6f0] sm:$0xff]  }
  0xa3   :  { %1975 = vmatmul.mubr.bf16.vlgmr.msra.gmra.mrb[16].mxu0 %v18495_v37 }
  0xa4   :  { %2016 = vmatmul.mubr.bf16.vlgmr.msra.gmra.mrb[16].mxu1 %v18499_v39  ;;  %15845 = vmatpush3.bf16.msra.mxu0 %v17370_v62  ;;  %v17426_v62 = vld [vmem:[%s22205_s1 + $0x630] sm:$0xff]  }
  0xa5   :  { %15867 = vmatpush3.bf16.msra.mxu1 %v17371_v63  ;;  %2056 = vmatprep.mubr.bf16.mxu0 %v18607_v10  ;;  %v17427_v63 = vld [vmem:[%s22205_s1 + $0x6b0] sm:$0xff]  }
  0xa6   :  { %15846 = vmatprep.subr.bf16.mxu0 %v17372_v0  ;;  %2097 = vmatprep.mubr.bf16.mxu1 %v18617_v14  ;;  %v17428_v0 = vld [vmem:[%s22205_s1 + $0x678] sm:$0xff]  }
  0xa7   :  { %15868 = vmatprep.subr.bf16.mxu1 %v17373_v1  ;;  %v17429_v1 = vld [vmem:[%s22205_s1 + $0x6f8] sm:$0xff]  }
  0xa8   :  { %15847 = vmatpush3.bf16.msra.mxu0 %v17374_v2  ;;  %v17430_v2 = vld [vmem:[%s22205_s1 + $0x638] sm:$0xff]  }
  0xa9   :  { %15869 = vmatpush3.bf16.msra.mxu1 %v17375_v3  ;;  %15848 = vmatprep.subr.bf16.mxu0 %v17376_v4  ;;  %v17431_v3 = vld [vmem:[%s22205_s1 + $0x6b8] sm:$0xff]   ;;  %v17432_v4 = vld [vmem:[%s22205_s1 + $0x740] sm:$0xff]  }
  0xaa   :  { %15870 = vmatprep.subr.bf16.mxu1 %v17377_v5  ;;  %v17433_v5 = vld [vmem:[%s22205_s1 + $0x7c0] sm:$0xff]  }
  0xac   :  { %15849 = vmatpush3.bf16.msra.mxu0 %v17378_v6  ;;  %v17434_v6 = vld [vmem:[%s22205_s1 + $0x700] sm:$0xff]  }
  0xad   :  { %15871 = vmatpush3.bf16.msra.mxu1 %v17379_v7  ;;  %15850 = vmatprep.subr.bf16.mxu0 %v17380_v8  ;;  %v17435_v7 = vld [vmem:[%s22205_s1 + $0x780] sm:$0xff]   ;;  %v17436_v8 = vld [vmem:[%s22205_s1 + $0x748] sm:$0xff]  }
  0xae   :  { %15872 = vmatprep.subr.bf16.mxu1 %v17381_v9  ;;  %v17437_v9 = vld [vmem:[%s22205_s1 + $0x7c8] sm:$0xff]  }
  0xb0   :  { %15851 = vmatpush3.bf16.msra.mxu0 %v17382_v11  ;;  %v17438_v11 = vld [vmem:[%s22205_s1 + $0x708] sm:$0xff]  }
  0xb1   :  { %15873 = vmatpush3.bf16.msra.mxu1 %v17383_v12  ;;  %15852 = vmatprep.subr.bf16.mxu0 %v17384_v16  ;;  %v17439_v12 = vld [vmem:[%s22205_s1 + $0x788] sm:$0xff]   ;;  %v17440_v16 = vld [vmem:[%s22205_s1 + $0x750] sm:$0xff]  }
  0xb2   :  { %15874 = vmatprep.subr.bf16.mxu1 %v17385_v17  ;;  %v17441_v17 = vld [vmem:[%s22205_s1 + $0x7d0] sm:$0xff]  }
  0xb4   :  { %15853 = vmatpush3.bf16.msra.mxu0 %v17386_v18  ;;  %v17442_v18 = vld [vmem:[%s22205_s1 + $0x710] sm:$0xff]  }
  0xb5   :  { %15875 = vmatpush3.bf16.msra.mxu1 %v17387_v19  ;;  %15854 = vmatprep.subr.bf16.mxu0 %v17388_v20  ;;  %v17443_v19 = vld [vmem:[%s22205_s1 + $0x790] sm:$0xff]   ;;  %v17444_v20 = vld [vmem:[%s22205_s1 + $0x758] sm:$0xff]  }
  0xb6   :  { %15876 = vmatprep.subr.bf16.mxu1 %v17389_v21  ;;  %v17445_v21 = vld [vmem:[%s22205_s1 + $0x7d8] sm:$0xff]  }
  0xb8   :  { %15855 = vmatpush3.bf16.msra.mxu0 %v17390_v22  ;;  %v17446_v22 = vld [vmem:[%s22205_s1 + $0x718] sm:$0xff]  }
  0xb9   :  { %15877 = vmatpush3.bf16.msra.mxu1 %v17391_v23  ;;  %15856 = vmatprep.subr.bf16.mxu0 %v17392_v24  ;;  %v17447_v23 = vld [vmem:[%s22205_s1 + $0x798] sm:$0xff]   ;;  %v17448_v24 = vld [vmem:[%s22205_s1 + $0x760] sm:$0xff]  }
  0xba   :  { %15878 = vmatprep.subr.bf16.mxu1 %v17393_v25  ;;  %v17449_v25 = vld [vmem:[%s22205_s1 + $0x7e0] sm:$0xff]  }
  0xbc   :  { %15857 = vmatpush3.bf16.msra.mxu0 %v17394_v26  ;;  %v17450_v26 = vld [vmem:[%s22205_s1 + $0x720] sm:$0xff]  }
  0xbd   :  { %15879 = vmatpush3.bf16.msra.mxu1 %v17395_v27  ;;  %15858 = vmatprep.subr.bf16.mxu0 %v17396_v28  ;;  %v17451_v27 = vld [vmem:[%s22205_s1 + $0x7a0] sm:$0xff]  }
  0xbe   :  { %15880 = vmatprep.subr.bf16.mxu1 %v17397_v29  ;;  %v17452_v29 = vld [vmem:[%s22205_s1 + $0x768] sm:$0xff]  }
  0xc0   :  { %15859 = vmatpush3.bf16.msra.mxu0 %v17398_v30 }
  0xc1   :  { %15881 = vmatpush3.bf16.msra.mxu1 %v17399_v31  ;;  %15888 = vmatprep.subr.bf16.mxu0 %v17400_v32  ;;  %v17453_v32 = vld [vmem:[%s22205_s1 + $0x7e8] sm:$0xff]  }
  0xc2   :  { %15910 = vmatprep.subr.bf16.mxu1 %v17401_v33  ;;  %v17454_v33 = vld [vmem:[%s22205_s1 + $0x728] sm:$0xff]  }
  0xc3   :  { %2057 = vmatmul.mubr.bf16.vlgmr.msra.gmra.mrb[20].mxu0 %v18615_v13 }
  0xc4   :  { %2098 = vmatmul.mubr.bf16.vlgmr.msra.gmra.mrb[20].mxu1 %v18619_v15  ;;  %15889 = vmatpush3.bf16.msra.mxu0 %v17402_v34 }
  0xc5   :  { %15911 = vmatpush3.bf16.msra.mxu1 %v17403_v36  ;;  %2659 = vmatprep.mubr.bf16.mxu0 %v18490_v35 }
  0xc6   :  { %15890 = vmatprep.subr.bf16.mxu0 %v17404_v40  ;;  %2700 = vmatprep.mubr.bf16.mxu1 %v18497_v38 }
  0xc7   :  { %15912 = vmatprep.subr.bf16.mxu1 %v17405_v41 }
  0xc8   :  { %15891 = vmatpush3.bf16.msra.mxu0 %v17406_v42 }
  0xc9   :  { %15913 = vmatpush3.bf16.msra.mxu1 %v17407_v43  ;;  %15892 = vmatprep.subr.bf16.mxu0 %v17408_v44  ;;  %v17455_v43 = vld [vmem:[%s22205_s1 + $0x7a8] sm:$0xff]  }
  0xca   :  { %15914 = vmatprep.subr.bf16.mxu1 %v17409_v45 }
  0xcc   :  { %15893 = vmatpush3.bf16.msra.mxu0 %v17410_v46 }
  0xcd   :  { %15915 = vmatpush3.bf16.msra.mxu1 %v17411_v47  ;;  %15894 = vmatprep.subr.bf16.mxu0 %v17412_v48  ;;  %v17456_v47 = vld [vmem:[%s22205_s1 + $0x770] sm:$0xff]  }
  0xce   :  { %15916 = vmatprep.subr.bf16.mxu1 %v17413_v49  ;;  %v17457_v48 = vld [vmem:[%s22205_s1 + $0x7f0] sm:$0xff]  }
  0xcf   :  { %v17458_v49 = vld [vmem:[%s22205_s1 + $0x730] sm:$0xff]  }
  0xd0   :  { %15895 = vmatpush3.bf16.msra.mxu0 %v17414_v50  ;;  %v17459_v50 = vld [vmem:[%s22205_s1 + $0x7b0] sm:$0xff]  }
  0xd1   :  { %15917 = vmatpush3.bf16.msra.mxu1 %v17415_v51  ;;  %15896 = vmatprep.subr.bf16.mxu0 %v17416_v52  ;;  %v17460_v51 = vld [vmem:[%s22205_s1 + $0x778] sm:$0xff]  }
  0xd2   :  { %15918 = vmatprep.subr.bf16.mxu1 %v17417_v53  ;;  %v17461_v52 = vld [vmem:[%s22205_s1 + $0x7f8] sm:$0xff]  }
  0xd3   :  { %v17462_v53 = vld [vmem:[%s22205_s1 + $0x738] sm:$0xff]  }
  0xd4   :  { %15897 = vmatpush3.bf16.msra.mxu0 %v17418_v54  ;;  %v17463_v54 = vld [vmem:[%s22205_s1 + $0x7b8] sm:$0xff]  }
  0xd5   :  { %15919 = vmatpush3.bf16.msra.mxu1 %v17419_v55  ;;  %15898 = vmatprep.subr.bf16.mxu0 %v17420_v56  ;;  %v17464_v55 = vld [vmem:[%s22205_s1 + $0x840] sm:$0xff]  }
  0xd6   :  { %15920 = vmatprep.subr.bf16.mxu1 %v17421_v57  ;;  %v17465_v56 = vld [vmem:[%s22205_s1 + $0x8c0] sm:$0xff]  }
  0xd7   :  { %v17466_v57 = vld [vmem:[%s22205_s1 + $0x800] sm:$0xff]  }
  0xd8   :  { %15899 = vmatpush3.bf16.msra.mxu0 %v17422_v58  ;;  %v17467_v58 = vld [vmem:[%s22205_s1 + $0x880] sm:$0xff]  }
  0xd9   :  { %15921 = vmatpush3.bf16.msra.mxu1 %v17423_v59  ;;  %15900 = vmatprep.subr.bf16.mxu0 %v17424_v60  ;;  %v17468_v59 = vld [vmem:[%s22205_s1 + $0x848] sm:$0xff]  }
  0xda   :  { %15922 = vmatprep.subr.bf16.mxu1 %v17425_v61  ;;  %v17469_v60 = vld [vmem:[%s22205_s1 + $0x8c8] sm:$0xff]  }
  0xdb   :  { %v17470_v61 = vld [vmem:[%s22205_s1 + $0x808] sm:$0xff]  }
  0xdc   :  { %15901 = vmatpush3.bf16.msra.mxu0 %v17426_v62  ;;  %v17471_v62 = vld [vmem:[%s22205_s1 + $0x888] sm:$0xff]  }
  0xdd   :  { %15923 = vmatpush3.bf16.msra.mxu1 %v17427_v63  ;;  %15902 = vmatprep.subr.bf16.mxu0 %v17428_v0  ;;  %v17472_v63 = vld [vmem:[%s22205_s1 + $0x850] sm:$0xff]  }
  0xde   :  { %15924 = vmatprep.subr.bf16.mxu1 %v17429_v1  ;;  %v17473_v0 = vld [vmem:[%s22205_s1 + $0x8d0] sm:$0xff]  }
  0xdf   :  { %v17474_v1 = vld [vmem:[%s22205_s1 + $0x810] sm:$0xff]  }
  0xe0   :  { %15903 = vmatpush3.bf16.msra.mxu0 %v17430_v2  ;;  %v17475_v2 = vld [vmem:[%s22205_s1 + $0x890] sm:$0xff]  }
  0xe1   :  { %15925 = vmatpush3.bf16.msra.mxu1 %v17431_v3  ;;  %15932 = vmatprep.subr.bf16.mxu0 %v17432_v4  ;;  %v17476_v3 = vld [vmem:[%s22205_s1 + $0x858] sm:$0xff]  }
  0xe2   :  { %15954 = vmatprep.subr.bf16.mxu1 %v17433_v5  ;;  %v17477_v4 = vld [vmem:[%s22205_s1 + $0x8d8] sm:$0xff]  }
  0xe3   :  { %2660 = vmatmul.mubr.bf16.vlgmr.msra.gmra.mrb[24].mxu0 %v18495_v37  ;;  %v17478_v5 = vld [vmem:[%s22205_s1 + $0x818] sm:$0xff]  }
  0xe4   :  { %2701 = vmatmul.mubr.bf16.vlgmr.msra.gmra.mrb[24].mxu1 %v18499_v39  ;;  %15933 = vmatpush3.bf16.msra.mxu0 %v17434_v6  ;;  %v17479_v6 = vld [vmem:[%s22205_s1 + $0x898] sm:$0xff]  }
  0xe5   :  { %15955 = vmatpush3.bf16.msra.mxu1 %v17435_v7  ;;  %2741 = vmatprep.mubr.bf16.mxu0 %v18607_v10  ;;  %v17480_v7 = vld [vmem:[%s22205_s1 + $0x860] sm:$0xff]  }
  0xe6   :  { %15934 = vmatprep.subr.bf16.mxu0 %v17436_v8  ;;  %2782 = vmatprep.mubr.bf16.mxu1 %v18617_v14  ;;  %v17481_v8 = vld [vmem:[%s22205_s1 + $0x8e0] sm:$0xff]  }
  0xe7   :  { %15956 = vmatprep.subr.bf16.mxu1 %v17437_v9  ;;  %v17482_v9 = vld [vmem:[%s22205_s1 + $0x820] sm:$0xff]  }
  0xe8   :  { %15935 = vmatpush3.bf16.msra.mxu0 %v17438_v11  ;;  %v17483_v11 = vld [vmem:[%s22205_s1 + $0x8a0] sm:$0xff]  }
  0xe9   :  { %15957 = vmatpush3.bf16.msra.mxu1 %v17439_v12  ;;  %15936 = vmatprep.subr.bf16.mxu0 %v17440_v16  ;;  %v17484_v16 = vld [vmem:[%s22205_s1 + $0x868] sm:$0xff]  }
  0xea   :  { %15958 = vmatprep.subr.bf16.mxu1 %v17441_v17 }
  0xec   :  { %15937 = vmatpush3.bf16.msra.mxu0 %v17442_v18 }
  0xed   :  { %15959 = vmatpush3.bf16.msra.mxu1 %v17443_v19  ;;  %15938 = vmatprep.subr.bf16.mxu0 %v17444_v20  ;;  %v17485_v19 = vld [vmem:[%s22205_s1 + $0x8e8] sm:$0xff]  }
  0xee   :  { %15960 = vmatprep.subr.bf16.mxu1 %v17445_v21  ;;  %v17486_v20 = vld [vmem:[%s22205_s1 + $0x828] sm:$0xff]  }
  0xf0   :  { %15939 = vmatpush3.bf16.msra.mxu0 %v17446_v22 }
  0xf1   :  { %15961 = vmatpush3.bf16.msra.mxu1 %v17447_v23  ;;  %15940 = vmatprep.subr.bf16.mxu0 %v17448_v24 }
  0xf2   :  { %15962 = vmatprep.subr.bf16.mxu1 %v17449_v25 }
  0xf4   :  { %15941 = vmatpush3.bf16.msra.mxu0 %v17450_v26  ;;  %v17487_v26 = vld [vmem:[%s22205_s1 + $0x8a8] sm:$0xff]  }
  0xf5   :  { %15963 = vmatpush3.bf16.msra.mxu1 %v17451_v27  ;;  %15942 = vmatprep.subr.bf16.mxu0 %v17452_v29 }
  0xf6   :  { %v15640_v28 = vpop.f32.mrb[0].mxu0  ;;  %15964 = vmatprep.subr.bf16.mxu1 %v17453_v32  ;;  %v17489_v32 = vld [vmem:[%s22205_s1 + $0x8f0] sm:$0xff]  }
  0xf7   :  { %v15662_v30 = vpop.f32.mrb[0].mxu1  ;;  %v15641_v31 = vpop.f32.mrb[1].mxu0 }
  0xf8   :  { %v15642_v34 = vadd.f32 %v15641_v31, %v15640_v28  ;;  %v15663_v36 = vpop.f32.mrb[1].mxu1  ;;  %v15643_v40 = vpop.f32.mrb[2].mxu0  ;;  %15943 = vmatpush3.bf16.msra.mxu0 %v17454_v33  ;;  %v17490_v33 = vld [vmem:[%s22205_s1 + $0x830] sm:$0xff]  }
  0xf9   :  { %v15664_v41 = vadd.f32 %v15663_v36, %v15662_v30  ;;  %v15665_v42 = vpop.f32.mrb[2].mxu1  ;;  %v15644_v44 = vpop.f32.mrb[3].mxu0  ;;  %15965 = vmatpush3.bf16.msra.mxu1 %v17455_v43  ;;  %15944 = vmatprep.subr.bf16.mxu0 %v17456_v47  ;;  %v17488_v30 = vld [vmem:[%s22205_s1 + $0x870] sm:$0xff]   ;;  %v17492_v36 = vld [vmem:[%s22205_s1 + $0x878] sm:$0xff]   ;;  %v17496_v43 = vld [vmem:[%s22205_s1 + $0x940] sm:$0xff]  }
  0xfa   :  { %v15666_v45 = vpop.f32.mrb[3].mxu1  ;;  %15966 = vmatprep.subr.bf16.mxu1 %v17457_v48  ;;  %v17493_v40 = vld [vmem:[%s22205_s1 + $0x8f8] sm:$0xff]   ;;  %v17497_v44 = vld [vmem:[%s22205_s1 + $0x9c0] sm:$0xff]   ;;  %v17500_v47 = vld [vmem:[%s22205_s1 + $0x948] sm:$0xff]  }
  0xfb   :  { %v19199_v46 = vadd.f32 %v15664_v41, %v15642_v34  ;;  %v17491_v34 = vld [vmem:[%s22205_s1 + $0x8b0] sm:$0xff]   ;;  %v17494_v41 = vld [vmem:[%s22205_s1 + $0x838] sm:$0xff]   ;;  %v17498_v45 = vld [vmem:[%s22205_s1 + $0x900] sm:$0xff]  }
  0xfc   :  { %15945 = vmatpush3.bf16.msra.mxu0 %v17458_v49  ;;  %v17495_v42 = vld [vmem:[%s22205_s1 + $0x8b8] sm:$0xff]   ;;  %v17501_v48 = vld [vmem:[%s22205_s1 + $0x9c8] sm:$0xff]  }
  0xfd   :  { %15967 = vmatpush3.bf16.msra.mxu1 %v17459_v50  ;;  %15946 = vmatprep.subr.bf16.mxu0 %v17460_v51  ;;  %v17502_v49 = vld [vmem:[%s22205_s1 + $0x908] sm:$0xff]   ;;  %v17504_v51 = vld [vmem:[%s22205_s1 + $0x950] sm:$0xff]  }
  0xfe   :  { %15968 = vmatprep.subr.bf16.mxu1 %v17461_v52  ;;  %v17503_v50 = vld [vmem:[%s22205_s1 + $0x988] sm:$0xff]   ;;  %v17505_v52 = vld [vmem:[%s22205_s1 + $0x9d0] sm:$0xff]  }
 0x100   :  { %15947 = vmatpush3.bf16.msra.mxu0 %v17462_v53  ;;  %v17506_v53 = vld [vmem:[%s22205_s1 + $0x910] sm:$0xff]  }
 0x101   :  { %15969 = vmatpush3.bf16.msra.mxu1 %v17463_v54  ;;  %15976 = vmatprep.subr.bf16.mxu0 %v17464_v55  ;;  %v17507_v54 = vld [vmem:[%s22205_s1 + $0x990] sm:$0xff]   ;;  %v17508_v55 = vld [vmem:[%s22205_s1 + $0x958] sm:$0xff]  }
 0x102   :  { %15998 = vmatprep.subr.bf16.mxu1 %v17465_v56  ;;  %v17509_v56 = vld [vmem:[%s22205_s1 + $0x9d8] sm:$0xff]  }
 0x103   :  { %2742 = vmatmul.mubr.bf16.vlgmr.msra.gmra.mrb[28].mxu0 %v18615_v13 }
 0x104   :  { %2783 = vmatmul.mubr.bf16.vlgmr.msra.gmra.mrb[28].mxu1 %v18619_v15  ;;  %15977 = vmatpush3.bf16.msra.mxu0 %v17466_v57  ;;  %v17510_v57 = vld [vmem:[%s22205_s1 + $0x918] sm:$0xff]  }
 0x105   :  { %15999 = vmatpush3.bf16.msra.mxu1 %v17467_v58  ;;  %3344 = vmatprep.mubr.bf16.mxu0 %v18490_v35  ;;  %v17511_v58 = vld [vmem:[%s22205_s1 + $0x998] sm:$0xff]  }
 0x106   :  { %15978 = vmatprep.subr.bf16.mxu0 %v17468_v59  ;;  %3385 = vmatprep.mubr.bf16.mxu1 %v18497_v38  ;;  %v17512_v59 = vld [vmem:[%s22205_s1 + $0x960] sm:$0xff]  }
 0x107   :  { %16000 = vmatprep.subr.bf16.mxu1 %v17469_v60  ;;  %v17513_v60 = vld [vmem:[%s22205_s1 + $0x9e0] sm:$0xff]  }
 0x108   :  { %15979 = vmatpush3.bf16.msra.mxu0 %v17470_v61  ;;  %v17514_v61 = vld [vmem:[%s22205_s1 + $0x920] sm:$0xff]  }
 0x109   :  { %16001 = vmatpush3.bf16.msra.mxu1 %v17471_v62  ;;  %15980 = vmatprep.subr.bf16.mxu0 %v17472_v63  ;;  %v17515_v62 = vld [vmem:[%s22205_s1 + $0x9a0] sm:$0xff]  }
 0x10a   :  { %16002 = vmatprep.subr.bf16.mxu1 %v17473_v0  ;;  %v17516_v0 = vld [vmem:[%s22205_s1 + $0x968] sm:$0xff]  }
 0x10c   :  { %15981 = vmatpush3.bf16.msra.mxu0 %v17474_v1 }
 0x10d   :  { %16003 = vmatpush3.bf16.msra.mxu1 %v17475_v2  ;;  %15982 = vmatprep.subr.bf16.mxu0 %v17476_v3  ;;  %v17517_v3 = vld [vmem:[%s22205_s1 + $0x9e8] sm:$0xff]  }
 0x10e   :  { %16004 = vmatprep.subr.bf16.mxu1 %v17477_v4  ;;  %v17518_v4 = vld [vmem:[%s22205_s1 + $0x928] sm:$0xff]  }
 0x110   :  { %15983 = vmatpush3.bf16.msra.mxu0 %v17478_v5 }
 0x111   :  { %16005 = vmatpush3.bf16.msra.mxu1 %v17479_v6  ;;  %15984 = vmatprep.subr.bf16.mxu0 %v17480_v7 }
 0x112   :  { %16006 = vmatprep.subr.bf16.mxu1 %v17481_v8 }
 0x114   :  { %15985 = vmatpush3.bf16.msra.mxu0 %v17482_v9 }
 0x115   :  { %16007 = vmatpush3.bf16.msra.mxu1 %v17483_v11  ;;  %15986 = vmatprep.subr.bf16.mxu0 %v17484_v16  ;;  %v17519_v11 = vld [vmem:[%s22205_s1 + $0x9a8] sm:$0xff]   ;;  %v17520_v16 = vld [vmem:[%s22205_s1 + $0x970] sm:$0xff]  }
 0x116   :  { %v15684_v12 = vpop.f32.mrb[4].mxu0  ;;  %16008 = vmatprep.subr.bf16.mxu1 %v17485_v19  ;;  %v17521_v19 = vld [vmem:[%s22205_s1 + $0x9f0] sm:$0xff]  }
 0x117   :  { %v15706_v17 = vpop.f32.mrb[4].mxu1  ;;  %v15685_v18 = vpop.f32.mrb[5].mxu0 }
 0x118   :  { %v15686_v21 = vadd.f32 %v15685_v18, %v15684_v12  ;;  %v15707_v22 = vpop.f32.mrb[5].mxu1  ;;  %v15687_v23 = vpop.f32.mrb[6].mxu0  ;;  %15987 = vmatpush3.bf16.msra.mxu0 %v17486_v20 }
 0x119   :  { %v15708_v24 = vadd.f32 %v15707_v22, %v15706_v17  ;;  %v15709_v25 = vpop.f32.mrb[6].mxu1  ;;  %v15688_v28 = vpop.f32.mrb[7].mxu0  ;;  %16009 = vmatpush3.bf16.msra.mxu1 %v17487_v26  ;;  %15988 = vmatprep.subr.bf16.mxu0 %v17488_v30  ;;  %v17522_v22 = vld [vmem:[%s22205_s1 + $0x930] sm:$0xff]   ;;  %v17525_v26 = vld [vmem:[%s22205_s1 + $0x9f8] sm:$0xff]   ;;  %v17529_v30 = vld [vmem:[%s22205_s1 + $0xac0] sm:$0xff]  }
 0x11a   :  { %v698_v27 = vadd.f32 %v15686_v21, %v19199_v46  ;;  %v15710_v29 = vpop.f32.mrb[7].mxu1  ;;  %16010 = vmatprep.subr.bf16.mxu1 %v17489_v32  ;;  %v17499_v46 = vld [vmem:[%s22205_s1 + $0x980] sm:$0xff]   ;;  %v17524_v25 = vld [vmem:[%s22205_s1 + $0x978] sm:$0xff]  }
 0x11b   :  { %v17527_v28 = vld [vmem:[%s22205_s1 + $0x9b8] sm:$0xff]   ;;  %v17528_v29 = vld [vmem:[%s22205_s1 + $0xa40] sm:$0xff]  }
 0x11c   :  { %v19305_v31 = vadd.f32 %v15708_v24, %v698_v27  ;;  %15989 = vmatpush3.bf16.msra.mxu0 %v17490_v33  ;;  %v17523_v24 = vld [vmem:[%s22205_s1 + $0x9b0] sm:$0xff]   ;;  %v17526_v27 = vld [vmem:[%s22205_s1 + $0x938] sm:$0xff]   ;;  %v17530_v32 = vld [vmem:[%s22205_s1 + $0xa00] sm:$0xff]  }
 0x11d   :  { %16011 = vmatpush3.bf16.msra.mxu1 %v17491_v34  ;;  %15990 = vmatprep.subr.bf16.mxu0 %v17492_v36  ;;  %v17531_v33 = vld [vmem:[%s22205_s1 + $0xa80] sm:$0xff]   ;;  %v17532_v34 = vld [vmem:[%s22205_s1 + $0xa48] sm:$0xff]  }
 0x11e   :  { %16012 = vmatprep.subr.bf16.mxu1 %v17493_v40  ;;  %v17533_v36 = vld [vmem:[%s22205_s1 + $0xac8] sm:$0xff]  }
 0x11f   :  { %v17534_v40 = vld [vmem:[%s22205_s1 + $0xa08] sm:$0xff]  }
 0x120   :  { %15991 = vmatpush3.bf16.msra.mxu0 %v17494_v41  ;;  %v17535_v41 = vld [vmem:[%s22205_s1 + $0xa88] sm:$0xff]  }
 0x121   :  { %16013 = vmatpush3.bf16.msra.mxu1 %v17495_v42  ;;  %16020 = vmatprep.subr.bf16.mxu0 %v17496_v43  ;;  %v17536_v42 = vld [vmem:[%s22205_s1 + $0xa50] sm:$0xff]  }
 0x122   :  { %16042 = vmatprep.subr.bf16.mxu1 %v17497_v44  ;;  %v17537_v43 = vld [vmem:[%s22205_s1 + $0xad0] sm:$0xff]  }
 0x123   :  { %3345 = vmatmul.mubr.bf16.vlgmr.msra.gmra.mrb[32].mxu0 %v18495_v37  ;;  %v17538_v44 = vld [vmem:[%s22205_s1 + $0xa10] sm:$0xff]  }
 0x124   :  { %3386 = vmatmul.mubr.bf16.vlgmr.msra.gmra.mrb[32].mxu1 %v18499_v39  ;;  %16021 = vmatpush3.bf16.msra.mxu0 %v17498_v45  ;;  %v17539_v45 = vld [vmem:[%s22205_s1 + $0xa90] sm:$0xff]  }
 0x125   :  { %16043 = vmatpush3.bf16.msra.mxu1 %v17499_v46  ;;  %3426 = vmatprep.mubr.bf16.mxu0 %v18607_v10  ;;  %v17540_v46 = vld [vmem:[%s22205_s1 + $0xa58] sm:$0xff]  }
 0x126   :  { %16022 = vmatprep.subr.bf16.mxu0 %v17500_v47  ;;  %3467 = vmatprep.mubr.bf16.mxu1 %v18617_v14  ;;  %v17541_v47 = vld [vmem:[%s22205_s1 + $0xad8] sm:$0xff]  }
 0x127   :  { %16044 = vmatprep.subr.bf16.mxu1 %v17501_v48  ;;  %v17542_v48 = vld [vmem:[%s22205_s1 + $0xa18] sm:$0xff]  }
 0x128   :  { %16023 = vmatpush3.bf16.msra.mxu0 %v17502_v49  ;;  %v17543_v49 = vld [vmem:[%s22205_s1 + $0xa98] sm:$0xff]  }
 0x129   :  { %16045 = vmatpush3.bf16.msra.mxu1 %v17503_v50  ;;  %16024 = vmatprep.subr.bf16.mxu0 %v17504_v51  ;;  %v17544_v50 = vld [vmem:[%s22205_s1 + $0xa60] sm:$0xff]  }
 0x12a   :  { %16046 = vmatprep.subr.bf16.mxu1 %v17505_v52  ;;  %v17545_v51 = vld [vmem:[%s22205_s1 + $0xae0] sm:$0xff]  }
 0x12b   :  { %v17546_v52 = vld [vmem:[%s22205_s1 + $0xa20] sm:$0xff]  }
 0x12c   :  { %16025 = vmatpush3.bf16.msra.mxu0 %v17506_v53  ;;  %v17547_v53 = vld [vmem:[%s22205_s1 + $0xaa0] sm:$0xff]  }
 0x12d   :  { %16047 = vmatpush3.bf16.msra.mxu1 %v17507_v54  ;;  %16026 = vmatprep.subr.bf16.mxu0 %v17508_v55  ;;  %v17548_v55 = vld [vmem:[%s22205_s1 + $0xa68] sm:$0xff]  }
 0x12e   :  { %16048 = vmatprep.subr.bf16.mxu1 %v17509_v56 }
 0x130   :  { %16027 = vmatpush3.bf16.msra.mxu0 %v17510_v57 }
 0x131   :  { %16049 = vmatpush3.bf16.msra.mxu1 %v17511_v58  ;;  %16028 = vmatprep.subr.bf16.mxu0 %v17512_v59  ;;  %v17549_v58 = vld [vmem:[%s22205_s1 + $0xae8] sm:$0xff]  }
 0x132   :  { %16050 = vmatprep.subr.bf16.mxu1 %v17513_v60  ;;  %v17550_v59 = vld [vmem:[%s22205_s1 + $0xa28] sm:$0xff]  }
 0x134   :  { %16029 = vmatpush3.bf16.msra.mxu0 %v17514_v61 }
 0x135   :  { %16051 = vmatpush3.bf16.msra.mxu1 %v17515_v62  ;;  %16030 = vmatprep.subr.bf16.mxu0 %v17516_v0 }
 0x136   :  { %v15728_v63 = vpop.f32.mrb[8].mxu0  ;;  %16052 = vmatprep.subr.bf16.mxu1 %v17517_v3 }
 0x137   :  { %v15750_v1 = vpop.f32.mrb[8].mxu1  ;;  %v15729_v2 = vpop.f32.mrb[9].mxu0 }
 0x138   :  { %v15730_v5 = vadd.f32 %v15729_v2, %v15728_v63  ;;  %v15751_v6 = vpop.f32.mrb[9].mxu1  ;;  %v15731_v7 = vpop.f32.mrb[10].mxu0  ;;  %16031 = vmatpush3.bf16.msra.mxu0 %v17518_v4 }
 0x139   :  { %v15752_v8 = vadd.f32 %v15751_v6, %v15750_v1  ;;  %v15753_v9 = vpop.f32.mrb[10].mxu1  ;;  %v15732_v12 = vpop.f32.mrb[11].mxu0  ;;  %16053 = vmatpush3.bf16.msra.mxu1 %v17519_v11  ;;  %16032 = vmatprep.subr.bf16.mxu0 %v17520_v16  ;;  %v17551_v1 = vld [vmem:[%s22205_s1 + $0xaa8] sm:$0xff]   ;;  %v12398_v11 = vld [vmem:[%s22207_s2] ss:$0 sm:$0xff]  ;;  %v17554_v16 = vld [vmem:[%s22205_s1 + $0xa30] sm:$0xff]  }
 0x13a   :  { %v15733_v17 = vadd.f32 %v15732_v12, %v15731_v7  ;;  %v15754_v18 = vpop.f32.mrb[11].mxu1  ;;  %16054 = vmatprep.subr.bf16.mxu1 %v17521_v19  ;;  %v17552_v7 = vld [vmem:[%s22205_s1 + $0xa70] sm:$0xff]   ;;  %v17556_v19 = vld [vmem:[%s22205_s1 + $0xa78] sm:$0xff]  }
 0x13b   :  { %v19410_v20 = vadd.f32 %v15752_v8, %v15730_v5  ;;  %v15755_v21 = vadd.f32 %v15754_v18, %v15753_v9  ;;  %v17553_v9 = vld [vmem:[%s22205_s1 + $0xaf0] sm:$0xff]  }
 0x13c   :  { %16033 = vmatpush3.bf16.msra.mxu0 %v17522_v22 }
 0x13d   :  { %v19415_v23 = vadd.f32 %v15755_v21, %v15733_v17  ;;  %16055 = vmatpush3.bf16.msra.mxu1 %v17523_v24  ;;  %16034 = vmatprep.subr.bf16.mxu0 %v17524_v25  ;;  %v17555_v17 = vld [vmem:[%s22205_s1 + $0xab0] sm:$0xff]   ;;  %v17557_v21 = vld [vmem:[%s22205_s1 + $0xaf8] sm:$0xff]   ;;  %v743_v24 = vadd.f32 %v12398_v11, %v19305_v31  ;;  %v17562_v31 = vld [vmem:[%s22205_s1 + $0xb00] sm:$0xff]  }
 0x13e   :  { %16056 = vmatprep.subr.bf16.mxu1 %v17525_v26  ;;  %v17559_v25 = vld [vmem:[%s22205_s1 + $0xab8] sm:$0xff]  }
 0x13f   :  { %v17588_v11 = vld [vmem:[%s22205_s1 + $0xb78] sm:$0xff]  }
 0x140   :  { %16035 = vmatpush3.bf16.msra.mxu0 %v17526_v27  ;;  %v17560_v27 = vld [vmem:[%s22205_s1 + $0xb40] sm:$0xff]  }
 0x141   :  { %16057 = vmatpush3.bf16.msra.mxu1 %v17527_v28  ;;  %16064 = vmatprep.subr.bf16.mxu0 %v17528_v29  ;;  %v17561_v29 = vld [vmem:[%s22205_s1 + $0xbc0] sm:$0xff]  }
 0x142   :  { %16086 = vmatprep.subr.bf16.mxu1 %v17529_v30  ;;  %v17563_v30 = vld [vmem:[%s22205_s1 + $0xb80] sm:$0xff]  }
 0x143   :  { %3427 = vmatmul.mubr.bf16.vlgmr.msra.gmra.mrb[36].mxu0 %v18615_v13 }
 0x144   :  { %3468 = vmatmul.mubr.bf16.vlgmr.msra.gmra.mrb[36].mxu1 %v18619_v15  ;;  %16065 = vmatpush3.bf16.msra.mxu0 %v17530_v32  ;;  %v17564_v32 = vld [vmem:[%s22205_s1 + $0xb48] sm:$0xff]  }
 0x145   :  { %16087 = vmatpush3.bf16.msra.mxu1 %v17531_v33  ;;  %4029 = vmatprep.mubr.bf16.mxu0 %v18490_v35  ;;  %v17565_v33 = vld [vmem:[%s22205_s1 + $0xbc8] sm:$0xff]  }
 0x146   :  { %16066 = vmatprep.subr.bf16.mxu0 %v17532_v34  ;;  %4070 = vmatprep.mubr.bf16.mxu1 %v18497_v38  ;;  %v17566_v34 = vld [vmem:[%s22205_s1 + $0xb08] sm:$0xff]  }
 0x147   :  { %16088 = vmatprep.subr.bf16.mxu1 %v17533_v36  ;;  %v17567_v36 = vld [vmem:[%s22205_s1 + $0xb88] sm:$0xff]  }
 0x148   :  { %16067 = vmatpush3.bf16.msra.mxu0 %v17534_v40  ;;  %v17568_v40 = vld [vmem:[%s22205_s1 + $0xb50] sm:$0xff]  }
 0x149   :  { %16089 = vmatpush3.bf16.msra.mxu1 %v17535_v41  ;;  %16068 = vmatprep.subr.bf16.mxu0 %v17536_v42  ;;  %v17569_v41 = vld [vmem:[%s22205_s1 + $0xbd0] sm:$0xff]  }
 0x14a   :  { %16090 = vmatprep.subr.bf16.mxu1 %v17537_v43  ;;  %v17570_v42 = vld [vmem:[%s22205_s1 + $0xb10] sm:$0xff]  }
 0x14b   :  { %v17571_v43 = vld [vmem:[%s22205_s1 + $0xb90] sm:$0xff]  }
 0x14c   :  { %16069 = vmatpush3.bf16.msra.mxu0 %v17538_v44  ;;  %v17572_v44 = vld [vmem:[%s22205_s1 + $0xb58] sm:$0xff]  }
 0x14d   :  { %16091 = vmatpush3.bf16.msra.mxu1 %v17539_v45  ;;  %16070 = vmatprep.subr.bf16.mxu0 %v17540_v46  ;;  %v17573_v45 = vld [vmem:[%s22205_s1 + $0xbd8] sm:$0xff]  }
 0x14e   :  { %16092 = vmatprep.subr.bf16.mxu1 %v17541_v47  ;;  %v17574_v46 = vld [vmem:[%s22205_s1 + $0xb18] sm:$0xff]  }
 0x14f   :  { %v17575_v47 = vld [vmem:[%s22205_s1 + $0xb98] sm:$0xff]  }
 0x150   :  { %16071 = vmatpush3.bf16.msra.mxu0 %v17542_v48  ;;  %v17576_v48 = vld [vmem:[%s22205_s1 + $0xb60] sm:$0xff]  }
 0x151   :  { %16093 = vmatpush3.bf16.msra.mxu1 %v17543_v49  ;;  %16072 = vmatprep.subr.bf16.mxu0 %v17544_v50  ;;  %v17577_v49 = vld [vmem:[%s22205_s1 + $0xbe0] sm:$0xff]  }
 0x152   :  { %16094 = vmatprep.subr.bf16.mxu1 %v17545_v51  ;;  %v17578_v50 = vld [vmem:[%s22205_s1 + $0xb20] sm:$0xff]  }
 0x153   :  { %v17579_v51 = vld [vmem:[%s22205_s1 + $0xba0] sm:$0xff]  }
 0x154   :  { %16073 = vmatpush3.bf16.msra.mxu0 %v17546_v52 }
 0x155   :  { %16095 = vmatpush3.bf16.msra.mxu1 %v17547_v53  ;;  %16074 = vmatprep.subr.bf16.mxu0 %v17548_v55  ;;  %v17580_v55 = vld [vmem:[%s22205_s1 + $0xb68] sm:$0xff]  }
 0x156   :  { %v15772_v54 = vpop.f32.mrb[12].mxu0  ;;  %16096 = vmatprep.subr.bf16.mxu1 %v17549_v58 }
 0x157   :  { %v15794_v56 = vpop.f32.mrb[12].mxu1  ;;  %v15773_v57 = vpop.f32.mrb[13].mxu0 }
 0x158   :  { %v15774_v60 = vadd.f32 %v15773_v57, %v15772_v54  ;;  %v15795_v61 = vpop.f32.mrb[13].mxu1  ;;  %v15775_v62 = vpop.f32.mrb[14].mxu0  ;;  %16075 = vmatpush3.bf16.msra.mxu0 %v17550_v59 }
 0x159   :  { %v15796_v63 = vadd.f32 %v15795_v61, %v15794_v56  ;;  %v15797_v0 = vpop.f32.mrb[14].mxu1  ;;  %v15776_v3 = vpop.f32.mrb[15].mxu0  ;;  %16097 = vmatpush3.bf16.msra.mxu1 %v17551_v1  ;;  %16076 = vmatprep.subr.bf16.mxu0 %v17552_v7  ;;  %v17581_v56 = vld [vmem:[%s22205_s1 + $0xbe8] sm:$0xff]  }
 0x15a   :  { %v1374_v2 = vadd.f32 %v15774_v60, %v19410_v20  ;;  %v15798_v4 = vpop.f32.mrb[15].mxu1  ;;  %v15777_v5 = vadd.f32 %v15776_v3, %v15775_v62  ;;  %16098 = vmatprep.subr.bf16.mxu1 %v17553_v9  ;;  %v17582_v62 = vld [vmem:[%s22205_s1 + $0xb28] sm:$0xff]   ;;  %v17587_v9 = vld [vmem:[%s22205_s1 + $0xbb0] sm:$0xff]  }
 0x15b   :  { %v15799_v6 = vadd.f32 %v15798_v4, %v15797_v0 }
 0x15c   :  { %v1415_v8 = vadd.f32 %v15796_v63, %v1374_v2  ;;  %v1377_v12 = vadd.f32 %v15777_v5, %v19415_v23  ;;  %16077 = vmatpush3.bf16.msra.mxu0 %v17554_v16  ;;  %v17558_v23 = vld [vmem:[%s22205_s1 + $0xa38] sm:$0xff]   ;;  %v17583_v63 = vld [vmem:[%s22205_s1 + $0xba8] sm:$0xff]   ;;  %v17584_v2 = vld [vmem:[%s22205_s1 + $0xb70] sm:$0xff]  }
 0x15d   :  { %16099 = vmatpush3.bf16.msra.mxu1 %v17555_v17  ;;  %16078 = vmatprep.subr.bf16.mxu0 %v17556_v19  ;;  %v17590_v16 = vld [vmem:[%s22205_s1 + $0xb38] sm:$0xff]   ;;  %v17593_v19 = vld [vmem:[%s22205_s1 + $0xcc0] sm:$0xff]  }
 0x15e   :  { %v1418_v18 = vadd.f32 %v15799_v6, %v1377_v12  ;;  %v1424_v20 = vrot.slane %v1415_v8, 1  ;;  %16100 = vmatprep.subr.bf16.mxu1 %v17557_v21  ;;  %v17585_v6 = vld [vmem:[%s22205_s1 + $0xbf0] sm:$0xff]   ;;  %v17589_v12 = vld [vmem:[%s22205_s1 + $0xbf8] sm:$0xff]   ;;  %v17595_v21 = vld [vmem:[%s22205_s1 + $0xc80] sm:$0xff]  }
 0x15f   :  { %v17586_v8 = vld [vmem:[%s22205_s1 + $0xb30] sm:$0xff]   ;;  %v17591_v17 = vld [vmem:[%s22205_s1 + $0xbb8] sm:$0xff]  }
 0x160   :  { %v1425_v22 = vrot.slane %v1418_v18, 1  ;;  %16079 = vmatpush3.bf16.msra.mxu0 %v17558_v23  ;;  %v17592_v18 = vld [vmem:[%s22205_s1 + $0xc40] sm:$0xff]   ;;  %v17597_v23 = vld [vmem:[%s22205_s1 + $0xcc8] sm:$0xff]  }
 0x161   :  { %16101 = vmatpush3.bf16.msra.mxu1 %v17559_v25  ;;  %16108 = vmatprep.subr.bf16.mxu0 %v17560_v27  ;;  %v17599_v25 = vld [vmem:[%s22205_s1 + $0xc88] sm:$0xff]   ;;  %v17601_v27 = vld [vmem:[%s22205_s1 + $0xcd0] sm:$0xff]  }
 0x162   :  { %v1426_v26 = vsel %vm1423_vm0, %v1424_v20, %v1425_v22  ;;  %16130 = vmatprep.subr.bf16.mxu1 %v17561_v29  ;;  %v17594_v20 = vld [vmem:[%s22205_s1 + $0xc00] sm:$0xff]   ;;  %v17596_v22 = vld [vmem:[%s22205_s1 + $0xc48] sm:$0xff]   ;;  %v17602_v29 = vld [vmem:[%s22205_s1 + $0xc10] sm:$0xff]  }
 0x163   :  { %v19542_v28 = vadd.f32 %v1426_v26, %v743_v24  ;;  %4030 = vmatmul.mubr.bf16.vlgmr.msra.gmra.mrb[40].mxu0 %v18495_v37  ;;  %v17598_v24 = vld [vmem:[%s22205_s1 + $0xc08] sm:$0xff]   ;;  %v17600_v26 = vld [vmem:[%s22205_s1 + $0xc50] sm:$0xff]  }
 0x164   :  { %4071 = vmatmul.mubr.bf16.vlgmr.msra.gmra.mrb[40].mxu1 %v18499_v39  ;;  %16109 = vmatpush3.bf16.msra.mxu0 %v17562_v31  ;;  %v17603_v31 = vld [vmem:[%s22205_s1 + $0xc90] sm:$0xff]  }
 0x165   :  { %16131 = vmatpush3.bf16.msra.mxu1 %v17563_v30  ;;  %4111 = vmatprep.mubr.bf16.mxu0 %v18607_v10  ;;  %v17604_v30 = vld [vmem:[%s22205_s1 + $0xc58] sm:$0xff]  }
 0x166   :  { %16110 = vmatprep.subr.bf16.mxu0 %v17564_v32  ;;  %4152 = vmatprep.mubr.bf16.mxu1 %v18617_v14  ;;  %v17605_v32 = vld [vmem:[%s22205_s1 + $0xcd8] sm:$0xff]  }
 0x167   :  { %16132 = vmatprep.subr.bf16.mxu1 %v17565_v33  ;;  %v17606_v33 = vld [vmem:[%s22205_s1 + $0xc18] sm:$0xff]  }
 0x168   :  { %16111 = vmatpush3.bf16.msra.mxu0 %v17566_v34  ;;  %v17607_v34 = vld [vmem:[%s22205_s1 + $0xc98] sm:$0xff]  }
 0x169   :  { %16133 = vmatpush3.bf16.msra.mxu1 %v17567_v36  ;;  %16112 = vmatprep.subr.bf16.mxu0 %v17568_v40  ;;  %v17608_v36 = vld [vmem:[%s22205_s1 + $0xc60] sm:$0xff]  }
 0x16a   :  { %16134 = vmatprep.subr.bf16.mxu1 %v17569_v41  ;;  %v17609_v40 = vld [vmem:[%s22205_s1 + $0xce0] sm:$0xff]  }
 0x16b   :  { %v17610_v41 = vld [vmem:[%s22205_s1 + $0xc20] sm:$0xff]  }
 0x16c   :  { %16113 = vmatpush3.bf16.msra.mxu0 %v17570_v42  ;;  %v17611_v42 = vld [vmem:[%s22205_s1 + $0xca0] sm:$0xff]  }
 0x16d   :  { %16135 = vmatpush3.bf16.msra.mxu1 %v17571_v43  ;;  %16114 = vmatprep.subr.bf16.mxu0 %v17572_v44 }
 0x16e   :  { %16136 = vmatprep.subr.bf16.mxu1 %v17573_v45 }
 0x170   :  { %16115 = vmatpush3.bf16.msra.mxu0 %v17574_v46  ;;  %v17612_v46 = vld [vmem:[%s22205_s1 + $0xc68] sm:$0xff]  }
 0x171   :  { %16137 = vmatpush3.bf16.msra.mxu1 %v17575_v47  ;;  %16116 = vmatprep.subr.bf16.mxu0 %v17576_v48  ;;  %v17613_v47 = vld [vmem:[%s22205_s1 + $0xce8] sm:$0xff]  }
 0x172   :  { %16138 = vmatprep.subr.bf16.mxu1 %v17577_v49 }
 0x174   :  { %16117 = vmatpush3.bf16.msra.mxu0 %v17578_v50 }
 0x175   :  { %16139 = vmatpush3.bf16.msra.mxu1 %v17579_v51  ;;  %16118 = vmatprep.subr.bf16.mxu0 %v17580_v55  ;;  %v17615_v55 = vld [vmem:[%s22205_s1 + $0xca8] sm:$0xff]  }
 0x176   :  { %v15816_v52 = vpop.f32.mrb[16].mxu0  ;;  %16140 = vmatprep.subr.bf16.mxu1 %v17581_v56 }
 0x177   :  { %v15838_v53 = vpop.f32.mrb[16].mxu1  ;;  %v15817_v54 = vpop.f32.mrb[17].mxu0 }
 0x178   :  { %v15818_v57 = vadd.f32 %v15817_v54, %v15816_v52  ;;  %v15839_v58 = vpop.f32.mrb[17].mxu1  ;;  %v15819_v59 = vpop.f32.mrb[18].mxu0  ;;  %16119 = vmatpush3.bf16.msra.mxu0 %v17582_v62  ;;  %v17617_v62 = vld [vmem:[%s22205_s1 + $0xcf0] sm:$0xff]  }
 0x179   :  { %v15840_v60 = vadd.f32 %v15839_v58, %v15838_v53  ;;  %v15841_v61 = vpop.f32.mrb[18].mxu1  ;;  %v15820_v0 = vpop.f32.mrb[19].mxu0  ;;  %16141 = vmatpush3.bf16.msra.mxu1 %v17583_v63  ;;  %16120 = vmatprep.subr.bf16.mxu0 %v17584_v2  ;;  %v17614_v53 = vld [vmem:[%s22205_s1 + $0xc28] sm:$0xff]  }
 0x17a   :  { %v15842_v1 = vpop.f32.mrb[19].mxu1  ;;  %v15821_v4 = vadd.f32 %v15820_v0, %v15819_v59  ;;  %16142 = vmatprep.subr.bf16.mxu1 %v17585_v6  ;;  %v17616_v59 = vld [vmem:[%s22205_s1 + $0xc70] sm:$0xff]  }
 0x17b   :  { %v19620_v3 = vadd.f32 %v15840_v60, %v15818_v57  ;;  %v15843_v5 = vadd.f32 %v15842_v1, %v15841_v61  ;;  %v17618_v0 = vld [vmem:[%s22205_s1 + $0xc30] sm:$0xff]  }
 0x17c   :  { %16121 = vmatpush3.bf16.msra.mxu0 %v17586_v8  ;;  %v17619_v1 = vld [vmem:[%s22205_s1 + $0xcb0] sm:$0xff]   ;;  %v17623_v8 = vld [vmem:[%s22205_s1 + $0xcb8] sm:$0xff]  }
 0x17d   :  { %v19625_v7 = vadd.f32 %v15843_v5, %v15821_v4  ;;  %16143 = vmatpush3.bf16.msra.mxu1 %v17587_v9  ;;  %16122 = vmatprep.subr.bf16.mxu0 %v17588_v11  ;;  %v17621_v5 = vld [vmem:[%s22205_s1 + $0xcf8] sm:$0xff]   ;;  %v17624_v11 = vld [vmem:[%s22205_s1 + $0xd40] sm:$0xff]  }
 0x17e   :  { %16144 = vmatprep.subr.bf16.mxu1 %v17589_v12 }
 0x180   :  { %16123 = vmatpush3.bf16.msra.mxu0 %v17590_v16  ;;  %v17625_v16 = vld [vmem:[%s22205_s1 + $0xdc0] sm:$0xff]  }
 0x181   :  { %16145 = vmatpush3.bf16.msra.mxu1 %v17591_v17  ;;  %16152 = vmatprep.subr.bf16.mxu0 %v17592_v18  ;;  %v17626_v17 = vld [vmem:[%s22205_s1 + $0xd00] sm:$0xff]  }
 0x182   :  { %16174 = vmatprep.subr.bf16.mxu1 %v17593_v19  ;;  %v17627_v18 = vld [vmem:[%s22205_s1 + $0xd80] sm:$0xff]   ;;  %v17629_v19 = vld [vmem:[%s22205_s1 + $0xdc8] sm:$0xff]  }
 0x183   :  { %4112 = vmatmul.mubr.bf16.vlgmr.msra.gmra.mrb[44].mxu0 %v18615_v13 }
 0x184   :  { %4153 = vmatmul.mubr.bf16.vlgmr.msra.gmra.mrb[44].mxu1 %v18619_v15  ;;  %16153 = vmatpush3.bf16.msra.mxu0 %v17594_v20  ;;  %v17630_v20 = vld [vmem:[%s22205_s1 + $0xd08] sm:$0xff]  }
 0x185   :  { %16175 = vmatpush3.bf16.msra.mxu1 %v17595_v21  ;;  %4714 = vmatprep.mubr.bf16.mxu0 %v18490_v35  ;;  %v17631_v21 = vld [vmem:[%s22205_s1 + $0xd88] sm:$0xff]  }
 0x186   :  { %16154 = vmatprep.subr.bf16.mxu0 %v17596_v22  ;;  %4755 = vmatprep.mubr.bf16.mxu1 %v18497_v38  ;;  %v17632_v22 = vld [vmem:[%s22205_s1 + $0xd50] sm:$0xff]  }
 0x187   :  { %16176 = vmatprep.subr.bf16.mxu1 %v17597_v23  ;;  %v17633_v23 = vld [vmem:[%s22205_s1 + $0xdd0] sm:$0xff]  }
 0x188   :  { %16155 = vmatpush3.bf16.msra.mxu0 %v17598_v24  ;;  %v17634_v24 = vld [vmem:[%s22205_s1 + $0xd10] sm:$0xff]  }
 0x189   :  { %16177 = vmatpush3.bf16.msra.mxu1 %v17599_v25  ;;  %16156 = vmatprep.subr.bf16.mxu0 %v17600_v26  ;;  %v17635_v25 = vld [vmem:[%s22205_s1 + $0xd90] sm:$0xff]   ;;  %v17636_v26 = vld [vmem:[%s22205_s1 + $0xd58] sm:$0xff]  }
 0x18a   :  { %16178 = vmatprep.subr.bf16.mxu1 %v17601_v27  ;;  %v17637_v27 = vld [vmem:[%s22205_s1 + $0xdd8] sm:$0xff]  }
 0x18c   :  { %16157 = vmatpush3.bf16.msra.mxu0 %v17602_v29  ;;  %v17638_v29 = vld [vmem:[%s22205_s1 + $0xd18] sm:$0xff]  }
 0x18d   :  { %16179 = vmatpush3.bf16.msra.mxu1 %v17603_v31  ;;  %16158 = vmatprep.subr.bf16.mxu0 %v17604_v30  ;;  %v17639_v31 = vld [vmem:[%s22205_s1 + $0xd98] sm:$0xff]   ;;  %v17640_v30 = vld [vmem:[%s22205_s1 + $0xd60] sm:$0xff]  }
 0x18e   :  { %16180 = vmatprep.subr.bf16.mxu1 %v17605_v32  ;;  %v17641_v32 = vld [vmem:[%s22205_s1 + $0xde0] sm:$0xff]  }
 0x190   :  { %16159 = vmatpush3.bf16.msra.mxu0 %v17606_v33  ;;  %v17642_v33 = vld [vmem:[%s22205_s1 + $0xd20] sm:$0xff]  }
 0x191   :  { %16181 = vmatpush3.bf16.msra.mxu1 %v17607_v34  ;;  %16160 = vmatprep.subr.bf16.mxu0 %v17608_v36  ;;  %v17643_v34 = vld [vmem:[%s22205_s1 + $0xda0] sm:$0xff]  }
 0x192   :  { %16182 = vmatprep.subr.bf16.mxu1 %v17609_v40 }
 0x194   :  { %16161 = vmatpush3.bf16.msra.mxu0 %v17610_v41 }
 0x195   :  { %16183 = vmatpush3.bf16.msra.mxu1 %v17611_v42  ;;  %16162 = vmatprep.subr.bf16.mxu0 %v17612_v46  ;;  %v17645_v46 = vld [vmem:[%s22205_s1 + $0xde8] sm:$0xff]  }
 0x196   :  { %v15860_v43 = vpop.f32.mrb[20].mxu0  ;;  %16184 = vmatprep.subr.bf16.mxu1 %v17613_v47 }
 0x197   :  { %v15882_v44 = vpop.f32.mrb[20].mxu1  ;;  %v15861_v45 = vpop.f32.mrb[21].mxu0 }
 0x198   :  { %v15862_v48 = vadd.f32 %v15861_v45, %v15860_v43  ;;  %v15883_v49 = vpop.f32.mrb[21].mxu1  ;;  %v15863_v50 = vpop.f32.mrb[22].mxu0  ;;  %16163 = vmatpush3.bf16.msra.mxu0 %v17614_v53 }
 0x199   :  { %v15884_v51 = vadd.f32 %v15883_v49, %v15882_v44  ;;  %v15885_v52 = vpop.f32.mrb[22].mxu1  ;;  %v15864_v56 = vpop.f32.mrb[23].mxu0  ;;  %16185 = vmatpush3.bf16.msra.mxu1 %v17615_v55  ;;  %16164 = vmatprep.subr.bf16.mxu0 %v17616_v59  ;;  %v17644_v44 = vld [vmem:[%s22205_s1 + $0xd68] sm:$0xff]   ;;  %v17650_v59 = vld [vmem:[%s22205_s1 + $0xd30] sm:$0xff]  }
 0x19a   :  { %v2059_v54 = vadd.f32 %v15862_v48, %v19620_v3  ;;  %v15865_v57 = vadd.f32 %v15864_v56, %v15863_v50  ;;  %v15886_v58 = vpop.f32.mrb[23].mxu1  ;;  %16186 = vmatprep.subr.bf16.mxu1 %v17617_v62  ;;  %v17620_v3 = vld [vmem:[%s22205_s1 + $0xc78] sm:$0xff]   ;;  %v17646_v49 = vld [vmem:[%s22205_s1 + $0xd28] sm:$0xff]  }
 0x19b   :  { %v15887_v61 = vadd.f32 %v15886_v58, %v15885_v52  ;;  %v17653_v62 = vld [vmem:[%s22205_s1 + $0xdf8] sm:$0xff]  }
 0x19c   :  { %v2100_v60 = vadd.f32 %v15884_v51, %v2059_v54  ;;  %v2062_v63 = vadd.f32 %v15865_v57, %v19625_v7  ;;  %16165 = vmatpush3.bf16.msra.mxu0 %v17618_v0  ;;  %v17622_v7 = vld [vmem:[%s22205_s1 + $0xc38] sm:$0xff]   ;;  %v17647_v51 = vld [vmem:[%s22205_s1 + $0xda8] sm:$0xff]   ;;  %v17648_v54 = vld [vmem:[%s22205_s1 + $0xd70] sm:$0xff]  }
 0x19d   :  { %16187 = vmatpush3.bf16.msra.mxu1 %v17619_v1  ;;  %16166 = vmatprep.subr.bf16.mxu0 %v17620_v3  ;;  %v17649_v57 = vld [vmem:[%s22205_s1 + $0xdf0] sm:$0xff]   ;;  %v17655_v0 = vld [vmem:[%s22205_s1 + $0xdb8] sm:$0xff]   ;;  %v17656_v1 = vld [vmem:[%s22205_s1 + $0xe40] sm:$0xff]  }
 0x19e   :  { %v2103_v2 = vadd.f32 %v15887_v61, %v2062_v63  ;;  %v2109_v4 = vrot.slane %v2100_v60, 2  ;;  %16188 = vmatprep.subr.bf16.mxu1 %v17621_v5  ;;  %v17651_v60 = vld [vmem:[%s22205_s1 + $0xdb0] sm:$0xff]   ;;  %v17652_v61 = vld [vmem:[%s22205_s1 + $0xd78] sm:$0xff]   ;;  %v17658_v3 = vld [vmem:[%s22205_s1 + $0xe00] sm:$0xff]  }
 0x19f   :  { %v17654_v63 = vld [vmem:[%s22205_s1 + $0xd38] sm:$0xff]   ;;  %v17660_v5 = vld [vmem:[%s22205_s1 + $0xe48] sm:$0xff]  }
 0x1a0   :  { %v2110_v6 = vrot.slane %v2103_v2, 2  ;;  %16167 = vmatpush3.bf16.msra.mxu0 %v17622_v7  ;;  %v17657_v2 = vld [vmem:[%s22205_s1 + $0xec0] sm:$0xff]   ;;  %v17662_v7 = vld [vmem:[%s22205_s1 + $0xe08] sm:$0xff]  }
 0x1a1   :  { %16189 = vmatpush3.bf16.msra.mxu1 %v17623_v8  ;;  %16196 = vmatprep.subr.bf16.mxu0 %v17624_v11  ;;  %v17663_v8 = vld [vmem:[%s22205_s1 + $0xe88] sm:$0xff]   ;;  %v17665_v11 = vld [vmem:[%s22205_s1 + $0xed0] sm:$0xff]  }
 0x1a2   :  { %v2111_v9 = vsel %vm2108_vm1, %v2109_v4, %v2110_v6  ;;  %16218 = vmatprep.subr.bf16.mxu1 %v17625_v16  ;;  %v17659_v4 = vld [vmem:[%s22205_s1 + $0xe80] sm:$0xff]   ;;  %v17661_v6 = vld [vmem:[%s22205_s1 + $0xec8] sm:$0xff]   ;;  %v17666_v16 = vld [vmem:[%s22205_s1 + $0xe10] sm:$0xff]  }
 0x1a3   :  { %v19752_v12 = vadd.f32 %v2111_v9, %v19542_v28  ;;  %4715 = vmatmul.mubr.bf16.vlgmr.msra.gmra.mrb[48].mxu0 %v18495_v37  ;;  %v17628_v28 = vld [vmem:[%s22205_s1 + $0xd48] sm:$0xff]   ;;  %v17664_v9 = vld [vmem:[%s22205_s1 + $0xe50] sm:$0xff]  }
 0x1a4   :  { %4756 = vmatmul.mubr.bf16.vlgmr.msra.gmra.mrb[48].mxu1 %v18499_v39  ;;  %16197 = vmatpush3.bf16.msra.mxu0 %v17626_v17  ;;  %v17667_v17 = vld [vmem:[%s22205_s1 + $0xe90] sm:$0xff]  }
 0x1a5   :  { %16219 = vmatpush3.bf16.msra.mxu1 %v17627_v18  ;;  %4796 = vmatprep.mubr.bf16.mxu0 %v18607_v10  ;;  %v17668_v18 = vld [vmem:[%s22205_s1 + $0xe58] sm:$0xff]  }
 0x1a6   :  { %16198 = vmatprep.subr.bf16.mxu0 %v17628_v28  ;;  %4837 = vmatprep.mubr.bf16.mxu1 %v18617_v14  ;;  %v17669_v28 = vld [vmem:[%s22205_s1 + $0xed8] sm:$0xff]  }
 0x1a7   :  { %16220 = vmatprep.subr.bf16.mxu1 %v17629_v19  ;;  %v17670_v19 = vld [vmem:[%s22205_s1 + $0xe18] sm:$0xff]  }
 0x1a8   :  { %16199 = vmatpush3.bf16.msra.mxu0 %v17630_v20  ;;  %v17671_v20 = vld [vmem:[%s22205_s1 + $0xe98] sm:$0xff]  }
 0x1a9   :  { %16221 = vmatpush3.bf16.msra.mxu1 %v17631_v21  ;;  %16200 = vmatprep.subr.bf16.mxu0 %v17632_v22  ;;  %v17672_v21 = vld [vmem:[%s22205_s1 + $0xe60] sm:$0xff]  }
 0x1aa   :  { %16222 = vmatprep.subr.bf16.mxu1 %v17633_v23  ;;  %v17673_v22 = vld [vmem:[%s22205_s1 + $0xee0] sm:$0xff]  }
 0x1ab   :  { %v17674_v23 = vld [vmem:[%s22205_s1 + $0xe20] sm:$0xff]  }
 0x1ac   :  { %16201 = vmatpush3.bf16.msra.mxu0 %v17634_v24  ;;  %v17675_v24 = vld [vmem:[%s22205_s1 + $0xea0] sm:$0xff]  }
 0x1ad   :  { %16223 = vmatpush3.bf16.msra.mxu1 %v17635_v25  ;;  %16202 = vmatprep.subr.bf16.mxu0 %v17636_v26 }
 0x1ae   :  { %16224 = vmatprep.subr.bf16.mxu1 %v17637_v27 }
 0x1b0   :  { %16203 = vmatpush3.bf16.msra.mxu0 %v17638_v29  ;;  %v17676_v29 = vld [vmem:[%s22205_s1 + $0xe68] sm:$0xff]  }
 0x1b1   :  { %16225 = vmatpush3.bf16.msra.mxu1 %v17639_v31  ;;  %16204 = vmatprep.subr.bf16.mxu0 %v17640_v30  ;;  %v17677_v31 = vld [vmem:[%s22205_s1 + $0xee8] sm:$0xff]  }
 0x1b2   :  { %16226 = vmatprep.subr.bf16.mxu1 %v17641_v32 }
 0x1b4   :  { %16205 = vmatpush3.bf16.msra.mxu0 %v17642_v33 }
 0x1b5   :  { %16227 = vmatpush3.bf16.msra.mxu1 %v17643_v34  ;;  %16206 = vmatprep.subr.bf16.mxu0 %v17644_v44 }
 0x1b6   :  { %v15904_v36 = vpop.f32.mrb[24].mxu0  ;;  %16228 = vmatprep.subr.bf16.mxu1 %v17645_v46 }
 0x1b7   :  { %v15926_v40 = vpop.f32.mrb[24].mxu1  ;;  %v15905_v41 = vpop.f32.mrb[25].mxu0 }
 0x1b8   :  { %v15906_v42 = vadd.f32 %v15905_v41, %v15904_v36  ;;  %v15927_v43 = vpop.f32.mrb[25].mxu1  ;;  %v15907_v47 = vpop.f32.mrb[26].mxu0  ;;  %16207 = vmatpush3.bf16.msra.mxu0 %v17646_v49  ;;  %v17681_v49 = vld [vmem:[%s22205_s1 + $0xef0] sm:$0xff]  }
 0x1b9   :  { %v15928_v45 = vadd.f32 %v15927_v43, %v15926_v40  ;;  %v15929_v48 = vpop.f32.mrb[26].mxu1  ;;  %v15908_v52 = vpop.f32.mrb[27].mxu0  ;;  %16229 = vmatpush3.bf16.msra.mxu1 %v17647_v51  ;;  %16208 = vmatprep.subr.bf16.mxu0 %v17648_v54  ;;  %v17678_v40 = vld [vmem:[%s22205_s1 + $0xe28] sm:$0xff]   ;;  %v17682_v51 = vld [vmem:[%s22205_s1 + $0xe30] sm:$0xff]   ;;  %v17684_v54 = vld [vmem:[%s22205_s1 + $0xe78] sm:$0xff]  }
 0x1ba   :  { %v15930_v53 = vpop.f32.mrb[27].mxu1  ;;  %v15909_v55 = vadd.f32 %v15908_v52, %v15907_v47  ;;  %16230 = vmatprep.subr.bf16.mxu1 %v17649_v57  ;;  %v17683_v52 = vld [vmem:[%s22205_s1 + $0xeb0] sm:$0xff]  }
 0x1bb   :  { %v19824_v50 = vadd.f32 %v15928_v45, %v15906_v42  ;;  %v15931_v56 = vadd.f32 %v15930_v53, %v15929_v48  ;;  %v17679_v42 = vld [vmem:[%s22205_s1 + $0xea8] sm:$0xff]   ;;  %v17680_v45 = vld [vmem:[%s22205_s1 + $0xe70] sm:$0xff]  }
 0x1bc   :  { %16209 = vmatpush3.bf16.msra.mxu0 %v17650_v59  ;;  %v17687_v59 = vld [vmem:[%s22205_s1 + $0xeb8] sm:$0xff]  }
 0x1bd   :  { %v19835_v58 = vadd.f32 %v15931_v56, %v15909_v55  ;;  %16231 = vmatpush3.bf16.msra.mxu1 %v17651_v60  ;;  %16210 = vmatprep.subr.bf16.mxu0 %v17652_v61  ;;  %v17685_v56 = vld [vmem:[%s22205_s1 + $0xef8] sm:$0xff]   ;;  %v17688_v61 = vld [vmem:[%s22205_s1 + $0xf40] sm:$0xff]  }
 0x1be   :  { %16232 = vmatprep.subr.bf16.mxu1 %v17653_v62 }
 0x1c0   :  { %16211 = vmatpush3.bf16.msra.mxu0 %v17654_v63  ;;  %v17689_v63 = vld [vmem:[%s22205_s1 + $0xfc0] sm:$0xff]  }
 0x1c1   :  { %16233 = vmatpush3.bf16.msra.mxu1 %v17655_v0  ;;  %16240 = vmatprep.subr.bf16.mxu0 %v17656_v1  ;;  %v17690_v0 = vld [vmem:[%s22205_s1 + $0xf00] sm:$0xff]  }
 0x1c2   :  { %16262 = vmatprep.subr.bf16.mxu1 %v17657_v2  ;;  %v17691_v1 = vld [vmem:[%s22205_s1 + $0xf80] sm:$0xff]   ;;  %v17693_v2 = vld [vmem:[%s22205_s1 + $0xfc8] sm:$0xff]  }
 0x1c3   :  { %4797 = vmatmul.mubr.bf16.vlgmr.msra.gmra.mrb[52].mxu0 %v18615_v13 }
 0x1c4   :  { %4838 = vmatmul.mubr.bf16.vlgmr.msra.gmra.mrb[52].mxu1 %v18619_v15  ;;  %16241 = vmatpush3.bf16.msra.mxu0 %v17658_v3  ;;  %v17694_v3 = vld [vmem:[%s22205_s1 + $0xf08] sm:$0xff]  }
 0x1c5   :  { %16263 = vmatpush3.bf16.msra.mxu1 %v17659_v4  ;;  %5399 = vmatprep.mubr.bf16.mxu0 %v18490_v35  ;;  %v17695_v4 = vld [vmem:[%s22205_s1 + $0xf88] sm:$0xff]  }
 0x1c6   :  { %16242 = vmatprep.subr.bf16.mxu0 %v17660_v5  ;;  %5440 = vmatprep.mubr.bf16.mxu1 %v18497_v38  ;;  %v17696_v5 = vld [vmem:[%s22205_s1 + $0xf50] sm:$0xff]  }
 0x1c7   :  { %16264 = vmatprep.subr.bf16.mxu1 %v17661_v6  ;;  %v17697_v6 = vld [vmem:[%s22205_s1 + $0xfd0] sm:$0xff]  }
 0x1c8   :  { %16243 = vmatpush3.bf16.msra.mxu0 %v17662_v7  ;;  %v17698_v7 = vld [vmem:[%s22205_s1 + $0xf10] sm:$0xff]  }
 0x1c9   :  { %16265 = vmatpush3.bf16.msra.mxu1 %v17663_v8  ;;  %16244 = vmatprep.subr.bf16.mxu0 %v17664_v9  ;;  %v17699_v8 = vld [vmem:[%s22205_s1 + $0xf90] sm:$0xff]   ;;  %v17700_v9 = vld [vmem:[%s22205_s1 + $0xf58] sm:$0xff]  }
 0x1ca   :  { %16266 = vmatprep.subr.bf16.mxu1 %v17665_v11  ;;  %v17701_v11 = vld [vmem:[%s22205_s1 + $0xfd8] sm:$0xff]  }
 0x1cc   :  { %16245 = vmatpush3.bf16.msra.mxu0 %v17666_v16  ;;  %v17702_v16 = vld [vmem:[%s22205_s1 + $0xf18] sm:$0xff]  }
 0x1cd   :  { %16267 = vmatpush3.bf16.msra.mxu1 %v17667_v17  ;;  %16246 = vmatprep.subr.bf16.mxu0 %v17668_v18  ;;  %v17703_v17 = vld [vmem:[%s22205_s1 + $0xf98] sm:$0xff]   ;;  %v17704_v18 = vld [vmem:[%s22205_s1 + $0xf60] sm:$0xff]  }
 0x1ce   :  { %16268 = vmatprep.subr.bf16.mxu1 %v17669_v28  ;;  %v17705_v28 = vld [vmem:[%s22205_s1 + $0xfe0] sm:$0xff]  }
 0x1d0   :  { %16247 = vmatpush3.bf16.msra.mxu0 %v17670_v19  ;;  %v17706_v19 = vld [vmem:[%s22205_s1 + $0xf20] sm:$0xff]  }
 0x1d1   :  { %16269 = vmatpush3.bf16.msra.mxu1 %v17671_v20  ;;  %16248 = vmatprep.subr.bf16.mxu0 %v17672_v21  ;;  %v17707_v20 = vld [vmem:[%s22205_s1 + $0xfa0] sm:$0xff]  }
 0x1d2   :  { %16270 = vmatprep.subr.bf16.mxu1 %v17673_v22  ;;  %v17708_v22 = vld [vmem:[%s22205_s1 + $0xf68] sm:$0xff]  }
 0x1d4   :  { %16249 = vmatpush3.bf16.msra.mxu0 %v17674_v23 }
 0x1d5   :  { %16271 = vmatpush3.bf16.msra.mxu1 %v17675_v24  ;;  %16250 = vmatprep.subr.bf16.mxu0 %v17676_v29 }
 0x1d6   :  { %v15948_v25 = vpop.f32.mrb[28].mxu0  ;;  %16272 = vmatprep.subr.bf16.mxu1 %v17677_v31 }
 0x1d7   :  { %v15970_v26 = vpop.f32.mrb[28].mxu1  ;;  %v15949_v27 = vpop.f32.mrb[29].mxu0 }
 0x1d8   :  { %v15950_v30 = vadd.f32 %v15949_v27, %v15948_v25  ;;  %v15971_v32 = vpop.f32.mrb[29].mxu1  ;;  %v15951_v33 = vpop.f32.mrb[30].mxu0  ;;  %16251 = vmatpush3.bf16.msra.mxu0 %v17678_v40  ;;  %v17709_v25 = vld [vmem:[%s22205_s1 + $0xfe8] sm:$0xff]  }
 0x1d9   :  { %v15972_v34 = vadd.f32 %v15971_v32, %v15970_v26  ;;  %v15973_v36 = vpop.f32.mrb[30].mxu1  ;;  %v15952_v43 = vpop.f32.mrb[31].mxu0  ;;  %16273 = vmatpush3.bf16.msra.mxu1 %v17679_v42  ;;  %16252 = vmatprep.subr.bf16.mxu0 %v17680_v45  ;;  %v17710_v26 = vld [vmem:[%s22205_s1 + $0xf28] sm:$0xff]  }
 0x1da   :  { %v2744_v41 = vadd.f32 %v15950_v30, %v19824_v50  ;;  %v15974_v44 = vpop.f32.mrb[31].mxu1  ;;  %v15953_v46 = vadd.f32 %v15952_v43, %v15951_v33  ;;  %16274 = vmatprep.subr.bf16.mxu1 %v17681_v49  ;;  %v17711_v33 = vld [vmem:[%s22205_s1 + $0xfa8] sm:$0xff]   ;;  %v17712_v43 = vld [vmem:[%s22205_s1 + $0xf70] sm:$0xff]   ;;  %v17717_v49 = vld [vmem:[%s22205_s1 + $0xff8] sm:$0xff]  }
 0x1db   :  { %v15975_v47 = vadd.f32 %v15974_v44, %v15973_v36  ;;  %v17713_v44 = vld [vmem:[%s22205_s1 + $0xff0] sm:$0xff]  }
 0x1dc   :  { %v2785_v48 = vadd.f32 %v15972_v34, %v2744_v41  ;;  %v2747_v50 = vadd.f32 %v15953_v46, %v19835_v58  ;;  %16253 = vmatpush3.bf16.msra.mxu0 %v17682_v51  ;;  %v17686_v58 = vld [vmem:[%s22205_s1 + $0xe38] sm:$0xff]   ;;  %v17714_v46 = vld [vmem:[%s22205_s1 + $0xf30] sm:$0xff]  }
 0x1dd   :  { %16275 = vmatpush3.bf16.msra.mxu1 %v17683_v52  ;;  %16254 = vmatprep.subr.bf16.mxu0 %v17684_v54  ;;  %v17719_v51 = vld [vmem:[%s22205_s1 + $0xfb8] sm:$0xff]   ;;  %v17720_v52 = vld [vmem:[%s22205_s1 + $0x1040] sm:$0xff]  }
 0x1de   :  { %v2788_v53 = vadd.f32 %v15975_v47, %v2747_v50  ;;  %v2794_v55 = vrot.slane %v2785_v48, 3  ;;  %16276 = vmatprep.subr.bf16.mxu1 %v17685_v56  ;;  %v17715_v47 = vld [vmem:[%s22205_s1 + $0xfb0] sm:$0xff]   ;;  %v17716_v48 = vld [vmem:[%s22205_s1 + $0xf78] sm:$0xff]   ;;  %v17722_v54 = vld [vmem:[%s22205_s1 + $0x1000] sm:$0xff]  }
 0x1df   :  { %v17718_v50 = vld [vmem:[%s22205_s1 + $0xf38] sm:$0xff]   ;;  %v17724_v56 = vld [vmem:[%s22205_s1 + $0x1048] sm:$0xff]  }
 0x1e0   :  { %v2795_v57 = vrot.slane %v2788_v53, 3  ;;  %16255 = vmatpush3.bf16.msra.mxu0 %v17686_v58  ;;  %v17721_v53 = vld [vmem:[%s22205_s1 + $0x10c0] sm:$0xff]   ;;  %v17726_v58 = vld [vmem:[%s22205_s1 + $0x1008] sm:$0xff]  }
 0x1e1   :  { %16277 = vmatpush3.bf16.msra.mxu1 %v17687_v59  ;;  %16284 = vmatprep.subr.bf16.mxu0 %v17688_v61  ;;  %v17727_v59 = vld [vmem:[%s22205_s1 + $0x1088] sm:$0xff]   ;;  %v17731_v61 = vld [vmem:[%s22205_s1 + $0x1090] sm:$0xff]  }
 0x1e2   :  { %v2796_v60 = vsel %vm2793_vm2, %v2794_v55, %v2795_v57  ;;  %16306 = vmatprep.subr.bf16.mxu1 %v17689_v63  ;;  %v17723_v55 = vld [vmem:[%s22205_s1 + $0x1080] sm:$0xff]   ;;  %v17725_v57 = vld [vmem:[%s22205_s1 + $0x10c8] sm:$0xff]   ;;  %v17732_v63 = vld [vmem:[%s22205_s1 + $0x1058] sm:$0xff]  }
 0x1e3   :  { %v19962_v62 = vadd.f32 %v2796_v60, %v19752_v12  ;;  %5400 = vmatmul.mubr.bf16.vlgmr.msra.gmra.mrb[56].mxu0 %v18495_v37  ;;  %v17692_v12 = vld [vmem:[%s22205_s1 + $0xf48] sm:$0xff]   ;;  %v17728_v60 = vld [vmem:[%s22205_s1 + $0x1050] sm:$0xff]  }
 0x1e4   :  { %5441 = vmatmul.mubr.bf16.vlgmr.msra.gmra.mrb[56].mxu1 %v18499_v39  ;;  %16285 = vmatpush3.bf16.msra.mxu0 %v17690_v0  ;;  %v17733_v0 = vld [vmem:[%s22205_s1 + $0x10d8] sm:$0xff]  }
 0x1e5   :  { %16307 = vmatpush3.bf16.msra.mxu1 %v17691_v1  ;;  %5481 = vmatprep.mubr.bf16.mxu0 %v18607_v10  ;;  %v17734_v1 = vld [vmem:[%s22205_s1 + $0x1018] sm:$0xff]  }
 0x1e6   :  { %16286 = vmatprep.subr.bf16.mxu0 %v17692_v12  ;;  %5522 = vmatprep.mubr.bf16.mxu1 %v18617_v14  ;;  %v17735_v12 = vld [vmem:[%s22205_s1 + $0x1098] sm:$0xff]  }
 0x1e7   :  { %16308 = vmatprep.subr.bf16.mxu1 %v17693_v2  ;;  %v17736_v2 = vld [vmem:[%s22205_s1 + $0x1060] sm:$0xff]  }
 0x1e8   :  { %16287 = vmatpush3.bf16.msra.mxu0 %v17694_v3  ;;  %v17737_v3 = vld [vmem:[%s22205_s1 + $0x10e0] sm:$0xff]  }
 0x1e9   :  { %16309 = vmatpush3.bf16.msra.mxu1 %v17695_v4  ;;  %16288 = vmatprep.subr.bf16.mxu0 %v17696_v5  ;;  %v17738_v4 = vld [vmem:[%s22205_s1 + $0x1020] sm:$0xff]  }
 0x1ea   :  { %16310 = vmatprep.subr.bf16.mxu1 %v17697_v6  ;;  %v17739_v5 = vld [vmem:[%s22205_s1 + $0x10a0] sm:$0xff]  }
 0x1ec   :  { %16289 = vmatpush3.bf16.msra.mxu0 %v17698_v7 }
 0x1ed   :  { %16311 = vmatpush3.bf16.msra.mxu1 %v17699_v8  ;;  %16290 = vmatprep.subr.bf16.mxu0 %v17700_v9  ;;  %v17740_v9 = vld [vmem:[%s22205_s1 + $0x1068] sm:$0xff]  }
 0x1ee   :  { %16312 = vmatprep.subr.bf16.mxu1 %v17701_v11  ;;  %v17741_v11 = vld [vmem:[%s22205_s1 + $0x10e8] sm:$0xff]  }
 0x1f0   :  { %16291 = vmatpush3.bf16.msra.mxu0 %v17702_v16 }
 0x1f1   :  { %16313 = vmatpush3.bf16.msra.mxu1 %v17703_v17  ;;  %16292 = vmatprep.subr.bf16.mxu0 %v17704_v18 }
 0x1f2   :  { %16314 = vmatprep.subr.bf16.mxu1 %v17705_v28 }
 0x1f4   :  { %16293 = vmatpush3.bf16.msra.mxu0 %v17706_v19 }
 0x1f5   :  { %16315 = vmatpush3.bf16.msra.mxu1 %v17707_v20  ;;  %16294 = vmatprep.subr.bf16.mxu0 %v17708_v22  ;;  %v17742_v20 = vld [vmem:[%s22205_s1 + $0x1028] sm:$0xff]  }
 0x1f6   :  { %v15992_v21 = vpop.f32.mrb[32].mxu0  ;;  %16316 = vmatprep.subr.bf16.mxu1 %v17709_v25  ;;  %v17743_v22 = vld [vmem:[%s22205_s1 + $0x10a8] sm:$0xff]   ;;  %v17744_v25 = vld [vmem:[%s22205_s1 + $0x1070] sm:$0xff]  }
 0x1f7   :  { %v16014_v23 = vpop.f32.mrb[32].mxu1  ;;  %v15993_v24 = vpop.f32.mrb[33].mxu0 }
 0x1f8   :  { %v15994_v27 = vadd.f32 %v15993_v24, %v15992_v21  ;;  %v16015_v29 = vpop.f32.mrb[33].mxu1  ;;  %v15995_v31 = vpop.f32.mrb[34].mxu0  ;;  %16295 = vmatpush3.bf16.msra.mxu0 %v17710_v26 }
 0x1f9   :  { %v16016_v30 = vadd.f32 %v16015_v29, %v16014_v23  ;;  %v16017_v32 = vpop.f32.mrb[34].mxu1  ;;  %v15996_v34 = vpop.f32.mrb[35].mxu0  ;;  %16317 = vmatpush3.bf16.msra.mxu1 %v17711_v33  ;;  %16296 = vmatprep.subr.bf16.mxu0 %v17712_v43  ;;  %v17747_v33 = vld [vmem:[%s22205_s1 + $0x10b0] sm:$0xff]   ;;  %v17750_v43 = vld [vmem:[%s22205_s1 + $0x1038] sm:$0xff]  }
 0x1fa   :  { %v16018_v36 = vpop.f32.mrb[35].mxu1  ;;  %v15997_v41 = vadd.f32 %v15996_v34, %v15995_v31  ;;  %16318 = vmatprep.subr.bf16.mxu1 %v17713_v44  ;;  %v17745_v31 = vld [vmem:[%s22205_s1 + $0x10f0] sm:$0xff]   ;;  %v17751_v44 = vld [vmem:[%s22205_s1 + $0x10b8] sm:$0xff]  }
 0x1fb   :  { %v20037_v40 = vadd.f32 %v16016_v30, %v15994_v27  ;;  %v16019_v42 = vadd.f32 %v16018_v36, %v16017_v32  ;;  %v17746_v32 = vld [vmem:[%s22205_s1 + $0x1030] sm:$0xff]   ;;  %v17748_v36 = vld [vmem:[%s22205_s1 + $0x1078] sm:$0xff]  }
 0x1fc   :  { %16297 = vmatpush3.bf16.msra.mxu0 %v17714_v46  ;;  %v17752_v46 = vld [vmem:[%s22205_s1 + $0x1140] sm:$0xff]  }
 0x1fd   :  { %v20045_v45 = vadd.f32 %v16019_v42, %v15997_v41  ;;  %16319 = vmatpush3.bf16.msra.mxu1 %v17715_v47  ;;  %16298 = vmatprep.subr.bf16.mxu0 %v17716_v48  ;;  %v17749_v41 = vld [vmem:[%s22205_s1 + $0x10f8] sm:$0xff]   ;;  %v17753_v48 = vld [vmem:[%s22205_s1 + $0x11c0] sm:$0xff]  }
 0x1fe   :  { %16320 = vmatprep.subr.bf16.mxu1 %v17717_v49  ;;  %v17754_v49 = vld [vmem:[%s22205_s1 + $0x1100] sm:$0xff]  }
 0x200   :  { %16299 = vmatpush3.bf16.msra.mxu0 %v17718_v50  ;;  %v17755_v50 = vld [vmem:[%s22205_s1 + $0x1180] sm:$0xff]  }
 0x201   :  { %16321 = vmatpush3.bf16.msra.mxu1 %v17719_v51  ;;  %16328 = vmatprep.subr.bf16.mxu0 %v17720_v52  ;;  %v17757_v51 = vld [vmem:[%s22205_s1 + $0x11c8] sm:$0xff]   ;;  %v17760_v52 = vld [vmem:[%s22205_s1 + $0x1150] sm:$0xff]  }
 0x202   :  { %16350 = vmatprep.subr.bf16.mxu1 %v17721_v53  ;;  %v17763_v53 = vld [vmem:[%s22205_s1 + $0x1190] sm:$0xff]  }
 0x203   :  { %5482 = vmatmul.mubr.bf16.vlgmr.msra.gmra.mrb[60].mxu0 %v18615_v13 }
 0x204   :  { %5523 = vmatmul.mubr.bf16.vlgmr.msra.gmra.mrb[60].mxu1 %v18619_v15  ;;  %16329 = vmatpush3.bf16.msra.mxu0 %v17722_v54  ;;  %v17764_v54 = vld [vmem:[%s22205_s1 + $0x1158] sm:$0xff]  }
 0x205   :  { %16351 = vmatpush3.bf16.msra.mxu1 %v17723_v55  ;;  %6084 = vmatprep.mubr.bf16.mxu0 %v18490_v35  ;;  %v17729_v35 = vld [vmem:[%s22205_s1 + $0x10d0] sm:$0xff]   ;;  %v17765_v55 = vld [vmem:[%s22205_s1 + $0x11d8] sm:$0xff]  }
 0x206   :  { %16330 = vmatprep.subr.bf16.mxu0 %v17724_v56  ;;  %6124 = vmatprep.mubr.bf16.mxu1 %v18497_v38  ;;  %v17730_v38 = vld [vmem:[%s22205_s1 + $0x1010] sm:$0xff]   ;;  %v17766_v56 = vld [vmem:[%s22205_s1 + $0x1118] sm:$0xff]  }
 0x207   :  { %16352 = vmatprep.subr.bf16.mxu1 %v17725_v57  ;;  %v17767_v57 = vld [vmem:[%s22205_s1 + $0x1198] sm:$0xff]  }
 0x208   :  { %16331 = vmatpush3.bf16.msra.mxu0 %v17726_v58  ;;  %v17768_v58 = vld [vmem:[%s22205_s1 + $0x1160] sm:$0xff]  }
 0x209   :  { %16353 = vmatpush3.bf16.msra.mxu1 %v17727_v59  ;;  %16332 = vmatprep.subr.bf16.mxu0 %v17728_v60  ;;  %v17769_v59 = vld [vmem:[%s22205_s1 + $0x11e0] sm:$0xff]  }
 0x20a   :  { %16354 = vmatprep.subr.bf16.mxu1 %v17729_v35  ;;  %v17770_v60 = vld [vmem:[%s22205_s1 + $0x1120] sm:$0xff]  }
 0x20b   :  { %v17771_v35 = vld [vmem:[%s22205_s1 + $0x11a0] sm:$0xff]  }
 0x20c   :  { %16333 = vmatpush3.bf16.msra.mxu0 %v17730_v38 }
 0x20d   :  { %16355 = vmatpush3.bf16.msra.mxu1 %v17731_v61  ;;  %16334 = vmatprep.subr.bf16.mxu0 %v17732_v63  ;;  %v17772_v61 = vld [vmem:[%s22205_s1 + $0x1168] sm:$0xff]  }
 0x20e   :  { %16356 = vmatprep.subr.bf16.mxu1 %v17733_v0 }
 0x210   :  { %16335 = vmatpush3.bf16.msra.mxu0 %v17734_v1  ;;  %v17773_v1 = vld [vmem:[%s22205_s1 + $0x11e8] sm:$0xff]  }
 0x211   :  { %16357 = vmatpush3.bf16.msra.mxu1 %v17735_v12  ;;  %16336 = vmatprep.subr.bf16.mxu0 %v17736_v2  ;;  %v17774_v12 = vld [vmem:[%s22205_s1 + $0x1128] sm:$0xff]  }
 0x212   :  { %16358 = vmatprep.subr.bf16.mxu1 %v17737_v3 }
 0x214   :  { %16337 = vmatpush3.bf16.msra.mxu0 %v17738_v4 }
 0x215   :  { %16359 = vmatpush3.bf16.msra.mxu1 %v17739_v5  ;;  %16338 = vmatprep.subr.bf16.mxu0 %v17740_v9 }
 0x216   :  { %v16036_v6 = vpop.f32.mrb[36].mxu0  ;;  %16360 = vmatprep.subr.bf16.mxu1 %v17741_v11 }
 0x217   :  { %v16058_v7 = vpop.f32.mrb[36].mxu1  ;;  %v16037_v8 = vpop.f32.mrb[37].mxu0 }
 0x218   :  { %v16038_v16 = vadd.f32 %v16037_v8, %v16036_v6  ;;  %v16059_v17 = vpop.f32.mrb[37].mxu1  ;;  %v16039_v18 = vpop.f32.mrb[38].mxu0  ;;  %16339 = vmatpush3.bf16.msra.mxu0 %v17742_v20  ;;  %v17778_v20 = vld [vmem:[%s22205_s1 + $0x1130] sm:$0xff]  }
 0x219   :  { %v16060_v28 = vadd.f32 %v16059_v17, %v16058_v7  ;;  %v16061_v19 = vpop.f32.mrb[38].mxu1  ;;  %v16040_v23 = vpop.f32.mrb[39].mxu0  ;;  %16361 = vmatpush3.bf16.msra.mxu1 %v17743_v22  ;;  %16340 = vmatprep.subr.bf16.mxu0 %v17744_v25  ;;  %v17775_v7 = vld [vmem:[%s22205_s1 + $0x11a8] sm:$0xff]   ;;  %v17780_v22 = vld [vmem:[%s22205_s1 + $0x1178] sm:$0xff]  }
 0x21a   :  { %v3429_v21 = vadd.f32 %v16038_v16, %v20037_v40  ;;  %v16062_v24 = vpop.f32.mrb[39].mxu1  ;;  %v16041_v26 = vadd.f32 %v16040_v23, %v16039_v18  ;;  %16362 = vmatprep.subr.bf16.mxu1 %v17745_v31  ;;  %v17776_v18 = vld [vmem:[%s22205_s1 + $0x1170] sm:$0xff]   ;;  %v17781_v23 = vld [vmem:[%s22205_s1 + $0x11f8] sm:$0xff]   ;;  %v17787_v31 = vld [vmem:[%s22205_s1 + $0x80] sm:$0xff]  }
 0x21b   :  { %v16063_v27 = vadd.f32 %v16062_v24, %v16061_v19  ;;  %v17782_v24 = vld [vmem:[%s22205_s1 + $0x1138] sm:$0xff]  }
 0x21c   :  { %v3470_v29 = vadd.f32 %v16060_v28, %v3429_v21  ;;  %v3432_v30 = vadd.f32 %v16041_v26, %v20045_v45  ;;  %16341 = vmatpush3.bf16.msra.mxu0 %v17746_v32  ;;  %v17777_v28 = vld [vmem:[%s22205_s1 + $0x11f0] sm:$0xff]   ;;  %v17783_v25 = vld [vmem:[%s22205_s1 + $0x11b8] sm:$0xff]   ;;  %v17784_v26 = vld [vmem:[%s22205_s1 + $0x40] sm:$0xff]  }
 0x21d   :  { %16363 = vmatpush3.bf16.msra.mxu1 %v17747_v33  ;;  %16342 = vmatprep.subr.bf16.mxu0 %v17748_v36  ;;  %v17779_v21 = vld [vmem:[%s22205_s1 + $0x11b0] sm:$0xff]   ;;  %v17789_v32 = vld [vmem:[%s22205_s1 + $0xc8] sm:$0xff]  }
 0x21e   :  { %v3473_v34 = vadd.f32 %v16063_v27, %v3432_v30  ;;  %v3479_v40 = vrot.slane %v3470_v29, 4  ;;  %16364 = vmatprep.subr.bf16.mxu1 %v17749_v41  ;;  %v17785_v27 = vld [vmem:[%s22205_s1 + $0xc0] sm:$0xff]   ;;  %v17788_v30 = vld [vmem:[%s22205_s1 + $0x48] sm:$0xff]   ;;  %v17792_v33 = vld [vmem:[%s22205_s1 + $0x50] sm:$0xff]  }
 0x21f   :  { %v17786_v29 = vld [vmem:[%s22205_s1] sm:$0xff]   ;;  %v17794_v36 = vld [vmem:[%s22205_s1 + $0x10] sm:$0xff]   ;;  %v17796_v41 = vld [vmem:[%s22205_s1 + $0x58] sm:$0xff]  }
 0x220   :  { %v3480_v42 = vrot.slane %v3473_v34, 4  ;;  %16343 = vmatpush3.bf16.msra.mxu0 %v17750_v43  ;;  %v17793_v34 = vld [vmem:[%s22205_s1 + $0xd0] sm:$0xff]   ;;  %v17798_v43 = vld [vmem:[%s22205_s1 + $0x18] sm:$0xff]  }
 0x221   :  { %16365 = vmatpush3.bf16.msra.mxu1 %v17751_v44  ;;  %16372 = vmatprep.subr.bf16.mxu0 %v17752_v46  ;;  %v17799_v44 = vld [vmem:[%s22205_s1 + $0x98] sm:$0xff]   ;;  %v17801_v46 = vld [vmem:[%s22205_s1 + $0xe0] sm:$0xff]  }
 0x222   :  { %v3481_v45 = vsel %vm3478_vm3, %v3479_v40, %v3480_v42  ;;  %16394 = vmatprep.subr.bf16.mxu1 %v17753_v48  ;;  %v17795_v40 = vld [vmem:[%s22205_s1 + $0x90] sm:$0xff]   ;;  %v17797_v42 = vld [vmem:[%s22205_s1 + $0xd8] sm:$0xff]   ;;  %v17802_v48 = vld [vmem:[%s22205_s1 + $0x20] sm:$0xff]  }
 0x223   :  { %v20172_v47 = vadd.f32 %v3481_v45, %v19962_v62  ;;  %6085 = vmatmul.mubr.bf16.vlgmr.msra.gmra.mrb[64].mxu0 %v18495_v37  ;;  %v17756_v62 = vld [vmem:[%s22205_s1 + $0x1148] sm:$0xff]   ;;  %v17800_v45 = vld [vmem:[%s22205_s1 + $0x60] sm:$0xff]  }
 0x224   :  { %6125 = vmatmul.mubr.bf16.vlgmr.msra.gmra.mrb[64].mxu1 %v18499_v39  ;;  %16373 = vmatpush3.bf16.msra.mxu0 %v17754_v49  ;;  %v17758_v37 = vld [vmem:[%s22205_s1 + $0x1108] sm:$0xff]   ;;  %v17803_v49 = vld [vmem:[%s22205_s1 + $0xa0] sm:$0xff]  }
 0x225   :  { %16395 = vmatpush3.bf16.msra.mxu1 %v17755_v50  ;;  %6164 = vmatprep.mubr.bf16.mxu0 %v18607_v10  ;;  %v17759_v39 = vld [vmem:[%s22205_s1 + $0x1188] sm:$0xff]   ;;  %v17761_v10 = vld [vmem:[%s22205_s1 + $0x11d0] sm:$0xff]  }
 0x226   :  { %16374 = vmatprep.subr.bf16.mxu0 %v17756_v62  ;;  %6204 = vmatprep.mubr.bf16.mxu1 %v18617_v14  ;;  %v17762_v14 = vld [vmem:[%s22205_s1 + $0x1110] sm:$0xff]  }
 0x227   :  { %16396 = vmatprep.subr.bf16.mxu1 %v17757_v51 }
 0x228   :  { %16375 = vmatpush3.bf16.msra.mxu0 %v17758_v37  ;;  %v17804_v37 = vld [vmem:[%s22205_s1 + $0x68] sm:$0xff]  }
 0x229   :  { %16397 = vmatpush3.bf16.msra.mxu1 %v17759_v39  ;;  %16376 = vmatprep.subr.bf16.mxu0 %v17760_v52  ;;  %v17805_v39 = vld [vmem:[%s22205_s1 + $0xe8] sm:$0xff]  }
 0x22a   :  { %16398 = vmatprep.subr.bf16.mxu1 %v17761_v10 }
 0x22c   :  { %16377 = vmatpush3.bf16.msra.mxu0 %v17762_v14 }
 0x22d   :  { %16399 = vmatpush3.bf16.msra.mxu1 %v17763_v53  ;;  %16378 = vmatprep.subr.bf16.mxu0 %v17764_v54 }
 0x22e   :  { %16400 = vmatprep.subr.bf16.mxu1 %v17765_v55  ;;  %v17806_v55 = vld [vmem:[%s22205_s1 + $0x28] sm:$0xff]  }
 0x230   :  { %16379 = vmatpush3.bf16.msra.mxu0 %v17766_v56 }
 0x231   :  { %16401 = vmatpush3.bf16.msra.mxu1 %v17767_v57  ;;  %16380 = vmatprep.subr.bf16.mxu0 %v17768_v58  ;;  %v17807_v57 = vld [vmem:[%s22205_s1 + $0xa8] sm:$0xff]  }
 0x232   :  { %16402 = vmatprep.subr.bf16.mxu1 %v17769_v59 }
 0x234   :  { %16381 = vmatpush3.bf16.msra.mxu0 %v17770_v60  ;;  %v17808_v60 = vld [vmem:[%s22205_s1 + $0x70] sm:$0xff]  }
 0x235   :  { %16403 = vmatpush3.bf16.msra.mxu1 %v17771_v35  ;;  %16382 = vmatprep.subr.bf16.mxu0 %v17772_v61 }
 0x236   :  { %v16080_v38 = vpop.f32.mrb[40].mxu0  ;;  %16404 = vmatprep.subr.bf16.mxu1 %v17773_v1  ;;  %v17810_v1 = vld [vmem:[%s22205_s1 + $0x30] sm:$0xff]  }
 0x237   :  { %v16102_v63 = vpop.f32.mrb[40].mxu1  ;;  %v16081_v0 = vpop.f32.mrb[41].mxu0 }
 0x238   :  { %v16082_v2 = vadd.f32 %v16081_v0, %v16080_v38  ;;  %v16103_v3 = vpop.f32.mrb[41].mxu1  ;;  %v16083_v4 = vpop.f32.mrb[42].mxu0  ;;  %16383 = vmatpush3.bf16.msra.mxu0 %v17774_v12  ;;  %v17811_v12 = vld [vmem:[%s22205_s1 + $0xb0] sm:$0xff]  }
 0x239   :  { %v16104_v5 = vadd.f32 %v16103_v3, %v16102_v63  ;;  %v16105_v6 = vpop.f32.mrb[42].mxu1  ;;  %v16084_v8 = vpop.f32.mrb[43].mxu0  ;;  %16405 = vmatpush3.bf16.msra.mxu1 %v17775_v7  ;;  %16384 = vmatprep.subr.bf16.mxu0 %v17776_v18  ;;  %v17809_v63 = vld [vmem:[%s22205_s1 + $0xf0] sm:$0xff]   ;;  %v17812_v3 = vld [vmem:[%s22205_s1 + $0x78] sm:$0xff]   ;;  %v14012_v18 = vld [vmem:[%s22206_s0 + $0x68] sm:$0xff] }
 0x23a   :  { %v16106_v9 = vpop.f32.mrb[43].mxu1  ;;  %v16085_v16 = vadd.f32 %v16084_v8, %v16083_v4  ;;  %16406 = vmatprep.subr.bf16.mxu1 %v17777_v28  ;;  %v17814_v7 = vld [vmem:[%s22205_s1 + $0x38] sm:$0xff]  }
 0x23b   :  { %v20247_v11 = vadd.f32 %v16104_v5, %v16082_v2  ;;  %v16107_v17 = vadd.f32 %v16106_v9, %v16105_v6  ;;  %v17813_v5 = vld [vmem:[%s22205_s1 + $0xf8] sm:$0xff]   ;;  %v14007_v9 = vld [vmem:[%s22206_s0 + $0x40] sm:$0xff] }
 0x23c   :  { %16385 = vmatpush3.bf16.msra.mxu0 %v17778_v20  ;;  %v17815_v8 = vld [vmem:[%s22205_s1 + $0xb8] sm:$0xff]  }
 0x23d   :  { %v20255_v19 = vadd.f32 %v16107_v17, %v16085_v16  ;;  %16407 = vmatpush3.bf16.msra.mxu1 %v17779_v21  ;;  %16386 = vmatprep.subr.bf16.mxu0 %v17780_v22  ;;  %v14011_v16 = vld [vmem:[%s22206_s0 + $0x60] sm:$0xff]  ;;  %v14008_v17 = vld [vmem:[%s22206_s0 + $0x48] sm:$0xff] }
 0x23e   :  { %16408 = vmatprep.subr.bf16.mxu1 %v17781_v23  ;;  %v20393_v20 = vcombine.high %v14008_v17, %v14012_v18  ;;  %v20395_v21 = vcombine.low %v14007_v9, %v14011_v16  ;;  %v17816_v22 = vld [vmem:[%s22205_s1 + $0x140] sm:$0xff]   ;;  %v20400_v23 = vcombine.low %v14008_v17, %v14012_v18  ;;  %v17852_v18 = vld [vmem:[%s22205_s1 + $0x248] sm:$0xff]  }
 0x23f   :  { %v17851_v17 = vld [vmem:[%s22205_s1 + $0x280] sm:$0xff]  }
 0x240   :  { %16387 = vmatpush3.bf16.msra.mxu0 %v17782_v24  ;;  %v17817_v24 = vld [vmem:[%s22205_s1 + $0x1c0] sm:$0xff]  }
 0x241   :  { %16409 = vmatpush3.bf16.msra.mxu1 %v17783_v25  ;;  %16416 = vmatprep.subr.bf16.mxu0 %v17784_v26  ;;  %v17819_v25 = vld [vmem:[%s22205_s1 + $0x180] sm:$0xff]   ;;  %v17820_v26 = vld [vmem:[%s22205_s1 + $0x148] sm:$0xff]  }
 0x242   :  { %16438 = vmatprep.subr.bf16.mxu1 %v17785_v27  ;;  %v17821_v27 = vld [vmem:[%s22205_s1 + $0x1c8] sm:$0xff]  }
 0x243   :  { %6165 = vmatmul.mubr.bf16.vlgmr.msra.gmra.mrb[68].mxu0 %v18615_v13  ;;  %v17790_v13 = vld [vmem:[%s22205_s1 + $0x8] sm:$0xff]  }
 0x244   :  { %6205 = vmatmul.mubr.bf16.vlgmr.msra.gmra.mrb[68].mxu1 %v18619_v15  ;;  %16417 = vmatpush3.bf16.msra.mxu0 %v17786_v29  ;;  %v17791_v15 = vld [vmem:[%s22205_s1 + $0x88] sm:$0xff]  }
 0x245   :  { %16439 = vmatpush3.bf16.msra.mxu1 %v17787_v31  ;;  %16418 = vmatprep.subr.bf16.mxu0 %v17788_v30  ;;  %v17822_v29 = vld [vmem:[%s22205_s1 + $0x108] sm:$0xff]   ;;  %v17824_v30 = vld [vmem:[%s22205_s1 + $0x150] sm:$0xff]  }
 0x246   :  { %16440 = vmatprep.subr.bf16.mxu1 %v17789_v32  ;;  %6848 = vmatprep.mubr.bf16.mxu1 %v20393_v20  ;;  %v17823_v31 = vld [vmem:[%s22205_s1 + $0x188] sm:$0xff]   ;;  %v17825_v32 = vld [vmem:[%s22205_s1 + $0x1d0] sm:$0xff]  }
 0x248   :  { %16419 = vmatpush3.bf16.msra.mxu0 %v17790_v13  ;;  %v17826_v13 = vld [vmem:[%s22205_s1 + $0x110] sm:$0xff]  }
 0x249   :  { %16441 = vmatpush3.bf16.msra.mxu1 %v17791_v15  ;;  %16420 = vmatprep.subr.bf16.mxu0 %v17792_v33  ;;  %v17827_v15 = vld [vmem:[%s22205_s1 + $0x190] sm:$0xff]   ;;  %v17828_v33 = vld [vmem:[%s22205_s1 + $0x158] sm:$0xff]  }
 0x24a   :  { %16442 = vmatprep.subr.bf16.mxu1 %v17793_v34  ;;  %v17829_v34 = vld [vmem:[%s22205_s1 + $0x1d8] sm:$0xff]  }
 0x24c   :  { %16421 = vmatpush3.bf16.msra.mxu0 %v17794_v36  ;;  %v17830_v36 = vld [vmem:[%s22205_s1 + $0x118] sm:$0xff]  }
 0x24d   :  { %16443 = vmatpush3.bf16.msra.mxu1 %v17795_v40  ;;  %16422 = vmatprep.subr.bf16.mxu0 %v17796_v41  ;;  %v17831_v40 = vld [vmem:[%s22205_s1 + $0x198] sm:$0xff]   ;;  %v17832_v41 = vld [vmem:[%s22205_s1 + $0x160] sm:$0xff]  }
 0x24e   :  { %16444 = vmatprep.subr.bf16.mxu1 %v17797_v42  ;;  %v17833_v42 = vld [vmem:[%s22205_s1 + $0x1e0] sm:$0xff]  }
 0x250   :  { %16423 = vmatpush3.bf16.msra.mxu0 %v17798_v43  ;;  %v17834_v43 = vld [vmem:[%s22205_s1 + $0x120] sm:$0xff]  }
 0x251   :  { %16445 = vmatpush3.bf16.msra.mxu1 %v17799_v44  ;;  %16424 = vmatprep.subr.bf16.mxu0 %v17800_v45  ;;  %v17835_v45 = vld [vmem:[%s22205_s1 + $0x1a0] sm:$0xff]  }
 0x252   :  { %16446 = vmatprep.subr.bf16.mxu1 %v17801_v46 }
 0x254   :  { %16425 = vmatpush3.bf16.msra.mxu0 %v17802_v48 }
 0x255   :  { %16447 = vmatpush3.bf16.msra.mxu1 %v17803_v49  ;;  %16426 = vmatprep.subr.bf16.mxu0 %v17804_v37 }
 0x256   :  { %v16124_v50 = vpop.f32.mrb[44].mxu0  ;;  %16448 = vmatprep.subr.bf16.mxu1 %v17805_v39  ;;  %v17837_v39 = vld [vmem:[%s22205_s1 + $0x1e8] sm:$0xff]  }
 0x257   :  { %v16146_v62 = vpop.f32.mrb[44].mxu1  ;;  %v16125_v51 = vpop.f32.mrb[45].mxu0 }
 0x258   :  { %v16126_v52 = vadd.f32 %v16125_v51, %v16124_v50  ;;  %v16147_v10 = vpop.f32.mrb[45].mxu1  ;;  %v16127_v14 = vpop.f32.mrb[46].mxu0  ;;  %16427 = vmatpush3.bf16.msra.mxu0 %v17806_v55  ;;  %v17836_v51 = vld [vmem:[%s22205_s1 + $0x168] sm:$0xff]  }
 0x259   :  { %v16148_v53 = vadd.f32 %v16147_v10, %v16146_v62  ;;  %v16149_v54 = vpop.f32.mrb[46].mxu1  ;;  %v16128_v58 = vpop.f32.mrb[47].mxu0  ;;  %16449 = vmatpush3.bf16.msra.mxu1 %v17807_v57  ;;  %16428 = vmatprep.subr.bf16.mxu0 %v17808_v60 }
 0x25a   :  { %v4114_v56 = vadd.f32 %v16126_v52, %v20247_v11  ;;  %v16150_v59 = vpop.f32.mrb[47].mxu1  ;;  %v16129_v35 = vadd.f32 %v16128_v58, %v16127_v14  ;;  %16450 = vmatprep.subr.bf16.mxu1 %v17809_v63  ;;  %v17838_v14 = vld [vmem:[%s22205_s1 + $0x128] sm:$0xff]   ;;  %v17840_v58 = vld [vmem:[%s22205_s1 + $0x170] sm:$0xff]   ;;  %v17845_v63 = vld [vmem:[%s22205_s1 + $0x1f8] sm:$0xff]  }
 0x25b   :  { %v16151_v38 = vadd.f32 %v16150_v59, %v16149_v54  ;;  %v17839_v54 = vld [vmem:[%s22205_s1 + $0x1a8] sm:$0xff]   ;;  %v17841_v59 = vld [vmem:[%s22205_s1 + $0x1f0] sm:$0xff]  }
 0x25c   :  { %v4155_v61 = vadd.f32 %v16148_v53, %v4114_v56  ;;  %v4117_v0 = vadd.f32 %v16129_v35, %v20255_v19  ;;  %16429 = vmatpush3.bf16.msra.mxu0 %v17810_v1  ;;  %v20391_v19 = vcombine.high %v14007_v9, %v14011_v16  ;;  %v17842_v35 = vld [vmem:[%s22205_s1 + $0x130] sm:$0xff]   ;;  %v17847_v1 = vld [vmem:[%s22205_s1 + $0x1b8] sm:$0xff]   ;;  %v17848_v9 = vld [vmem:[%s22205_s1 + $0x240] sm:$0xff]  }
 0x25d   :  { %16451 = vmatpush3.bf16.msra.mxu1 %v17811_v12  ;;  %16430 = vmatprep.subr.bf16.mxu0 %v17812_v3  ;;  %v14009_v12 = vld [vmem:[%s22206_s0 + $0x50] sm:$0xff]  ;;  %v17850_v16 = vld [vmem:[%s22205_s1 + $0x200] sm:$0xff]  }
 0x25e   :  { %v4158_v2 = vadd.f32 %v16151_v38, %v4117_v0  ;;  %v4164_v4 = vrot.slane %v4155_v61, 5  ;;  %16452 = vmatprep.subr.bf16.mxu1 %v17813_v5  ;;  %6808 = vmatprep.mubr.bf16.mxu0 %v20391_v19  ;;  %v17843_v38 = vld [vmem:[%s22205_s1 + $0x1b0] sm:$0xff]   ;;  %v17844_v61 = vld [vmem:[%s22205_s1 + $0x178] sm:$0xff]  }
 0x25f   :  { %v17846_v0 = vld [vmem:[%s22205_s1 + $0x138] sm:$0xff]  }
 0x260   :  { %v4165_v6 = vrot.slane %v4158_v2, 5  ;;  %16431 = vmatpush3.bf16.msra.mxu0 %v17814_v7  ;;  %v14013_v2 = vld [vmem:[%s22206_s0 + $0x70] sm:$0xff]  ;;  %v14014_v5 = vld [vmem:[%s22206_s0 + $0x78] sm:$0xff] }
 0x261   :  { %16453 = vmatpush3.bf16.msra.mxu1 %v17815_v8  ;;  %16460 = vmatprep.subr.bf16.mxu0 %v17816_v22  ;;  %v20509_v3 = vcombine.high %v14009_v12, %v14013_v2  ;;  %v17853_v22 = vld [vmem:[%s22205_s1 + $0x2c8] sm:$0xff]  }
 0x262   :  { %v4166_v11 = vsel %vm4163_vm4, %v4164_v4, %v4165_v6  ;;  %16482 = vmatprep.subr.bf16.mxu1 %v17817_v24  ;;  %v14010_v4 = vld [vmem:[%s22206_s0 + $0x58] sm:$0xff]  ;;  %v20517_v6 = vcombine.low %v14009_v12, %v14013_v2  ;;  %v17854_v24 = vld [vmem:[%s22205_s1 + $0x208] sm:$0xff]   ;;  %v17880_v12 = vld [vmem:[%s22205_s1 + $0x340] sm:$0xff]  }
 0x263   :  { %v20389_v28 = vadd.f32 %v4166_v11, %v20172_v47  ;;  %v17818_v47 = vld [vmem:[%s22205_s1 + $0x100] sm:$0xff]   ;;  %6809 = vmatmul.mubr.bf16.vlgmr.msra.gmra.mrb[72].mxu0 %v20395_v21  ;;  %v20519_v7 = vcombine.high %v14010_v4, %v14014_v5  ;;  %v20521_v8 = vcombine.low %v14010_v4, %v14014_v5 }
 0x264   :  { %6849 = vmatmul.mubr.bf16.vlgmr.msra.gmra.mrb[72].mxu1 %v20400_v23  ;;  %16461 = vmatpush3.bf16.msra.mxu0 %v17818_v47  ;;  %v17849_v11 = vld [vmem:[%s22205_s1 + $0x2c0] sm:$0xff]   ;;  %v17855_v47 = vld [vmem:[%s22205_s1 + $0x288] sm:$0xff]  }
 0x265   :  { %16483 = vmatpush3.bf16.msra.mxu1 %v17819_v25  ;;  %16462 = vmatprep.subr.bf16.mxu0 %v17820_v26  ;;  %v17856_v25 = vld [vmem:[%s22205_s1 + $0x250] sm:$0xff]   ;;  %v17881_v2 = vld [vmem:[%s22205_s1 + $0x3c0] sm:$0xff]  }
 0x266   :  { %16484 = vmatprep.subr.bf16.mxu1 %v17821_v27  ;;  %6888 = vmatprep.mubr.bf16.mxu0 %v20509_v3  ;;  %v17857_v26 = vld [vmem:[%s22205_s1 + $0x2d0] sm:$0xff]   ;;  %v17882_v5 = vld [vmem:[%s22205_s1 + $0x300] sm:$0xff]  }
 0x267   :  { %6928 = vmatprep.mubr.bf16.mxu1 %v20519_v7  ;;  %v17858_v27 = vld [vmem:[%s22205_s1 + $0x210] sm:$0xff]  }
 0x268   :  { %16463 = vmatpush3.bf16.msra.mxu0 %v17822_v29  ;;  %v17859_v29 = vld [vmem:[%s22205_s1 + $0x290] sm:$0xff]  }
 0x269   :  { %16485 = vmatpush3.bf16.msra.mxu1 %v17823_v31  ;;  %16464 = vmatprep.subr.bf16.mxu0 %v17824_v30  ;;  %v17860_v31 = vld [vmem:[%s22205_s1 + $0x258] sm:$0xff]  }
 0x26a   :  { %16486 = vmatprep.subr.bf16.mxu1 %v17825_v32  ;;  %v17861_v30 = vld [vmem:[%s22205_s1 + $0x2d8] sm:$0xff]  }
 0x26b   :  { %v17862_v32 = vld [vmem:[%s22205_s1 + $0x218] sm:$0xff]  }
 0x26c   :  { %16465 = vmatpush3.bf16.msra.mxu0 %v17826_v13  ;;  %v17863_v13 = vld [vmem:[%s22205_s1 + $0x298] sm:$0xff]  }
 0x26d   :  { %16487 = vmatpush3.bf16.msra.mxu1 %v17827_v15  ;;  %16466 = vmatprep.subr.bf16.mxu0 %v17828_v33  ;;  %v17864_v15 = vld [vmem:[%s22205_s1 + $0x260] sm:$0xff]  }
 0x26e   :  { %16488 = vmatprep.subr.bf16.mxu1 %v17829_v34  ;;  %v17865_v33 = vld [vmem:[%s22205_s1 + $0x2e0] sm:$0xff]  }
 0x270   :  { %16467 = vmatpush3.bf16.msra.mxu0 %v17830_v36  ;;  %v17866_v36 = vld [vmem:[%s22205_s1 + $0x220] sm:$0xff]  }
 0x271   :  { %16489 = vmatpush3.bf16.msra.mxu1 %v17831_v40  ;;  %16468 = vmatprep.subr.bf16.mxu0 %v17832_v41  ;;  %v17867_v41 = vld [vmem:[%s22205_s1 + $0x2a0] sm:$0xff]  }
 0x272   :  { %16490 = vmatprep.subr.bf16.mxu1 %v17833_v42 }
 0x274   :  { %16469 = vmatpush3.bf16.msra.mxu0 %v17834_v43 }
 0x275   :  { %16491 = vmatpush3.bf16.msra.mxu1 %v17835_v45  ;;  %16470 = vmatprep.subr.bf16.mxu0 %v17836_v51 }
 0x276   :  { %v16168_v44 = vpop.f32.mrb[48].mxu0  ;;  %16492 = vmatprep.subr.bf16.mxu1 %v17837_v39 }
 0x277   :  { %v16190_v46 = vpop.f32.mrb[48].mxu1  ;;  %v16169_v48 = vpop.f32.mrb[49].mxu0 }
 0x278   :  { %v16191_v49 = vpop.f32.mrb[49].mxu1  ;;  %v16170_v50 = vadd.f32 %v16169_v48, %v16168_v44  ;;  %v16171_v37 = vpop.f32.mrb[50].mxu0  ;;  %16471 = vmatpush3.bf16.msra.mxu0 %v17838_v14  ;;  %v17868_v44 = vld [vmem:[%s22205_s1 + $0x268] sm:$0xff]   ;;  %v17872_v14 = vld [vmem:[%s22205_s1 + $0x270] sm:$0xff]  }
 0x279   :  { %v16192_v62 = vadd.f32 %v16191_v49, %v16190_v46  ;;  %v16193_v52 = vpop.f32.mrb[50].mxu1  ;;  %v16172_v53 = vpop.f32.mrb[51].mxu0  ;;  %16493 = vmatpush3.bf16.msra.mxu1 %v17839_v54  ;;  %16472 = vmatprep.subr.bf16.mxu0 %v17840_v58  ;;  %v17869_v48 = vld [vmem:[%s22205_s1 + $0x2e8] sm:$0xff]   ;;  %v17875_v58 = vld [vmem:[%s22205_s1 + $0x2b0] sm:$0xff]  }
 0x27a   :  { %v16173_v55 = vadd.f32 %v16172_v53, %v16171_v37  ;;  %v16194_v56 = vpop.f32.mrb[51].mxu1  ;;  %16494 = vmatprep.subr.bf16.mxu1 %v17841_v59  ;;  %v17871_v37 = vld [vmem:[%s22205_s1 + $0x2a8] sm:$0xff]  }
 0x27b   :  { %v20469_v10 = vadd.f32 %v16192_v62, %v16170_v50  ;;  %v16195_v57 = vadd.f32 %v16194_v56, %v16193_v52  ;;  %v17870_v62 = vld [vmem:[%s22205_s1 + $0x228] sm:$0xff]  }
 0x27c   :  { %16473 = vmatpush3.bf16.msra.mxu0 %v17842_v35  ;;  %v17876_v35 = vld [vmem:[%s22205_s1 + $0x278] sm:$0xff]  }
 0x27d   :  { %v20483_v60 = vadd.f32 %v16195_v57, %v16173_v55  ;;  %16495 = vmatpush3.bf16.msra.mxu1 %v17843_v38  ;;  %16474 = vmatprep.subr.bf16.mxu0 %v17844_v61  ;;  %v17874_v57 = vld [vmem:[%s22205_s1 + $0x230] sm:$0xff]  }
 0x27e   :  { %16496 = vmatprep.subr.bf16.mxu1 %v17845_v63  ;;  %v17878_v63 = vld [vmem:[%s22205_s1 + $0x238] sm:$0xff]  }
 0x280   :  { %16475 = vmatpush3.bf16.msra.mxu0 %v17846_v0  ;;  %v17879_v0 = vld [vmem:[%s22205_s1 + $0x2b8] sm:$0xff]  }
 0x281   :  { %16497 = vmatpush3.bf16.msra.mxu1 %v17847_v1  ;;  %16504 = vmatprep.subr.bf16.mxu0 %v17848_v9  ;;  %v17883_v9 = vld [vmem:[%s22205_s1 + $0x380] sm:$0xff]  }
 0x282   :  { %16526 = vmatprep.subr.bf16.mxu1 %v17849_v11  ;;  %v17885_v11 = vld [vmem:[%s22205_s1 + $0x3c8] sm:$0xff]  }
 0x283   :  { %6889 = vmatmul.mubr.bf16.vlgmr.msra.gmra.mrb[76].mxu0 %v20517_v6 }
 0x284   :  { %6929 = vmatmul.mubr.bf16.vlgmr.msra.gmra.mrb[76].mxu1 %v20521_v8  ;;  %16505 = vmatpush3.bf16.msra.mxu0 %v17850_v16  ;;  %v17886_v16 = vld [vmem:[%s22205_s1 + $0x308] sm:$0xff]  }
 0x285   :  { %16527 = vmatpush3.bf16.msra.mxu1 %v17851_v17  ;;  %7481 = vmatprep.mubr.bf16.mxu0 %v20391_v19  ;;  %v17887_v17 = vld [vmem:[%s22205_s1 + $0x388] sm:$0xff]  }
 0x286   :  { %16506 = vmatprep.subr.bf16.mxu0 %v17852_v18  ;;  %7522 = vmatprep.mubr.bf16.mxu1 %v20393_v20  ;;  %v17888_v18 = vld [vmem:[%s22205_s1 + $0x350] sm:$0xff]  }
 0x287   :  { %16528 = vmatprep.subr.bf16.mxu1 %v17853_v22  ;;  %v17889_v22 = vld [vmem:[%s22205_s1 + $0x3d0] sm:$0xff]  }
 0x288   :  { %16507 = vmatpush3.bf16.msra.mxu0 %v17854_v24  ;;  %v17890_v24 = vld [vmem:[%s22205_s1 + $0x310] sm:$0xff]  }
 0x289   :  { %16529 = vmatpush3.bf16.msra.mxu1 %v17855_v47  ;;  %16508 = vmatprep.subr.bf16.mxu0 %v17856_v25  ;;  %v17891_v47 = vld [vmem:[%s22205_s1 + $0x390] sm:$0xff]   ;;  %v17892_v25 = vld [vmem:[%s22205_s1 + $0x358] sm:$0xff]  }
 0x28a   :  { %16530 = vmatprep.subr.bf16.mxu1 %v17857_v26  ;;  %v17893_v26 = vld [vmem:[%s22205_s1 + $0x3d8] sm:$0xff]  }
 0x28c   :  { %16509 = vmatpush3.bf16.msra.mxu0 %v17858_v27  ;;  %v17894_v27 = vld [vmem:[%s22205_s1 + $0x318] sm:$0xff]  }
 0x28d   :  { %16531 = vmatpush3.bf16.msra.mxu1 %v17859_v29  ;;  %16510 = vmatprep.subr.bf16.mxu0 %v17860_v31  ;;  %v17895_v29 = vld [vmem:[%s22205_s1 + $0x398] sm:$0xff]   ;;  %v17896_v31 = vld [vmem:[%s22205_s1 + $0x360] sm:$0xff]  }
 0x28e   :  { %16532 = vmatprep.subr.bf16.mxu1 %v17861_v30  ;;  %v17897_v30 = vld [vmem:[%s22205_s1 + $0x3e0] sm:$0xff]  }
 0x290   :  { %16511 = vmatpush3.bf16.msra.mxu0 %v17862_v32 }
 0x291   :  { %16533 = vmatpush3.bf16.msra.mxu1 %v17863_v13  ;;  %16512 = vmatprep.subr.bf16.mxu0 %v17864_v15  ;;  %v17898_v13 = vld [vmem:[%s22205_s1 + $0x320] sm:$0xff]  }
 0x292   :  { %16534 = vmatprep.subr.bf16.mxu1 %v17865_v33  ;;  %v17899_v33 = vld [vmem:[%s22205_s1 + $0x3a0] sm:$0xff]  }
 0x294   :  { %16513 = vmatpush3.bf16.msra.mxu0 %v17866_v36 }
 0x295   :  { %16535 = vmatpush3.bf16.msra.mxu1 %v17867_v41  ;;  %16514 = vmatprep.subr.bf16.mxu0 %v17868_v44 }
 0x296   :  { %v16212_v34 = vpop.f32.mrb[52].mxu0  ;;  %16536 = vmatprep.subr.bf16.mxu1 %v17869_v48 }
 0x297   :  { %v16234_v40 = vpop.f32.mrb[52].mxu1  ;;  %v16213_v42 = vpop.f32.mrb[53].mxu0 }
 0x298   :  { %v16235_v43 = vpop.f32.mrb[53].mxu1  ;;  %v16214_v45 = vadd.f32 %v16213_v42, %v16212_v34  ;;  %v16215_v49 = vpop.f32.mrb[54].mxu0  ;;  %16515 = vmatpush3.bf16.msra.mxu0 %v17870_v62 }
 0x299   :  { %v16236_v46 = vadd.f32 %v16235_v43, %v16234_v40  ;;  %v16237_v50 = vpop.f32.mrb[54].mxu1  ;;  %v16216_v39 = vpop.f32.mrb[55].mxu0  ;;  %16537 = vmatpush3.bf16.msra.mxu1 %v17871_v37  ;;  %16516 = vmatprep.subr.bf16.mxu0 %v17872_v14  ;;  %v17900_v40 = vld [vmem:[%s22205_s1 + $0x368] sm:$0xff]  }
 0x29a   :  { %v4799_v51 = vadd.f32 %v16214_v45, %v20469_v10  ;;  %v16238_v52 = vpop.f32.mrb[55].mxu1  ;;  %v16217_v54 = vadd.f32 %v16216_v39, %v16215_v49  ;;  %v17873_v10 = vld [vmem:[%s22205_s1 + $0x2f0] sm:$0xff]   ;;  %v17901_v43 = vld [vmem:[%s22205_s1 + $0x3e8] sm:$0xff]  }
 0x29b   :  { %v16239_v55 = vadd.f32 %v16238_v52, %v16237_v50  ;;  %16538 = vmatprep.subr.bf16.mxu1 %v17873_v10  ;;  %v17903_v49 = vld [vmem:[%s22205_s1 + $0x3a8] sm:$0xff]   ;;  %v17905_v52 = vld [vmem:[%s22205_s1 + $0x3f0] sm:$0xff]   ;;  %v17909_v10 = vld [vmem:[%s22205_s1 + $0x3f8] sm:$0xff]  }
 0x29c   :  { %v4840_v53 = vadd.f32 %v16236_v46, %v4799_v51  ;;  %v4802_v56 = vadd.f32 %v16217_v54, %v20483_v60  ;;  %16517 = vmatpush3.bf16.msra.mxu0 %v17874_v57  ;;  %v17877_v60 = vld [vmem:[%s22205_s1 + $0x2f8] sm:$0xff]   ;;  %v17902_v46 = vld [vmem:[%s22205_s1 + $0x328] sm:$0xff]   ;;  %v17904_v51 = vld [vmem:[%s22205_s1 + $0x370] sm:$0xff]  }
 0x29d   :  { %16539 = vmatpush3.bf16.msra.mxu1 %v17875_v58  ;;  %16518 = vmatprep.subr.bf16.mxu0 %v17876_v35  ;;  %v17907_v54 = vld [vmem:[%s22205_s1 + $0x3b0] sm:$0xff]   ;;  %v17911_v57 = vld [vmem:[%s22205_s1 + $0x3b8] sm:$0xff]   ;;  %v17912_v58 = vld [vmem:[%s22205_s1 + $0x440] sm:$0xff]  }
 0x29e   :  { %v4843_v59 = vadd.f32 %v16239_v55, %v4802_v56  ;;  %v4849_v38 = vrot.slane %v4840_v53, 6  ;;  %16540 = vmatprep.subr.bf16.mxu1 %v17877_v60  ;;  %v17906_v53 = vld [vmem:[%s22205_s1 + $0x330] sm:$0xff]   ;;  %v17908_v55 = vld [vmem:[%s22205_s1 + $0x378] sm:$0xff]   ;;  %v17914_v35 = vld [vmem:[%s22205_s1 + $0x400] sm:$0xff]  }
 0x29f   :  { %v17910_v56 = vld [vmem:[%s22205_s1 + $0x338] sm:$0xff]   ;;  %v17916_v60 = vld [vmem:[%s22205_s1 + $0x448] sm:$0xff]  }
 0x2a0   :  { %v4850_v61 = vrot.slane %v4843_v59, 6  ;;  %16519 = vmatpush3.bf16.msra.mxu0 %v17878_v63  ;;  %v17913_v59 = vld [vmem:[%s22205_s1 + $0x4c0] sm:$0xff]   ;;  %v17918_v63 = vld [vmem:[%s22205_s1 + $0x408] sm:$0xff]  }
 0x2a1   :  { %16541 = vmatpush3.bf16.msra.mxu1 %v17879_v0  ;;  %16548 = vmatprep.subr.bf16.mxu0 %v17880_v12  ;;  %v17919_v0 = vld [vmem:[%s22205_s1 + $0x488] sm:$0xff]   ;;  %v17921_v12 = vld [vmem:[%s22205_s1 + $0x4d0] sm:$0xff]  }
 0x2a2   :  { %v4851_v1 = vsel %vm4848_vm5, %v4849_v38, %v4850_v61  ;;  %16570 = vmatprep.subr.bf16.mxu1 %v17881_v2  ;;  %v17915_v38 = vld [vmem:[%s22205_s1 + $0x480] sm:$0xff]   ;;  %v17917_v61 = vld [vmem:[%s22205_s1 + $0x4c8] sm:$0xff]   ;;  %v17922_v2 = vld [vmem:[%s22205_s1 + $0x410] sm:$0xff]  }
 0x2a3   :  { %v20635_v4 = vadd.f32 %v4851_v1, %v20389_v28  ;;  %7482 = vmatmul.mubr.bf16.vlgmr.msra.gmra.mrb[80].mxu0 %v20395_v21  ;;  %v17884_v28 = vld [vmem:[%s22205_s1 + $0x348] sm:$0xff]   ;;  %v17920_v1 = vld [vmem:[%s22205_s1 + $0x450] sm:$0xff]  }
 0x2a4   :  { %7523 = vmatmul.mubr.bf16.vlgmr.msra.gmra.mrb[80].mxu1 %v20400_v23  ;;  %16549 = vmatpush3.bf16.msra.mxu0 %v17882_v5  ;;  %v17923_v5 = vld [vmem:[%s22205_s1 + $0x490] sm:$0xff]  }
 0x2a5   :  { %16571 = vmatpush3.bf16.msra.mxu1 %v17883_v9  ;;  %7563 = vmatprep.mubr.bf16.mxu0 %v20509_v3  ;;  %v17924_v9 = vld [vmem:[%s22205_s1 + $0x458] sm:$0xff]  }
 0x2a6   :  { %16550 = vmatprep.subr.bf16.mxu0 %v17884_v28  ;;  %7604 = vmatprep.mubr.bf16.mxu1 %v20519_v7  ;;  %v17925_v28 = vld [vmem:[%s22205_s1 + $0x4d8] sm:$0xff]  }
 0x2a7   :  { %16572 = vmatprep.subr.bf16.mxu1 %v17885_v11  ;;  %v17926_v11 = vld [vmem:[%s22205_s1 + $0x418] sm:$0xff]  }
 0x2a8   :  { %16551 = vmatpush3.bf16.msra.mxu0 %v17886_v16  ;;  %v17927_v16 = vld [vmem:[%s22205_s1 + $0x498] sm:$0xff]  }
 0x2a9   :  { %16573 = vmatpush3.bf16.msra.mxu1 %v17887_v17  ;;  %16552 = vmatprep.subr.bf16.mxu0 %v17888_v18  ;;  %v17928_v17 = vld [vmem:[%s22205_s1 + $0x460] sm:$0xff]  }
 0x2aa   :  { %16574 = vmatprep.subr.bf16.mxu1 %v17889_v22  ;;  %v17929_v18 = vld [vmem:[%s22205_s1 + $0x4e0] sm:$0xff]  }
 0x2ab   :  { %v17930_v22 = vld [vmem:[%s22205_s1 + $0x420] sm:$0xff]  }
 0x2ac   :  { %16553 = vmatpush3.bf16.msra.mxu0 %v17890_v24 }
 0x2ad   :  { %16575 = vmatpush3.bf16.msra.mxu1 %v17891_v47  ;;  %16554 = vmatprep.subr.bf16.mxu0 %v17892_v25  ;;  %v17931_v47 = vld [vmem:[%s22205_s1 + $0x4a0] sm:$0xff]  }
 0x2ae   :  { %16576 = vmatprep.subr.bf16.mxu1 %v17893_v26 }
 0x2b0   :  { %16555 = vmatpush3.bf16.msra.mxu0 %v17894_v27  ;;  %v17932_v27 = vld [vmem:[%s22205_s1 + $0x468] sm:$0xff]  }
 0x2b1   :  { %16577 = vmatpush3.bf16.msra.mxu1 %v17895_v29  ;;  %16556 = vmatprep.subr.bf16.mxu0 %v17896_v31 }
 0x2b2   :  { %16578 = vmatprep.subr.bf16.mxu1 %v17897_v30  ;;  %v17933_v30 = vld [vmem:[%s22205_s1 + $0x4e8] sm:$0xff]  }
 0x2b4   :  { %16557 = vmatpush3.bf16.msra.mxu0 %v17898_v13 }
 0x2b5   :  { %16579 = vmatpush3.bf16.msra.mxu1 %v17899_v33  ;;  %16558 = vmatprep.subr.bf16.mxu0 %v17900_v40  ;;  %v17935_v40 = vld [vmem:[%s22205_s1 + $0x4a8] sm:$0xff]  }
 0x2b6   :  { %v16256_v32 = vpop.f32.mrb[56].mxu0  ;;  %16580 = vmatprep.subr.bf16.mxu1 %v17901_v43 }
 0x2b7   :  { %v16278_v15 = vpop.f32.mrb[56].mxu1  ;;  %v16257_v34 = vpop.f32.mrb[57].mxu0 }
 0x2b8   :  { %v16279_v36 = vpop.f32.mrb[57].mxu1  ;;  %v16258_v41 = vadd.f32 %v16257_v34, %v16256_v32  ;;  %v16259_v44 = vpop.f32.mrb[58].mxu0  ;;  %16559 = vmatpush3.bf16.msra.mxu0 %v17902_v46  ;;  %v17934_v34 = vld [vmem:[%s22205_s1 + $0x428] sm:$0xff]  }
 0x2b9   :  { %v16280_v42 = vadd.f32 %v16279_v36, %v16278_v15  ;;  %v16281_v45 = vpop.f32.mrb[58].mxu1  ;;  %v16260_v50 = vpop.f32.mrb[59].mxu0  ;;  %16581 = vmatpush3.bf16.msra.mxu1 %v17903_v49  ;;  %16560 = vmatprep.subr.bf16.mxu0 %v17904_v51  ;;  %v17938_v49 = vld [vmem:[%s22205_s1 + $0x430] sm:$0xff]  }
 0x2ba   :  { %v16282_v62 = vpop.f32.mrb[59].mxu1  ;;  %v16261_v37 = vadd.f32 %v16260_v50, %v16259_v44  ;;  %16582 = vmatprep.subr.bf16.mxu1 %v17905_v52  ;;  %v17941_v52 = vld [vmem:[%s22205_s1 + $0x4f8] sm:$0xff]  }
 0x2bb   :  { %v20704_v48 = vadd.f32 %v16280_v42, %v16258_v41  ;;  %v16283_v39 = vadd.f32 %v16282_v62, %v16281_v45  ;;  %v17936_v45 = vld [vmem:[%s22205_s1 + $0x470] sm:$0xff]  }
 0x2bc   :  { %16561 = vmatpush3.bf16.msra.mxu0 %v17906_v53  ;;  %v17939_v62 = vld [vmem:[%s22205_s1 + $0x4b0] sm:$0xff]   ;;  %v17943_v53 = vld [vmem:[%s22205_s1 + $0x4b8] sm:$0xff]  }
 0x2bd   :  { %v20715_v14 = vadd.f32 %v16283_v39, %v16261_v37  ;;  %16583 = vmatpush3.bf16.msra.mxu1 %v17907_v54  ;;  %16562 = vmatprep.subr.bf16.mxu0 %v17908_v55  ;;  %v17940_v37 = vld [vmem:[%s22205_s1 + $0x478] sm:$0xff]   ;;  %v17944_v55 = vld [vmem:[%s22205_s1 + $0x540] sm:$0xff]  }
 0x2be   :  { %16584 = vmatprep.subr.bf16.mxu1 %v17909_v10 }
 0x2c0   :  { %16563 = vmatpush3.bf16.msra.mxu0 %v17910_v56  ;;  %v17945_v56 = vld [vmem:[%s22205_s1 + $0x5c0] sm:$0xff]  }
 0x2c1   :  { %16585 = vmatpush3.bf16.msra.mxu1 %v17911_v57  ;;  %16592 = vmatprep.subr.bf16.mxu0 %v17912_v58  ;;  %v17946_v57 = vld [vmem:[%s22205_s1 + $0x500] sm:$0xff]  }
 0x2c2   :  { %16614 = vmatprep.subr.bf16.mxu1 %v17913_v59  ;;  %v17947_v58 = vld [vmem:[%s22205_s1 + $0x580] sm:$0xff]   ;;  %v17949_v59 = vld [vmem:[%s22205_s1 + $0x5c8] sm:$0xff]  }
 0x2c3   :  { %7564 = vmatmul.mubr.bf16.vlgmr.msra.gmra.mrb[84].mxu0 %v20517_v6 }
 0x2c4   :  { %7605 = vmatmul.mubr.bf16.vlgmr.msra.gmra.mrb[84].mxu1 %v20521_v8  ;;  %16593 = vmatpush3.bf16.msra.mxu0 %v17914_v35  ;;  %v17950_v35 = vld [vmem:[%s22205_s1 + $0x508] sm:$0xff]  }
 0x2c5   :  { %16615 = vmatpush3.bf16.msra.mxu1 %v17915_v38  ;;  %8164 = vmatprep.mubr.bf16.mxu0 %v20391_v19  ;;  %v17951_v38 = vld [vmem:[%s22205_s1 + $0x588] sm:$0xff]  }
 0x2c6   :  { %16594 = vmatprep.subr.bf16.mxu0 %v17916_v60  ;;  %8205 = vmatprep.mubr.bf16.mxu1 %v20393_v20  ;;  %v17952_v60 = vld [vmem:[%s22205_s1 + $0x550] sm:$0xff]  }
 0x2c7   :  { %16616 = vmatprep.subr.bf16.mxu1 %v17917_v61  ;;  %v17953_v61 = vld [vmem:[%s22205_s1 + $0x5d0] sm:$0xff]  }
 0x2c8   :  { %16595 = vmatpush3.bf16.msra.mxu0 %v17918_v63  ;;  %v17954_v63 = vld [vmem:[%s22205_s1 + $0x510] sm:$0xff]  }
 0x2c9   :  { %16617 = vmatpush3.bf16.msra.mxu1 %v17919_v0  ;;  %16596 = vmatprep.subr.bf16.mxu0 %v17920_v1  ;;  %v17955_v0 = vld [vmem:[%s22205_s1 + $0x590] sm:$0xff]   ;;  %v17956_v1 = vld [vmem:[%s22205_s1 + $0x558] sm:$0xff]  }
 0x2ca   :  { %16618 = vmatprep.subr.bf16.mxu1 %v17921_v12  ;;  %v17957_v12 = vld [vmem:[%s22205_s1 + $0x5d8] sm:$0xff]  }
 0x2cc   :  { %16597 = vmatpush3.bf16.msra.mxu0 %v17922_v2  ;;  %v17958_v2 = vld [vmem:[%s22205_s1 + $0x518] sm:$0xff]  }
 0x2cd   :  { %16619 = vmatpush3.bf16.msra.mxu1 %v17923_v5  ;;  %16598 = vmatprep.subr.bf16.mxu0 %v17924_v9  ;;  %v17959_v5 = vld [vmem:[%s22205_s1 + $0x598] sm:$0xff]   ;;  %v17960_v9 = vld [vmem:[%s22205_s1 + $0x560] sm:$0xff]  }
 0x2ce   :  { %16620 = vmatprep.subr.bf16.mxu1 %v17925_v28  ;;  %v17961_v28 = vld [vmem:[%s22205_s1 + $0x5e0] sm:$0xff]  }
 0x2d0   :  { %16599 = vmatpush3.bf16.msra.mxu0 %v17926_v11  ;;  %v17962_v11 = vld [vmem:[%s22205_s1 + $0x520] sm:$0xff]  }
 0x2d1   :  { %16621 = vmatpush3.bf16.msra.mxu1 %v17927_v16  ;;  %16600 = vmatprep.subr.bf16.mxu0 %v17928_v17  ;;  %v17963_v17 = vld [vmem:[%s22205_s1 + $0x5a0] sm:$0xff]  }
 0x2d2   :  { %16622 = vmatprep.subr.bf16.mxu1 %v17929_v18 }
 0x2d4   :  { %16601 = vmatpush3.bf16.msra.mxu0 %v17930_v22 }
 0x2d5   :  { %16623 = vmatpush3.bf16.msra.mxu1 %v17931_v47  ;;  %16602 = vmatprep.subr.bf16.mxu0 %v17932_v27  ;;  %v17964_v47 = vld [vmem:[%s22205_s1 + $0x568] sm:$0xff]  }
 0x2d6   :  { %v16300_v24 = vpop.f32.mrb[60].mxu0  ;;  %16624 = vmatprep.subr.bf16.mxu1 %v17933_v30  ;;  %v17967_v30 = vld [vmem:[%s22205_s1 + $0x5a8] sm:$0xff]  }
 0x2d7   :  { %v16322_v25 = vpop.f32.mrb[60].mxu1  ;;  %v16301_v26 = vpop.f32.mrb[61].mxu0 }
 0x2d8   :  { %v16302_v29 = vadd.f32 %v16301_v26, %v16300_v24  ;;  %v16323_v31 = vpop.f32.mrb[61].mxu1  ;;  %v16303_v13 = vpop.f32.mrb[62].mxu0  ;;  %16603 = vmatpush3.bf16.msra.mxu0 %v17934_v34  ;;  %v17965_v26 = vld [vmem:[%s22205_s1 + $0x5e8] sm:$0xff]   ;;  %v17969_v34 = vld [vmem:[%s22205_s1 + $0x5f0] sm:$0xff]  }
 0x2d9   :  { %v16324_v32 = vadd.f32 %v16323_v31, %v16322_v25  ;;  %v16325_v15 = vpop.f32.mrb[62].mxu1  ;;  %v16304_v36 = vpop.f32.mrb[63].mxu0  ;;  %16625 = vmatpush3.bf16.msra.mxu1 %v17935_v40  ;;  %16604 = vmatprep.subr.bf16.mxu0 %v17936_v45  ;;  %v17970_v40 = vld [vmem:[%s22205_s1 + $0x530] sm:$0xff]   ;;  %v17975_v45 = vld [vmem:[%s22205_s1 + $0x5b8] sm:$0xff]  }
 0x2da   :  { %v5484_v33 = vadd.f32 %v16302_v29, %v20704_v48  ;;  %v16305_v41 = vadd.f32 %v16304_v36, %v16303_v13  ;;  %v16326_v42 = vpop.f32.mrb[63].mxu1  ;;  %v17937_v48 = vld [vmem:[%s22205_s1 + $0x4f0] sm:$0xff]   ;;  %v17966_v29 = vld [vmem:[%s22205_s1 + $0x528] sm:$0xff]  }
 0x2db   :  { %v16327_v44 = vadd.f32 %v16326_v42, %v16325_v15  ;;  %16626 = vmatprep.subr.bf16.mxu1 %v17937_v48  ;;  %v17972_v42 = vld [vmem:[%s22205_s1 + $0x578] sm:$0xff]   ;;  %v17977_v48 = vld [vmem:[%s22205_s1 + $0x6c0] sm:$0xff]  }
 0x2dc   :  { %v5525_v43 = vadd.f32 %v16324_v32, %v5484_v33  ;;  %v5487_v46 = vadd.f32 %v16305_v41, %v20715_v14  ;;  %16605 = vmatpush3.bf16.msra.mxu0 %v17938_v49  ;;  %v17942_v14 = vld [vmem:[%s22205_s1 + $0x438] sm:$0xff]   ;;  %v17968_v33 = vld [vmem:[%s22205_s1 + $0x570] sm:$0xff]   ;;  %v17978_v49 = vld [vmem:[%s22205_s1 + $0x600] sm:$0xff]  }
 0x2dd   :  { %16627 = vmatpush3.bf16.msra.mxu1 %v17939_v62  ;;  %16606 = vmatprep.subr.bf16.mxu0 %v17940_v37  ;;  %v17971_v41 = vld [vmem:[%s22205_s1 + $0x5b0] sm:$0xff]   ;;  %v17980_v62 = vld [vmem:[%s22205_s1 + $0x648] sm:$0xff]  }
 0x2de   :  { %v5528_v50 = vadd.f32 %v16327_v44, %v5487_v46  ;;  %v5534_v51 = vrot.slane %v5525_v43, 7  ;;  %16628 = vmatprep.subr.bf16.mxu1 %v17941_v52  ;;  %v17973_v43 = vld [vmem:[%s22205_s1 + $0x5f8] sm:$0xff]   ;;  %v17976_v46 = vld [vmem:[%s22205_s1 + $0x640] sm:$0xff]   ;;  %v17982_v37 = vld [vmem:[%s22205_s1 + $0x608] sm:$0xff]  }
 0x2df   :  { %v17974_v44 = vld [vmem:[%s22205_s1 + $0x538] sm:$0xff]   ;;  %v17984_v52 = vld [vmem:[%s22205_s1 + $0x650] sm:$0xff]  }
 0x2e0   :  { %v5535_v39 = vrot.slane %v5528_v50, 7  ;;  %16607 = vmatpush3.bf16.msra.mxu0 %v17942_v14  ;;  %v17979_v50 = vld [vmem:[%s22205_s1 + $0x680] sm:$0xff]   ;;  %v17985_v14 = vld [vmem:[%s22205_s1 + $0x6d0] sm:$0xff]  }
 0x2e1   :  { %16629 = vmatpush3.bf16.msra.mxu1 %v17943_v53  ;;  %16636 = vmatprep.subr.bf16.mxu0 %v17944_v55  ;;  %v17986_v53 = vld [vmem:[%s22205_s1 + $0x610] sm:$0xff]   ;;  %v17988_v55 = vld [vmem:[%s22205_s1 + $0x658] sm:$0xff]  }
 0x2e2   :  { %v5536_v54 = vsel %vm5533_vm6, %v5534_v51, %v5535_v39  ;;  %16658 = vmatprep.subr.bf16.mxu1 %v17945_v56  ;;  %v17981_v51 = vld [vmem:[%s22205_s1 + $0x6c8] sm:$0xff]   ;;  %v17989_v56 = vld [vmem:[%s22205_s1 + $0x6d8] sm:$0xff]  }
 0x2e3   :  { %v20842_v10 = vadd.f32 %v5536_v54, %v20635_v4  ;;  %8165 = vmatmul.mubr.bf16.vlgmr.msra.gmra.mrb[88].mxu0 %v20395_v21  ;;  %v17948_v4 = vld [vmem:[%s22205_s1 + $0x548] sm:$0xff]   ;;  %v17987_v54 = vld [vmem:[%s22205_s1 + $0x690] sm:$0xff]  }
 0x2e4   :  { %8206 = vmatmul.mubr.bf16.vlgmr.msra.gmra.mrb[88].mxu1 %v20400_v23  ;;  %16637 = vmatpush3.bf16.msra.mxu0 %v17946_v57  ;;  %v17983_v39 = vld [vmem:[%s22205_s1 + $0x688] sm:$0xff]   ;;  %v17990_v57 = vld [vmem:[%s22205_s1 + $0x618] sm:$0xff]  }
 0x2e5   :  { %16659 = vmatpush3.bf16.msra.mxu1 %v17947_v58  ;;  %8246 = vmatprep.mubr.bf16.mxu0 %v20509_v3  ;;  %v17991_v58 = vld [vmem:[%s22205_s1 + $0x698] sm:$0xff]  }
 0x2e6   :  { %16638 = vmatprep.subr.bf16.mxu0 %v17948_v4  ;;  %8287 = vmatprep.mubr.bf16.mxu1 %v20519_v7  ;;  %v17992_v4 = vld [vmem:[%s22205_s1 + $0x660] sm:$0xff]  }
 0x2e7   :  { %16660 = vmatprep.subr.bf16.mxu1 %v17949_v59  ;;  %v17993_v59 = vld [vmem:[%s22205_s1 + $0x6e0] sm:$0xff]  }
 0x2e8   :  { %16639 = vmatpush3.bf16.msra.mxu0 %v17950_v35  ;;  %v17994_v35 = vld [vmem:[%s22205_s1 + $0x620] sm:$0xff]  }
 0x2e9   :  { %16661 = vmatpush3.bf16.msra.mxu1 %v17951_v38  ;;  %16640 = vmatprep.subr.bf16.mxu0 %v17952_v60  ;;  %v17995_v60 = vld [vmem:[%s22205_s1 + $0x6a0] sm:$0xff]  }
 0x2ea   :  { %16662 = vmatprep.subr.bf16.mxu1 %v17953_v61 }
 0x2ec   :  { %16641 = vmatpush3.bf16.msra.mxu0 %v17954_v63 }
 0x2ed   :  { %16663 = vmatpush3.bf16.msra.mxu1 %v17955_v0  ;;  %16642 = vmatprep.subr.bf16.mxu0 %v17956_v1  ;;  %v17996_v0 = vld [vmem:[%s22205_s1 + $0x668] sm:$0xff]  }
 0x2ee   :  { %16664 = vmatprep.subr.bf16.mxu1 %v17957_v12  ;;  %v17997_v12 = vld [vmem:[%s22205_s1 + $0x6e8] sm:$0xff]  }
 0x2f0   :  { %16643 = vmatpush3.bf16.msra.mxu0 %v17958_v2 }
 0x2f1   :  { %16665 = vmatpush3.bf16.msra.mxu1 %v17959_v5  ;;  %16644 = vmatprep.subr.bf16.mxu0 %v17960_v9  ;;  %v17998_v9 = vld [vmem:[%s22205_s1 + $0x628] sm:$0xff]  }
 0x2f2   :  { %16666 = vmatprep.subr.bf16.mxu1 %v17961_v28 }
 0x2f4   :  { %16645 = vmatpush3.bf16.msra.mxu0 %v17962_v11  ;;  %v17999_v11 = vld [vmem:[%s22205_s1 + $0x6a8] sm:$0xff]  }
 0x2f5   :  { %16667 = vmatpush3.bf16.msra.mxu1 %v17963_v17  ;;  %16646 = vmatprep.subr.bf16.mxu0 %v17964_v47  ;;  %v18001_v47 = vld [vmem:[%s22205_s1 + $0x6f0] sm:$0xff]  }
 0x2f6   :  { %v16344_v16 = vpop.f32.mrb[64].mxu0  ;;  %16668 = vmatprep.subr.bf16.mxu1 %v17965_v26 }
 0x2f7   :  { %v16366_v18 = vpop.f32.mrb[64].mxu1  ;;  %v16345_v22 = vpop.f32.mrb[65].mxu0 }
 0x2f8   :  { %v16367_v24 = vpop.f32.mrb[65].mxu1  ;;  %v16347_v25 = vpop.f32.mrb[66].mxu0  ;;  %16647 = vmatpush3.bf16.msra.mxu0 %v17966_v29  ;;  %v18000_v22 = vld [vmem:[%s22205_s1 + $0x670] sm:$0xff]   ;;  %v18004_v29 = vld [vmem:[%s22205_s1 + $0x678] sm:$0xff]  }
 0x2f9   :  { %v16369_v27 = vpop.f32.mrb[66].mxu1  ;;  %v16348_v31 = vpop.f32.mrb[67].mxu0  ;;  %16669 = vmatpush3.bf16.msra.mxu1 %v17967_v30  ;;  %16648 = vmatprep.subr.bf16.mxu0 %v17968_v33  ;;  %v18005_v30 = vld [vmem:[%s22205_s1 + $0x6f8] sm:$0xff]   ;;  %v18010_v33 = vld [vmem:[%s22205_s1 + $0x700] sm:$0xff]  }
 0x2fa   :  { %v16349_v32 = vadd.f32 %v16348_v31, %v16347_v25  ;;  %v16370_v13 = vpop.f32.mrb[67].mxu1  ;;  %16670 = vmatprep.subr.bf16.mxu1 %v17969_v34  ;;  %v18002_v25 = vld [vmem:[%s22205_s1 + $0x630] sm:$0xff]   ;;  %v18011_v34 = vld [vmem:[%s22205_s1 + $0x780] sm:$0xff]  }
 0x2fb   :  { %v16371_v15 = vadd.f32 %v16370_v13, %v16369_v27  ;;  %v18003_v27 = vld [vmem:[%s22205_s1 + $0x6b0] sm:$0xff]   ;;  %v18007_v13 = vld [vmem:[%s22205_s1 + $0x6b8] sm:$0xff]  }
 0x2fc   :  { %16649 = vmatpush3.bf16.msra.mxu0 %v17970_v40  ;;  %v18013_v40 = vld [vmem:[%s22205_s1 + $0x7c8] sm:$0xff]  }
 0x2fd   :  { %v20923_v36 = vadd.f32 %v16371_v15, %v16349_v32  ;;  %16671 = vmatpush3.bf16.msra.mxu1 %v17971_v41  ;;  %16650 = vmatprep.subr.bf16.mxu0 %v17972_v42  ;;  %v18006_v32 = vld [vmem:[%s22205_s1 + $0x638] sm:$0xff]   ;;  %v18009_v15 = vld [vmem:[%s22205_s1 + $0x7c0] sm:$0xff]   ;;  %v18014_v41 = vld [vmem:[%s22205_s1 + $0x708] sm:$0xff]  }
 0x2fe   :  { %16672 = vmatprep.subr.bf16.mxu1 %v17973_v43  ;;  %v18015_v42 = vld [vmem:[%s22205_s1 + $0x788] sm:$0xff]   ;;  %v18016_v43 = vld [vmem:[%s22205_s1 + $0x750] sm:$0xff]  }
 0x300   :  { %16651 = vmatpush3.bf16.msra.mxu0 %v17974_v44 }
 0x301   :  { %16673 = vmatpush3.bf16.msra.mxu1 %v17975_v45  ;;  %16680 = vmatprep.subr.bf16.mxu0 %v17976_v46  ;;  %v18017_v45 = vld [vmem:[%s22205_s1 + $0x7d0] sm:$0xff]  }
 0x302   :  { %16702 = vmatprep.subr.bf16.mxu1 %v17977_v48  ;;  %v18018_v46 = vld [vmem:[%s22205_s1 + $0x710] sm:$0xff]  }
 0x303   :  { %8247 = vmatmul.mubr.bf16.vlgmr.msra.gmra.mrb[92].mxu0 %v20517_v6  ;;  %v18019_v48 = vld [vmem:[%s22205_s1 + $0x790] sm:$0xff]  }
 0x304   :  { %8288 = vmatmul.mubr.bf16.vlgmr.msra.gmra.mrb[92].mxu1 %v20521_v8  ;;  %16681 = vmatpush3.bf16.msra.mxu0 %v17978_v49  ;;  %v18020_v49 = vld [vmem:[%s22205_s1 + $0x758] sm:$0xff]  }
 0x305   :  { %16703 = vmatpush3.bf16.msra.mxu1 %v17979_v50  ;;  %8847 = vmatprep.mubr.bf16.mxu0 %v20391_v19  ;;  %v18021_v50 = vld [vmem:[%s22205_s1 + $0x7d8] sm:$0xff]  }
 0x306   :  { %16682 = vmatprep.subr.bf16.mxu0 %v17980_v62  ;;  %8888 = vmatprep.mubr.bf16.mxu1 %v20393_v20  ;;  %v18022_v62 = vld [vmem:[%s22205_s1 + $0x718] sm:$0xff]  }
 0x307   :  { %16704 = vmatprep.subr.bf16.mxu1 %v17981_v51  ;;  %v18023_v51 = vld [vmem:[%s22205_s1 + $0x798] sm:$0xff]  }
 0x308   :  { %16683 = vmatpush3.bf16.msra.mxu0 %v17982_v37  ;;  %v18024_v37 = vld [vmem:[%s22205_s1 + $0x760] sm:$0xff]  }
 0x309   :  { %16705 = vmatpush3.bf16.msra.mxu1 %v17983_v39  ;;  %16684 = vmatprep.subr.bf16.mxu0 %v17984_v52  ;;  %v18025_v39 = vld [vmem:[%s22205_s1 + $0x7e0] sm:$0xff]  }
 0x30a   :  { %16706 = vmatprep.subr.bf16.mxu1 %v17985_v14  ;;  %v18026_v52 = vld [vmem:[%s22205_s1 + $0x720] sm:$0xff]  }
 0x30b   :  { %v18027_v14 = vld [vmem:[%s22205_s1 + $0x7a0] sm:$0xff]  }
 0x30c   :  { %16685 = vmatpush3.bf16.msra.mxu0 %v17986_v53 }
 0x30d   :  { %16707 = vmatpush3.bf16.msra.mxu1 %v17987_v54  ;;  %16686 = vmatprep.subr.bf16.mxu0 %v17988_v55  ;;  %v18028_v55 = vld [vmem:[%s22205_s1 + $0x768] sm:$0xff]  }
 0x30e   :  { %16708 = vmatprep.subr.bf16.mxu1 %v17989_v56 }
 0x310   :  { %16687 = vmatpush3.bf16.msra.mxu0 %v17990_v57 }
 0x311   :  { %16709 = vmatpush3.bf16.msra.mxu1 %v17991_v58  ;;  %16688 = vmatprep.subr.bf16.mxu0 %v17992_v4 }
 0x312   :  { %16710 = vmatprep.subr.bf16.mxu1 %v17993_v59  ;;  %v18029_v59 = vld [vmem:[%s22205_s1 + $0x7e8] sm:$0xff]  }
 0x314   :  { %16689 = vmatpush3.bf16.msra.mxu0 %v17994_v35 }
 0x315   :  { %16711 = vmatpush3.bf16.msra.mxu1 %v17995_v60  ;;  %16690 = vmatprep.subr.bf16.mxu0 %v17996_v0  ;;  %v18030_v60 = vld [vmem:[%s22205_s1 + $0x728] sm:$0xff]  }
 0x316   :  { %v16388_v38 = vpop.f32.mrb[68].mxu0  ;;  %16712 = vmatprep.subr.bf16.mxu1 %v17997_v12  ;;  %v18032_v12 = vld [vmem:[%s22205_s1 + $0x770] sm:$0xff]  }
 0x317   :  { %v16410_v61 = vpop.f32.mrb[68].mxu1  ;;  %v16389_v63 = vpop.f32.mrb[69].mxu0 }
 0x318   :  { %v16411_v1 = vpop.f32.mrb[69].mxu1  ;;  %v16391_v2 = vpop.f32.mrb[70].mxu0  ;;  %16691 = vmatpush3.bf16.msra.mxu0 %v17998_v9  ;;  %v18031_v63 = vld [vmem:[%s22205_s1 + $0x7a8] sm:$0xff]   ;;  %v18035_v9 = vld [vmem:[%s22205_s1 + $0x7b0] sm:$0xff]  }
 0x319   :  { %v16413_v5 = vpop.f32.mrb[70].mxu1  ;;  %v16392_v28 = vpop.f32.mrb[71].mxu0  ;;  %16713 = vmatpush3.bf16.msra.mxu1 %v17999_v11  ;;  %16692 = vmatprep.subr.bf16.mxu0 %v18000_v22  ;;  %v18037_v11 = vld [vmem:[%s22205_s1 + $0x7f8] sm:$0xff]   ;;  %v18041_v22 = vld [vmem:[%s22205_s1 + $0x8c0] sm:$0xff]  }
 0x31a   :  { %v16393_v16 = vadd.f32 %v16392_v28, %v16391_v2  ;;  %v16414_v17 = vpop.f32.mrb[71].mxu1  ;;  %16714 = vmatprep.subr.bf16.mxu1 %v18001_v47  ;;  %v18033_v2 = vld [vmem:[%s22205_s1 + $0x7f0] sm:$0xff]   ;;  %v18036_v28 = vld [vmem:[%s22205_s1 + $0x778] sm:$0xff]   ;;  %v18043_v47 = vld [vmem:[%s22205_s1 + $0x880] sm:$0xff]  }
 0x31b   :  { %v16415_v18 = vadd.f32 %v16414_v17, %v16413_v5  ;;  %v18034_v5 = vld [vmem:[%s22205_s1 + $0x730] sm:$0xff]   ;;  %v18039_v17 = vld [vmem:[%s22205_s1 + $0x7b8] sm:$0xff]  }
 0x31c   :  { %v6169_v24 = vadd.f32 %v16393_v16, %v20923_v36  ;;  %16693 = vmatpush3.bf16.msra.mxu0 %v18002_v25  ;;  %v18012_v36 = vld [vmem:[%s22205_s1 + $0x748] sm:$0xff]   ;;  %v18038_v16 = vld [vmem:[%s22205_s1 + $0x738] sm:$0xff]  }
 0x31d   :  { %16715 = vmatpush3.bf16.msra.mxu1 %v18003_v27  ;;  %16694 = vmatprep.subr.bf16.mxu0 %v18004_v29  ;;  %v18044_v25 = vld [vmem:[%s22205_s1 + $0x848] sm:$0xff]  }
 0x31e   :  { %v6209_v26 = vadd.f32 %v16415_v18, %v6169_v24  ;;  %16716 = vmatprep.subr.bf16.mxu1 %v18005_v30  ;;  %v18040_v18 = vld [vmem:[%s22205_s1 + $0x840] sm:$0xff]   ;;  %v18046_v27 = vld [vmem:[%s22205_s1 + $0x808] sm:$0xff]   ;;  %v18049_v30 = vld [vmem:[%s22205_s1 + $0x8d0] sm:$0xff]  }
 0x31f   :  { %v18042_v24 = vld [vmem:[%s22205_s1 + $0x800] sm:$0xff]   ;;  %v18047_v29 = vld [vmem:[%s22205_s1 + $0x888] sm:$0xff]  }
 0x320   :  { %v6212_v31 = vadd.f32 %v6209_v26, %v20842_v10  ;;  %16695 = vmatpush3.bf16.msra.mxu0 %v18006_v32  ;;  %v18008_v10 = vld [vmem:[%s22205_s1 + $0x740] sm:$0xff]   ;;  %v18045_v26 = vld [vmem:[%s22205_s1 + $0x8c8] sm:$0xff]   ;;  %v18050_v32 = vld [vmem:[%s22205_s1 + $0x810] sm:$0xff]  }
 0x321   :  { %16717 = vmatpush3.bf16.msra.mxu1 %v18007_v13  ;;  %16724 = vmatprep.subr.bf16.mxu0 %v18008_v10  ;;  %v18051_v13 = vld [vmem:[%s22205_s1 + $0x890] sm:$0xff]   ;;  %v18052_v10 = vld [vmem:[%s22205_s1 + $0x858] sm:$0xff]  }
 0x322   :  { %18360 = vtanh.f32 %v6212_v31  ;;  %16746 = vmatprep.subr.bf16.mxu1 %v18009_v15  ;;  %v18048_v31 = vld [vmem:[%s22205_s1 + $0x850] sm:$0xff]   ;;  %v18053_v15 = vld [vmem:[%s22205_s1 + $0x8d8] sm:$0xff]  }
 0x323   :  { %8848 = vmatmul.mubr.bf16.vlgmr.msra.gmra.mrb[96].mxu0 %v20395_v21 }
 0x324   :  { %8889 = vmatmul.mubr.bf16.vlgmr.msra.gmra.mrb[96].mxu1 %v20400_v23  ;;  %16725 = vmatpush3.bf16.msra.mxu0 %v18010_v33  ;;  %v18054_v33 = vld [vmem:[%s22205_s1 + $0x818] sm:$0xff]  }
 0x325   :  { %16747 = vmatpush3.bf16.msra.mxu1 %v18011_v34  ;;  %8929 = vmatprep.mubr.bf16.mxu0 %v20509_v3  ;;  %v18055_v34 = vld [vmem:[%s22205_s1 + $0x898] sm:$0xff]  }
 0x326   :  { %16726 = vmatprep.subr.bf16.mxu0 %v18012_v36  ;;  %8970 = vmatprep.mubr.bf16.mxu1 %v20519_v7  ;;  %v18056_v36 = vld [vmem:[%s22205_s1 + $0x860] sm:$0xff]  }
 0x327   :  { %16748 = vmatprep.subr.bf16.mxu1 %v18013_v40  ;;  %v18057_v40 = vld [vmem:[%s22205_s1 + $0x8e0] sm:$0xff]  }
 0x328   :  { %16727 = vmatpush3.bf16.msra.mxu0 %v18014_v41  ;;  %v18058_v41 = vld [vmem:[%s22205_s1 + $0x820] sm:$0xff]  }
 0x329   :  { %16749 = vmatpush3.bf16.msra.mxu1 %v18015_v42  ;;  %16728 = vmatprep.subr.bf16.mxu0 %v18016_v43  ;;  %v18059_v42 = vld [vmem:[%s22205_s1 + $0x8a0] sm:$0xff]  }
 0x32a   :  { %16750 = vmatprep.subr.bf16.mxu1 %v18017_v45 }
 0x32c   :  { %v18361_v44 = vpop.eup %18360  ;;  %16729 = vmatpush3.bf16.msra.mxu0 %v18018_v46 }
 0x32d   :  { %6214 = vst [vmem:[%s22208_s3] sm:$0xff] %v18361_v44  ;;  %16751 = vmatpush3.bf16.msra.mxu1 %v18019_v48  ;;  %16730 = vmatprep.subr.bf16.mxu0 %v18020_v49  ;;  %v18060_v44 = vld [vmem:[%s22205_s1 + $0x868] sm:$0xff]  }
 0x32e   :  { %16752 = vmatprep.subr.bf16.mxu1 %v18021_v50  ;;  %v18061_v50 = vld [vmem:[%s22205_s1 + $0x8e8] sm:$0xff]  }
 0x330   :  { %16731 = vmatpush3.bf16.msra.mxu0 %v18022_v62 }
 0x331   :  { %16753 = vmatpush3.bf16.msra.mxu1 %v18023_v51  ;;  %16732 = vmatprep.subr.bf16.mxu0 %v18024_v37  ;;  %v18062_v51 = vld [vmem:[%s22205_s1 + $0x828] sm:$0xff]  }
 0x332   :  { %16754 = vmatprep.subr.bf16.mxu1 %v18025_v39 }
 0x334   :  { %16733 = vmatpush3.bf16.msra.mxu0 %v18026_v52  ;;  %v18063_v52 = vld [vmem:[%s22205_s1 + $0x8a8] sm:$0xff]  }
 0x335   :  { %16755 = vmatpush3.bf16.msra.mxu1 %v18027_v14  ;;  %16734 = vmatprep.subr.bf16.mxu0 %v18028_v55  ;;  %v18064_v55 = vld [vmem:[%s22205_s1 + $0x870] sm:$0xff]  }
 0x336   :  { %v16432_v53 = vpop.f32.mrb[72].mxu0  ;;  %16756 = vmatprep.subr.bf16.mxu1 %v18029_v59  ;;  %v18068_v59 = vld [vmem:[%s22205_s1 + $0x878] sm:$0xff]  }
 0x337   :  { %v16454_v54 = vpop.f32.mrb[72].mxu1  ;;  %v16433_v56 = vpop.f32.mrb[73].mxu0 }
 0x338   :  { %v16455_v57 = vpop.f32.mrb[73].mxu1  ;;  %v16434_v58 = vadd.f32 %v16433_v56, %v16432_v53  ;;  %v16435_v35 = vpop.f32.mrb[74].mxu0  ;;  %16735 = vmatpush3.bf16.msra.mxu0 %v18030_v60  ;;  %v18071_v60 = vld [vmem:[%s22205_s1 + $0x8b8] sm:$0xff]  }
 0x339   :  { %v16456_v4 = vadd.f32 %v16455_v57, %v16454_v54  ;;  %v16457_v38 = vpop.f32.mrb[74].mxu1  ;;  %v16436_v0 = vpop.f32.mrb[75].mxu0  ;;  %16757 = vmatpush3.bf16.msra.mxu1 %v18031_v63  ;;  %16736 = vmatprep.subr.bf16.mxu0 %v18032_v12  ;;  %v18065_v57 = vld [vmem:[%s22205_s1 + $0x8f0] sm:$0xff]   ;;  %v18069_v35 = vld [vmem:[%s22205_s1 + $0x8f8] sm:$0xff]   ;;  %v18073_v63 = vld [vmem:[%s22205_s1 + $0x9c0] sm:$0xff]  }
 0x33a   :  { %v16458_v1 = vpop.f32.mrb[75].mxu1  ;;  %16758 = vmatprep.subr.bf16.mxu1 %v18033_v2  ;;  %v18070_v38 = vld [vmem:[%s22205_s1 + $0x838] sm:$0xff]   ;;  %v18074_v0 = vld [vmem:[%s22205_s1 + $0x900] sm:$0xff]   ;;  %v18076_v12 = vld [vmem:[%s22205_s1 + $0x948] sm:$0xff]  }
 0x33b   :  { %v21121_v61 = vadd.f32 %v16456_v4, %v16434_v58  ;;  %v18066_v58 = vld [vmem:[%s22205_s1 + $0x830] sm:$0xff]   ;;  %v18075_v1 = vld [vmem:[%s22205_s1 + $0x980] sm:$0xff]   ;;  %v18077_v2 = vld [vmem:[%s22205_s1 + $0x9c8] sm:$0xff]  }
 0x33c   :  { %16737 = vmatpush3.bf16.msra.mxu0 %v18034_v5  ;;  %v18067_v4 = vld [vmem:[%s22205_s1 + $0x8b0] sm:$0xff]   ;;  %v18078_v5 = vld [vmem:[%s22205_s1 + $0x908] sm:$0xff]  }
 0x33d   :  { %16759 = vmatpush3.bf16.msra.mxu1 %v18035_v9  ;;  %16738 = vmatprep.subr.bf16.mxu0 %v18036_v28  ;;  %v18079_v9 = vld [vmem:[%s22205_s1 + $0x988] sm:$0xff]   ;;  %v18080_v28 = vld [vmem:[%s22205_s1 + $0x950] sm:$0xff]  }
 0x33e   :  { %16760 = vmatprep.subr.bf16.mxu1 %v18037_v11  ;;  %v18081_v11 = vld [vmem:[%s22205_s1 + $0x9d0] sm:$0xff]  }
 0x340   :  { %16739 = vmatpush3.bf16.msra.mxu0 %v18038_v16  ;;  %v18082_v16 = vld [vmem:[%s22205_s1 + $0x910] sm:$0xff]  }
 0x341   :  { %16761 = vmatpush3.bf16.msra.mxu1 %v18039_v17  ;;  %16768 = vmatprep.subr.bf16.mxu0 %v18040_v18  ;;  %v18083_v17 = vld [vmem:[%s22205_s1 + $0x990] sm:$0xff]   ;;  %v18084_v18 = vld [vmem:[%s22205_s1 + $0x958] sm:$0xff]  }
 0x342   :  { %16790 = vmatprep.subr.bf16.mxu1 %v18041_v22  ;;  %v18085_v22 = vld [vmem:[%s22205_s1 + $0x9d8] sm:$0xff]  }
 0x343   :  { %8930 = vmatmul.mubr.bf16.vlgmr.msra.gmra.mrb[100].mxu0 %v20517_v6 }
 0x344   :  { %8971 = vmatmul.mubr.bf16.vlgmr.msra.gmra.mrb[100].mxu1 %v20521_v8  ;;  %16769 = vmatpush3.bf16.msra.mxu0 %v18042_v24  ;;  %v18086_v24 = vld [vmem:[%s22205_s1 + $0x918] sm:$0xff]  }
 0x345   :  { %16791 = vmatpush3.bf16.msra.mxu1 %v18043_v47  ;;  %9530 = vmatprep.mubr.bf16.mxu0 %v20391_v19  ;;  %v18087_v47 = vld [vmem:[%s22205_s1 + $0x998] sm:$0xff]  }
 0x346   :  { %16770 = vmatprep.subr.bf16.mxu0 %v18044_v25  ;;  %9571 = vmatprep.mubr.bf16.mxu1 %v20393_v20  ;;  %v18088_v25 = vld [vmem:[%s22205_s1 + $0x960] sm:$0xff]  }
 0x347   :  { %16792 = vmatprep.subr.bf16.mxu1 %v18045_v26  ;;  %v18089_v26 = vld [vmem:[%s22205_s1 + $0x9e0] sm:$0xff]  }
 0x348   :  { %16771 = vmatpush3.bf16.msra.mxu0 %v18046_v27  ;;  %v18090_v27 = vld [vmem:[%s22205_s1 + $0x920] sm:$0xff]  }
 0x349   :  { %16793 = vmatpush3.bf16.msra.mxu1 %v18047_v29  ;;  %16772 = vmatprep.subr.bf16.mxu0 %v18048_v31  ;;  %v18091_v29 = vld [vmem:[%s22205_s1 + $0x9a0] sm:$0xff]  }
 0x34a   :  { %16794 = vmatprep.subr.bf16.mxu1 %v18049_v30  ;;  %v18092_v30 = vld [vmem:[%s22205_s1 + $0x968] sm:$0xff]  }
 0x34c   :  { %16773 = vmatpush3.bf16.msra.mxu0 %v18050_v32 }
 0x34d   :  { %16795 = vmatpush3.bf16.msra.mxu1 %v18051_v13  ;;  %16774 = vmatprep.subr.bf16.mxu0 %v18052_v10  ;;  %v18093_v10 = vld [vmem:[%s22205_s1 + $0x9e8] sm:$0xff]  }
 0x34e   :  { %16796 = vmatprep.subr.bf16.mxu1 %v18053_v15  ;;  %v18094_v15 = vld [vmem:[%s22205_s1 + $0x928] sm:$0xff]  }
 0x350   :  { %16775 = vmatpush3.bf16.msra.mxu0 %v18054_v33 }
 0x351   :  { %16797 = vmatpush3.bf16.msra.mxu1 %v18055_v34  ;;  %16776 = vmatprep.subr.bf16.mxu0 %v18056_v36 }
 0x352   :  { %16798 = vmatprep.subr.bf16.mxu1 %v18057_v40 }
 0x354   :  { %16777 = vmatpush3.bf16.msra.mxu0 %v18058_v41 }
 0x355   :  { %16799 = vmatpush3.bf16.msra.mxu1 %v18059_v42  ;;  %16778 = vmatprep.subr.bf16.mxu0 %v18060_v44  ;;  %v18095_v42 = vld [vmem:[%s22205_s1 + $0x9a8] sm:$0xff]  }
 0x356   :  { %v16476_v43 = vpop.f32.mrb[76].mxu0  ;;  %16800 = vmatprep.subr.bf16.mxu1 %v18061_v50  ;;  %v18097_v50 = vld [vmem:[%s22205_s1 + $0x9f0] sm:$0xff]  }
 0x357   :  { %v16498_v45 = vpop.f32.mrb[76].mxu1  ;;  %v16477_v46 = vpop.f32.mrb[77].mxu0 }
 0x358   :  { %v16478_v48 = vadd.f32 %v16477_v46, %v16476_v43  ;;  %v16499_v49 = vpop.f32.mrb[77].mxu1  ;;  %v16479_v62 = vpop.f32.mrb[78].mxu0  ;;  %16779 = vmatpush3.bf16.msra.mxu0 %v18062_v51  ;;  %v18098_v51 = vld [vmem:[%s22205_s1 + $0x930] sm:$0xff]  }
 0x359   :  { %v16500_v37 = vadd.f32 %v16499_v49, %v16498_v45  ;;  %v16501_v39 = vpop.f32.mrb[78].mxu1  ;;  %v16480_v53 = vpop.f32.mrb[79].mxu0  ;;  %16801 = vmatpush3.bf16.msra.mxu1 %v18063_v52  ;;  %16780 = vmatprep.subr.bf16.mxu0 %v18064_v55  ;;  %v18096_v49 = vld [vmem:[%s22205_s1 + $0x970] sm:$0xff]   ;;  %v18101_v52 = vld [vmem:[%s22205_s1 + $0x9f8] sm:$0xff]   ;;  %v18105_v55 = vld [vmem:[%s22205_s1 + $0xac0] sm:$0xff]  }
 0x35a   :  { %v6891_v14 = vadd.f32 %v16478_v48, %v21121_v61  ;;  %v16502_v54 = vpop.f32.mrb[79].mxu1  ;;  %16802 = vmatprep.subr.bf16.mxu1 %v18065_v57  ;;  %v18072_v61 = vld [vmem:[%s22205_s1 + $0x940] sm:$0xff]   ;;  %v18100_v39 = vld [vmem:[%s22205_s1 + $0x978] sm:$0xff]  }
 0x35b   :  { %v18103_v53 = vld [vmem:[%s22205_s1 + $0x9b8] sm:$0xff]   ;;  %v18104_v54 = vld [vmem:[%s22205_s1 + $0xa40] sm:$0xff]  }
 0x35c   :  { %v21230_v56 = vadd.f32 %v16500_v37, %v6891_v14  ;;  %16781 = vmatpush3.bf16.msra.mxu0 %v18066_v58  ;;  %v18099_v37 = vld [vmem:[%s22205_s1 + $0x9b0] sm:$0xff]   ;;  %v18102_v14 = vld [vmem:[%s22205_s1 + $0x938] sm:$0xff]   ;;  %v18106_v57 = vld [vmem:[%s22205_s1 + $0xa00] sm:$0xff]  }
 0x35d   :  { %16803 = vmatpush3.bf16.msra.mxu1 %v18067_v4  ;;  %16782 = vmatprep.subr.bf16.mxu0 %v18068_v59  ;;  %v18107_v58 = vld [vmem:[%s22205_s1 + $0xa80] sm:$0xff]   ;;  %v18108_v4 = vld [vmem:[%s22205_s1 + $0xa48] sm:$0xff]  }
 0x35e   :  { %16804 = vmatprep.subr.bf16.mxu1 %v18069_v35  ;;  %v18109_v59 = vld [vmem:[%s22205_s1 + $0xac8] sm:$0xff]  }
 0x35f   :  { %v18110_v35 = vld [vmem:[%s22205_s1 + $0xa08] sm:$0xff]  }
 0x360   :  { %16783 = vmatpush3.bf16.msra.mxu0 %v18070_v38  ;;  %v18111_v38 = vld [vmem:[%s22205_s1 + $0xa88] sm:$0xff]  }
 0x361   :  { %16805 = vmatpush3.bf16.msra.mxu1 %v18071_v60  ;;  %16812 = vmatprep.subr.bf16.mxu0 %v18072_v61  ;;  %v18112_v60 = vld [vmem:[%s22205_s1 + $0xa50] sm:$0xff]  }
 0x362   :  { %16834 = vmatprep.subr.bf16.mxu1 %v18073_v63  ;;  %v18113_v61 = vld [vmem:[%s22205_s1 + $0xad0] sm:$0xff]  }
 0x363   :  { %9531 = vmatmul.mubr.bf16.vlgmr.msra.gmra.mrb[104].mxu0 %v20395_v21  ;;  %v18114_v63 = vld [vmem:[%s22205_s1 + $0xa10] sm:$0xff]  }
 0x364   :  { %9572 = vmatmul.mubr.bf16.vlgmr.msra.gmra.mrb[104].mxu1 %v20400_v23  ;;  %16813 = vmatpush3.bf16.msra.mxu0 %v18074_v0  ;;  %v18115_v0 = vld [vmem:[%s22205_s1 + $0xa90] sm:$0xff]  }
 0x365   :  { %16835 = vmatpush3.bf16.msra.mxu1 %v18075_v1  ;;  %9612 = vmatprep.mubr.bf16.mxu0 %v20509_v3  ;;  %v18116_v1 = vld [vmem:[%s22205_s1 + $0xa58] sm:$0xff]  }
 0x366   :  { %16814 = vmatprep.subr.bf16.mxu0 %v18076_v12  ;;  %9653 = vmatprep.mubr.bf16.mxu1 %v20519_v7  ;;  %v18117_v12 = vld [vmem:[%s22205_s1 + $0xad8] sm:$0xff]  }
 0x367   :  { %16836 = vmatprep.subr.bf16.mxu1 %v18077_v2  ;;  %v18118_v2 = vld [vmem:[%s22205_s1 + $0xa18] sm:$0xff]  }
 0x368   :  { %16815 = vmatpush3.bf16.msra.mxu0 %v18078_v5  ;;  %v18119_v5 = vld [vmem:[%s22205_s1 + $0xa98] sm:$0xff]  }
 0x369   :  { %16837 = vmatpush3.bf16.msra.mxu1 %v18079_v9  ;;  %16816 = vmatprep.subr.bf16.mxu0 %v18080_v28  ;;  %v18120_v9 = vld [vmem:[%s22205_s1 + $0xa60] sm:$0xff]  }
 0x36a   :  { %16838 = vmatprep.subr.bf16.mxu1 %v18081_v11  ;;  %v18121_v28 = vld [vmem:[%s22205_s1 + $0xae0] sm:$0xff]  }
 0x36b   :  { %v18122_v11 = vld [vmem:[%s22205_s1 + $0xa20] sm:$0xff]  }
 0x36c   :  { %16817 = vmatpush3.bf16.msra.mxu0 %v18082_v16  ;;  %v18123_v16 = vld [vmem:[%s22205_s1 + $0xaa0] sm:$0xff]  }
 0x36d   :  { %16839 = vmatpush3.bf16.msra.mxu1 %v18083_v17  ;;  %16818 = vmatprep.subr.bf16.mxu0 %v18084_v18 }
 0x36e   :  { %16840 = vmatprep.subr.bf16.mxu1 %v18085_v22 }
 0x370   :  { %16819 = vmatpush3.bf16.msra.mxu0 %v18086_v24  ;;  %v18124_v24 = vld [vmem:[%s22205_s1 + $0xa68] sm:$0xff]  }
 0x371   :  { %16841 = vmatpush3.bf16.msra.mxu1 %v18087_v47  ;;  %16820 = vmatprep.subr.bf16.mxu0 %v18088_v25  ;;  %v18125_v47 = vld [vmem:[%s22205_s1 + $0xae8] sm:$0xff]  }
 0x372   :  { %16842 = vmatprep.subr.bf16.mxu1 %v18089_v26 }
 0x374   :  { %16821 = vmatpush3.bf16.msra.mxu0 %v18090_v27 }
 0x375   :  { %16843 = vmatpush3.bf16.msra.mxu1 %v18091_v29  ;;  %16822 = vmatprep.subr.bf16.mxu0 %v18092_v30  ;;  %v18126_v30 = vld [vmem:[%s22205_s1 + $0xa28] sm:$0xff]  }
 0x376   :  { %v16520_v31 = vpop.f32.mrb[80].mxu0  ;;  %16844 = vmatprep.subr.bf16.mxu1 %v18093_v10 }
 0x377   :  { %v16542_v32 = vpop.f32.mrb[80].mxu1  ;;  %v16521_v13 = vpop.f32.mrb[81].mxu0 }
 0x378   :  { %v16522_v33 = vadd.f32 %v16521_v13, %v16520_v31  ;;  %v16543_v34 = vpop.f32.mrb[81].mxu1  ;;  %v16523_v36 = vpop.f32.mrb[82].mxu0  ;;  %16823 = vmatpush3.bf16.msra.mxu0 %v18094_v15  ;;  %v18127_v13 = vld [vmem:[%s22205_s1 + $0xaa8] sm:$0xff]  }
 0x379   :  { %v16544_v40 = vadd.f32 %v16543_v34, %v16542_v32  ;;  %v16545_v41 = vpop.f32.mrb[82].mxu1  ;;  %v16524_v43 = vpop.f32.mrb[83].mxu0  ;;  %16845 = vmatpush3.bf16.msra.mxu1 %v18095_v42  ;;  %16824 = vmatprep.subr.bf16.mxu0 %v18096_v49  ;;  %v18133_v49 = vld [vmem:[%s22205_s1 + $0xaf8] sm:$0xff]  }
 0x37a   :  { %v16546_v44 = vpop.f32.mrb[83].mxu1  ;;  %v16525_v46 = vadd.f32 %v16524_v43, %v16523_v36  ;;  %16846 = vmatprep.subr.bf16.mxu1 %v18097_v50  ;;  %v18130_v43 = vld [vmem:[%s22205_s1 + $0xa30] sm:$0xff]  }
 0x37b   :  { %v21329_v45 = vadd.f32 %v16544_v40, %v16522_v33  ;;  %v16547_v48 = vadd.f32 %v16546_v44, %v16545_v41  ;;  %v18128_v33 = vld [vmem:[%s22205_s1 + $0xa70] sm:$0xff]  }
 0x37c   :  { %16825 = vmatpush3.bf16.msra.mxu0 %v18098_v51  ;;  %v18129_v41 = vld [vmem:[%s22205_s1 + $0xaf0] sm:$0xff]   ;;  %v18364_v51 = vld [vmem:[%s22207_s2] ss:$0 sm:$0xff] }
 0x37d   :  { %v21337_v62 = vadd.f32 %v16547_v48, %v16525_v46  ;;  %16847 = vmatpush3.bf16.msra.mxu1 %v18099_v37  ;;  %16826 = vmatprep.subr.bf16.mxu0 %v18100_v39  ;;  %v18131_v44 = vld [vmem:[%s22205_s1 + $0xab0] sm:$0xff]   ;;  %v18132_v46 = vld [vmem:[%s22205_s1 + $0xa78] sm:$0xff]   ;;  %v6936_v37 = vadd.f32 %v18364_v51, %v21230_v56  ;;  %v18138_v56 = vld [vmem:[%s22205_s1 + $0xb00] sm:$0xff]  }
 0x37e   :  { %16848 = vmatprep.subr.bf16.mxu1 %v18101_v52  ;;  %v18135_v39 = vld [vmem:[%s22205_s1 + $0xab8] sm:$0xff]   ;;  %v18173_v51 = vld [vmem:[%s22205_s1 + $0xcc8] sm:$0xff]  }
 0x380   :  { %16827 = vmatpush3.bf16.msra.mxu0 %v18102_v14  ;;  %v18136_v14 = vld [vmem:[%s22205_s1 + $0xb40] sm:$0xff]  }
 0x381   :  { %16849 = vmatpush3.bf16.msra.mxu1 %v18103_v53  ;;  %16856 = vmatprep.subr.bf16.mxu0 %v18104_v54  ;;  %v18137_v54 = vld [vmem:[%s22205_s1 + $0xbc0] sm:$0xff]  }
 0x382   :  { %16878 = vmatprep.subr.bf16.mxu1 %v18105_v55  ;;  %v18139_v55 = vld [vmem:[%s22205_s1 + $0xb80] sm:$0xff]  }
 0x383   :  { %9613 = vmatmul.mubr.bf16.vlgmr.msra.gmra.mrb[108].mxu0 %v20517_v6 }
 0x384   :  { %9654 = vmatmul.mubr.bf16.vlgmr.msra.gmra.mrb[108].mxu1 %v20521_v8  ;;  %16857 = vmatpush3.bf16.msra.mxu0 %v18106_v57  ;;  %v18140_v57 = vld [vmem:[%s22205_s1 + $0xb48] sm:$0xff]  }
 0x385   :  { %16879 = vmatpush3.bf16.msra.mxu1 %v18107_v58  ;;  %10213 = vmatprep.mubr.bf16.mxu0 %v20391_v19  ;;  %v18141_v58 = vld [vmem:[%s22205_s1 + $0xbc8] sm:$0xff]  }
 0x386   :  { %16858 = vmatprep.subr.bf16.mxu0 %v18108_v4  ;;  %10254 = vmatprep.mubr.bf16.mxu1 %v20393_v20  ;;  %v18142_v4 = vld [vmem:[%s22205_s1 + $0xb08] sm:$0xff]  }
 0x387   :  { %16880 = vmatprep.subr.bf16.mxu1 %v18109_v59  ;;  %v18143_v59 = vld [vmem:[%s22205_s1 + $0xb88] sm:$0xff]  }
 0x388   :  { %16859 = vmatpush3.bf16.msra.mxu0 %v18110_v35  ;;  %v18144_v35 = vld [vmem:[%s22205_s1 + $0xb50] sm:$0xff]  }
 0x389   :  { %16881 = vmatpush3.bf16.msra.mxu1 %v18111_v38  ;;  %16860 = vmatprep.subr.bf16.mxu0 %v18112_v60  ;;  %v18145_v38 = vld [vmem:[%s22205_s1 + $0xbd0] sm:$0xff]  }
 0x38a   :  { %16882 = vmatprep.subr.bf16.mxu1 %v18113_v61  ;;  %v18146_v60 = vld [vmem:[%s22205_s1 + $0xb10] sm:$0xff]  }
 0x38b   :  { %v18147_v61 = vld [vmem:[%s22205_s1 + $0xb90] sm:$0xff]  }
 0x38c   :  { %16861 = vmatpush3.bf16.msra.mxu0 %v18114_v63  ;;  %v18148_v63 = vld [vmem:[%s22205_s1 + $0xb58] sm:$0xff]  }
 0x38d   :  { %16883 = vmatpush3.bf16.msra.mxu1 %v18115_v0  ;;  %16862 = vmatprep.subr.bf16.mxu0 %v18116_v1  ;;  %v18149_v0 = vld [vmem:[%s22205_s1 + $0xbd8] sm:$0xff]  }
 0x38e   :  { %16884 = vmatprep.subr.bf16.mxu1 %v18117_v12  ;;  %v18150_v1 = vld [vmem:[%s22205_s1 + $0xb18] sm:$0xff]  }
 0x38f   :  { %v18151_v12 = vld [vmem:[%s22205_s1 + $0xb98] sm:$0xff]  }
 0x390   :  { %16863 = vmatpush3.bf16.msra.mxu0 %v18118_v2  ;;  %v18152_v2 = vld [vmem:[%s22205_s1 + $0xb60] sm:$0xff]  }
 0x391   :  { %16885 = vmatpush3.bf16.msra.mxu1 %v18119_v5  ;;  %16864 = vmatprep.subr.bf16.mxu0 %v18120_v9  ;;  %v18153_v5 = vld [vmem:[%s22205_s1 + $0xbe0] sm:$0xff]  }
 0x392   :  { %16886 = vmatprep.subr.bf16.mxu1 %v18121_v28  ;;  %v18154_v9 = vld [vmem:[%s22205_s1 + $0xb20] sm:$0xff]  }
 0x393   :  { %v18155_v28 = vld [vmem:[%s22205_s1 + $0xba0] sm:$0xff]  }
 0x394   :  { %16865 = vmatpush3.bf16.msra.mxu0 %v18122_v11 }
 0x395   :  { %16887 = vmatpush3.bf16.msra.mxu1 %v18123_v16  ;;  %16866 = vmatprep.subr.bf16.mxu0 %v18124_v24 }
 0x396   :  { %v16564_v17 = vpop.f32.mrb[84].mxu0  ;;  %16888 = vmatprep.subr.bf16.mxu1 %v18125_v47 }
 0x397   :  { %v16586_v18 = vpop.f32.mrb[84].mxu1  ;;  %v16565_v22 = vpop.f32.mrb[85].mxu0 }
 0x398   :  { %v16566_v25 = vadd.f32 %v16565_v22, %v16564_v17  ;;  %v16587_v26 = vpop.f32.mrb[85].mxu1  ;;  %v16567_v27 = vpop.f32.mrb[86].mxu0  ;;  %16867 = vmatpush3.bf16.msra.mxu0 %v18126_v30  ;;  %v18157_v22 = vld [vmem:[%s22205_s1 + $0xbe8] sm:$0xff]  }
 0x399   :  { %v16588_v29 = vadd.f32 %v16587_v26, %v16586_v18  ;;  %v16589_v31 = vpop.f32.mrb[86].mxu1  ;;  %v16568_v10 = vpop.f32.mrb[87].mxu0  ;;  %16889 = vmatpush3.bf16.msra.mxu1 %v18127_v13  ;;  %16868 = vmatprep.subr.bf16.mxu0 %v18128_v33  ;;  %v18156_v18 = vld [vmem:[%s22205_s1 + $0xb68] sm:$0xff]  }
 0x39a   :  { %v7566_v32 = vadd.f32 %v16566_v25, %v21329_v45  ;;  %v16590_v15 = vpop.f32.mrb[87].mxu1  ;;  %v16569_v34 = vadd.f32 %v16568_v10, %v16567_v27  ;;  %16890 = vmatprep.subr.bf16.mxu1 %v18129_v41  ;;  %v18163_v41 = vld [vmem:[%s22205_s1 + $0xbb0] sm:$0xff]  }
 0x39b   :  { %v16591_v36 = vadd.f32 %v16590_v15, %v16589_v31  ;;  %v18159_v31 = vld [vmem:[%s22205_s1 + $0xba8] sm:$0xff]   ;;  %v18160_v15 = vld [vmem:[%s22205_s1 + $0xb70] sm:$0xff]  }
 0x39c   :  { %v7607_v40 = vadd.f32 %v16588_v29, %v7566_v32  ;;  %v7569_v42 = vadd.f32 %v16569_v34, %v21337_v62  ;;  %16869 = vmatpush3.bf16.msra.mxu0 %v18130_v43  ;;  %v18134_v62 = vld [vmem:[%s22205_s1 + $0xa38] sm:$0xff]   ;;  %v18158_v29 = vld [vmem:[%s22205_s1 + $0xb28] sm:$0xff]   ;;  %v18161_v34 = vld [vmem:[%s22205_s1 + $0xbf0] sm:$0xff]  }
 0x39d   :  { %16891 = vmatpush3.bf16.msra.mxu1 %v18131_v44  ;;  %16870 = vmatprep.subr.bf16.mxu0 %v18132_v46  ;;  %v18165_v43 = vld [vmem:[%s22205_s1 + $0xbf8] sm:$0xff]   ;;  %v18168_v46 = vld [vmem:[%s22205_s1 + $0xc40] sm:$0xff]  }
 0x39e   :  { %v7610_v45 = vadd.f32 %v16591_v36, %v7569_v42  ;;  %v7615_v48 = vrot.slane %v7607_v40, 1  ;;  %16892 = vmatprep.subr.bf16.mxu1 %v18133_v49  ;;  %v18162_v36 = vld [vmem:[%s22205_s1 + $0xb30] sm:$0xff]   ;;  %v18164_v42 = vld [vmem:[%s22205_s1 + $0xb78] sm:$0xff]   ;;  %v18170_v49 = vld [vmem:[%s22205_s1 + $0xc00] sm:$0xff]  }
 0x39f   :  { %v18166_v44 = vld [vmem:[%s22205_s1 + $0xb38] sm:$0xff]  }
 0x3a0   :  { %v7616_v50 = vrot.slane %v7610_v45, 1  ;;  %16871 = vmatpush3.bf16.msra.mxu0 %v18134_v62  ;;  %v18167_v45 = vld [vmem:[%s22205_s1 + $0xbb8] sm:$0xff]   ;;  %v18172_v62 = vld [vmem:[%s22205_s1 + $0xc48] sm:$0xff]  }
 0x3a1   :  { %16893 = vmatpush3.bf16.msra.mxu1 %v18135_v39  ;;  %16900 = vmatprep.subr.bf16.mxu0 %v18136_v14  ;;  %v18175_v39 = vld [vmem:[%s22205_s1 + $0xc88] sm:$0xff]   ;;  %v18177_v14 = vld [vmem:[%s22205_s1 + $0xcd0] sm:$0xff]  }
 0x3a2   :  { %v7617_v52 = vsel %vm1423_vm0, %v7615_v48, %v7616_v50  ;;  %16922 = vmatprep.subr.bf16.mxu1 %v18137_v54  ;;  %v18169_v48 = vld [vmem:[%s22205_s1 + $0xcc0] sm:$0xff]   ;;  %v18178_v54 = vld [vmem:[%s22205_s1 + $0xc10] sm:$0xff]  }
 0x3a3   :  { %v21467_v53 = vadd.f32 %v7617_v52, %v6936_v37  ;;  %10214 = vmatmul.mubr.bf16.vlgmr.msra.gmra.mrb[112].mxu0 %v20395_v21  ;;  %v18171_v50 = vld [vmem:[%s22205_s1 + $0xc80] sm:$0xff]   ;;  %v18174_v37 = vld [vmem:[%s22205_s1 + $0xc08] sm:$0xff]   ;;  %v18176_v52 = vld [vmem:[%s22205_s1 + $0xc50] sm:$0xff]  }
 0x3a4   :  { %10255 = vmatmul.mubr.bf16.vlgmr.msra.gmra.mrb[112].mxu1 %v20400_v23  ;;  %16901 = vmatpush3.bf16.msra.mxu0 %v18138_v56  ;;  %v18179_v56 = vld [vmem:[%s22205_s1 + $0xc90] sm:$0xff]  }
 0x3a5   :  { %16923 = vmatpush3.bf16.msra.mxu1 %v18139_v55  ;;  %10295 = vmatprep.mubr.bf16.mxu0 %v20509_v3  ;;  %v18180_v55 = vld [vmem:[%s22205_s1 + $0xc58] sm:$0xff]  }
 0x3a6   :  { %16902 = vmatprep.subr.bf16.mxu0 %v18140_v57  ;;  %10336 = vmatprep.mubr.bf16.mxu1 %v20519_v7  ;;  %v18181_v57 = vld [vmem:[%s22205_s1 + $0xcd8] sm:$0xff]  }
 0x3a7   :  { %16924 = vmatprep.subr.bf16.mxu1 %v18141_v58  ;;  %v18182_v58 = vld [vmem:[%s22205_s1 + $0xc18] sm:$0xff]  }
 0x3a8   :  { %16903 = vmatpush3.bf16.msra.mxu0 %v18142_v4  ;;  %v18183_v4 = vld [vmem:[%s22205_s1 + $0xc98] sm:$0xff]  }
 0x3a9   :  { %16925 = vmatpush3.bf16.msra.mxu1 %v18143_v59  ;;  %16904 = vmatprep.subr.bf16.mxu0 %v18144_v35  ;;  %v18184_v59 = vld [vmem:[%s22205_s1 + $0xc60] sm:$0xff]  }
 0x3aa   :  { %16926 = vmatprep.subr.bf16.mxu1 %v18145_v38  ;;  %v18185_v35 = vld [vmem:[%s22205_s1 + $0xce0] sm:$0xff]  }
 0x3ab   :  { %v18186_v38 = vld [vmem:[%s22205_s1 + $0xc20] sm:$0xff]  }
 0x3ac   :  { %16905 = vmatpush3.bf16.msra.mxu0 %v18146_v60  ;;  %v18187_v60 = vld [vmem:[%s22205_s1 + $0xca0] sm:$0xff]  }
 0x3ad   :  { %16927 = vmatpush3.bf16.msra.mxu1 %v18147_v61  ;;  %16906 = vmatprep.subr.bf16.mxu0 %v18148_v63  ;;  %v18188_v63 = vld [vmem:[%s22205_s1 + $0xc68] sm:$0xff]  }
 0x3ae   :  { %16928 = vmatprep.subr.bf16.mxu1 %v18149_v0 }
 0x3b0   :  { %16907 = vmatpush3.bf16.msra.mxu0 %v18150_v1 }
 0x3b1   :  { %16929 = vmatpush3.bf16.msra.mxu1 %v18151_v12  ;;  %16908 = vmatprep.subr.bf16.mxu0 %v18152_v2 }
 0x3b2   :  { %16930 = vmatprep.subr.bf16.mxu1 %v18153_v5  ;;  %v18189_v5 = vld [vmem:[%s22205_s1 + $0xce8] sm:$0xff]  }
 0x3b4   :  { %16909 = vmatpush3.bf16.msra.mxu0 %v18154_v9 }
 0x3b5   :  { %16931 = vmatpush3.bf16.msra.mxu1 %v18155_v28  ;;  %16910 = vmatprep.subr.bf16.mxu0 %v18156_v18  ;;  %v18190_v28 = vld [vmem:[%s22205_s1 + $0xc28] sm:$0xff]  }
 0x3b6   :  { %v16608_v11 = vpop.f32.mrb[88].mxu0  ;;  %16932 = vmatprep.subr.bf16.mxu1 %v18157_v22 }
 0x3b7   :  { %v16630_v16 = vpop.f32.mrb[88].mxu1  ;;  %v16609_v17 = vpop.f32.mrb[89].mxu0 }
 0x3b8   :  { %v16610_v24 = vadd.f32 %v16609_v17, %v16608_v11  ;;  %v16631_v47 = vpop.f32.mrb[89].mxu1  ;;  %v16611_v25 = vpop.f32.mrb[90].mxu0  ;;  %16911 = vmatpush3.bf16.msra.mxu0 %v18158_v29  ;;  %v18191_v17 = vld [vmem:[%s22205_s1 + $0xca8] sm:$0xff]   ;;  %v18193_v29 = vld [vmem:[%s22205_s1 + $0xcf0] sm:$0xff]  }
 0x3b9   :  { %v16632_v26 = vadd.f32 %v16631_v47, %v16630_v16  ;;  %v16633_v27 = vpop.f32.mrb[90].mxu1  ;;  %v16612_v30 = vpop.f32.mrb[91].mxu0  ;;  %16933 = vmatpush3.bf16.msra.mxu1 %v18159_v31  ;;  %16912 = vmatprep.subr.bf16.mxu0 %v18160_v15 }
 0x3ba   :  { %v16613_v13 = vadd.f32 %v16612_v30, %v16611_v25  ;;  %v16634_v10 = vpop.f32.mrb[91].mxu1  ;;  %16934 = vmatprep.subr.bf16.mxu1 %v18161_v34  ;;  %v18194_v30 = vld [vmem:[%s22205_s1 + $0xc30] sm:$0xff]  }
 0x3bb   :  { %v21542_v32 = vadd.f32 %v16632_v26, %v16610_v24  ;;  %v16635_v33 = vadd.f32 %v16634_v10, %v16633_v27  ;;  %v18192_v26 = vld [vmem:[%s22205_s1 + $0xc70] sm:$0xff]   ;;  %v18196_v10 = vld [vmem:[%s22205_s1 + $0xc78] sm:$0xff]  }
 0x3bc   :  { %16913 = vmatpush3.bf16.msra.mxu0 %v18162_v36  ;;  %v18198_v36 = vld [vmem:[%s22205_s1 + $0xc38] sm:$0xff]  }
 0x3bd   :  { %v21553_v40 = vadd.f32 %v16635_v33, %v16613_v13  ;;  %16935 = vmatpush3.bf16.msra.mxu1 %v18163_v41  ;;  %16914 = vmatprep.subr.bf16.mxu0 %v18164_v42  ;;  %v18197_v33 = vld [vmem:[%s22205_s1 + $0xcf8] sm:$0xff]   ;;  %v18200_v42 = vld [vmem:[%s22205_s1 + $0xd40] sm:$0xff]  }
 0x3be   :  { %16936 = vmatprep.subr.bf16.mxu1 %v18165_v43 }
 0x3c0   :  { %16915 = vmatpush3.bf16.msra.mxu0 %v18166_v44  ;;  %v18201_v44 = vld [vmem:[%s22205_s1 + $0xdc0] sm:$0xff]  }
 0x3c1   :  { %16937 = vmatpush3.bf16.msra.mxu1 %v18167_v45  ;;  %16944 = vmatprep.subr.bf16.mxu0 %v18168_v46  ;;  %v18202_v45 = vld [vmem:[%s22205_s1 + $0xd00] sm:$0xff]  }
 0x3c2   :  { %16966 = vmatprep.subr.bf16.mxu1 %v18169_v48  ;;  %v18203_v46 = vld [vmem:[%s22205_s1 + $0xd80] sm:$0xff]   ;;  %v18205_v48 = vld [vmem:[%s22205_s1 + $0xdc8] sm:$0xff]  }
 0x3c3   :  { %10296 = vmatmul.mubr.bf16.vlgmr.msra.gmra.mrb[116].mxu0 %v20517_v6 }
 0x3c4   :  { %10337 = vmatmul.mubr.bf16.vlgmr.msra.gmra.mrb[116].mxu1 %v20521_v8  ;;  %16945 = vmatpush3.bf16.msra.mxu0 %v18170_v49  ;;  %v18206_v49 = vld [vmem:[%s22205_s1 + $0xd08] sm:$0xff]  }
 0x3c5   :  { %16967 = vmatpush3.bf16.msra.mxu1 %v18171_v50  ;;  %10896 = vmatprep.mubr.bf16.mxu0 %v20391_v19  ;;  %v18207_v50 = vld [vmem:[%s22205_s1 + $0xd88] sm:$0xff]  }
 0x3c6   :  { %16946 = vmatprep.subr.bf16.mxu0 %v18172_v62  ;;  %10937 = vmatprep.mubr.bf16.mxu1 %v20393_v20  ;;  %v18208_v62 = vld [vmem:[%s22205_s1 + $0xd50] sm:$0xff]  }
 0x3c7   :  { %16968 = vmatprep.subr.bf16.mxu1 %v18173_v51  ;;  %v18209_v51 = vld [vmem:[%s22205_s1 + $0xdd0] sm:$0xff]  }
 0x3c8   :  { %16947 = vmatpush3.bf16.msra.mxu0 %v18174_v37  ;;  %v18210_v37 = vld [vmem:[%s22205_s1 + $0xd10] sm:$0xff]  }
 0x3c9   :  { %16969 = vmatpush3.bf16.msra.mxu1 %v18175_v39  ;;  %16948 = vmatprep.subr.bf16.mxu0 %v18176_v52  ;;  %v18211_v39 = vld [vmem:[%s22205_s1 + $0xd90] sm:$0xff]   ;;  %v18212_v52 = vld [vmem:[%s22205_s1 + $0xd58] sm:$0xff]  }
 0x3ca   :  { %16970 = vmatprep.subr.bf16.mxu1 %v18177_v14  ;;  %v18213_v14 = vld [vmem:[%s22205_s1 + $0xdd8] sm:$0xff]  }
 0x3cc   :  { %16949 = vmatpush3.bf16.msra.mxu0 %v18178_v54  ;;  %v18214_v54 = vld [vmem:[%s22205_s1 + $0xd18] sm:$0xff]  }
 0x3cd   :  { %16971 = vmatpush3.bf16.msra.mxu1 %v18179_v56  ;;  %16950 = vmatprep.subr.bf16.mxu0 %v18180_v55  ;;  %v18215_v56 = vld [vmem:[%s22205_s1 + $0xd98] sm:$0xff]   ;;  %v18216_v55 = vld [vmem:[%s22205_s1 + $0xd60] sm:$0xff]  }
 0x3ce   :  { %16972 = vmatprep.subr.bf16.mxu1 %v18181_v57  ;;  %v18217_v57 = vld [vmem:[%s22205_s1 + $0xde0] sm:$0xff]  }
 0x3d0   :  { %16951 = vmatpush3.bf16.msra.mxu0 %v18182_v58  ;;  %v18218_v58 = vld [vmem:[%s22205_s1 + $0xd20] sm:$0xff]  }
 0x3d1   :  { %16973 = vmatpush3.bf16.msra.mxu1 %v18183_v4  ;;  %16952 = vmatprep.subr.bf16.mxu0 %v18184_v59  ;;  %v18219_v4 = vld [vmem:[%s22205_s1 + $0xda0] sm:$0xff]  }
 0x3d2   :  { %16974 = vmatprep.subr.bf16.mxu1 %v18185_v35 }
 0x3d4   :  { %16953 = vmatpush3.bf16.msra.mxu0 %v18186_v38 }
 0x3d5   :  { %16975 = vmatpush3.bf16.msra.mxu1 %v18187_v60  ;;  %16954 = vmatprep.subr.bf16.mxu0 %v18188_v63  ;;  %v18220_v60 = vld [vmem:[%s22205_s1 + $0xd68] sm:$0xff]  }
 0x3d6   :  { %v16652_v61 = vpop.f32.mrb[92].mxu0  ;;  %16976 = vmatprep.subr.bf16.mxu1 %v18189_v5  ;;  %v18222_v5 = vld [vmem:[%s22205_s1 + $0xd28] sm:$0xff]  }
 0x3d7   :  { %v16674_v0 = vpop.f32.mrb[92].mxu1  ;;  %v16653_v1 = vpop.f32.mrb[93].mxu0 }
 0x3d8   :  { %v16654_v12 = vadd.f32 %v16653_v1, %v16652_v61  ;;  %v16675_v2 = vpop.f32.mrb[93].mxu1  ;;  %v16655_v9 = vpop.f32.mrb[94].mxu0  ;;  %16955 = vmatpush3.bf16.msra.mxu0 %v18190_v28  ;;  %v18221_v61 = vld [vmem:[%s22205_s1 + $0xde8] sm:$0xff]  }
 0x3d9   :  { %v16676_v11 = vadd.f32 %v16675_v2, %v16674_v0  ;;  %v16677_v16 = vpop.f32.mrb[94].mxu1  ;;  %v16656_v22 = vpop.f32.mrb[95].mxu0  ;;  %16977 = vmatpush3.bf16.msra.mxu1 %v18191_v17  ;;  %16956 = vmatprep.subr.bf16.mxu0 %v18192_v26  ;;  %v18227_v26 = vld [vmem:[%s22205_s1 + $0xdb0] sm:$0xff]  }
 0x3da   :  { %v8249_v18 = vadd.f32 %v16654_v12, %v21542_v32  ;;  %v16678_v24 = vpop.f32.mrb[95].mxu1  ;;  %v16657_v47 = vadd.f32 %v16656_v22, %v16655_v9  ;;  %16978 = vmatprep.subr.bf16.mxu1 %v18193_v29  ;;  %v18195_v32 = vld [vmem:[%s22205_s1 + $0xcb0] sm:$0xff]   ;;  %v18223_v9 = vld [vmem:[%s22205_s1 + $0xda8] sm:$0xff]   ;;  %v18229_v29 = vld [vmem:[%s22205_s1 + $0xdf8] sm:$0xff]  }
 0x3db   :  { %v16679_v25 = vadd.f32 %v16678_v24, %v16677_v16  ;;  %v18225_v24 = vld [vmem:[%s22205_s1 + $0xdf0] sm:$0xff]  }
 0x3dc   :  { %v8290_v27 = vadd.f32 %v16676_v11, %v8249_v18  ;;  %v8252_v31 = vadd.f32 %v16657_v47, %v21553_v40  ;;  %16957 = vmatpush3.bf16.msra.mxu0 %v18194_v30  ;;  %v18199_v40 = vld [vmem:[%s22205_s1 + $0xcb8] sm:$0xff]   ;;  %v18224_v18 = vld [vmem:[%s22205_s1 + $0xd70] sm:$0xff]  }
 0x3dd   :  { %16979 = vmatpush3.bf16.msra.mxu1 %v18195_v32  ;;  %16958 = vmatprep.subr.bf16.mxu0 %v18196_v10  ;;  %v18226_v47 = vld [vmem:[%s22205_s1 + $0xd30] sm:$0xff]   ;;  %v18231_v30 = vld [vmem:[%s22205_s1 + $0xdb8] sm:$0xff]   ;;  %v18232_v32 = vld [vmem:[%s22205_s1 + $0xe40] sm:$0xff]  }
 0x3de   :  { %v8293_v13 = vadd.f32 %v16679_v25, %v8252_v31  ;;  %v8298_v15 = vrot.slane %v8290_v27, 2  ;;  %16980 = vmatprep.subr.bf16.mxu1 %v18197_v33  ;;  %v18228_v27 = vld [vmem:[%s22205_s1 + $0xd78] sm:$0xff]   ;;  %v18234_v10 = vld [vmem:[%s22205_s1 + $0xe00] sm:$0xff]   ;;  %v18236_v33 = vld [vmem:[%s22205_s1 + $0xe48] sm:$0xff]  }
 0x3df   :  { %v18230_v31 = vld [vmem:[%s22205_s1 + $0xd38] sm:$0xff]  }
 0x3e0   :  { %v8299_v34 = vrot.slane %v8293_v13, 2  ;;  %16959 = vmatpush3.bf16.msra.mxu0 %v18198_v36  ;;  %v18233_v13 = vld [vmem:[%s22205_s1 + $0xec0] sm:$0xff]   ;;  %v18238_v36 = vld [vmem:[%s22205_s1 + $0xe08] sm:$0xff]  }
 0x3e1   :  { %16981 = vmatpush3.bf16.msra.mxu1 %v18199_v40  ;;  %16988 = vmatprep.subr.bf16.mxu0 %v18200_v42  ;;  %v18239_v40 = vld [vmem:[%s22205_s1 + $0xe88] sm:$0xff]   ;;  %v18241_v42 = vld [vmem:[%s22205_s1 + $0xed0] sm:$0xff]  }
 0x3e2   :  { %v8300_v41 = vsel %vm2108_vm1, %v8298_v15, %v8299_v34  ;;  %17010 = vmatprep.subr.bf16.mxu1 %v18201_v44  ;;  %v18235_v15 = vld [vmem:[%s22205_s1 + $0xe80] sm:$0xff]   ;;  %v18237_v34 = vld [vmem:[%s22205_s1 + $0xec8] sm:$0xff]   ;;  %v18242_v44 = vld [vmem:[%s22205_s1 + $0xe10] sm:$0xff]  }
 0x3e3   :  { %v21677_v43 = vadd.f32 %v8300_v41, %v21467_v53  ;;  %10897 = vmatmul.mubr.bf16.vlgmr.msra.gmra.mrb[120].mxu0 %v20395_v21  ;;  %v18204_v53 = vld [vmem:[%s22205_s1 + $0xd48] sm:$0xff]   ;;  %v18240_v41 = vld [vmem:[%s22205_s1 + $0xe50] sm:$0xff]  }
 0x3e4   :  { %10938 = vmatmul.mubr.bf16.vlgmr.msra.gmra.mrb[120].mxu1 %v20400_v23  ;;  %16989 = vmatpush3.bf16.msra.mxu0 %v18202_v45  ;;  %v18243_v45 = vld [vmem:[%s22205_s1 + $0xe90] sm:$0xff]  }
 0x3e5   :  { %17011 = vmatpush3.bf16.msra.mxu1 %v18203_v46  ;;  %10978 = vmatprep.mubr.bf16.mxu0 %v20509_v3  ;;  %v18244_v46 = vld [vmem:[%s22205_s1 + $0xe58] sm:$0xff]  }
 0x3e6   :  { %16990 = vmatprep.subr.bf16.mxu0 %v18204_v53  ;;  %11019 = vmatprep.mubr.bf16.mxu1 %v20519_v7  ;;  %v18245_v53 = vld [vmem:[%s22205_s1 + $0xed8] sm:$0xff]  }
 0x3e7   :  { %17012 = vmatprep.subr.bf16.mxu1 %v18205_v48  ;;  %v18246_v48 = vld [vmem:[%s22205_s1 + $0xe18] sm:$0xff]  }
 0x3e8   :  { %16991 = vmatpush3.bf16.msra.mxu0 %v18206_v49  ;;  %v18247_v49 = vld [vmem:[%s22205_s1 + $0xe98] sm:$0xff]  }
 0x3e9   :  { %17013 = vmatpush3.bf16.msra.mxu1 %v18207_v50  ;;  %16992 = vmatprep.subr.bf16.mxu0 %v18208_v62  ;;  %v18248_v50 = vld [vmem:[%s22205_s1 + $0xe60] sm:$0xff]  }
 0x3ea   :  { %17014 = vmatprep.subr.bf16.mxu1 %v18209_v51  ;;  %v18249_v62 = vld [vmem:[%s22205_s1 + $0xee0] sm:$0xff]  }
 0x3eb   :  { %v18250_v51 = vld [vmem:[%s22205_s1 + $0xe20] sm:$0xff]  }
 0x3ec   :  { %16993 = vmatpush3.bf16.msra.mxu0 %v18210_v37  ;;  %v18251_v37 = vld [vmem:[%s22205_s1 + $0xea0] sm:$0xff]  }
 0x3ed   :  { %17015 = vmatpush3.bf16.msra.mxu1 %v18211_v39  ;;  %16994 = vmatprep.subr.bf16.mxu0 %v18212_v52 }
 0x3ee   :  { %17016 = vmatprep.subr.bf16.mxu1 %v18213_v14 }
 0x3f0   :  { %16995 = vmatpush3.bf16.msra.mxu0 %v18214_v54 }
 0x3f1   :  { %17017 = vmatpush3.bf16.msra.mxu1 %v18215_v56  ;;  %16996 = vmatprep.subr.bf16.mxu0 %v18216_v55  ;;  %v18252_v55 = vld [vmem:[%s22205_s1 + $0xe68] sm:$0xff]  }
 0x3f2   :  { %17018 = vmatprep.subr.bf16.mxu1 %v18217_v57 }
 0x3f4   :  { %16997 = vmatpush3.bf16.msra.mxu0 %v18218_v58  ;;  %v18253_v58 = vld [vmem:[%s22205_s1 + $0xee8] sm:$0xff]  }
 0x3f5   :  { %17019 = vmatpush3.bf16.msra.mxu1 %v18219_v4  ;;  %16998 = vmatprep.subr.bf16.mxu0 %v18220_v60  ;;  %v18255_v60 = vld [vmem:[%s22205_s1 + $0xea8] sm:$0xff]  }
 0x3f6   :  { %v16696_v59 = vpop.f32.mrb[96].mxu0  ;;  %17020 = vmatprep.subr.bf16.mxu1 %v18221_v61 }
 0x3f7   :  { %v16718_v35 = vpop.f32.mrb[96].mxu1  ;;  %v16697_v38 = vpop.f32.mrb[97].mxu0 }
 0x3f8   :  { %v16698_v63 = vadd.f32 %v16697_v38, %v16696_v59  ;;  %v16719_v0 = vpop.f32.mrb[97].mxu1  ;;  %v16699_v1 = vpop.f32.mrb[98].mxu0  ;;  %16999 = vmatpush3.bf16.msra.mxu0 %v18222_v5  ;;  %v18257_v5 = vld [vmem:[%s22205_s1 + $0xef0] sm:$0xff]  }
 0x3f9   :  { %v16720_v12 = vadd.f32 %v16719_v0, %v16718_v35  ;;  %v16721_v2 = vpop.f32.mrb[98].mxu1  ;;  %v16700_v28 = vpop.f32.mrb[99].mxu0  ;;  %17021 = vmatpush3.bf16.msra.mxu1 %v18223_v9  ;;  %17000 = vmatprep.subr.bf16.mxu0 %v18224_v18  ;;  %v18254_v35 = vld [vmem:[%s22205_s1 + $0xe28] sm:$0xff]   ;;  %v18256_v0 = vld [vmem:[%s22205_s1 + $0xe70] sm:$0xff]  }
 0x3fa   :  { %v16701_v16 = vadd.f32 %v16700_v28, %v16699_v1  ;;  %v16722_v17 = vpop.f32.mrb[99].mxu1  ;;  %17022 = vmatprep.subr.bf16.mxu1 %v18225_v24  ;;  %v18258_v28 = vld [vmem:[%s22205_s1 + $0xe30] sm:$0xff]  }
 0x3fb   :  { %v21752_v11 = vadd.f32 %v16720_v12, %v16698_v63  ;;  %v16723_v22 = vadd.f32 %v16722_v17, %v16721_v2  ;;  %v18260_v17 = vld [vmem:[%s22205_s1 + $0xe78] sm:$0xff]  }
 0x3fc   :  { %17001 = vmatpush3.bf16.msra.mxu0 %v18226_v47  ;;  %v18262_v47 = vld [vmem:[%s22205_s1 + $0xe38] sm:$0xff]  }
 0x3fd   :  { %v21763_v25 = vadd.f32 %v16723_v22, %v16701_v16  ;;  %17023 = vmatpush3.bf16.msra.mxu1 %v18227_v26  ;;  %17002 = vmatprep.subr.bf16.mxu0 %v18228_v27  ;;  %v18261_v22 = vld [vmem:[%s22205_s1 + $0xef8] sm:$0xff]   ;;  %v18264_v27 = vld [vmem:[%s22205_s1 + $0xf40] sm:$0xff]  }
 0x3fe   :  { %17024 = vmatprep.subr.bf16.mxu1 %v18229_v29 }
 0x400   :  { %17003 = vmatpush3.bf16.msra.mxu0 %v18230_v31  ;;  %v18265_v31 = vld [vmem:[%s22205_s1 + $0xfc0] sm:$0xff]  }
 0x401   :  { %17025 = vmatpush3.bf16.msra.mxu1 %v18231_v30  ;;  %17032 = vmatprep.subr.bf16.mxu0 %v18232_v32  ;;  %v18266_v30 = vld [vmem:[%s22205_s1 + $0xf00] sm:$0xff]  }
 0x402   :  { %17054 = vmatprep.subr.bf16.mxu1 %v18233_v13  ;;  %v18267_v32 = vld [vmem:[%s22205_s1 + $0xf80] sm:$0xff]   ;;  %v18269_v13 = vld [vmem:[%s22205_s1 + $0xfc8] sm:$0xff]  }
 0x403   :  { %10979 = vmatmul.mubr.bf16.vlgmr.msra.gmra.mrb[124].mxu0 %v20517_v6 }
 0x404   :  { %11020 = vmatmul.mubr.bf16.vlgmr.msra.gmra.mrb[124].mxu1 %v20521_v8  ;;  %17033 = vmatpush3.bf16.msra.mxu0 %v18234_v10  ;;  %v18270_v10 = vld [vmem:[%s22205_s1 + $0xf08] sm:$0xff]  }
 0x405   :  { %17055 = vmatpush3.bf16.msra.mxu1 %v18235_v15  ;;  %11579 = vmatprep.mubr.bf16.mxu0 %v20391_v19  ;;  %v18271_v15 = vld [vmem:[%s22205_s1 + $0xf88] sm:$0xff]  }
 0x406   :  { %17034 = vmatprep.subr.bf16.mxu0 %v18236_v33  ;;  %11620 = vmatprep.mubr.bf16.mxu1 %v20393_v20  ;;  %v18272_v33 = vld [vmem:[%s22205_s1 + $0xf50] sm:$0xff]  }
 0x407   :  { %17056 = vmatprep.subr.bf16.mxu1 %v18237_v34  ;;  %v18273_v34 = vld [vmem:[%s22205_s1 + $0xfd0] sm:$0xff]  }
 0x408   :  { %17035 = vmatpush3.bf16.msra.mxu0 %v18238_v36  ;;  %v18274_v36 = vld [vmem:[%s22205_s1 + $0xf10] sm:$0xff]  }
 0x409   :  { %17057 = vmatpush3.bf16.msra.mxu1 %v18239_v40  ;;  %17036 = vmatprep.subr.bf16.mxu0 %v18240_v41  ;;  %v18275_v40 = vld [vmem:[%s22205_s1 + $0xf90] sm:$0xff]   ;;  %v18276_v41 = vld [vmem:[%s22205_s1 + $0xf58] sm:$0xff]  }
 0x40a   :  { %17058 = vmatprep.subr.bf16.mxu1 %v18241_v42  ;;  %v18277_v42 = vld [vmem:[%s22205_s1 + $0xfd8] sm:$0xff]  }
 0x40c   :  { %17037 = vmatpush3.bf16.msra.mxu0 %v18242_v44  ;;  %v18278_v44 = vld [vmem:[%s22205_s1 + $0xf18] sm:$0xff]  }
 0x40d   :  { %17059 = vmatpush3.bf16.msra.mxu1 %v18243_v45  ;;  %17038 = vmatprep.subr.bf16.mxu0 %v18244_v46  ;;  %v18279_v45 = vld [vmem:[%s22205_s1 + $0xf98] sm:$0xff]   ;;  %v18280_v46 = vld [vmem:[%s22205_s1 + $0xf60] sm:$0xff]  }
 0x40e   :  { %17060 = vmatprep.subr.bf16.mxu1 %v18245_v53  ;;  %v18281_v53 = vld [vmem:[%s22205_s1 + $0xfe0] sm:$0xff]  }
 0x410   :  { %17039 = vmatpush3.bf16.msra.mxu0 %v18246_v48  ;;  %v18282_v48 = vld [vmem:[%s22205_s1 + $0xf20] sm:$0xff]  }
 0x411   :  { %17061 = vmatpush3.bf16.msra.mxu1 %v18247_v49  ;;  %17040 = vmatprep.subr.bf16.mxu0 %v18248_v50  ;;  %v18283_v49 = vld [vmem:[%s22205_s1 + $0xfa0] sm:$0xff]  }
 0x412   :  { %17062 = vmatprep.subr.bf16.mxu1 %v18249_v62 }
 0x414   :  { %17041 = vmatpush3.bf16.msra.mxu0 %v18250_v51 }
 0x415   :  { %17063 = vmatpush3.bf16.msra.mxu1 %v18251_v37  ;;  %17042 = vmatprep.subr.bf16.mxu0 %v18252_v55  ;;  %v18284_v37 = vld [vmem:[%s22205_s1 + $0xf68] sm:$0xff]  }
 0x416   :  { %v16740_v39 = vpop.f32.mrb[100].mxu0  ;;  %17064 = vmatprep.subr.bf16.mxu1 %v18253_v58  ;;  %v18287_v58 = vld [vmem:[%s22205_s1 + $0xfa8] sm:$0xff]  }
 0x417   :  { %v16762_v52 = vpop.f32.mrb[100].mxu1  ;;  %v16741_v14 = vpop.f32.mrb[101].mxu0 }
 0x418   :  { %v16742_v54 = vadd.f32 %v16741_v14, %v16740_v39  ;;  %v16763_v56 = vpop.f32.mrb[101].mxu1  ;;  %v16743_v4 = vpop.f32.mrb[102].mxu0  ;;  %17043 = vmatpush3.bf16.msra.mxu0 %v18254_v35  ;;  %v18285_v39 = vld [vmem:[%s22205_s1 + $0xfe8] sm:$0xff]   ;;  %v18288_v35 = vld [vmem:[%s22205_s1 + $0xf70] sm:$0xff]  }
 0x419   :  { %v16764_v57 = vadd.f32 %v16763_v56, %v16762_v52  ;;  %v16765_v59 = vpop.f32.mrb[102].mxu1  ;;  %v16744_v61 = vpop.f32.mrb[103].mxu0  ;;  %17065 = vmatpush3.bf16.msra.mxu1 %v18255_v60  ;;  %17044 = vmatprep.subr.bf16.mxu0 %v18256_v0 }
 0x41a   :  { %v8932_v38 = vadd.f32 %v16742_v54, %v21752_v11  ;;  %v16766_v63 = vpop.f32.mrb[103].mxu1  ;;  %v16745_v12 = vadd.f32 %v16744_v61, %v16743_v4  ;;  %17066 = vmatprep.subr.bf16.mxu1 %v18257_v5  ;;  %v18259_v11 = vld [vmem:[%s22205_s1 + $0xeb0] sm:$0xff]   ;;  %v18293_v5 = vld [vmem:[%s22205_s1 + $0xff8] sm:$0xff]  }
 0x41b   :  { %v16767_v2 = vadd.f32 %v16766_v63, %v16765_v59  ;;  %v18289_v63 = vld [vmem:[%s22205_s1 + $0xff0] sm:$0xff]  }
 0x41c   :  { %v8973_v1 = vadd.f32 %v16764_v57, %v8932_v38  ;;  %v8935_v9 = vadd.f32 %v16745_v12, %v21763_v25  ;;  %17045 = vmatpush3.bf16.msra.mxu0 %v18258_v28  ;;  %v18263_v25 = vld [vmem:[%s22205_s1 + $0xeb8] sm:$0xff]   ;;  %v18286_v57 = vld [vmem:[%s22205_s1 + $0xf28] sm:$0xff]   ;;  %v18291_v12 = vld [vmem:[%s22205_s1 + $0xfb0] sm:$0xff]  }
 0x41d   :  { %17067 = vmatpush3.bf16.msra.mxu1 %v18259_v11  ;;  %17046 = vmatprep.subr.bf16.mxu0 %v18260_v17  ;;  %v18295_v28 = vld [vmem:[%s22205_s1 + $0xfb8] sm:$0xff]   ;;  %v18296_v11 = vld [vmem:[%s22205_s1 + $0x1040] sm:$0xff]  }
 0x41e   :  { %v8976_v16 = vadd.f32 %v16767_v2, %v8935_v9  ;;  %v8981_v18 = vrot.slane %v8973_v1, 3  ;;  %17068 = vmatprep.subr.bf16.mxu1 %v18261_v22  ;;  %v18290_v1 = vld [vmem:[%s22205_s1 + $0xf30] sm:$0xff]   ;;  %v18292_v2 = vld [vmem:[%s22205_s1 + $0xf78] sm:$0xff]   ;;  %v18298_v17 = vld [vmem:[%s22205_s1 + $0x1000] sm:$0xff]  }
 0x41f   :  { %v18294_v9 = vld [vmem:[%s22205_s1 + $0xf38] sm:$0xff]   ;;  %v18300_v22 = vld [vmem:[%s22205_s1 + $0x1048] sm:$0xff]  }
 0x420   :  { %v8982_v24 = vrot.slane %v8976_v16, 3  ;;  %17047 = vmatpush3.bf16.msra.mxu0 %v18262_v47  ;;  %v18297_v16 = vld [vmem:[%s22205_s1 + $0x10c0] sm:$0xff]   ;;  %v18302_v47 = vld [vmem:[%s22205_s1 + $0x1008] sm:$0xff]  }
 0x421   :  { %17069 = vmatpush3.bf16.msra.mxu1 %v18263_v25  ;;  %17076 = vmatprep.subr.bf16.mxu0 %v18264_v27  ;;  %v18303_v25 = vld [vmem:[%s22205_s1 + $0x1088] sm:$0xff]   ;;  %v18307_v27 = vld [vmem:[%s22205_s1 + $0x1090] sm:$0xff]  }
 0x422   :  { %v8983_v26 = vsel %vm2793_vm2, %v8981_v18, %v8982_v24  ;;  %17098 = vmatprep.subr.bf16.mxu1 %v18265_v31  ;;  %v18299_v18 = vld [vmem:[%s22205_s1 + $0x1080] sm:$0xff]   ;;  %v18301_v24 = vld [vmem:[%s22205_s1 + $0x10c8] sm:$0xff]   ;;  %v18308_v31 = vld [vmem:[%s22205_s1 + $0x1058] sm:$0xff]  }
 0x423   :  { %v21887_v29 = vadd.f32 %v8983_v26, %v21677_v43  ;;  %11580 = vmatmul.mubr.bf16.vlgmr.msra.gmra.mrb[128].mxu0 %v20395_v21  ;;  %v18268_v43 = vld [vmem:[%s22205_s1 + $0xf48] sm:$0xff]   ;;  %v18304_v26 = vld [vmem:[%s22205_s1 + $0x1050] sm:$0xff]  }
 0x424   :  { %11621 = vmatmul.mubr.bf16.vlgmr.msra.gmra.mrb[128].mxu1 %v20400_v23  ;;  %17077 = vmatpush3.bf16.msra.mxu0 %v18266_v30  ;;  %v18309_v30 = vld [vmem:[%s22205_s1 + $0x10d8] sm:$0xff]  }
 0x425   :  { %17099 = vmatpush3.bf16.msra.mxu1 %v18267_v32  ;;  %11661 = vmatprep.mubr.bf16.mxu0 %v20509_v3  ;;  %v18310_v32 = vld [vmem:[%s22205_s1 + $0x1018] sm:$0xff]  }
 0x426   :  { %17078 = vmatprep.subr.bf16.mxu0 %v18268_v43  ;;  %11702 = vmatprep.mubr.bf16.mxu1 %v20519_v7  ;;  %v18311_v43 = vld [vmem:[%s22205_s1 + $0x1098] sm:$0xff]  }
 0x427   :  { %17100 = vmatprep.subr.bf16.mxu1 %v18269_v13  ;;  %v18312_v13 = vld [vmem:[%s22205_s1 + $0x1060] sm:$0xff]  }
 0x428   :  { %17079 = vmatpush3.bf16.msra.mxu0 %v18270_v10  ;;  %v18313_v10 = vld [vmem:[%s22205_s1 + $0x10e0] sm:$0xff]  }
 0x429   :  { %17101 = vmatpush3.bf16.msra.mxu1 %v18271_v15  ;;  %17080 = vmatprep.subr.bf16.mxu0 %v18272_v33  ;;  %v18314_v15 = vld [vmem:[%s22205_s1 + $0x1020] sm:$0xff]  }
 0x42a   :  { %17102 = vmatprep.subr.bf16.mxu1 %v18273_v34  ;;  %v18315_v33 = vld [vmem:[%s22205_s1 + $0x10a0] sm:$0xff]  }
 0x42c   :  { %17081 = vmatpush3.bf16.msra.mxu0 %v18274_v36  ;;  %v18316_v36 = vld [vmem:[%s22205_s1 + $0x1068] sm:$0xff]  }
 0x42d   :  { %17103 = vmatpush3.bf16.msra.mxu1 %v18275_v40  ;;  %17082 = vmatprep.subr.bf16.mxu0 %v18276_v41 }
 0x42e   :  { %17104 = vmatprep.subr.bf16.mxu1 %v18277_v42  ;;  %v18317_v42 = vld [vmem:[%s22205_s1 + $0x10e8] sm:$0xff]  }
 0x430   :  { %17083 = vmatpush3.bf16.msra.mxu0 %v18278_v44  ;;  %v18318_v44 = vld [vmem:[%s22205_s1 + $0x1028] sm:$0xff]  }
 0x431   :  { %17105 = vmatpush3.bf16.msra.mxu1 %v18279_v45  ;;  %17084 = vmatprep.subr.bf16.mxu0 %v18280_v46 }
 0x432   :  { %17106 = vmatprep.subr.bf16.mxu1 %v18281_v53 }
 0x434   :  { %17085 = vmatpush3.bf16.msra.mxu0 %v18282_v48 }
 0x435   :  { %17107 = vmatpush3.bf16.msra.mxu1 %v18283_v49  ;;  %17086 = vmatprep.subr.bf16.mxu0 %v18284_v37 }
 0x436   :  { %v16784_v50 = vpop.f32.mrb[104].mxu0  ;;  %17108 = vmatprep.subr.bf16.mxu1 %v18285_v39 }
 0x437   :  { %v16806_v62 = vpop.f32.mrb[104].mxu1  ;;  %v16785_v51 = vpop.f32.mrb[105].mxu0 }
 0x438   :  { %v16786_v52 = vadd.f32 %v16785_v51, %v16784_v50  ;;  %v16807_v14 = vpop.f32.mrb[105].mxu1  ;;  %v16787_v54 = vpop.f32.mrb[106].mxu0  ;;  %17087 = vmatpush3.bf16.msra.mxu0 %v18286_v57  ;;  %v18319_v50 = vld [vmem:[%s22205_s1 + $0x10a8] sm:$0xff]   ;;  %v18322_v57 = vld [vmem:[%s22205_s1 + $0x1030] sm:$0xff]  }
 0x439   :  { %v16808_v56 = vadd.f32 %v16807_v14, %v16806_v62  ;;  %v16809_v55 = vpop.f32.mrb[106].mxu1  ;;  %v16788_v4 = vpop.f32.mrb[107].mxu0  ;;  %17109 = vmatpush3.bf16.msra.mxu1 %v18287_v58  ;;  %17088 = vmatprep.subr.bf16.mxu0 %v18288_v35  ;;  %v18320_v14 = vld [vmem:[%s22205_s1 + $0x1070] sm:$0xff]  }
 0x43a   :  { %v16810_v59 = vpop.f32.mrb[107].mxu1  ;;  %v16789_v60 = vadd.f32 %v16788_v4, %v16787_v54  ;;  %17110 = vmatprep.subr.bf16.mxu1 %v18289_v63  ;;  %v18323_v58 = vld [vmem:[%s22205_s1 + $0x10b0] sm:$0xff]   ;;  %v18327_v63 = vld [vmem:[%s22205_s1 + $0x10b8] sm:$0xff]  }
 0x43b   :  { %v21965_v38 = vadd.f32 %v16808_v56, %v16786_v52  ;;  %v16811_v61 = vadd.f32 %v16810_v59, %v16809_v55  ;;  %v18321_v56 = vld [vmem:[%s22205_s1 + $0x10f0] sm:$0xff]   ;;  %v18324_v59 = vld [vmem:[%s22205_s1 + $0x1078] sm:$0xff]  }
 0x43c   :  { %17089 = vmatpush3.bf16.msra.mxu0 %v18290_v1  ;;  %v18328_v1 = vld [vmem:[%s22205_s1 + $0x1140] sm:$0xff]  }
 0x43d   :  { %v21970_v0 = vadd.f32 %v16811_v61, %v16789_v60  ;;  %17111 = vmatpush3.bf16.msra.mxu1 %v18291_v12  ;;  %17090 = vmatprep.subr.bf16.mxu0 %v18292_v2  ;;  %v18326_v61 = vld [vmem:[%s22205_s1 + $0x1038] sm:$0xff]   ;;  %v18329_v2 = vld [vmem:[%s22205_s1 + $0x11c0] sm:$0xff]  }
 0x43e   :  { %17112 = vmatprep.subr.bf16.mxu1 %v18293_v5  ;;  %v18330_v5 = vld [vmem:[%s22205_s1 + $0x1100] sm:$0xff]  }
 0x440   :  { %17091 = vmatpush3.bf16.msra.mxu0 %v18294_v9  ;;  %v18331_v9 = vld [vmem:[%s22205_s1 + $0x1180] sm:$0xff]  }
 0x441   :  { %17113 = vmatpush3.bf16.msra.mxu1 %v18295_v28  ;;  %17120 = vmatprep.subr.bf16.mxu0 %v18296_v11  ;;  %v18333_v28 = vld [vmem:[%s22205_s1 + $0x11c8] sm:$0xff]   ;;  %v18336_v11 = vld [vmem:[%s22205_s1 + $0x1150] sm:$0xff]  }
 0x442   :  { %17142 = vmatprep.subr.bf16.mxu1 %v18297_v16  ;;  %v18339_v16 = vld [vmem:[%s22205_s1 + $0x1190] sm:$0xff]  }
 0x443   :  { %11662 = vmatmul.mubr.bf16.vlgmr.msra.gmra.mrb[132].mxu0 %v20517_v6 }
 0x444   :  { %11703 = vmatmul.mubr.bf16.vlgmr.msra.gmra.mrb[132].mxu1 %v20521_v8  ;;  %17121 = vmatpush3.bf16.msra.mxu0 %v18298_v17  ;;  %v18340_v17 = vld [vmem:[%s22205_s1 + $0x1158] sm:$0xff]  }
 0x445   :  { %17143 = vmatpush3.bf16.msra.mxu1 %v18299_v18  ;;  %12262 = vmatprep.mubr.bf16.mxu0 %v20391_v19  ;;  %v18305_v19 = vld [vmem:[%s22205_s1 + $0x10d0] sm:$0xff]   ;;  %v18341_v18 = vld [vmem:[%s22205_s1 + $0x11d8] sm:$0xff]  }
 0x446   :  { %17122 = vmatprep.subr.bf16.mxu0 %v18300_v22  ;;  %12302 = vmatprep.mubr.bf16.mxu1 %v20393_v20  ;;  %v18306_v20 = vld [vmem:[%s22205_s1 + $0x1010] sm:$0xff]   ;;  %v18342_v22 = vld [vmem:[%s22205_s1 + $0x1118] sm:$0xff]  }
 0x447   :  { %17144 = vmatprep.subr.bf16.mxu1 %v18301_v24  ;;  %v18343_v24 = vld [vmem:[%s22205_s1 + $0x1198] sm:$0xff]  }
 0x448   :  { %17123 = vmatpush3.bf16.msra.mxu0 %v18302_v47  ;;  %v18344_v47 = vld [vmem:[%s22205_s1 + $0x1160] sm:$0xff]  }
 0x449   :  { %17145 = vmatpush3.bf16.msra.mxu1 %v18303_v25  ;;  %17124 = vmatprep.subr.bf16.mxu0 %v18304_v26  ;;  %v18345_v25 = vld [vmem:[%s22205_s1 + $0x11e0] sm:$0xff]  }
 0x44a   :  { %17146 = vmatprep.subr.bf16.mxu1 %v18305_v19  ;;  %v18346_v26 = vld [vmem:[%s22205_s1 + $0x1120] sm:$0xff]  }
 0x44b   :  { %v18347_v19 = vld [vmem:[%s22205_s1 + $0x11a0] sm:$0xff]  }
 0x44c   :  { %17125 = vmatpush3.bf16.msra.mxu0 %v18306_v20 }
 0x44d   :  { %17147 = vmatpush3.bf16.msra.mxu1 %v18307_v27  ;;  %17126 = vmatprep.subr.bf16.mxu0 %v18308_v31 }
 0x44e   :  { %17148 = vmatprep.subr.bf16.mxu1 %v18309_v30  ;;  %v18348_v30 = vld [vmem:[%s22205_s1 + $0x1168] sm:$0xff]  }
 0x450   :  { %17127 = vmatpush3.bf16.msra.mxu0 %v18310_v32  ;;  %v18349_v32 = vld [vmem:[%s22205_s1 + $0x11e8] sm:$0xff]  }
 0x451   :  { %17149 = vmatpush3.bf16.msra.mxu1 %v18311_v43  ;;  %17128 = vmatprep.subr.bf16.mxu0 %v18312_v13 }
 0x452   :  { %17150 = vmatprep.subr.bf16.mxu1 %v18313_v10 }
 0x454   :  { %17129 = vmatpush3.bf16.msra.mxu0 %v18314_v15 }
 0x455   :  { %17151 = vmatpush3.bf16.msra.mxu1 %v18315_v33  ;;  %17130 = vmatprep.subr.bf16.mxu0 %v18316_v36  ;;  %v18351_v36 = vld [vmem:[%s22205_s1 + $0x11a8] sm:$0xff]  }
 0x456   :  { %v16828_v34 = vpop.f32.mrb[108].mxu0  ;;  %17152 = vmatprep.subr.bf16.mxu1 %v18317_v42  ;;  %v18352_v42 = vld [vmem:[%s22205_s1 + $0x1170] sm:$0xff]  }
 0x457   :  { %v16850_v40 = vpop.f32.mrb[108].mxu1  ;;  %v16829_v41 = vpop.f32.mrb[109].mxu0 }
 0x458   :  { %v16830_v45 = vadd.f32 %v16829_v41, %v16828_v34  ;;  %v16851_v46 = vpop.f32.mrb[109].mxu1  ;;  %v16831_v53 = vpop.f32.mrb[110].mxu0  ;;  %17131 = vmatpush3.bf16.msra.mxu0 %v18318_v44  ;;  %v18350_v34 = vld [vmem:[%s22205_s1 + $0x1128] sm:$0xff]  }
 0x459   :  { %v16852_v48 = vadd.f32 %v16851_v46, %v16850_v40  ;;  %v16853_v49 = vpop.f32.mrb[110].mxu1  ;;  %v16832_v51 = vpop.f32.mrb[111].mxu0  ;;  %17153 = vmatpush3.bf16.msra.mxu1 %v18319_v50  ;;  %17132 = vmatprep.subr.bf16.mxu0 %v18320_v14  ;;  %v18355_v50 = vld [vmem:[%s22205_s1 + $0x11b0] sm:$0xff]  }
 0x45a   :  { %v9615_v62 = vadd.f32 %v16830_v45, %v21965_v38  ;;  %v16854_v37 = vpop.f32.mrb[111].mxu1  ;;  %v16833_v39 = vadd.f32 %v16832_v51, %v16831_v53  ;;  %17154 = vmatprep.subr.bf16.mxu1 %v18321_v56  ;;  %v18325_v38 = vld [vmem:[%s22205_s1 + $0x10f8] sm:$0xff]   ;;  %v18353_v53 = vld [vmem:[%s22205_s1 + $0x11f0] sm:$0xff]  }
 0x45b   :  { %v16855_v52 = vadd.f32 %v16854_v37, %v16853_v49  ;;  %v18354_v49 = vld [vmem:[%s22205_s1 + $0x1130] sm:$0xff]   ;;  %v18357_v51 = vld [vmem:[%s22205_s1 + $0x11f8] sm:$0xff]  }
 0x45c   :  { %v9656_v54 = vadd.f32 %v16852_v48, %v9615_v62  ;;  %v9618_v55 = vadd.f32 %v16833_v39, %v21970_v0  ;;  %17133 = vmatpush3.bf16.msra.mxu0 %v18322_v57  ;;  %v18356_v62 = vld [vmem:[%s22205_s1 + $0x1178] sm:$0xff]  }
 0x45d   :  { %17155 = vmatpush3.bf16.msra.mxu1 %v18323_v58  ;;  %17134 = vmatprep.subr.bf16.mxu0 %v18324_v59  ;;  %v18358_v37 = vld [vmem:[%s22205_s1 + $0x1138] sm:$0xff]  }
 0x45e   :  { %v9659_v4 = vadd.f32 %v16855_v52, %v9618_v55  ;;  %v9664_v35 = vrot.slane %v9656_v54, 4  ;;  %17156 = vmatprep.subr.bf16.mxu1 %v18325_v38  ;;  %v18359_v39 = vld [vmem:[%s22205_s1 + $0x11b8] sm:$0xff]  }
 0x460   :  { %v9665_v60 = vrot.slane %v9659_v4, 4  ;;  %17135 = vmatpush3.bf16.msra.mxu0 %v18326_v61 }
 0x461   :  { %17157 = vmatpush3.bf16.msra.mxu1 %v18327_v63  ;;  %17164 = vmatprep.subr.bf16.mxu0 %v18328_v1 }
 0x462   :  { %v9666_v0 = vsel %vm3478_vm3, %v9664_v35, %v9665_v60  ;;  %17186 = vmatprep.subr.bf16.mxu1 %v18329_v2 }
 0x463   :  { %v22097_v12 = vadd.f32 %v9666_v0, %v21887_v29  ;;  %12263 = vmatmul.mubr.bf16.vlgmr.msra.gmra.mrb[136].mxu0 %v20395_v21  ;;  %v18332_v29 = vld [vmem:[%s22205_s1 + $0x1148] sm:$0xff]  }
 0x464   :  { %12303 = vmatmul.mubr.bf16.vlgmr.msra.gmra.mrb[136].mxu1 %v20400_v23  ;;  %17165 = vmatpush3.bf16.msra.mxu0 %v18330_v5  ;;  %v18334_v21 = vld [vmem:[%s22205_s1 + $0x1108] sm:$0xff]  }
 0x465   :  { %17187 = vmatpush3.bf16.msra.mxu1 %v18331_v9  ;;  %12342 = vmatprep.mubr.bf16.mxu0 %v20509_v3  ;;  %v18335_v23 = vld [vmem:[%s22205_s1 + $0x1188] sm:$0xff]   ;;  %v18337_v3 = vld [vmem:[%s22205_s1 + $0x11d0] sm:$0xff]  }
 0x466   :  { %17166 = vmatprep.subr.bf16.mxu0 %v18332_v29  ;;  %12382 = vmatprep.mubr.bf16.mxu1 %v20519_v7  ;;  %v18338_v7 = vld [vmem:[%s22205_s1 + $0x1110] sm:$0xff]  }
 0x467   :  { %17188 = vmatprep.subr.bf16.mxu1 %v18333_v28 }
 0x468   :  { %17167 = vmatpush3.bf16.msra.mxu0 %v18334_v21 }
 0x469   :  { %17189 = vmatpush3.bf16.msra.mxu1 %v18335_v23  ;;  %17168 = vmatprep.subr.bf16.mxu0 %v18336_v11 }
 0x46a   :  { %17190 = vmatprep.subr.bf16.mxu1 %v18337_v3 }
 0x46c   :  { %17169 = vmatpush3.bf16.msra.mxu0 %v18338_v7 }
 0x46d   :  { %17191 = vmatpush3.bf16.msra.mxu1 %v18339_v16  ;;  %17170 = vmatprep.subr.bf16.mxu0 %v18340_v17 }
 0x46e   :  { %17192 = vmatprep.subr.bf16.mxu1 %v18341_v18 }
 0x470   :  { %17171 = vmatpush3.bf16.msra.mxu0 %v18342_v22 }
 0x471   :  { %17193 = vmatpush3.bf16.msra.mxu1 %v18343_v24  ;;  %17172 = vmatprep.subr.bf16.mxu0 %v18344_v47 }
 0x472   :  { %17194 = vmatprep.subr.bf16.mxu1 %v18345_v25 }
 0x474   :  { %17173 = vmatpush3.bf16.msra.mxu0 %v18346_v26 }
 0x475   :  { %17195 = vmatpush3.bf16.msra.mxu1 %v18347_v19  ;;  %17174 = vmatprep.subr.bf16.mxu0 %v18348_v30 }
 0x476   :  { %v16872_v20 = vpop.f32.mrb[112].mxu0  ;;  %17196 = vmatprep.subr.bf16.mxu1 %v18349_v32 }
 0x477   :  { %v16894_v27 = vpop.f32.mrb[112].mxu1  ;;  %v16873_v31 = vpop.f32.mrb[113].mxu0 }
 0x478   :  { %v16874_v43 = vadd.f32 %v16873_v31, %v16872_v20  ;;  %v16895_v13 = vpop.f32.mrb[113].mxu1  ;;  %v16875_v10 = vpop.f32.mrb[114].mxu0  ;;  %17175 = vmatpush3.bf16.msra.mxu0 %v18350_v34 }
 0x479   :  { %v16896_v15 = vadd.f32 %v16895_v13, %v16894_v27  ;;  %v16897_v33 = vpop.f32.mrb[114].mxu1  ;;  %v16876_v40 = vpop.f32.mrb[115].mxu0  ;;  %17197 = vmatpush3.bf16.msra.mxu1 %v18351_v36  ;;  %17176 = vmatprep.subr.bf16.mxu0 %v18352_v42 }
 0x47a   :  { %v16898_v41 = vpop.f32.mrb[115].mxu1  ;;  %v16877_v45 = vadd.f32 %v16876_v40, %v16875_v10  ;;  %17198 = vmatprep.subr.bf16.mxu1 %v18353_v53 }
 0x47b   :  { %v10257_v44 = vadd.f32 %v16896_v15, %v16874_v43  ;;  %v16899_v46 = vadd.f32 %v16898_v41, %v16897_v33 }
 0x47c   :  { %17177 = vmatpush3.bf16.msra.mxu0 %v18354_v49 }
 0x47d   :  { %v10260_v48 = vadd.f32 %v16899_v46, %v16877_v45  ;;  %17199 = vmatpush3.bf16.msra.mxu1 %v18355_v50  ;;  %17178 = vmatprep.subr.bf16.mxu0 %v18356_v62 }
 0x47e   :  { %17200 = vmatprep.subr.bf16.mxu1 %v18357_v51 }
 0x480   :  { %17179 = vmatpush3.bf16.msra.mxu0 %v18358_v37 }
 0x481   :  { %17201 = vmatpush3.bf16.msra.mxu1 %v18359_v39 }
 0x483   :  { %12343 = vmatmul.mubr.bf16.vlgmr.msra.gmra.mrb[140].mxu0 %v20517_v6 }
 0x484   :  { %12383 = vmatmul.mubr.bf16.vlgmr.msra.gmra.mrb[140].mxu1 %v20521_v8 }
 0x496   :  { %v16916_v52 = vpop.f32.mrb[116].mxu0 }
 0x497   :  { %v16938_v14 = vpop.f32.mrb[116].mxu1  ;;  %v16917_v54 = vpop.f32.mrb[117].mxu0 }
 0x498   :  { %v16918_v56 = vadd.f32 %v16917_v54, %v16916_v52  ;;  %v16939_v55 = vpop.f32.mrb[117].mxu1  ;;  %v16919_v57 = vpop.f32.mrb[118].mxu0 }
 0x499   :  { %v16940_v58 = vadd.f32 %v16939_v55, %v16938_v14  ;;  %v16941_v4 = vpop.f32.mrb[118].mxu1  ;;  %v16920_v59 = vpop.f32.mrb[119].mxu0 }
 0x49a   :  { %v10298_v35 = vadd.f32 %v16918_v56, %v10257_v44  ;;  %v16921_v38 = vadd.f32 %v16920_v59, %v16919_v57  ;;  %v16942_v60 = vpop.f32.mrb[119].mxu1 }
 0x49b   :  { %v16943_v61 = vadd.f32 %v16942_v60, %v16941_v4 }
 0x49c   :  { %v10339_v63 = vadd.f32 %v16940_v58, %v10298_v35  ;;  %v10301_v0 = vadd.f32 %v16921_v38, %v10260_v48 }
 0x49e   :  { %v10342_v1 = vadd.f32 %v16943_v61, %v10301_v0  ;;  %v10347_v2 = vrot.slane %v10339_v63, 5 }
 0x4a0   :  { %v10348_v6 = vrot.slane %v10342_v1, 5 }
 0x4a2   :  { %v10349_v8 = vsel %vm4163_vm4, %v10347_v2, %v10348_v6 }
 0x4a3   :  { %v10351_v5 = vadd.f32 %v10349_v8, %v22097_v12 }
 0x4b6   :  { %v16960_v9 = vpop.f32.mrb[120].mxu0 }
 0x4b7   :  { %v16982_v29 = vpop.f32.mrb[120].mxu1  ;;  %v16961_v28 = vpop.f32.mrb[121].mxu0 }
 0x4b8   :  { %v16962_v21 = vadd.f32 %v16961_v28, %v16960_v9  ;;  %v16983_v23 = vpop.f32.mrb[121].mxu1  ;;  %v16963_v11 = vpop.f32.mrb[122].mxu0 }
 0x4b9   :  { %v16984_v3 = vadd.f32 %v16983_v23, %v16982_v29  ;;  %v16985_v7 = vpop.f32.mrb[122].mxu1  ;;  %v16964_v16 = vpop.f32.mrb[123].mxu0 }
 0x4ba   :  { %v16965_v17 = vadd.f32 %v16964_v16, %v16963_v11  ;;  %v16986_v18 = vpop.f32.mrb[123].mxu1 }
 0x4bb   :  { %v10940_v22 = vadd.f32 %v16984_v3, %v16962_v21  ;;  %v16987_v24 = vadd.f32 %v16986_v18, %v16985_v7 }
 0x4bd   :  { %v10943_v47 = vadd.f32 %v16987_v24, %v16965_v17 }
 0x4d6   :  { %v17004_v25 = vpop.f32.mrb[124].mxu0 }
 0x4d7   :  { %v17026_v26 = vpop.f32.mrb[124].mxu1  ;;  %v17005_v19 = vpop.f32.mrb[125].mxu0 }
 0x4d8   :  { %v17006_v20 = vadd.f32 %v17005_v19, %v17004_v25  ;;  %v17027_v27 = vpop.f32.mrb[125].mxu1  ;;  %v17007_v12 = vpop.f32.mrb[126].mxu0 }
 0x4d9   :  { %v17028_v31 = vadd.f32 %v17027_v27, %v17026_v26  ;;  %v17029_v30 = vpop.f32.mrb[126].mxu1  ;;  %v17008_v32 = vpop.f32.mrb[127].mxu0 }
 0x4da   :  { %v10981_v43 = vadd.f32 %v17006_v20, %v10940_v22  ;;  %v17009_v13 = vadd.f32 %v17008_v32, %v17007_v12  ;;  %v17030_v10 = vpop.f32.mrb[127].mxu1 }
 0x4db   :  { %v17031_v15 = vadd.f32 %v17030_v10, %v17029_v30 }
 0x4dc   :  { %v11022_v33 = vadd.f32 %v17028_v31, %v10981_v43  ;;  %v10984_v34 = vadd.f32 %v17009_v13, %v10943_v47 }
 0x4de   :  { %v11025_v36 = vadd.f32 %v17031_v15, %v10984_v34  ;;  %v11030_v40 = vrot.slane %v11022_v33, 6 }
 0x4e0   :  { %v11031_v41 = vrot.slane %v11025_v36, 6 }
 0x4e2   :  { %v11032_v42 = vsel %vm4848_vm5, %v11030_v40, %v11031_v41 }
 0x4e3   :  { %v11034_v44 = vadd.f32 %v11032_v42, %v10351_v5 }
 0x4f6   :  { %v17048_v45 = vpop.f32.mrb[128].mxu0 }
 0x4f7   :  { %v17070_v46 = vpop.f32.mrb[128].mxu1  ;;  %v17049_v53 = vpop.f32.mrb[129].mxu0 }
 0x4f8   :  { %v17050_v48 = vadd.f32 %v17049_v53, %v17048_v45  ;;  %v17071_v49 = vpop.f32.mrb[129].mxu1  ;;  %v17051_v50 = vpop.f32.mrb[130].mxu0 }
 0x4f9   :  { %v17072_v62 = vadd.f32 %v17071_v49, %v17070_v46  ;;  %v17073_v51 = vpop.f32.mrb[130].mxu1  ;;  %v17052_v37 = vpop.f32.mrb[131].mxu0 }
 0x4fa   :  { %v17053_v39 = vadd.f32 %v17052_v37, %v17051_v50  ;;  %v17074_v52 = vpop.f32.mrb[131].mxu1 }
 0x4fb   :  { %v11623_v14 = vadd.f32 %v17072_v62, %v17050_v48  ;;  %v17075_v54 = vadd.f32 %v17074_v52, %v17073_v51 }
 0x4fd   :  { %v11626_v56 = vadd.f32 %v17075_v54, %v17053_v39 }
 0x516   :  { %v17092_v55 = vpop.f32.mrb[132].mxu0 }
 0x517   :  { %v17114_v57 = vpop.f32.mrb[132].mxu1  ;;  %v17093_v58 = vpop.f32.mrb[133].mxu0 }
 0x518   :  { %v17094_v4 = vadd.f32 %v17093_v58, %v17092_v55  ;;  %v17115_v59 = vpop.f32.mrb[133].mxu1  ;;  %v17095_v35 = vpop.f32.mrb[134].mxu0 }
 0x519   :  { %v17116_v38 = vadd.f32 %v17115_v59, %v17114_v57  ;;  %v17117_v60 = vpop.f32.mrb[134].mxu1  ;;  %v17096_v61 = vpop.f32.mrb[135].mxu0 }
 0x51a   :  { %v11664_v63 = vadd.f32 %v17094_v4, %v11623_v14  ;;  %v17097_v0 = vadd.f32 %v17096_v61, %v17095_v35  ;;  %v17118_v1 = vpop.f32.mrb[135].mxu1 }
 0x51b   :  { %v17119_v2 = vadd.f32 %v17118_v1, %v17117_v60 }
 0x51c   :  { %v11705_v6 = vadd.f32 %v17116_v38, %v11664_v63  ;;  %v11667_v8 = vadd.f32 %v17097_v0, %v11626_v56 }
 0x51e   :  { %v11708_v5 = vadd.f32 %v17119_v2, %v11667_v8  ;;  %v11713_v9 = vrot.slane %v11705_v6, 7 }
 0x520   :  { %v11714_v29 = vrot.slane %v11708_v5, 7 }
 0x522   :  { %v11715_v28 = vsel %vm5533_vm6, %v11713_v9, %v11714_v29 }
 0x523   :  { %v11717_v21 = vadd.f32 %v11715_v28, %v11034_v44 }
 0x536   :  { %v17136_v23 = vpop.f32.mrb[136].mxu0 }
 0x537   :  { %v17158_v11 = vpop.f32.mrb[136].mxu1  ;;  %v17137_v3 = vpop.f32.mrb[137].mxu0 }
 0x538   :  { %v17159_v7 = vpop.f32.mrb[137].mxu1  ;;  %v17139_v16 = vpop.f32.mrb[138].mxu0 }
 0x539   :  { %v17161_v17 = vpop.f32.mrb[138].mxu1  ;;  %v17140_v18 = vpop.f32.mrb[139].mxu0 }
 0x53a   :  { %v17141_v22 = vadd.f32 %v17140_v18, %v17139_v16  ;;  %v17162_v24 = vpop.f32.mrb[139].mxu1 }
 0x53b   :  { %v17163_v47 = vadd.f32 %v17162_v24, %v17161_v17 }
 0x53d   :  { %v12307_v25 = vadd.f32 %v17163_v47, %v17141_v22 }
 0x556   :  { %v17180_v26 = vpop.f32.mrb[140].mxu0 }
 0x557   :  { %v17202_v19 = vpop.f32.mrb[140].mxu1  ;;  %v17181_v20 = vpop.f32.mrb[141].mxu0 }
 0x558   :  { %v17203_v27 = vpop.f32.mrb[141].mxu1  ;;  %v17183_v12 = vpop.f32.mrb[142].mxu0 }
 0x559   :  { %v17205_v31 = vpop.f32.mrb[142].mxu1  ;;  %v17184_v30 = vpop.f32.mrb[143].mxu0 }
 0x55a   :  { %v17185_v32 = vadd.f32 %v17184_v30, %v17183_v12  ;;  %v17206_v43 = vpop.f32.mrb[143].mxu1 }
 0x55b   :  { %v17207_v13 = vadd.f32 %v17206_v43, %v17205_v31 }
 0x55c   :  { %v12347_v10 = vadd.f32 %v17185_v32, %v12307_v25 }
 0x55e   :  { %v12387_v15 = vadd.f32 %v17207_v13, %v12347_v10 }
 0x560   :  { %v12390_v33 = vadd.f32 %v12387_v15, %v11717_v21 }
 0x562   :  { %18362 = vtanh.f32 %v12390_v33 }
 0x56c   :  { %v18363_v34 = vpop.eup %18362 }
 0x56d   :  { %15623 = vst [vmem:[%s22208_s3 + $0x8] sm:$0xff] %v18363_v34 }

</bundles_post_ra>
